<compile_context>
chip_gen: v7x
topology: tpu7x:2x2x1
jax: 0.10.0
libtpu: 0.0.40
codegen_flags: <defaults>
</compile_context>

<pallas_src>
import functools
import math

import jax
import jax.numpy as jnp
from jax.experimental import pallas as pl
from jax.experimental.pallas import tpu as pltpu

# ----------------------------------------------------------------------------
# Small synthetic config (mirrors HiViFANConfig fields used by forward()).
# ----------------------------------------------------------------------------
PYRAMID_LEVELS = [4, 8]          # only the count matters in forward()
PYRAMID_CHANNELS = [32, 64]      # must be divisible by GN_GROUPS
VISUAL_EMBED_DIM = 32
GN_GROUPS = 32
SE_REDUCTION = 16

LANE = 128
COMPUTE_DTYPE = jnp.bfloat16          # MXU fast path; accumulation stays f32
VMEM_LIMIT = 32 * 1024 * 1024         # safe on v5e/v6e/v7x


def _rup(n, m=LANE):
    return ((n + m - 1) // m) * m


def _pad_axis(a, axis, target):
    if a.shape[axis] >= target:
        return a
    widths = [(0, 0)] * a.ndim
    widths[axis] = (0, target - a.shape[axis])
    return jnp.pad(a, widths)


def _mosaic_params(n_parallel=1):
    return pltpu.CompilerParams(
        dimension_semantics=("parallel",) * n_parallel,
        vmem_limit_bytes=VMEM_LIMIT)


# ----------------------------------------------------------------------------
# GELU flavour: exact erf (PyTorch nn.GELU default) if it lowers, else tanh.
# Probed ONCE at init, never on the forward path.
# ----------------------------------------------------------------------------
_GELU_KIND = None


def _gelu(x, kind):
    if kind == "exact":
        return 0.5 * x * (1.0 + jax.lax.erf(x * (1.0 / math.sqrt(2.0))))
    return jax.nn.gelu(x, approximate=True)


def _gelu_probe_kernel(x_ref, o_ref):
    o_ref[...] = _gelu(x_ref[...], "exact")


def gelu_kind():
    global _GELU_KIND
    if _GELU_KIND is None:
        try:
            out = pl.pallas_call(
                _gelu_probe_kernel,
                out_shape=jax.ShapeDtypeStruct((8, LANE), jnp.float32),
                grid=(1,),
                in_specs=[pl.BlockSpec((8, LANE), lambda i: (0, 0))],
                out_specs=pl.BlockSpec((8, LANE), lambda i: (0, 0)),
            )(jnp.ones((8, LANE), jnp.float32))
            jax.block_until_ready(out)
            _GELU_KIND = "exact"
        except Exception:
            # TODO(synk): exact erf GELU failed to lower; tanh approximation
            # differs slightly from torch.nn.GELU() default numerics.
            _GELU_KIND = "tanh"
    return _GELU_KIND


# ----------------------------------------------------------------------------
# Pallas kernel 1: fused "tap" convolution (im2col done in-kernel from VMEM)
#   input blocks : (P, FlatIn, Cin)   per sample (P = stride phases)
#   weights      : (T, Cin, Coutp) bf16, T = number of taps (9 for 3x3)
#   output block : (Ho*Wo, Coutp) f32, lane-dense (Coutp multiple of 128)
# Supports several (input, weight) pairs accumulating into one output (used to
# fuse the post-lateral channel concat into the fusion conv).
# ----------------------------------------------------------------------------
def _conv_kernel(*refs, n_in, taps, ho, wo, wrow, compute_dtype):
    x_refs = refs[:n_in]
    w_refs = refs[n_in:2 * n_in]
    b_ref = refs[2 * n_in]
    o_ref = refs[2 * n_in + 1]
    rows = ho * wrow
    cop = o_ref.shape[-1]
    acc = jnp.zeros((rows, cop), jnp.float32)
    for x_ref, w_ref in zip(x_refs, w_refs):
        for t, (p, off) in enumerate(taps):
            patch = x_ref[p, off:off + rows, :].astype(compute_dtype)
            acc = acc + jnp.dot(patch, w_ref[t],
                                preferred_element_type=jnp.float32)
    acc = acc + b_ref[...]
    if wrow == wo:
        o_ref[...] = acc.astype(o_ref.dtype)
    else:
        # compact away the width-halo "garbage" columns; output stays dense.
        for oh in range(ho):
            o_ref[oh * wo:(oh + 1) * wo, :] = (
                acc[oh * wrow:oh * wrow + wo, :].astype(o_ref.dtype))


def _conv_call(xs, ws, b, taps, ho, wo, wrow):
    B = xs[0].shape[0]
    cop = ws[0].shape[-1]
    n_in = len(xs)
    kernel = functools.partial(
        _conv_kernel, n_in=n_in, taps=tuple(taps),
        ho=ho, wo=wo, wrow=wrow, compute_dtype=COMPUTE_DTYPE)
    in_specs = []
    for x in xs:
        _, P, F, Cin = x.shape
        in_specs.append(pl.BlockSpec((None, P, F, Cin), lambda bb: (bb, 0, 0, 0)))
    for w in ws:
        T, Cin, _ = w.shape
        in_specs.append(pl.BlockSpec((T, Cin, cop), lambda bb: (0, 0, 0)))
    in_specs.append(pl.BlockSpec((1, cop), lambda bb: (0, 0)))
    return pl.pallas_call(
        kernel,
        out_shape=jax.ShapeDtypeStruct((B, ho * wo, cop), jnp.float32),
        grid=(B,),
        in_specs=in_specs,
        out_specs=pl.BlockSpec((None, ho * wo, cop), lambda bb: (bb, 0, 0)),
        compiler_params=_mosaic_params(),
    )(*xs, *ws, b)


def conv3x3_s1(xs, H, W, ws, b):
    """Stride-1 3x3 conv, padding 1. Several (x, w) pairs accumulate into one
    output (fuses the channel-concat of [features, lateral] into the conv)."""
    B = xs[0].shape[0]
    wrow = W + 2
    prepped = []
    for x in xs:
        Cin = x.shape[-1]
        x4 = x.reshape(B, H, W, Cin)
        xp = jnp.pad(x4, ((0, 0), (1, 2), (1, 1), (0, 0)))     # (B, H+3, W+2, C)
        prepped.append(xp.reshape(B, 1, (H + 3) * wrow, Cin))
    taps = [(0, di * wrow + dj) for di in range(3) for dj in range(3)]
    return _conv_call(prepped, ws, b, taps, ho=H, wo=W, wrow=wrow)


def conv3x3_s2(x_flat, H, W, w, b):
    """Stride-2 3x3 conv, padding 1 (even H, W). The four stride-2 phases are
    split in XLA glue so every in-kernel tap is a contiguous slice."""
    B, _, Cin = x_flat.shape
    Ho, Wo = H // 2, W // 2
    wrow = Wo + 1
    x4 = x_flat.reshape(B, H, W, Cin)
    xp = jnp.pad(x4, ((0, 0), (1, 1), (1, 1), (0, 0)))          # (B, H+2, W+2, C)
    phases = [xp[:, 0::2, 0::2], xp[:, 0::2, 1::2],
              xp[:, 1::2, 0::2], xp[:, 1::2, 1::2]]             # (B, Ho+1, Wo+1, C)
    ph = jnp.stack(phases, axis=1).reshape(B, 4, (Ho + 1) * wrow, Cin)
    ph = jnp.pad(ph, ((0, 0), (0, 0), (0, wrow), (0, 0)))       # room for tap offsets
    taps = []
    for di in range(3):
        for dj in range(3):
            p = 2 * (1 if di == 1 else 0) + (1 if dj == 1 else 0)
            off = (1 if di == 2 else 0) * wrow + (1 if dj == 2 else 0)
            taps.append((p, off))
    return _conv_call([ph], [w], b, taps, ho=Ho, wo=Wo, wrow=wrow)


# ----------------------------------------------------------------------------
# Pallas kernel 2: fused GroupNorm (eps=1e-5, centered variance) + GELU
# ----------------------------------------------------------------------------
def _gn_gelu_chan_kernel(x_ref, g_ref, b_ref, o_ref, *, inv_n, eps, gelu_kind):
    # Cg == 1: group stats are per-channel stats; no group-sum matmul needed.
    x = x_ref[...].astype(jnp.float32)                    # (HW, Cp)
    mean = jnp.sum(x, axis=0, keepdims=True) * inv_n
    xc = x - mean
    var = jnp.sum(xc * xc, axis=0, keepdims=True) * inv_n
    y = xc * jax.lax.rsqrt(var + eps) * g_ref[...] + b_ref[...]
    o_ref[...] = _gelu(y, gelu_kind).astype(o_ref.dtype)


def _gn_gelu_group_kernel(x_ref, g_ref, b_ref, p_ref, o_ref, *, inv_n, eps,
                          gelu_kind):
    x = x_ref[...].astype(jnp.float32)                    # (HW, Cp)
    s1 = jnp.sum(x, axis=0, keepdims=True)                # (1, Cp)
    mean = jnp.dot(s1, p_ref[...], preferred_element_type=jnp.float32) * inv_n
    xc = x - mean
    s2 = jnp.sum(xc * xc, axis=0, keepdims=True)
    var = jnp.dot(s2, p_ref[...], preferred_element_type=jnp.float32) * inv_n
    y = xc * jax.lax.rsqrt(var + eps) * g_ref[...] + b_ref[...]
    o_ref[...] = _gelu(y, gelu_kind).astype(o_ref.dtype)


def group_norm_gelu(x_flat, gamma, beta, p_mat, cg):
    B, HW, Cp = x_flat.shape
    inv_n = 1.0 / float(HW * cg)
    kind = gelu_kind()
    x_spec = pl.BlockSpec((None, HW, Cp), lambda b: (b, 0, 0))
    vec_spec = pl.BlockSpec((1, Cp), lambda b: (0, 0))
    common = dict(
        out_shape=jax.ShapeDtypeStruct((B, HW, Cp), jnp.float32),
        grid=(B,),
        out_specs=pl.BlockSpec((None, HW, Cp), lambda b: (b, 0, 0)),
        compiler_params=_mosaic_params(),
    )
    if cg == 1:
        kernel = functools.partial(_gn_gelu_chan_kernel, inv_n=inv_n, eps=1e-5,
                                   gelu_kind=kind)
        return pl.pallas_call(kernel, in_specs=[x_spec, vec_spec, vec_spec],
                              **common)(x_flat, gamma, beta)
    kernel = functools.partial(_gn_gelu_group_kernel, inv_n=inv_n, eps=1e-5,
                               gelu_kind=kind)
    p_spec = pl.BlockSpec((Cp, Cp), lambda b: (0, 0))
    return pl.pallas_call(kernel, in_specs=[x_spec, vec_spec, vec_spec, p_spec],
                          **common)(x_flat, gamma, beta, p_mat)


# ----------------------------------------------------------------------------
# Pallas kernel 3: fused SE block (GAP + FC/ReLU + FC/Sigmoid + rescale).
# Also emits GAP of the rescaled output (== pooled * gate) so the final global
# feature needs no extra pass over f.
# ----------------------------------------------------------------------------
def _se_kernel(x_ref, w1_ref, b1_ref, w2_ref, b2_ref, o_ref, pool_ref, *, inv_hw):
    x = x_ref[...]                                        # (HW, Cp) f32
    pooled = jnp.sum(x, axis=0, keepdims=True) * inv_hw   # (1, Cp)
    h = jnp.dot(pooled, w1_ref[...], preferred_element_type=jnp.float32) + b1_ref[...]
    h = jnp.maximum(h, 0.0)
    s = jax.nn.sigmoid(
        jnp.dot(h, w2_ref[...], preferred_element_type=jnp.float32) + b2_ref[...])
    o_ref[...] = (x * s).astype(o_ref.dtype)
    pool_ref[...] = (pooled * s).astype(pool_ref.dtype)


def se_block(x_flat, w1, b1, w2, b2):
    B, HW, Cp = x_flat.shape
    Rp = w1.shape[-1]
    out, pooled = pl.pallas_call(
        functools.partial(_se_kernel, inv_hw=1.0 / float(HW)),
        out_shape=(jax.ShapeDtypeStruct((B, HW, Cp), jnp.float32),
                   jax.ShapeDtypeStruct((B, 1, Cp), jnp.float32)),
        grid=(B,),
        in_specs=[pl.BlockSpec((None, HW, Cp), lambda b: (b, 0, 0)),
                  pl.BlockSpec((Cp, Rp), lambda b: (0, 0)),
                  pl.BlockSpec((1, Rp), lambda b: (0, 0)),
                  pl.BlockSpec((Rp, Cp), lambda b: (0, 0)),
                  pl.BlockSpec((1, Cp), lambda b: (0, 0))],
        out_specs=(pl.BlockSpec((None, HW, Cp), lambda b: (b, 0, 0)),
                   pl.BlockSpec((None, 1, Cp), lambda b: (b, 0, 0))),
        compiler_params=_mosaic_params(),
    )(x_flat, w1, b1, w2, b2)
    return out, pooled.reshape(B, Cp)


# ----------------------------------------------------------------------------
# Pallas kernel 4: lateral path = 1x1 conv + exact 2x bilinear downsample.
# (pool-then-conv reorder is mathematically identical; 2x bilinear with
#  align_corners=False == 2x2 mean pooling.)
# ----------------------------------------------------------------------------
def _lateral_kernel(x_ref, w_ref, b_ref, o_ref, *, compute_dtype):
    avg = 0.25 * (x_ref[0] + x_ref[1] + x_ref[2] + x_ref[3])   # VPU average
    out = jnp.dot(avg.astype(compute_dtype), w_ref[...],
                  preferred_element_type=jnp.float32) + b_ref[...]
    o_ref[...] = out.astype(o_ref.dtype)


def lateral_pool_conv(x_flat, H, W, w, b):
    # TODO(synk): only the exact factor-2 bilinear resize produced by this
    # pyramid is implemented; general ratios are not.
    B, _, Cp = x_flat.shape
    Ho, Wo = H // 2, W // 2
    x4 = x_flat.reshape(B, H, W, Cp)
    ph = jnp.stack([x4[:, 0::2, 0::2], x4[:, 0::2, 1::2],
                    x4[:, 1::2, 0::2], x4[:, 1::2, 1::2]], axis=1)
    ph = ph.reshape(B, 4, Ho * Wo, Cp)
    Cop = w.shape[-1]
    return pl.pallas_call(
        functools.partial(_lateral_kernel, compute_dtype=COMPUTE_DTYPE),
        out_shape=jax.ShapeDtypeStruct((B, Ho * Wo, Cop), jnp.float32),
        grid=(B,),
        in_specs=[pl.BlockSpec((None, 4, Ho * Wo, Cp), lambda b: (b, 0, 0, 0)),
                  pl.BlockSpec((Cp, Cop), lambda b: (0, 0)),
                  pl.BlockSpec((1, Cop), lambda b: (0, 0))],
        out_specs=pl.BlockSpec((None, Ho * Wo, Cop), lambda b: (b, 0, 0)),
        compiler_params=_mosaic_params(),
    )(ph, w, b)


# ----------------------------------------------------------------------------
# Pallas kernel 5: tiny dense projection (B, sumC) @ (sumC, embed_pad) + bias
# ----------------------------------------------------------------------------
def _linear_kernel(a_ref, w_ref, b_ref, o_ref):
    o_ref[...] = (jnp.dot(a_ref[...], w_ref[...],
                          preferred_element_type=jnp.float32)
                  + b_ref[...]).astype(o_ref.dtype)


def linear(a, w, b):
    M, K = a.shape
    N = w.shape[-1]
    return pl.pallas_call(
        _linear_kernel,
        out_shape=jax.ShapeDtypeStruct((M, N), jnp.float32),
        grid=(1,),
        in_specs=[pl.BlockSpec((M, K), lambda i: (0, 0)),
                  pl.BlockSpec((K, N), lambda i: (0, 0)),
                  pl.BlockSpec((1, N), lambda i: (0, 0))],
        out_specs=pl.BlockSpec((M, N), lambda i: (0, 0)),
        compiler_params=pltpu.CompilerParams(
            dimension_semantics=("arbitrary",), vmem_limit_bytes=VMEM_LIMIT),
    )(a, w, b)


# ----------------------------------------------------------------------------
# Parameters: deterministic synthetic init at real shapes, then a one-time
# "prepare" pass that pads channels to 128 lanes and pre-casts weights to bf16.
# ----------------------------------------------------------------------------
def init_params(key):
    keys = jax.random.split(key, 64)
    counter = iter(range(64))

    def nrm(shape):
        return 0.02 * jax.random.normal(keys[next(counter)], shape, dtype=jnp.float32)

    params = {"levels": []}
    in_ch = 3
    for i, ch in enumerate(PYRAMID_CHANNELS):
        lvl = {}
        lvl["conv1_w"] = nrm((3, 3, in_ch, ch)); lvl["conv1_b"] = jnp.zeros((1, ch), jnp.float32)
        lvl["gn1_g"] = jnp.ones((1, ch), jnp.float32); lvl["gn1_b"] = jnp.zeros((1, ch), jnp.float32)
        lvl["conv2_w"] = nrm((3, 3, ch, ch)); lvl["conv2_b"] = jnp.zeros((1, ch), jnp.float32)
        lvl["gn2_g"] = jnp.ones((1, ch), jnp.float32); lvl["gn2_b"] = jnp.zeros((1, ch), jnp.float32)
        if i > 0:
            lvl["lat_w"] = nrm((1, 1, in_ch, ch)); lvl["lat_b"] = jnp.zeros((1, ch), jnp.float32)
        fus_in = ch * 2 if i > 0 else ch
        lvl["fus_w"] = nrm((3, 3, fus_in, ch)); lvl["fus_b"] = jnp.zeros((1, ch), jnp.float32)
        lvl["fgn_g"] = jnp.ones((1, ch), jnp.float32); lvl["fgn_b"] = jnp.zeros((1, ch), jnp.float32)
        red = max(1, ch // SE_REDUCTION)
        lvl["se_w1"] = nrm((ch, red)); lvl["se_b1"] = jnp.zeros((1, red), jnp.float32)
        lvl["se_w2"] = nrm((red, ch)); lvl["se_b2"] = jnp.zeros((1, ch), jnp.float32)
        params["levels"].append(lvl)
        in_ch = ch
    params["proj_w"] = nrm((sum(PYRAMID_CHANNELS), VISUAL_EMBED_DIM))
    params["proj_b"] = jnp.zeros((1, VISUAL_EMBED_DIM), jnp.float32)
    return params


def prepare_params(params):
    dev = {"levels": []}
    in_ch = 3
    for i, (lvl, ch) in enumerate(zip(params["levels"], PYRAMID_CHANNELS)):
        cp = _rup(ch)
        cin_p = in_ch if i == 0 else _rup(in_ch)
        cg = ch // GN_GROUPS
        d = {"C": ch, "Cp": cp, "cg": cg}

        def conv_w(w, ci_pad, co_pad):
            w = _pad_axis(_pad_axis(w, 2, ci_pad), 3, co_pad)
            kh, kw = w.shape[0], w.shape[1]
            return w.reshape(kh * kw, ci_pad, co_pad).astype(COMPUTE_DTYPE)

        d["conv1_w"] = conv_w(lvl["conv1_w"], cin_p, cp)
        d["conv1_b"] = _pad_axis(lvl["conv1_b"], 1, cp)
        d["gn1_g"] = _pad_axis(lvl["gn1_g"], 1, cp)
        d["gn1_b"] = _pad_axis(lvl["gn1_b"], 1, cp)
        d["conv2_w"] = conv_w(lvl["conv2_w"], cp, cp)
        d["conv2_b"] = _pad_axis(lvl["conv2_b"], 1, cp)
        d["gn2_g"] = _pad_axis(lvl["gn2_g"], 1, cp)
        d["gn2_b"] = _pad_axis(lvl["gn2_b"], 1, cp)
        if i > 0:
            lat = lvl["lat_w"].reshape(in_ch, ch)
            d["lat_w"] = _pad_axis(_pad_axis(lat, 0, cin_p), 1, cp).astype(COMPUTE_DTYPE)
            d["lat_b"] = _pad_axis(lvl["lat_b"], 1, cp)
            d["fus_w_f"] = conv_w(lvl["fus_w"][:, :, :ch, :], cp, cp)
            d["fus_w_l"] = conv_w(lvl["fus_w"][:, :, ch:, :], cp, cp)
        else:
            d["fus_w_f"] = conv_w(lvl["fus_w"], cp, cp)
        d["fus_b"] = _pad_axis(lvl["fus_b"], 1, cp)
        d["fgn_g"] = _pad_axis(lvl["fgn_g"], 1, cp)
        d["fgn_b"] = _pad_axis(lvl["fgn_b"], 1, cp)
        d["se_w1"] = _pad_axis(_pad_axis(lvl["se_w1"], 0, cp), 1, LANE)
        d["se_b1"] = _pad_axis(lvl["se_b1"], 1, LANE)
        d["se_w2"] = _pad_axis(_pad_axis(lvl["se_w2"], 0, LANE), 1, cp)
        d["se_b2"] = _pad_axis(lvl["se_b2"], 1, cp)
        if cg > 1:
            gid = jnp.arange(ch) // cg
            p_mat = (gid[:, None] == gid[None, :]).astype(jnp.float32)
            d["P"] = _pad_axis(_pad_axis(p_mat, 0, cp), 1, cp)
        else:
            d["P"] = None
        dev["levels"].append(d)
        in_ch = ch
    n_pad = _rup(VISUAL_EMBED_DIM)
    dev["proj_w"] = _pad_axis(params["proj_w"], 1, n_pad)
    dev["proj_b"] = _pad_axis(params["proj_b"], 1, n_pad)
    return dev


# ----------------------------------------------------------------------------
# Forward pass (mirrors MultiScaleVisualFeaturePyramid.forward)
# ----------------------------------------------------------------------------
def multi_scale_pyramid_forward(dev_params, x_nchw):
    x = jnp.transpose(x_nchw, (0, 2, 3, 1)).astype(jnp.float32)   # NCHW -> NHWC
    B, H, W, C0 = x.shape
    prev = x.reshape(B, H * W, C0)
    prev_hw = (H, W)

    pooled_list = []
    pyramid = []
    for i, lvl in enumerate(dev_params["levels"]):
        C = lvl["C"]
        h_in, w_in = prev_hw
        # pyramid block: conv(s=2) -> GN+GELU -> conv(s=1) -> GN+GELU
        f = conv3x3_s2(prev, h_in, w_in, lvl["conv1_w"], lvl["conv1_b"])
        ho, wo = h_in // 2, w_in // 2
        f = group_norm_gelu(f, lvl["gn1_g"], lvl["gn1_b"], lvl["P"], lvl["cg"])
        f = conv3x3_s1([f], ho, wo, [lvl["conv2_w"]], lvl["conv2_b"])
        f = group_norm_gelu(f, lvl["gn2_g"], lvl["gn2_b"], lvl["P"], lvl["cg"])
        # fusion block (lateral concat fused into the conv as a second operand)
        if i > 0:
            lat = lateral_pool_conv(prev, h_in, w_in, lvl["lat_w"], lvl["lat_b"])
            f = conv3x3_s1([f, lat], ho, wo,
                           [lvl["fus_w_f"], lvl["fus_w_l"]], lvl["fus_b"])
        else:
            f = conv3x3_s1([f], ho, wo, [lvl["fus_w_f"]], lvl["fus_b"])
        f = group_norm_gelu(f, lvl["fgn_g"], lvl["fgn_b"], lvl["P"], lvl["cg"])
        # SE block (also yields the global average pool of its output)
        f, pooled = se_block(f, lvl["se_w1"], lvl["se_b1"],
                             lvl["se_w2"], lvl["se_b2"])
        pooled_list.append(pooled[:, :C])
        pyramid.append((f, (ho, wo), C))
        prev, prev_hw = f, (ho, wo)

    g = jnp.concatenate(pooled_list, axis=1)                      # (B, sum(C))
    g = linear(g, dev_params["proj_w"], dev_params["proj_b"])[:, :VISUAL_EMBED_DIM]

    pyramid_nchw = [
        jnp.transpose(f.reshape(f.shape[0], hw[0], hw[1], -1)[..., :c],
                      (0, 3, 1, 2))
        for (f, hw, c) in pyramid
    ]
    return g, pyramid_nchw


# ----------------------------------------------------------------------------
if __name__ == "__main__":
    key = jax.random.PRNGKey(0)
    pkey, xkey = jax.random.split(key)
    params = init_params(pkey)
    dev_params = prepare_params(params)

    gelu_kind()   # resolve GELU lowering choice once, outside the forward path

    # PyTorch-style NCHW input image
    x = jax.random.normal(xkey, (2, 3, 16, 16), dtype=jnp.float32)

    fwd = jax.jit(lambda inp: multi_scale_pyramid_forward(dev_params, inp))
    global_features, pyramid_features = fwd(x)
    jax.block_until_ready(global_features)
    for f in pyramid_features:
        jax.block_until_ready(f)

    assert global_features.shape == (2, VISUAL_EMBED_DIM)
    assert pyramid_features[0].shape == (2, PYRAMID_CHANNELS[0], 8, 8)
    assert pyramid_features[1].shape == (2, PYRAMID_CHANNELS[1], 4, 4)
    print("KERNEL_OK")
</pallas_src>

<mosaic_0001>
module attributes {stable_mosaic.version = 11 : i64} {
  func.func @_gelu_probe_kernel(%arg0: i32, %arg1: memref<8x128xf32, #tpu.memory_space<vmem>>, %arg2: memref<8x128xf32, #tpu.memory_space<vmem>>) attributes {dimension_semantics = [#tpu.dimension_semantics<arbitrary>], iteration_bounds = array<i64: 1>, scalar_prefetch = 0 : i64, scratch_operands = 0 : i64, tpu.core_type = #tpu.core_type<tc>, window_params = [{pipeline_mode = #tpu.pipeline_mode<synchronous>, transform_indices = @transform_0, window_bounds = array<i64: 8, 128>}, {pipeline_mode = #tpu.pipeline_mode<synchronous>, transform_indices = @transform_1, window_bounds = array<i64: 8, 128>}]} {
    %c0 = arith.constant 0 : index
    %c0_0 = arith.constant 0 : index
    %0 = vector.load %arg1[%c0, %c0_0] : memref<8x128xf32, #tpu.memory_space<vmem>>, vector<8x128xf32>
    %cst = arith.constant 5.000000e-01 : f32
    %1 = vector.broadcast %cst : f32 to vector<8x128xf32>
    %2 = arith.mulf %1, %0 : vector<8x128xf32>
    %cst_1 = arith.constant 0.707106769 : f32
    %3 = vector.broadcast %cst_1 : f32 to vector<8x128xf32>
    %4 = arith.mulf %0, %3 : vector<8x128xf32>
    %5 = math.erf %4 : vector<8x128xf32>
    %cst_2 = arith.constant 1.000000e+00 : f32
    %6 = vector.broadcast %cst_2 : f32 to vector<8x128xf32>
    %7 = arith.addf %6, %5 : vector<8x128xf32>
    %8 = arith.mulf %2, %7 : vector<8x128xf32>
    %c0_3 = arith.constant 0 : index
    %c0_4 = arith.constant 0 : index
    %9 = vector.load %arg2[%c0_3, %c0_4] : memref<8x128xf32, #tpu.memory_space<vmem>>, vector<8x128xf32>
    tpu.vector_store %arg2[%c0_3, %c0_4], %8 {strides = array<i32>} : memref<8x128xf32, #tpu.memory_space<vmem>>, vector<8x128xf32>,
    return
  }
  func.func @transform_0(%arg0: i32) -> (i32, i32) {
    %c0_i32 = arith.constant 0 : i32
    %c0_i32_0 = arith.constant 0 : i32
    %c0_i32_1 = arith.constant 0 : i32
    return %c0_i32, %c0_i32_0 : i32, i32
  }
  func.func @transform_1(%arg0: i32) -> (i32, i32) {
    %c0_i32 = arith.constant 0 : i32
    %c0_i32_0 = arith.constant 0 : i32
    %c0_i32_1 = arith.constant 0 : i32
    return %c0_i32, %c0_i32_0 : i32, i32
  }
}

module attributes {stable_mosaic.version = 11 : i64} {
  func.func @_gn_gelu_chan_kernel(%arg0: i32, %arg1: memref<1x64x128xf32, #tpu.memory_space<vmem>>, %arg2: memref<1x128xf32, #tpu.memory_space<vmem>>, %arg3: memref<1x128xf32, #tpu.memory_space<vmem>>, %arg4: memref<1x64x128xf32, #tpu.memory_space<vmem>>) attributes {dimension_semantics = [#tpu.dimension_semantics<parallel>], iteration_bounds = array<i64: 2>, scalar_prefetch = 0 : i64, scratch_operands = 0 : i64, tpu.core_type = #tpu.core_type<tc>, window_params = [{transform_indices = @transform_0, window_bounds = array<i64: 1, 64, 128>}, {pipeline_mode = #tpu.pipeline_mode<synchronous>, transform_indices = @transform_1, window_bounds = array<i64: 1, 128>}, {pipeline_mode = #tpu.pipeline_mode<synchronous>, transform_indices = @transform_2, window_bounds = array<i64: 1, 128>}, {transform_indices = @transform_3, window_bounds = array<i64: 1, 64, 128>}]} {
    %c0 = arith.constant 0 : index
    %c0_0 = arith.constant 0 : index
    %c0_1 = arith.constant 0 : index
    %0 = vector.load %arg1[%c0, %c0_0, %c0_1] : memref<1x64x128xf32, #tpu.memory_space<vmem>>, vector<1x64x128xf32>
    %1 = vector.shape_cast %0 : vector<1x64x128xf32> to vector<64x128xf32>
    %cst = arith.constant dense<0.000000e+00> : vector<128xf32>
    %2 = vector.multi_reduction <add>, %1, %cst [0] : vector<64x128xf32> to vector<128xf32>
    %3 = vector.shape_cast %2 : vector<128xf32> to vector<1x128xf32>
    %cst_2 = arith.constant 1.562500e-02 : f32
    %4 = vector.broadcast %cst_2 : f32 to vector<1x128xf32>
    %5 = arith.mulf %3, %4 : vector<1x128xf32>
    %6 = vector.broadcast %5 : vector<1x128xf32> to vector<64x128xf32>
    %7 = arith.subf %1, %6 : vector<64x128xf32>
    %8 = arith.mulf %7, %7 : vector<64x128xf32>
    %cst_3 = arith.constant dense<0.000000e+00> : vector<128xf32>
    %9 = vector.multi_reduction <add>, %8, %cst_3 [0] : vector<64x128xf32> to vector<128xf32>
    %10 = vector.shape_cast %9 : vector<128xf32> to vector<1x128xf32>
    %cst_4 = arith.constant 1.562500e-02 : f32
    %11 = vector.broadcast %cst_4 : f32 to vector<1x128xf32>
    %12 = arith.mulf %10, %11 : vector<1x128xf32>
    %cst_5 = arith.constant 9.99999974E-6 : f32
    %13 = vector.broadcast %cst_5 : f32 to vector<1x128xf32>
    %14 = arith.addf %12, %13 : vector<1x128xf32>
    %15 = math.rsqrt %14 : vector<1x128xf32>
    %16 = vector.broadcast %15 : vector<1x128xf32> to vector<64x128xf32>
    %17 = arith.mulf %7, %16 : vector<64x128xf32>
    %c0_6 = arith.constant 0 : index
    %c0_7 = arith.constant 0 : index
    %18 = vector.load %arg2[%c0_6, %c0_7] : memref<1x128xf32, #tpu.memory_space<vmem>>, vector<1x128xf32>
    %19 = vector.broadcast %18 : vector<1x128xf32> to vector<64x128xf32>
    %20 = arith.mulf %17, %19 : vector<64x128xf32>
    %c0_8 = arith.constant 0 : index
    %c0_9 = arith.constant 0 : index
    %21 = vector.load %arg3[%c0_8, %c0_9] : memref<1x128xf32, #tpu.memory_space<vmem>>, vector<1x128xf32>
    %22 = vector.broadcast %21 : vector<1x128xf32> to vector<64x128xf32>
    %23 = arith.addf %20, %22 : vector<64x128xf32>
    %24 = arith.mulf %23, %23 : vector<64x128xf32>
    %25 = arith.mulf %23, %24 : vector<64x128xf32>
    %cst_10 = arith.constant 4.471500e-02 : f32
    %26 = vector.broadcast %cst_10 : f32 to vector<64x128xf32>
    %27 = arith.mulf %26, %25 : vector<64x128xf32>
    %28 = arith.addf %23, %27 : vector<64x128xf32>
    %cst_11 = arith.constant 0.797884583 : f32
    %29 = vector.broadcast %cst_11 : f32 to vector<64x128xf32>
    %30 = arith.mulf %29, %28 : vector<64x128xf32>
    %31 = math.tanh %30 : vector<64x128xf32>
    %cst_12 = arith.constant 1.000000e+00 : f32
    %32 = vector.broadcast %cst_12 : f32 to vector<64x128xf32>
    %33 = arith.addf %32, %31 : vector<64x128xf32>
    %cst_13 = arith.constant 5.000000e-01 : f32
    %34 = vector.broadcast %cst_13 : f32 to vector<64x128xf32>
    %35 = arith.mulf %34, %33 : vector<64x128xf32>
    %36 = arith.mulf %23, %35 : vector<64x128xf32>
    %c0_14 = arith.constant 0 : index
    %c0_15 = arith.constant 0 : index
    %c0_16 = arith.constant 0 : index
    %37 = vector.load %arg4[%c0_14, %c0_15, %c0_16] : memref<1x64x128xf32, #tpu.memory_space<vmem>>, vector<1x64x128xf32>
    %38 = vector.shape_cast %37 : vector<1x64x128xf32> to vector<64x128xf32>
    %39 = vector.shape_cast %36 : vector<64x128xf32> to vector<1x64x128xf32>
    tpu.vector_store %arg4[%c0_14, %c0_15, %c0_16], %39 {strides = array<i32>} : memref<1x64x128xf32, #tpu.memory_space<vmem>>, vector<1x64x128xf32>,
    return
  }
  func.func @transform_0(%arg0: i32) -> (i32, i32, i32) {
    %c0_i32 = arith.constant 0 : i32
    %c0_i32_0 = arith.constant 0 : i32
    %c0_i32_1 = arith.constant 0 : i32
    return %arg0, %c0_i32, %c0_i32_0 : i32, i32, i32
  }
  func.func @transform_1(%arg0: i32) -> (i32, i32) {
    %c0_i32 = arith.constant 0 : i32
    %c0_i32_0 = arith.constant 0 : i32
    %c0_i32_1 = arith.constant 0 : i32
    return %c0_i32, %c0_i32_0 : i32, i32
  }
  func.func @transform_2(%arg0: i32) -> (i32, i32) {
    %c0_i32 = arith.constant 0 : i32
    %c0_i32_0 = arith.constant 0 : i32
    %c0_i32_1 = arith.constant 0 : i32
    return %c0_i32, %c0_i32_0 : i32, i32
  }
  func.func @transform_3(%arg0: i32) -> (i32, i32, i32) {
    %c0_i32 = arith.constant 0 : i32
    %c0_i32_0 = arith.constant 0 : i32
    %c0_i32_1 = arith.constant 0 : i32
    return %arg0, %c0_i32, %c0_i32_0 : i32, i32, i32
  }
}

module attributes {stable_mosaic.version = 11 : i64} {
  func.func @_conv_kernel(%arg0: i32, %arg1: memref<1x4x90x3xf32, #tpu.memory_space<vmem>>, %arg2: memref<9x3x128xbf16, #tpu.memory_space<vmem>>, %arg3: memref<1x128xf32, #tpu.memory_space<vmem>>, %arg4: memref<1x64x128xf32, #tpu.memory_space<vmem>>) attributes {dimension_semantics = [#tpu.dimension_semantics<parallel>], iteration_bounds = array<i64: 2>, scalar_prefetch = 0 : i64, scratch_operands = 0 : i64, tpu.core_type = #tpu.core_type<tc>, window_params = [{transform_indices = @transform_0, window_bounds = array<i64: 1, 4, 90, 3>}, {pipeline_mode = #tpu.pipeline_mode<synchronous>, transform_indices = @transform_1, window_bounds = array<i64: 9, 3, 128>}, {pipeline_mode = #tpu.pipeline_mode<synchronous>, transform_indices = @transform_2, window_bounds = array<i64: 1, 128>}, {transform_indices = @transform_3, window_bounds = array<i64: 1, 64, 128>}]} {
    %cst = arith.constant 0.000000e+00 : f32
    %0 = vector.broadcast %cst : f32 to vector<72x128xf32>
    %c0 = arith.constant 0 : index
    %c0_0 = arith.constant 0 : index
    %c0_1 = arith.constant 0 : index
    %c0_2 = arith.constant 0 : index
    %1 = vector.load %arg1[%c0, %c0_0, %c0_1, %c0_2] : memref<1x4x90x3xf32, #tpu.memory_space<vmem>>, vector<1x1x72x3xf32>
    %2 = vector.shape_cast %1 : vector<1x1x72x3xf32> to vector<72x3xf32>
    %3 = arith.truncf %2 : vector<72x3xf32> to vector<72x3xbf16>
    %c0_3 = arith.constant 0 : index
    %c0_4 = arith.constant 0 : index
    %c0_5 = arith.constant 0 : index
    %4 = vector.load %arg2[%c0_3, %c0_4, %c0_5] : memref<9x3x128xbf16, #tpu.memory_space<vmem>>, vector<1x3x128xbf16>
    %5 = vector.shape_cast %4 : vector<1x3x128xbf16> to vector<3x128xbf16>
    %cst_6 = arith.constant dense<0.000000e+00> : vector<72x128xf32>
    %6 = tpu.matmul %3, %5, %cst_6 {dimension_numbers = #tpu.dot_dimension_numbers<[1], [0], [0], [1], [0, 0, 1, 1], [], []>} : vector<72x3xbf16>, vector<3x128xbf16>, vector<72x128xf32> -> vector<72x128xf32>
    %7 = arith.addf %0, %6 : vector<72x128xf32>
    %c0_7 = arith.constant 0 : index
    %c1 = arith.constant 1 : index
    %c0_8 = arith.constant 0 : index
    %c0_9 = arith.constant 0 : index
    %8 = vector.load %arg1[%c0_7, %c1, %c0_8, %c0_9] : memref<1x4x90x3xf32, #tpu.memory_space<vmem>>, vector<1x1x72x3xf32>
    %9 = vector.shape_cast %8 : vector<1x1x72x3xf32> to vector<72x3xf32>
    %10 = arith.truncf %9 : vector<72x3xf32> to vector<72x3xbf16>
    %c1_10 = arith.constant 1 : index
    %c0_11 = arith.constant 0 : index
    %c0_12 = arith.constant 0 : index
    %11 = vector.load %arg2[%c1_10, %c0_11, %c0_12] : memref<9x3x128xbf16, #tpu.memory_space<vmem>>, vector<1x3x128xbf16>
    %12 = vector.shape_cast %11 : vector<1x3x128xbf16> to vector<3x128xbf16>
    %cst_13 = arith.constant dense<0.000000e+00> : vector<72x128xf32>
    %13 = tpu.matmul %10, %12, %cst_13 {dimension_numbers = #tpu.dot_dimension_numbers<[1], [0], [0], [1], [0, 0, 1, 1], [], []>} : vector<72x3xbf16>, vector<3x128xbf16>, vector<72x128xf32> -> vector<72x128xf32>
    %14 = arith.addf %7, %13 : vector<72x128xf32>
    %c0_14 = arith.constant 0 : index
    %c0_15 = arith.constant 0 : index
    %c1_16 = arith.constant 1 : index
    %c0_17 = arith.constant 0 : index
    %15 = vector.load %arg1[%c0_14, %c0_15, %c1_16, %c0_17] : memref<1x4x90x3xf32, #tpu.memory_space<vmem>>, vector<1x1x72x3xf32>
    %16 = vector.shape_cast %15 : vector<1x1x72x3xf32> to vector<72x3xf32>
    %17 = arith.truncf %16 : vector<72x3xf32> to vector<72x3xbf16>
    %c2 = arith.constant 2 : index
    %c0_18 = arith.constant 0 : index
    %c0_19 = arith.constant 0 : index
    %18 = vector.load %arg2[%c2, %c0_18, %c0_19] : memref<9x3x128xbf16, #tpu.memory_space<vmem>>, vector<1x3x128xbf16>
    %19 = vector.shape_cast %18 : vector<1x3x128xbf16> to vector<3x128xbf16>
    %cst_20 = arith.constant dense<0.000000e+00> : vector<72x128xf32>
    %20 = tpu.matmul %17, %19, %cst_20 {dimension_numbers = #tpu.dot_dimension_numbers<[1], [0], [0], [1], [0, 0, 1, 1], [], []>} : vector<72x3xbf16>, vector<3x128xbf16>, vector<72x128xf32> -> vector<72x128xf32>
    %21 = arith.addf %14, %20 : vector<72x128xf32>
    %c0_21 = arith.constant 0 : index
    %c2_22 = arith.constant 2 : index
    %c0_23 = arith.constant 0 : index
    %c0_24 = arith.constant 0 : index
    %22 = vector.load %arg1[%c0_21, %c2_22, %c0_23, %c0_24] : memref<1x4x90x3xf32, #tpu.memory_space<vmem>>, vector<1x1x72x3xf32>
    %23 = vector.shape_cast %22 : vector<1x1x72x3xf32> to vector<72x3xf32>
    %24 = arith.truncf %23 : vector<72x3xf32> to vector<72x3xbf16>
    %c3 = arith.constant 3 : index
    %c0_25 = arith.constant 0 : index
    %c0_26 = arith.constant 0 : index
    %25 = vector.load %arg2[%c3, %c0_25, %c0_26] : memref<9x3x128xbf16, #tpu.memory_space<vmem>>, vector<1x3x128xbf16>
    %26 = vector.shape_cast %25 : vector<1x3x128xbf16> to vector<3x128xbf16>
    %cst_27 = arith.constant dense<0.000000e+00> : vector<72x128xf32>
    %27 = tpu.matmul %24, %26, %cst_27 {dimension_numbers = #tpu.dot_dimension_numbers<[1], [0], [0], [1], [0, 0, 1, 1], [], []>} : vector<72x3xbf16>, vector<3x128xbf16>, vector<72x128xf32> -> vector<72x128xf32>
    %28 = arith.addf %21, %27 : vector<72x128xf32>
    %c0_28 = arith.constant 0 : index
    %c3_29 = arith.constant 3 : index
    %c0_30 = arith.constant 0 : index
    %c0_31 = arith.constant 0 : index
    %29 = vector.load %arg1[%c0_28, %c3_29, %c0_30, %c0_31] : memref<1x4x90x3xf32, #tpu.memory_space<vmem>>, vector<1x1x72x3xf32>
    %30 = vector.shape_cast %29 : vector<1x1x72x3xf32> to vector<72x3xf32>
    %31 = arith.truncf %30 : vector<72x3xf32> to vector<72x3xbf16>
    %c4 = arith.constant 4 : index
    %c0_32 = arith.constant 0 : index
    %c0_33 = arith.constant 0 : index
    %32 = vector.load %arg2[%c4, %c0_32, %c0_33] : memref<9x3x128xbf16, #tpu.memory_space<vmem>>, vector<1x3x128xbf16>
    %33 = vector.shape_cast %32 : vector<1x3x128xbf16> to vector<3x128xbf16>
    %cst_34 = arith.constant dense<0.000000e+00> : vector<72x128xf32>
    %34 = tpu.matmul %31, %33, %cst_34 {dimension_numbers = #tpu.dot_dimension_numbers<[1], [0], [0], [1], [0, 0, 1, 1], [], []>} : vector<72x3xbf16>, vector<3x128xbf16>, vector<72x128xf32> -> vector<72x128xf32>
    %35 = arith.addf %28, %34 : vector<72x128xf32>
    %c0_35 = arith.constant 0 : index
    %c2_36 = arith.constant 2 : index
    %c1_37 = arith.constant 1 : index
    %c0_38 = arith.constant 0 : index
    %36 = vector.load %arg1[%c0_35, %c2_36, %c1_37, %c0_38] : memref<1x4x90x3xf32, #tpu.memory_space<vmem>>, vector<1x1x72x3xf32>
    %37 = vector.shape_cast %36 : vector<1x1x72x3xf32> to vector<72x3xf32>
    %38 = arith.truncf %37 : vector<72x3xf32> to vector<72x3xbf16>
    %c5 = arith.constant 5 : index
    %c0_39 = arith.constant 0 : index
    %c0_40 = arith.constant 0 : index
    %39 = vector.load %arg2[%c5, %c0_39, %c0_40] : memref<9x3x128xbf16, #tpu.memory_space<vmem>>, vector<1x3x128xbf16>
    %40 = vector.shape_cast %39 : vector<1x3x128xbf16> to vector<3x128xbf16>
    %cst_41 = arith.constant dense<0.000000e+00> : vector<72x128xf32>
    %41 = tpu.matmul %38, %40, %cst_41 {dimension_numbers = #tpu.dot_dimension_numbers<[1], [0], [0], [1], [0, 0, 1, 1], [], []>} : vector<72x3xbf16>, vector<3x128xbf16>, vector<72x128xf32> -> vector<72x128xf32>
    %42 = arith.addf %35, %41 : vector<72x128xf32>
    %c0_42 = arith.constant 0 : index
    %c0_43 = arith.constant 0 : index
    %c9 = arith.constant 9 : index
    %c0_44 = arith.constant 0 : index
    %43 = vector.load %arg1[%c0_42, %c0_43, %c9, %c0_44] : memref<1x4x90x3xf32, #tpu.memory_space<vmem>>, vector<1x1x72x3xf32>
    %44 = vector.shape_cast %43 : vector<1x1x72x3xf32> to vector<72x3xf32>
    %45 = arith.truncf %44 : vector<72x3xf32> to vector<72x3xbf16>
    %c6 = arith.constant 6 : index
    %c0_45 = arith.constant 0 : index
    %c0_46 = arith.constant 0 : index
    %46 = vector.load %arg2[%c6, %c0_45, %c0_46] : memref<9x3x128xbf16, #tpu.memory_space<vmem>>, vector<1x3x128xbf16>
    %47 = vector.shape_cast %46 : vector<1x3x128xbf16> to vector<3x128xbf16>
    %cst_47 = arith.constant dense<0.000000e+00> : vector<72x128xf32>
    %48 = tpu.matmul %45, %47, %cst_47 {dimension_numbers = #tpu.dot_dimension_numbers<[1], [0], [0], [1], [0, 0, 1, 1], [], []>} : vector<72x3xbf16>, vector<3x128xbf16>, vector<72x128xf32> -> vector<72x128xf32>
    %49 = arith.addf %42, %48 : vector<72x128xf32>
    %c0_48 = arith.constant 0 : index
    %c1_49 = arith.constant 1 : index
    %c9_50 = arith.constant 9 : index
    %c0_51 = arith.constant 0 : index
    %50 = vector.load %arg1[%c0_48, %c1_49, %c9_50, %c0_51] : memref<1x4x90x3xf32, #tpu.memory_space<vmem>>, vector<1x1x72x3xf32>
    %51 = vector.shape_cast %50 : vector<1x1x72x3xf32> to vector<72x3xf32>
    %52 = arith.truncf %51 : vector<72x3xf32> to vector<72x3xbf16>
    %c7 = arith.constant 7 : index
    %c0_52 = arith.constant 0 : index
    %c0_53 = arith.constant 0 : index
    %53 = vector.load %arg2[%c7, %c0_52, %c0_53] : memref<9x3x128xbf16, #tpu.memory_space<vmem>>, vector<1x3x128xbf16>
    %54 = vector.shape_cast %53 : vector<1x3x128xbf16> to vector<3x128xbf16>
    %cst_54 = arith.constant dense<0.000000e+00> : vector<72x128xf32>
    %55 = tpu.matmul %52, %54, %cst_54 {dimension_numbers = #tpu.dot_dimension_numbers<[1], [0], [0], [1], [0, 0, 1, 1], [], []>} : vector<72x3xbf16>, vector<3x128xbf16>, vector<72x128xf32> -> vector<72x128xf32>
    %56 = arith.addf %49, %55 : vector<72x128xf32>
    %c0_55 = arith.constant 0 : index
    %c0_56 = arith.constant 0 : index
    %c10 = arith.constant 10 : index
    %c0_57 = arith.constant 0 : index
    %57 = vector.load %arg1[%c0_55, %c0_56, %c10, %c0_57] : memref<1x4x90x3xf32, #tpu.memory_space<vmem>>, vector<1x1x72x3xf32>
    %58 = vector.shape_cast %57 : vector<1x1x72x3xf32> to vector<72x3xf32>
    %59 = arith.truncf %58 : vector<72x3xf32> to vector<72x3xbf16>
    %c8 = arith.constant 8 : index
    %c0_58 = arith.constant 0 : index
    %c0_59 = arith.constant 0 : index
    %60 = vector.load %arg2[%c8, %c0_58, %c0_59] : memref<9x3x128xbf16, #tpu.memory_space<vmem>>, vector<1x3x128xbf16>
    %61 = vector.shape_cast %60 : vector<1x3x128xbf16> to vector<3x128xbf16>
    %cst_60 = arith.constant dense<0.000000e+00> : vector<72x128xf32>
    %62 = tpu.matmul %59, %61, %cst_60 {dimension_numbers = #tpu.dot_dimension_numbers<[1], [0], [0], [1], [0, 0, 1, 1], [], []>} : vector<72x3xbf16>, vector<3x128xbf16>, vector<72x128xf32> -> vector<72x128xf32>
    %63 = arith.addf %56, %62 : vector<72x128xf32>
    %c0_61 = arith.constant 0 : index
    %c0_62 = arith.constant 0 : index
    %64 = vector.load %arg3[%c0_61, %c0_62] : memref<1x128xf32, #tpu.memory_space<vmem>>, vector<1x128xf32>
    %65 = vector.broadcast %64 : vector<1x128xf32> to vector<72x128xf32>
    %66 = arith.addf %63, %65 : vector<72x128xf32>
    %67 = vector.extract_strided_slice %66 {offsets = [0, 0], sizes = [8, 128], strides = [1, 1]} : vector<72x128xf32> to vector<8x128xf32>
    %c0_63 = arith.constant 0 : index
    %c0_64 = arith.constant 0 : index
    %c0_65 = arith.constant 0 : index
    %68 = vector.load %arg4[%c0_63, %c0_64, %c0_65] : memref<1x64x128xf32, #tpu.memory_space<vmem>>, vector<1x8x128xf32>
    %69 = vector.shape_cast %68 : vector<1x8x128xf32> to vector<8x128xf32>
    %70 = vector.shape_cast %67 : vector<8x128xf32> to vector<1x8x128xf32>
    tpu.vector_store %arg4[%c0_63, %c0_64, %c0_65], %70 {strides = array<i32>} : memref<1x64x128xf32, #tpu.memory_space<vmem>>, vector<1x8x128xf32>,
    %71 = vector.extract_strided_slice %66 {offsets = [9, 0], sizes = [8, 128], strides = [1, 1]} : vector<72x128xf32> to vector<8x128xf32>
    %c0_66 = arith.constant 0 : index
    %c8_67 = arith.constant 8 : index
    %c0_68 = arith.constant 0 : index
    %72 = vector.load %arg4[%c0_66, %c8_67, %c0_68] : memref<1x64x128xf32, #tpu.memory_space<vmem>>, vector<1x8x128xf32>
    %73 = vector.shape_cast %72 : vector<1x8x128xf32> to vector<8x128xf32>
    %74 = vector.shape_cast %71 : vector<8x128xf32> to vector<1x8x128xf32>
    tpu.vector_store %arg4[%c0_66, %c8_67, %c0_68], %74 {strides = array<i32>} : memref<1x64x128xf32, #tpu.memory_space<vmem>>, vector<1x8x128xf32>,
    %75 = vector.extract_strided_slice %66 {offsets = [18, 0], sizes = [8, 128], strides = [1, 1]} : vector<72x128xf32> to vector<8x128xf32>
    %c0_69 = arith.constant 0 : index
    %c16 = arith.constant 16 : index
    %c0_70 = arith.constant 0 : index
    %76 = vector.load %arg4[%c0_69, %c16, %c0_70] : memref<1x64x128xf32, #tpu.memory_space<vmem>>, vector<1x8x128xf32>
    %77 = vector.shape_cast %76 : vector<1x8x128xf32> to vector<8x128xf32>
    %78 = vector.shape_cast %75 : vector<8x128xf32> to vector<1x8x128xf32>
    tpu.vector_store %arg4[%c0_69, %c16, %c0_70], %78 {strides = array<i32>} : memref<1x64x128xf32, #tpu.memory_space<vmem>>, vector<1x8x128xf32>,
    %79 = vector.extract_strided_slice %66 {offsets = [27, 0], sizes = [8, 128], strides = [1, 1]} : vector<72x128xf32> to vector<8x128xf32>
    %c0_71 = arith.constant 0 : index
    %c24 = arith.constant 24 : index
    %c0_72 = arith.constant 0 : index
    %80 = vector.load %arg4[%c0_71, %c24, %c0_72] : memref<1x64x128xf32, #tpu.memory_space<vmem>>, vector<1x8x128xf32>
    %81 = vector.shape_cast %80 : vector<1x8x128xf32> to vector<8x128xf32>
    %82 = vector.shape_cast %79 : vector<8x128xf32> to vector<1x8x128xf32>
    tpu.vector_store %arg4[%c0_71, %c24, %c0_72], %82 {strides = array<i32>} : memref<1x64x128xf32, #tpu.memory_space<vmem>>, vector<1x8x128xf32>,
    %83 = vector.extract_strided_slice %66 {offsets = [36, 0], sizes = [8, 128], strides = [1, 1]} : vector<72x128xf32> to vector<8x128xf32>
    %c0_73 = arith.constant 0 : index
    %c32 = arith.constant 32 : index
    %c0_74 = arith.constant 0 : index
    %84 = vector.load %arg4[%c0_73, %c32, %c0_74] : memref<1x64x128xf32, #tpu.memory_space<vmem>>, vector<1x8x128xf32>
    %85 = vector.shape_cast %84 : vector<1x8x128xf32> to vector<8x128xf32>
    %86 = vector.shape_cast %83 : vector<8x128xf32> to vector<1x8x128xf32>
    tpu.vector_store %arg4[%c0_73, %c32, %c0_74], %86 {strides = array<i32>} : memref<1x64x128xf32, #tpu.memory_space<vmem>>, vector<1x8x128xf32>,
    %87 = vector.extract_strided_slice %66 {offsets = [45, 0], sizes = [8, 128], strides = [1, 1]} : vector<72x128xf32> to vector<8x128xf32>
    %c0_75 = arith.constant 0 : index
    %c40 = arith.constant 40 : index
    %c0_76 = arith.constant 0 : index
    %88 = vector.load %arg4[%c0_75, %c40, %c0_76] : memref<1x64x128xf32, #tpu.memory_space<vmem>>, vector<1x8x128xf32>
    %89 = vector.shape_cast %88 : vector<1x8x128xf32> to vector<8x128xf32>
    %90 = vector.shape_cast %87 : vector<8x128xf32> to vector<1x8x128xf32>
    tpu.vector_store %arg4[%c0_75, %c40, %c0_76], %90 {strides = array<i32>} : memref<1x64x128xf32, #tpu.memory_space<vmem>>, vector<1x8x128xf32>,
    %91 = vector.extract_strided_slice %66 {offsets = [54, 0], sizes = [8, 128], strides = [1, 1]} : vector<72x128xf32> to vector<8x128xf32>
    %c0_77 = arith.constant 0 : index
    %c48 = arith.constant 48 : index
    %c0_78 = arith.constant 0 : index
    %92 = vector.load %arg4[%c0_77, %c48, %c0_78] : memref<1x64x128xf32, #tpu.memory_space<vmem>>, vector<1x8x128xf32>
    %93 = vector.shape_cast %92 : vector<1x8x128xf32> to vector<8x128xf32>
    %94 = vector.shape_cast %91 : vector<8x128xf32> to vector<1x8x128xf32>
    tpu.vector_store %arg4[%c0_77, %c48, %c0_78], %94 {strides = array<i32>} : memref<1x64x128xf32, #tpu.memory_space<vmem>>, vector<1x8x128xf32>,
    %95 = vector.extract_strided_slice %66 {offsets = [63, 0], sizes = [8, 128], strides = [1, 1]} : vector<72x128xf32> to vector<8x128xf32>
    %c0_79 = arith.constant 0 : index
    %c56 = arith.constant 56 : index
    %c0_80 = arith.constant 0 : index
    %96 = vector.load %arg4[%c0_79, %c56, %c0_80] : memref<1x64x128xf32, #tpu.memory_space<vmem>>, vector<1x8x128xf32>
    %97 = vector.shape_cast %96 : vector<1x8x128xf32> to vector<8x128xf32>
    %98 = vector.shape_cast %95 : vector<8x128xf32> to vector<1x8x128xf32>
    tpu.vector_store %arg4[%c0_79, %c56, %c0_80], %98 {strides = array<i32>} : memref<1x64x128xf32, #tpu.memory_space<vmem>>, vector<1x8x128xf32>,
    return
  }
  func.func @transform_0(%arg0: i32) -> (i32, i32, i32, i32) {
    %c0_i32 = arith.constant 0 : i32
    %c0_i32_0 = arith.constant 0 : i32
    %c0_i32_1 = arith.constant 0 : i32
    %c0_i32_2 = arith.constant 0 : i32
    return %arg0, %c0_i32, %c0_i32_0, %c0_i32_1 : i32, i32, i32, i32
  }
  func.func @transform_1(%arg0: i32) -> (i32, i32, i32) {
    %c0_i32 = arith.constant 0 : i32
    %c0_i32_0 = arith.constant 0 : i32
    %c0_i32_1 = arith.constant 0 : i32
    %c0_i32_2 = arith.constant 0 : i32
    return %c0_i32, %c0_i32_0, %c0_i32_1 : i32, i32, i32
  }
  func.func @transform_2(%arg0: i32) -> (i32, i32) {
    %c0_i32 = arith.constant 0 : i32
    %c0_i32_0 = arith.constant 0 : i32
    %c0_i32_1 = arith.constant 0 : i32
    return %c0_i32, %c0_i32_0 : i32, i32
  }
  func.func @transform_3(%arg0: i32) -> (i32, i32, i32) {
    %c0_i32 = arith.constant 0 : i32
    %c0_i32_0 = arith.constant 0 : i32
    %c0_i32_1 = arith.constant 0 : i32
    return %arg0, %c0_i32, %c0_i32_0 : i32, i32, i32
  }
}

module attributes {stable_mosaic.version = 11 : i64} {
  func.func @_se_kernel(%arg0: i32, %arg1: memref<1x64x128xf32, #tpu.memory_space<vmem>>, %arg2: memref<128x128xf32, #tpu.memory_space<vmem>>, %arg3: memref<1x128xf32, #tpu.memory_space<vmem>>, %arg4: memref<128x128xf32, #tpu.memory_space<vmem>>, %arg5: memref<1x128xf32, #tpu.memory_space<vmem>>, %arg6: memref<1x64x128xf32, #tpu.memory_space<vmem>>, %arg7: memref<1x1x128xf32, #tpu.memory_space<vmem>>) attributes {dimension_semantics = [#tpu.dimension_semantics<parallel>], iteration_bounds = array<i64: 2>, scalar_prefetch = 0 : i64, scratch_operands = 0 : i64, tpu.core_type = #tpu.core_type<tc>, window_params = [{transform_indices = @transform_0, window_bounds = array<i64: 1, 64, 128>}, {pipeline_mode = #tpu.pipeline_mode<synchronous>, transform_indices = @transform_1, window_bounds = array<i64: 128, 128>}, {pipeline_mode = #tpu.pipeline_mode<synchronous>, transform_indices = @transform_2, window_bounds = array<i64: 1, 128>}, {pipeline_mode = #tpu.pipeline_mode<synchronous>, transform_indices = @transform_3, window_bounds = array<i64: 128, 128>}, {pipeline_mode = #tpu.pipeline_mode<synchronous>, transform_indices = @transform_4, window_bounds = array<i64: 1, 128>}, {transform_indices = @transform_5, window_bounds = array<i64: 1, 64, 128>}, {transform_indices = @transform_6, window_bounds = array<i64: 1, 1, 128>}]} {
    %c0 = arith.constant 0 : index
    %c0_0 = arith.constant 0 : index
    %c0_1 = arith.constant 0 : index
    %0 = vector.load %arg1[%c0, %c0_0, %c0_1] : memref<1x64x128xf32, #tpu.memory_space<vmem>>, vector<1x64x128xf32>
    %1 = vector.shape_cast %0 : vector<1x64x128xf32> to vector<64x128xf32>
    %cst = arith.constant dense<0.000000e+00> : vector<128xf32>
    %2 = vector.multi_reduction <add>, %1, %cst [0] : vector<64x128xf32> to vector<128xf32>
    %3 = vector.shape_cast %2 : vector<128xf32> to vector<1x128xf32>
    %cst_2 = arith.constant 1.562500e-02 : f32
    %4 = vector.broadcast %cst_2 : f32 to vector<1x128xf32>
    %5 = arith.mulf %3, %4 : vector<1x128xf32>
    %c0_3 = arith.constant 0 : index
    %c0_4 = arith.constant 0 : index
    %6 = vector.load %arg2[%c0_3, %c0_4] : memref<128x128xf32, #tpu.memory_space<vmem>>, vector<128x128xf32>
    %cst_5 = arith.constant dense<0.000000e+00> : vector<1x128xf32>
    %7 = tpu.matmul %5, %6, %cst_5 {dimension_numbers = #tpu.dot_dimension_numbers<[1], [0], [0], [1], [0, 0, 1, 1], [], []>} : vector<1x128xf32>, vector<128x128xf32>, vector<1x128xf32> -> vector<1x128xf32>
    %c0_6 = arith.constant 0 : index
    %c0_7 = arith.constant 0 : index
    %8 = vector.load %arg3[%c0_6, %c0_7] : memref<1x128xf32, #tpu.memory_space<vmem>>, vector<1x128xf32>
    %9 = arith.addf %7, %8 : vector<1x128xf32>
    %cst_8 = arith.constant 0.000000e+00 : f32
    %10 = vector.broadcast %cst_8 : f32 to vector<1x128xf32>
    %11 = arith.maximumf %9, %10 : vector<1x128xf32>
    %c0_9 = arith.constant 0 : index
    %c0_10 = arith.constant 0 : index
    %12 = vector.load %arg4[%c0_9, %c0_10] : memref<128x128xf32, #tpu.memory_space<vmem>>, vector<128x128xf32>
    %cst_11 = arith.constant dense<0.000000e+00> : vector<1x128xf32>
    %13 = tpu.matmul %11, %12, %cst_11 {dimension_numbers = #tpu.dot_dimension_numbers<[1], [0], [0], [1], [0, 0, 1, 1], [], []>} : vector<1x128xf32>, vector<128x128xf32>, vector<1x128xf32> -> vector<1x128xf32>
    %c0_12 = arith.constant 0 : index
    %c0_13 = arith.constant 0 : index
    %14 = vector.load %arg5[%c0_12, %c0_13] : memref<1x128xf32, #tpu.memory_space<vmem>>, vector<1x128xf32>
    %15 = arith.addf %13, %14 : vector<1x128xf32>
    %16 = arith.negf %15 : vector<1x128xf32>
    %17 = math.exp %16 : vector<1x128xf32>
    %cst_14 = arith.constant 1.000000e+00 : f32
    %18 = vector.broadcast %cst_14 : f32 to vector<1x128xf32>
    %19 = arith.addf %18, %17 : vector<1x128xf32>
    %20 = arith.divf %18, %19 : vector<1x128xf32>
    %21 = vector.broadcast %20 : vector<1x128xf32> to vector<64x128xf32>
    %22 = arith.mulf %1, %21 : vector<64x128xf32>
    %c0_15 = arith.constant 0 : index
    %c0_16 = arith.constant 0 : index
    %c0_17 = arith.constant 0 : index
    %23 = vector.load %arg6[%c0_15, %c0_16, %c0_17] : memref<1x64x128xf32, #tpu.memory_space<vmem>>, vector<1x64x128xf32>
    %24 = vector.shape_cast %23 : vector<1x64x128xf32> to vector<64x128xf32>
    %25 = vector.shape_cast %22 : vector<64x128xf32> to vector<1x64x128xf32>
    tpu.vector_store %arg6[%c0_15, %c0_16, %c0_17], %25 {strides = array<i32>} : memref<1x64x128xf32, #tpu.memory_space<vmem>>, vector<1x64x128xf32>,
    %26 = arith.mulf %5, %20 : vector<1x128xf32>
    %c0_18 = arith.constant 0 : index
    %c0_19 = arith.constant 0 : index
    %c0_20 = arith.constant 0 : index
    %27 = vector.load %arg7[%c0_18, %c0_19, %c0_20] : memref<1x1x128xf32, #tpu.memory_space<vmem>>, vector<1x1x128xf32>
    %28 = vector.shape_cast %27 : vector<1x1x128xf32> to vector<1x128xf32>
    %29 = vector.shape_cast %26 : vector<1x128xf32> to vector<1x1x128xf32>
    tpu.vector_store %arg7[%c0_18, %c0_19, %c0_20], %29 {strides = array<i32>} : memref<1x1x128xf32, #tpu.memory_space<vmem>>, vector<1x1x128xf32>,
    return
  }
  func.func @transform_0(%arg0: i32) -> (i32, i32, i32) {
    %c0_i32 = arith.constant 0 : i32
    %c0_i32_0 = arith.constant 0 : i32
    %c0_i32_1 = arith.constant 0 : i32
    return %arg0, %c0_i32, %c0_i32_0 : i32, i32, i32
  }
  func.func @transform_1(%arg0: i32) -> (i32, i32) {
    %c0_i32 = arith.constant 0 : i32
    %c0_i32_0 = arith.constant 0 : i32
    %c0_i32_1 = arith.constant 0 : i32
    return %c0_i32, %c0_i32_0 : i32, i32
  }
  func.func @transform_2(%arg0: i32) -> (i32, i32) {
    %c0_i32 = arith.constant 0 : i32
    %c0_i32_0 = arith.constant 0 : i32
    %c0_i32_1 = arith.constant 0 : i32
    return %c0_i32, %c0_i32_0 : i32, i32
  }
  func.func @transform_3(%arg0: i32) -> (i32, i32) {
    %c0_i32 = arith.constant 0 : i32
    %c0_i32_0 = arith.constant 0 : i32
    %c0_i32_1 = arith.constant 0 : i32
    return %c0_i32, %c0_i32_0 : i32, i32
  }
  func.func @transform_4(%arg0: i32) -> (i32, i32) {
    %c0_i32 = arith.constant 0 : i32
    %c0_i32_0 = arith.constant 0 : i32
    %c0_i32_1 = arith.constant 0 : i32
    return %c0_i32, %c0_i32_0 : i32, i32
  }
  func.func @transform_5(%arg0: i32) -> (i32, i32, i32) {
    %c0_i32 = arith.constant 0 : i32
    %c0_i32_0 = arith.constant 0 : i32
    %c0_i32_1 = arith.constant 0 : i32
    return %arg0, %c0_i32, %c0_i32_0 : i32, i32, i32
  }
  func.func @transform_6(%arg0: i32) -> (i32, i32, i32) {
    %c0_i32 = arith.constant 0 : i32
    %c0_i32_0 = arith.constant 0 : i32
    %c0_i32_1 = arith.constant 0 : i32
    return %arg0, %c0_i32, %c0_i32_0 : i32, i32, i32
  }
}

module attributes {stable_mosaic.version = 11 : i64} {
  func.func @_conv_kernel(%arg0: i32, %arg1: memref<1x1x110x128xf32, #tpu.memory_space<vmem>>, %arg2: memref<9x128x128xbf16, #tpu.memory_space<vmem>>, %arg3: memref<1x128xf32, #tpu.memory_space<vmem>>, %arg4: memref<1x64x128xf32, #tpu.memory_space<vmem>>) attributes {dimension_semantics = [#tpu.dimension_semantics<parallel>], iteration_bounds = array<i64: 2>, scalar_prefetch = 0 : i64, scratch_operands = 0 : i64, tpu.core_type = #tpu.core_type<tc>, window_params = [{transform_indices = @transform_0, window_bounds = array<i64: 1, 1, 110, 128>}, {pipeline_mode = #tpu.pipeline_mode<synchronous>, transform_indices = @transform_1, window_bounds = array<i64: 9, 128, 128>}, {pipeline_mode = #tpu.pipeline_mode<synchronous>, transform_indices = @transform_2, window_bounds = array<i64: 1, 128>}, {transform_indices = @transform_3, window_bounds = array<i64: 1, 64, 128>}]} {
    %cst = arith.constant 0.000000e+00 : f32
    %0 = vector.broadcast %cst : f32 to vector<80x128xf32>
    %c0 = arith.constant 0 : index
    %c0_0 = arith.constant 0 : index
    %c0_1 = arith.constant 0 : index
    %c0_2 = arith.constant 0 : index
    %1 = vector.load %arg1[%c0, %c0_0, %c0_1, %c0_2] : memref<1x1x110x128xf32, #tpu.memory_space<vmem>>, vector<1x1x80x128xf32>
    %2 = vector.shape_cast %1 : vector<1x1x80x128xf32> to vector<80x128xf32>
    %3 = arith.truncf %2 : vector<80x128xf32> to vector<80x128xbf16>
    %c0_3 = arith.constant 0 : index
    %c0_4 = arith.constant 0 : index
    %c0_5 = arith.constant 0 : index
    %4 = vector.load %arg2[%c0_3, %c0_4, %c0_5] : memref<9x128x128xbf16, #tpu.memory_space<vmem>>, vector<1x128x128xbf16>
    %5 = vector.shape_cast %4 : vector<1x128x128xbf16> to vector<128x128xbf16>
    %cst_6 = arith.constant dense<0.000000e+00> : vector<80x128xf32>
    %6 = tpu.matmul %3, %5, %cst_6 {dimension_numbers = #tpu.dot_dimension_numbers<[1], [0], [0], [1], [0, 0, 1, 1], [], []>} : vector<80x128xbf16>, vector<128x128xbf16>, vector<80x128xf32> -> vector<80x128xf32>
    %7 = arith.addf %0, %6 : vector<80x128xf32>
    %c0_7 = arith.constant 0 : index
    %c0_8 = arith.constant 0 : index
    %c1 = arith.constant 1 : index
    %c0_9 = arith.constant 0 : index
    %8 = vector.load %arg1[%c0_7, %c0_8, %c1, %c0_9] : memref<1x1x110x128xf32, #tpu.memory_space<vmem>>, vector<1x1x80x128xf32>
    %9 = vector.shape_cast %8 : vector<1x1x80x128xf32> to vector<80x128xf32>
    %10 = arith.truncf %9 : vector<80x128xf32> to vector<80x128xbf16>
    %c1_10 = arith.constant 1 : index
    %c0_11 = arith.constant 0 : index
    %c0_12 = arith.constant 0 : index
    %11 = vector.load %arg2[%c1_10, %c0_11, %c0_12] : memref<9x128x128xbf16, #tpu.memory_space<vmem>>, vector<1x128x128xbf16>
    %12 = vector.shape_cast %11 : vector<1x128x128xbf16> to vector<128x128xbf16>
    %cst_13 = arith.constant dense<0.000000e+00> : vector<80x128xf32>
    %13 = tpu.matmul %10, %12, %cst_13 {dimension_numbers = #tpu.dot_dimension_numbers<[1], [0], [0], [1], [0, 0, 1, 1], [], []>} : vector<80x128xbf16>, vector<128x128xbf16>, vector<80x128xf32> -> vector<80x128xf32>
    %14 = arith.addf %7, %13 : vector<80x128xf32>
    %c0_14 = arith.constant 0 : index
    %c0_15 = arith.constant 0 : index
    %c2 = arith.constant 2 : index
    %c0_16 = arith.constant 0 : index
    %15 = vector.load %arg1[%c0_14, %c0_15, %c2, %c0_16] : memref<1x1x110x128xf32, #tpu.memory_space<vmem>>, vector<1x1x80x128xf32>
    %16 = vector.shape_cast %15 : vector<1x1x80x128xf32> to vector<80x128xf32>
    %17 = arith.truncf %16 : vector<80x128xf32> to vector<80x128xbf16>
    %c2_17 = arith.constant 2 : index
    %c0_18 = arith.constant 0 : index
    %c0_19 = arith.constant 0 : index
    %18 = vector.load %arg2[%c2_17, %c0_18, %c0_19] : memref<9x128x128xbf16, #tpu.memory_space<vmem>>, vector<1x128x128xbf16>
    %19 = vector.shape_cast %18 : vector<1x128x128xbf16> to vector<128x128xbf16>
    %cst_20 = arith.constant dense<0.000000e+00> : vector<80x128xf32>
    %20 = tpu.matmul %17, %19, %cst_20 {dimension_numbers = #tpu.dot_dimension_numbers<[1], [0], [0], [1], [0, 0, 1, 1], [], []>} : vector<80x128xbf16>, vector<128x128xbf16>, vector<80x128xf32> -> vector<80x128xf32>
    %21 = arith.addf %14, %20 : vector<80x128xf32>
    %c0_21 = arith.constant 0 : index
    %c0_22 = arith.constant 0 : index
    %c10 = arith.constant 10 : index
    %c0_23 = arith.constant 0 : index
    %22 = vector.load %arg1[%c0_21, %c0_22, %c10, %c0_23] : memref<1x1x110x128xf32, #tpu.memory_space<vmem>>, vector<1x1x80x128xf32>
    %23 = vector.shape_cast %22 : vector<1x1x80x128xf32> to vector<80x128xf32>
    %24 = arith.truncf %23 : vector<80x128xf32> to vector<80x128xbf16>
    %c3 = arith.constant 3 : index
    %c0_24 = arith.constant 0 : index
    %c0_25 = arith.constant 0 : index
    %25 = vector.load %arg2[%c3, %c0_24, %c0_25] : memref<9x128x128xbf16, #tpu.memory_space<vmem>>, vector<1x128x128xbf16>
    %26 = vector.shape_cast %25 : vector<1x128x128xbf16> to vector<128x128xbf16>
    %cst_26 = arith.constant dense<0.000000e+00> : vector<80x128xf32>
    %27 = tpu.matmul %24, %26, %cst_26 {dimension_numbers = #tpu.dot_dimension_numbers<[1], [0], [0], [1], [0, 0, 1, 1], [], []>} : vector<80x128xbf16>, vector<128x128xbf16>, vector<80x128xf32> -> vector<80x128xf32>
    %28 = arith.addf %21, %27 : vector<80x128xf32>
    %c0_27 = arith.constant 0 : index
    %c0_28 = arith.constant 0 : index
    %c11 = arith.constant 11 : index
    %c0_29 = arith.constant 0 : index
    %29 = vector.load %arg1[%c0_27, %c0_28, %c11, %c0_29] : memref<1x1x110x128xf32, #tpu.memory_space<vmem>>, vector<1x1x80x128xf32>
    %30 = vector.shape_cast %29 : vector<1x1x80x128xf32> to vector<80x128xf32>
    %31 = arith.truncf %30 : vector<80x128xf32> to vector<80x128xbf16>
    %c4 = arith.constant 4 : index
    %c0_30 = arith.constant 0 : index
    %c0_31 = arith.constant 0 : index
    %32 = vector.load %arg2[%c4, %c0_30, %c0_31] : memref<9x128x128xbf16, #tpu.memory_space<vmem>>, vector<1x128x128xbf16>
    %33 = vector.shape_cast %32 : vector<1x128x128xbf16> to vector<128x128xbf16>
    %cst_32 = arith.constant dense<0.000000e+00> : vector<80x128xf32>
    %34 = tpu.matmul %31, %33, %cst_32 {dimension_numbers = #tpu.dot_dimension_numbers<[1], [0], [0], [1], [0, 0, 1, 1], [], []>} : vector<80x128xbf16>, vector<128x128xbf16>, vector<80x128xf32> -> vector<80x128xf32>
    %35 = arith.addf %28, %34 : vector<80x128xf32>
    %c0_33 = arith.constant 0 : index
    %c0_34 = arith.constant 0 : index
    %c12 = arith.constant 12 : index
    %c0_35 = arith.constant 0 : index
    %36 = vector.load %arg1[%c0_33, %c0_34, %c12, %c0_35] : memref<1x1x110x128xf32, #tpu.memory_space<vmem>>, vector<1x1x80x128xf32>
    %37 = vector.shape_cast %36 : vector<1x1x80x128xf32> to vector<80x128xf32>
    %38 = arith.truncf %37 : vector<80x128xf32> to vector<80x128xbf16>
    %c5 = arith.constant 5 : index
    %c0_36 = arith.constant 0 : index
    %c0_37 = arith.constant 0 : index
    %39 = vector.load %arg2[%c5, %c0_36, %c0_37] : memref<9x128x128xbf16, #tpu.memory_space<vmem>>, vector<1x128x128xbf16>
    %40 = vector.shape_cast %39 : vector<1x128x128xbf16> to vector<128x128xbf16>
    %cst_38 = arith.constant dense<0.000000e+00> : vector<80x128xf32>
    %41 = tpu.matmul %38, %40, %cst_38 {dimension_numbers = #tpu.dot_dimension_numbers<[1], [0], [0], [1], [0, 0, 1, 1], [], []>} : vector<80x128xbf16>, vector<128x128xbf16>, vector<80x128xf32> -> vector<80x128xf32>
    %42 = arith.addf %35, %41 : vector<80x128xf32>
    %c0_39 = arith.constant 0 : index
    %c0_40 = arith.constant 0 : index
    %c20 = arith.constant 20 : index
    %c0_41 = arith.constant 0 : index
    %43 = vector.load %arg1[%c0_39, %c0_40, %c20, %c0_41] : memref<1x1x110x128xf32, #tpu.memory_space<vmem>>, vector<1x1x80x128xf32>
    %44 = vector.shape_cast %43 : vector<1x1x80x128xf32> to vector<80x128xf32>
    %45 = arith.truncf %44 : vector<80x128xf32> to vector<80x128xbf16>
    %c6 = arith.constant 6 : index
    %c0_42 = arith.constant 0 : index
    %c0_43 = arith.constant 0 : index
    %46 = vector.load %arg2[%c6, %c0_42, %c0_43] : memref<9x128x128xbf16, #tpu.memory_space<vmem>>, vector<1x128x128xbf16>
    %47 = vector.shape_cast %46 : vector<1x128x128xbf16> to vector<128x128xbf16>
    %cst_44 = arith.constant dense<0.000000e+00> : vector<80x128xf32>
    %48 = tpu.matmul %45, %47, %cst_44 {dimension_numbers = #tpu.dot_dimension_numbers<[1], [0], [0], [1], [0, 0, 1, 1], [], []>} : vector<80x128xbf16>, vector<128x128xbf16>, vector<80x128xf32> -> vector<80x128xf32>
    %49 = arith.addf %42, %48 : vector<80x128xf32>
    %c0_45 = arith.constant 0 : index
    %c0_46 = arith.constant 0 : index
    %c21 = arith.constant 21 : index
    %c0_47 = arith.constant 0 : index
    %50 = vector.load %arg1[%c0_45, %c0_46, %c21, %c0_47] : memref<1x1x110x128xf32, #tpu.memory_space<vmem>>, vector<1x1x80x128xf32>
    %51 = vector.shape_cast %50 : vector<1x1x80x128xf32> to vector<80x128xf32>
    %52 = arith.truncf %51 : vector<80x128xf32> to vector<80x128xbf16>
    %c7 = arith.constant 7 : index
    %c0_48 = arith.constant 0 : index
    %c0_49 = arith.constant 0 : index
    %53 = vector.load %arg2[%c7, %c0_48, %c0_49] : memref<9x128x128xbf16, #tpu.memory_space<vmem>>, vector<1x128x128xbf16>
    %54 = vector.shape_cast %53 : vector<1x128x128xbf16> to vector<128x128xbf16>
    %cst_50 = arith.constant dense<0.000000e+00> : vector<80x128xf32>
    %55 = tpu.matmul %52, %54, %cst_50 {dimension_numbers = #tpu.dot_dimension_numbers<[1], [0], [0], [1], [0, 0, 1, 1], [], []>} : vector<80x128xbf16>, vector<128x128xbf16>, vector<80x128xf32> -> vector<80x128xf32>
    %56 = arith.addf %49, %55 : vector<80x128xf32>
    %c0_51 = arith.constant 0 : index
    %c0_52 = arith.constant 0 : index
    %c22 = arith.constant 22 : index
    %c0_53 = arith.constant 0 : index
    %57 = vector.load %arg1[%c0_51, %c0_52, %c22, %c0_53] : memref<1x1x110x128xf32, #tpu.memory_space<vmem>>, vector<1x1x80x128xf32>
    %58 = vector.shape_cast %57 : vector<1x1x80x128xf32> to vector<80x128xf32>
    %59 = arith.truncf %58 : vector<80x128xf32> to vector<80x128xbf16>
    %c8 = arith.constant 8 : index
    %c0_54 = arith.constant 0 : index
    %c0_55 = arith.constant 0 : index
    %60 = vector.load %arg2[%c8, %c0_54, %c0_55] : memref<9x128x128xbf16, #tpu.memory_space<vmem>>, vector<1x128x128xbf16>
    %61 = vector.shape_cast %60 : vector<1x128x128xbf16> to vector<128x128xbf16>
    %cst_56 = arith.constant dense<0.000000e+00> : vector<80x128xf32>
    %62 = tpu.matmul %59, %61, %cst_56 {dimension_numbers = #tpu.dot_dimension_numbers<[1], [0], [0], [1], [0, 0, 1, 1], [], []>} : vector<80x128xbf16>, vector<128x128xbf16>, vector<80x128xf32> -> vector<80x128xf32>
    %63 = arith.addf %56, %62 : vector<80x128xf32>
    %c0_57 = arith.constant 0 : index
    %c0_58 = arith.constant 0 : index
    %64 = vector.load %arg3[%c0_57, %c0_58] : memref<1x128xf32, #tpu.memory_space<vmem>>, vector<1x128xf32>
    %65 = vector.broadcast %64 : vector<1x128xf32> to vector<80x128xf32>
    %66 = arith.addf %63, %65 : vector<80x128xf32>
    %67 = vector.extract_strided_slice %66 {offsets = [0, 0], sizes = [8, 128], strides = [1, 1]} : vector<80x128xf32> to vector<8x128xf32>
    %c0_59 = arith.constant 0 : index
    %c0_60 = arith.constant 0 : index
    %c0_61 = arith.constant 0 : index
    %68 = vector.load %arg4[%c0_59, %c0_60, %c0_61] : memref<1x64x128xf32, #tpu.memory_space<vmem>>, vector<1x8x128xf32>
    %69 = vector.shape_cast %68 : vector<1x8x128xf32> to vector<8x128xf32>
    %70 = vector.shape_cast %67 : vector<8x128xf32> to vector<1x8x128xf32>
    tpu.vector_store %arg4[%c0_59, %c0_60, %c0_61], %70 {strides = array<i32>} : memref<1x64x128xf32, #tpu.memory_space<vmem>>, vector<1x8x128xf32>,
    %71 = vector.extract_strided_slice %66 {offsets = [10, 0], sizes = [8, 128], strides = [1, 1]} : vector<80x128xf32> to vector<8x128xf32>
    %c0_62 = arith.constant 0 : index
    %c8_63 = arith.constant 8 : index
    %c0_64 = arith.constant 0 : index
    %72 = vector.load %arg4[%c0_62, %c8_63, %c0_64] : memref<1x64x128xf32, #tpu.memory_space<vmem>>, vector<1x8x128xf32>
    %73 = vector.shape_cast %72 : vector<1x8x128xf32> to vector<8x128xf32>
    %74 = vector.shape_cast %71 : vector<8x128xf32> to vector<1x8x128xf32>
    tpu.vector_store %arg4[%c0_62, %c8_63, %c0_64], %74 {strides = array<i32>} : memref<1x64x128xf32, #tpu.memory_space<vmem>>, vector<1x8x128xf32>,
    %75 = vector.extract_strided_slice %66 {offsets = [20, 0], sizes = [8, 128], strides = [1, 1]} : vector<80x128xf32> to vector<8x128xf32>
    %c0_65 = arith.constant 0 : index
    %c16 = arith.constant 16 : index
    %c0_66 = arith.constant 0 : index
    %76 = vector.load %arg4[%c0_65, %c16, %c0_66] : memref<1x64x128xf32, #tpu.memory_space<vmem>>, vector<1x8x128xf32>
    %77 = vector.shape_cast %76 : vector<1x8x128xf32> to vector<8x128xf32>
    %78 = vector.shape_cast %75 : vector<8x128xf32> to vector<1x8x128xf32>
    tpu.vector_store %arg4[%c0_65, %c16, %c0_66], %78 {strides = array<i32>} : memref<1x64x128xf32, #tpu.memory_space<vmem>>, vector<1x8x128xf32>,
    %79 = vector.extract_strided_slice %66 {offsets = [30, 0], sizes = [8, 128], strides = [1, 1]} : vector<80x128xf32> to vector<8x128xf32>
    %c0_67 = arith.constant 0 : index
    %c24 = arith.constant 24 : index
    %c0_68 = arith.constant 0 : index
    %80 = vector.load %arg4[%c0_67, %c24, %c0_68] : memref<1x64x128xf32, #tpu.memory_space<vmem>>, vector<1x8x128xf32>
    %81 = vector.shape_cast %80 : vector<1x8x128xf32> to vector<8x128xf32>
    %82 = vector.shape_cast %79 : vector<8x128xf32> to vector<1x8x128xf32>
    tpu.vector_store %arg4[%c0_67, %c24, %c0_68], %82 {strides = array<i32>} : memref<1x64x128xf32, #tpu.memory_space<vmem>>, vector<1x8x128xf32>,
    %83 = vector.extract_strided_slice %66 {offsets = [40, 0], sizes = [8, 128], strides = [1, 1]} : vector<80x128xf32> to vector<8x128xf32>
    %c0_69 = arith.constant 0 : index
    %c32 = arith.constant 32 : index
    %c0_70 = arith.constant 0 : index
    %84 = vector.load %arg4[%c0_69, %c32, %c0_70] : memref<1x64x128xf32, #tpu.memory_space<vmem>>, vector<1x8x128xf32>
    %85 = vector.shape_cast %84 : vector<1x8x128xf32> to vector<8x128xf32>
    %86 = vector.shape_cast %83 : vector<8x128xf32> to vector<1x8x128xf32>
    tpu.vector_store %arg4[%c0_69, %c32, %c0_70], %86 {strides = array<i32>} : memref<1x64x128xf32, #tpu.memory_space<vmem>>, vector<1x8x128xf32>,
    %87 = vector.extract_strided_slice %66 {offsets = [50, 0], sizes = [8, 128], strides = [1, 1]} : vector<80x128xf32> to vector<8x128xf32>
    %c0_71 = arith.constant 0 : index
    %c40 = arith.constant 40 : index
    %c0_72 = arith.constant 0 : index
    %88 = vector.load %arg4[%c0_71, %c40, %c0_72] : memref<1x64x128xf32, #tpu.memory_space<vmem>>, vector<1x8x128xf32>
    %89 = vector.shape_cast %88 : vector<1x8x128xf32> to vector<8x128xf32>
    %90 = vector.shape_cast %87 : vector<8x128xf32> to vector<1x8x128xf32>
    tpu.vector_store %arg4[%c0_71, %c40, %c0_72], %90 {strides = array<i32>} : memref<1x64x128xf32, #tpu.memory_space<vmem>>, vector<1x8x128xf32>,
    %91 = vector.extract_strided_slice %66 {offsets = [60, 0], sizes = [8, 128], strides = [1, 1]} : vector<80x128xf32> to vector<8x128xf32>
    %c0_73 = arith.constant 0 : index
    %c48 = arith.constant 48 : index
    %c0_74 = arith.constant 0 : index
    %92 = vector.load %arg4[%c0_73, %c48, %c0_74] : memref<1x64x128xf32, #tpu.memory_space<vmem>>, vector<1x8x128xf32>
    %93 = vector.shape_cast %92 : vector<1x8x128xf32> to vector<8x128xf32>
    %94 = vector.shape_cast %91 : vector<8x128xf32> to vector<1x8x128xf32>
    tpu.vector_store %arg4[%c0_73, %c48, %c0_74], %94 {strides = array<i32>} : memref<1x64x128xf32, #tpu.memory_space<vmem>>, vector<1x8x128xf32>,
    %95 = vector.extract_strided_slice %66 {offsets = [70, 0], sizes = [8, 128], strides = [1, 1]} : vector<80x128xf32> to vector<8x128xf32>
    %c0_75 = arith.constant 0 : index
    %c56 = arith.constant 56 : index
    %c0_76 = arith.constant 0 : index
    %96 = vector.load %arg4[%c0_75, %c56, %c0_76] : memref<1x64x128xf32, #tpu.memory_space<vmem>>, vector<1x8x128xf32>
    %97 = vector.shape_cast %96 : vector<1x8x128xf32> to vector<8x128xf32>
    %98 = vector.shape_cast %95 : vector<8x128xf32> to vector<1x8x128xf32>
    tpu.vector_store %arg4[%c0_75, %c56, %c0_76], %98 {strides = array<i32>} : memref<1x64x128xf32, #tpu.memory_space<vmem>>, vector<1x8x128xf32>,
    return
  }
  func.func @transform_0(%arg0: i32) -> (i32, i32, i32, i32) {
    %c0_i32 = arith.constant 0 : i32
    %c0_i32_0 = arith.constant 0 : i32
    %c0_i32_1 = arith.constant 0 : i32
    %c0_i32_2 = arith.constant 0 : i32
    return %arg0, %c0_i32, %c0_i32_0, %c0_i32_1 : i32, i32, i32, i32
  }
  func.func @transform_1(%arg0: i32) -> (i32, i32, i32) {
    %c0_i32 = arith.constant 0 : i32
    %c0_i32_0 = arith.constant 0 : i32
    %c0_i32_1 = arith.constant 0 : i32
    %c0_i32_2 = arith.constant 0 : i32
    return %c0_i32, %c0_i32_0, %c0_i32_1 : i32, i32, i32
  }
  func.func @transform_2(%arg0: i32) -> (i32, i32) {
    %c0_i32 = arith.constant 0 : i32
    %c0_i32_0 = arith.constant 0 : i32
    %c0_i32_1 = arith.constant 0 : i32
    return %c0_i32, %c0_i32_0 : i32, i32
  }
  func.func @transform_3(%arg0: i32) -> (i32, i32, i32) {
    %c0_i32 = arith.constant 0 : i32
    %c0_i32_0 = arith.constant 0 : i32
    %c0_i32_1 = arith.constant 0 : i32
    return %arg0, %c0_i32, %c0_i32_0 : i32, i32, i32
  }
}

module attributes {stable_mosaic.version = 11 : i64} {
  func.func @_conv_kernel(%arg0: i32, %arg1: memref<1x4x30x128xf32, #tpu.memory_space<vmem>>, %arg2: memref<9x128x128xbf16, #tpu.memory_space<vmem>>, %arg3: memref<1x128xf32, #tpu.memory_space<vmem>>, %arg4: memref<1x16x128xf32, #tpu.memory_space<vmem>>) attributes {dimension_semantics = [#tpu.dimension_semantics<parallel>], iteration_bounds = array<i64: 2>, scalar_prefetch = 0 : i64, scratch_operands = 0 : i64, tpu.core_type = #tpu.core_type<tc>, window_params = [{transform_indices = @transform_0, window_bounds = array<i64: 1, 4, 30, 128>}, {pipeline_mode = #tpu.pipeline_mode<synchronous>, transform_indices = @transform_1, window_bounds = array<i64: 9, 128, 128>}, {pipeline_mode = #tpu.pipeline_mode<synchronous>, transform_indices = @transform_2, window_bounds = array<i64: 1, 128>}, {transform_indices = @transform_3, window_bounds = array<i64: 1, 16, 128>}]} {
    %cst = arith.constant 0.000000e+00 : f32
    %0 = vector.broadcast %cst : f32 to vector<20x128xf32>
    %c0 = arith.constant 0 : index
    %c0_0 = arith.constant 0 : index
    %c0_1 = arith.constant 0 : index
    %c0_2 = arith.constant 0 : index
    %1 = vector.load %arg1[%c0, %c0_0, %c0_1, %c0_2] : memref<1x4x30x128xf32, #tpu.memory_space<vmem>>, vector<1x1x20x128xf32>
    %2 = vector.shape_cast %1 : vector<1x1x20x128xf32> to vector<20x128xf32>
    %3 = arith.truncf %2 : vector<20x128xf32> to vector<20x128xbf16>
    %c0_3 = arith.constant 0 : index
    %c0_4 = arith.constant 0 : index
    %c0_5 = arith.constant 0 : index
    %4 = vector.load %arg2[%c0_3, %c0_4, %c0_5] : memref<9x128x128xbf16, #tpu.memory_space<vmem>>, vector<1x128x128xbf16>
    %5 = vector.shape_cast %4 : vector<1x128x128xbf16> to vector<128x128xbf16>
    %cst_6 = arith.constant dense<0.000000e+00> : vector<20x128xf32>
    %6 = tpu.matmul %3, %5, %cst_6 {dimension_numbers = #tpu.dot_dimension_numbers<[1], [0], [0], [1], [0, 0, 1, 1], [], []>} : vector<20x128xbf16>, vector<128x128xbf16>, vector<20x128xf32> -> vector<20x128xf32>
    %7 = arith.addf %0, %6 : vector<20x128xf32>
    %c0_7 = arith.constant 0 : index
    %c1 = arith.constant 1 : index
    %c0_8 = arith.constant 0 : index
    %c0_9 = arith.constant 0 : index
    %8 = vector.load %arg1[%c0_7, %c1, %c0_8, %c0_9] : memref<1x4x30x128xf32, #tpu.memory_space<vmem>>, vector<1x1x20x128xf32>
    %9 = vector.shape_cast %8 : vector<1x1x20x128xf32> to vector<20x128xf32>
    %10 = arith.truncf %9 : vector<20x128xf32> to vector<20x128xbf16>
    %c1_10 = arith.constant 1 : index
    %c0_11 = arith.constant 0 : index
    %c0_12 = arith.constant 0 : index
    %11 = vector.load %arg2[%c1_10, %c0_11, %c0_12] : memref<9x128x128xbf16, #tpu.memory_space<vmem>>, vector<1x128x128xbf16>
    %12 = vector.shape_cast %11 : vector<1x128x128xbf16> to vector<128x128xbf16>
    %cst_13 = arith.constant dense<0.000000e+00> : vector<20x128xf32>
    %13 = tpu.matmul %10, %12, %cst_13 {dimension_numbers = #tpu.dot_dimension_numbers<[1], [0], [0], [1], [0, 0, 1, 1], [], []>} : vector<20x128xbf16>, vector<128x128xbf16>, vector<20x128xf32> -> vector<20x128xf32>
    %14 = arith.addf %7, %13 : vector<20x128xf32>
    %c0_14 = arith.constant 0 : index
    %c0_15 = arith.constant 0 : index
    %c1_16 = arith.constant 1 : index
    %c0_17 = arith.constant 0 : index
    %15 = vector.load %arg1[%c0_14, %c0_15, %c1_16, %c0_17] : memref<1x4x30x128xf32, #tpu.memory_space<vmem>>, vector<1x1x20x128xf32>
    %16 = vector.shape_cast %15 : vector<1x1x20x128xf32> to vector<20x128xf32>
    %17 = arith.truncf %16 : vector<20x128xf32> to vector<20x128xbf16>
    %c2 = arith.constant 2 : index
    %c0_18 = arith.constant 0 : index
    %c0_19 = arith.constant 0 : index
    %18 = vector.load %arg2[%c2, %c0_18, %c0_19] : memref<9x128x128xbf16, #tpu.memory_space<vmem>>, vector<1x128x128xbf16>
    %19 = vector.shape_cast %18 : vector<1x128x128xbf16> to vector<128x128xbf16>
    %cst_20 = arith.constant dense<0.000000e+00> : vector<20x128xf32>
    %20 = tpu.matmul %17, %19, %cst_20 {dimension_numbers = #tpu.dot_dimension_numbers<[1], [0], [0], [1], [0, 0, 1, 1], [], []>} : vector<20x128xbf16>, vector<128x128xbf16>, vector<20x128xf32> -> vector<20x128xf32>
    %21 = arith.addf %14, %20 : vector<20x128xf32>
    %c0_21 = arith.constant 0 : index
    %c2_22 = arith.constant 2 : index
    %c0_23 = arith.constant 0 : index
    %c0_24 = arith.constant 0 : index
    %22 = vector.load %arg1[%c0_21, %c2_22, %c0_23, %c0_24] : memref<1x4x30x128xf32, #tpu.memory_space<vmem>>, vector<1x1x20x128xf32>
    %23 = vector.shape_cast %22 : vector<1x1x20x128xf32> to vector<20x128xf32>
    %24 = arith.truncf %23 : vector<20x128xf32> to vector<20x128xbf16>
    %c3 = arith.constant 3 : index
    %c0_25 = arith.constant 0 : index
    %c0_26 = arith.constant 0 : index
    %25 = vector.load %arg2[%c3, %c0_25, %c0_26] : memref<9x128x128xbf16, #tpu.memory_space<vmem>>, vector<1x128x128xbf16>
    %26 = vector.shape_cast %25 : vector<1x128x128xbf16> to vector<128x128xbf16>
    %cst_27 = arith.constant dense<0.000000e+00> : vector<20x128xf32>
    %27 = tpu.matmul %24, %26, %cst_27 {dimension_numbers = #tpu.dot_dimension_numbers<[1], [0], [0], [1], [0, 0, 1, 1], [], []>} : vector<20x128xbf16>, vector<128x128xbf16>, vector<20x128xf32> -> vector<20x128xf32>
    %28 = arith.addf %21, %27 : vector<20x128xf32>
    %c0_28 = arith.constant 0 : index
    %c3_29 = arith.constant 3 : index
    %c0_30 = arith.constant 0 : index
    %c0_31 = arith.constant 0 : index
    %29 = vector.load %arg1[%c0_28, %c3_29, %c0_30, %c0_31] : memref<1x4x30x128xf32, #tpu.memory_space<vmem>>, vector<1x1x20x128xf32>
    %30 = vector.shape_cast %29 : vector<1x1x20x128xf32> to vector<20x128xf32>
    %31 = arith.truncf %30 : vector<20x128xf32> to vector<20x128xbf16>
    %c4 = arith.constant 4 : index
    %c0_32 = arith.constant 0 : index
    %c0_33 = arith.constant 0 : index
    %32 = vector.load %arg2[%c4, %c0_32, %c0_33] : memref<9x128x128xbf16, #tpu.memory_space<vmem>>, vector<1x128x128xbf16>
    %33 = vector.shape_cast %32 : vector<1x128x128xbf16> to vector<128x128xbf16>
    %cst_34 = arith.constant dense<0.000000e+00> : vector<20x128xf32>
    %34 = tpu.matmul %31, %33, %cst_34 {dimension_numbers = #tpu.dot_dimension_numbers<[1], [0], [0], [1], [0, 0, 1, 1], [], []>} : vector<20x128xbf16>, vector<128x128xbf16>, vector<20x128xf32> -> vector<20x128xf32>
    %35 = arith.addf %28, %34 : vector<20x128xf32>
    %c0_35 = arith.constant 0 : index
    %c2_36 = arith.constant 2 : index
    %c1_37 = arith.constant 1 : index
    %c0_38 = arith.constant 0 : index
    %36 = vector.load %arg1[%c0_35, %c2_36, %c1_37, %c0_38] : memref<1x4x30x128xf32, #tpu.memory_space<vmem>>, vector<1x1x20x128xf32>
    %37 = vector.shape_cast %36 : vector<1x1x20x128xf32> to vector<20x128xf32>
    %38 = arith.truncf %37 : vector<20x128xf32> to vector<20x128xbf16>
    %c5 = arith.constant 5 : index
    %c0_39 = arith.constant 0 : index
    %c0_40 = arith.constant 0 : index
    %39 = vector.load %arg2[%c5, %c0_39, %c0_40] : memref<9x128x128xbf16, #tpu.memory_space<vmem>>, vector<1x128x128xbf16>
    %40 = vector.shape_cast %39 : vector<1x128x128xbf16> to vector<128x128xbf16>
    %cst_41 = arith.constant dense<0.000000e+00> : vector<20x128xf32>
    %41 = tpu.matmul %38, %40, %cst_41 {dimension_numbers = #tpu.dot_dimension_numbers<[1], [0], [0], [1], [0, 0, 1, 1], [], []>} : vector<20x128xbf16>, vector<128x128xbf16>, vector<20x128xf32> -> vector<20x128xf32>
    %42 = arith.addf %35, %41 : vector<20x128xf32>
    %c0_42 = arith.constant 0 : index
    %c0_43 = arith.constant 0 : index
    %c5_44 = arith.constant 5 : index
    %c0_45 = arith.constant 0 : index
    %43 = vector.load %arg1[%c0_42, %c0_43, %c5_44, %c0_45] : memref<1x4x30x128xf32, #tpu.memory_space<vmem>>, vector<1x1x20x128xf32>
    %44 = vector.shape_cast %43 : vector<1x1x20x128xf32> to vector<20x128xf32>
    %45 = arith.truncf %44 : vector<20x128xf32> to vector<20x128xbf16>
    %c6 = arith.constant 6 : index
    %c0_46 = arith.constant 0 : index
    %c0_47 = arith.constant 0 : index
    %46 = vector.load %arg2[%c6, %c0_46, %c0_47] : memref<9x128x128xbf16, #tpu.memory_space<vmem>>, vector<1x128x128xbf16>
    %47 = vector.shape_cast %46 : vector<1x128x128xbf16> to vector<128x128xbf16>
    %cst_48 = arith.constant dense<0.000000e+00> : vector<20x128xf32>
    %48 = tpu.matmul %45, %47, %cst_48 {dimension_numbers = #tpu.dot_dimension_numbers<[1], [0], [0], [1], [0, 0, 1, 1], [], []>} : vector<20x128xbf16>, vector<128x128xbf16>, vector<20x128xf32> -> vector<20x128xf32>
    %49 = arith.addf %42, %48 : vector<20x128xf32>
    %c0_49 = arith.constant 0 : index
    %c1_50 = arith.constant 1 : index
    %c5_51 = arith.constant 5 : index
    %c0_52 = arith.constant 0 : index
    %50 = vector.load %arg1[%c0_49, %c1_50, %c5_51, %c0_52] : memref<1x4x30x128xf32, #tpu.memory_space<vmem>>, vector<1x1x20x128xf32>
    %51 = vector.shape_cast %50 : vector<1x1x20x128xf32> to vector<20x128xf32>
    %52 = arith.truncf %51 : vector<20x128xf32> to vector<20x128xbf16>
    %c7 = arith.constant 7 : index
    %c0_53 = arith.constant 0 : index
    %c0_54 = arith.constant 0 : index
    %53 = vector.load %arg2[%c7, %c0_53, %c0_54] : memref<9x128x128xbf16, #tpu.memory_space<vmem>>, vector<1x128x128xbf16>
    %54 = vector.shape_cast %53 : vector<1x128x128xbf16> to vector<128x128xbf16>
    %cst_55 = arith.constant dense<0.000000e+00> : vector<20x128xf32>
    %55 = tpu.matmul %52, %54, %cst_55 {dimension_numbers = #tpu.dot_dimension_numbers<[1], [0], [0], [1], [0, 0, 1, 1], [], []>} : vector<20x128xbf16>, vector<128x128xbf16>, vector<20x128xf32> -> vector<20x128xf32>
    %56 = arith.addf %49, %55 : vector<20x128xf32>
    %c0_56 = arith.constant 0 : index
    %c0_57 = arith.constant 0 : index
    %c6_58 = arith.constant 6 : index
    %c0_59 = arith.constant 0 : index
    %57 = vector.load %arg1[%c0_56, %c0_57, %c6_58, %c0_59] : memref<1x4x30x128xf32, #tpu.memory_space<vmem>>, vector<1x1x20x128xf32>
    %58 = vector.shape_cast %57 : vector<1x1x20x128xf32> to vector<20x128xf32>
    %59 = arith.truncf %58 : vector<20x128xf32> to vector<20x128xbf16>
    %c8 = arith.constant 8 : index
    %c0_60 = arith.constant 0 : index
    %c0_61 = arith.constant 0 : index
    %60 = vector.load %arg2[%c8, %c0_60, %c0_61] : memref<9x128x128xbf16, #tpu.memory_space<vmem>>, vector<1x128x128xbf16>
    %61 = vector.shape_cast %60 : vector<1x128x128xbf16> to vector<128x128xbf16>
    %cst_62 = arith.constant dense<0.000000e+00> : vector<20x128xf32>
    %62 = tpu.matmul %59, %61, %cst_62 {dimension_numbers = #tpu.dot_dimension_numbers<[1], [0], [0], [1], [0, 0, 1, 1], [], []>} : vector<20x128xbf16>, vector<128x128xbf16>, vector<20x128xf32> -> vector<20x128xf32>
    %63 = arith.addf %56, %62 : vector<20x128xf32>
    %c0_63 = arith.constant 0 : index
    %c0_64 = arith.constant 0 : index
    %64 = vector.load %arg3[%c0_63, %c0_64] : memref<1x128xf32, #tpu.memory_space<vmem>>, vector<1x128xf32>
    %65 = vector.broadcast %64 : vector<1x128xf32> to vector<20x128xf32>
    %66 = arith.addf %63, %65 : vector<20x128xf32>
    %67 = vector.extract_strided_slice %66 {offsets = [0, 0], sizes = [4, 128], strides = [1, 1]} : vector<20x128xf32> to vector<4x128xf32>
    %c0_65 = arith.constant 0 : index
    %c0_66 = arith.constant 0 : index
    %c0_67 = arith.constant 0 : index
    %68 = vector.load %arg4[%c0_65, %c0_66, %c0_67] : memref<1x16x128xf32, #tpu.memory_space<vmem>>, vector<1x4x128xf32>
    %69 = vector.shape_cast %68 : vector<1x4x128xf32> to vector<4x128xf32>
    %70 = vector.shape_cast %67 : vector<4x128xf32> to vector<1x4x128xf32>
    tpu.vector_store %arg4[%c0_65, %c0_66, %c0_67], %70 {strides = array<i32>} : memref<1x16x128xf32, #tpu.memory_space<vmem>>, vector<1x4x128xf32>,
    %71 = vector.extract_strided_slice %66 {offsets = [5, 0], sizes = [4, 128], strides = [1, 1]} : vector<20x128xf32> to vector<4x128xf32>
    %c0_68 = arith.constant 0 : index
    %c4_69 = arith.constant 4 : index
    %c0_70 = arith.constant 0 : index
    %72 = vector.load %arg4[%c0_68, %c4_69, %c0_70] : memref<1x16x128xf32, #tpu.memory_space<vmem>>, vector<1x4x128xf32>
    %73 = vector.shape_cast %72 : vector<1x4x128xf32> to vector<4x128xf32>
    %74 = vector.shape_cast %71 : vector<4x128xf32> to vector<1x4x128xf32>
    tpu.vector_store %arg4[%c0_68, %c4_69, %c0_70], %74 {strides = array<i32>} : memref<1x16x128xf32, #tpu.memory_space<vmem>>, vector<1x4x128xf32>,
    %75 = vector.extract_strided_slice %66 {offsets = [10, 0], sizes = [4, 128], strides = [1, 1]} : vector<20x128xf32> to vector<4x128xf32>
    %c0_71 = arith.constant 0 : index
    %c8_72 = arith.constant 8 : index
    %c0_73 = arith.constant 0 : index
    %76 = vector.load %arg4[%c0_71, %c8_72, %c0_73] : memref<1x16x128xf32, #tpu.memory_space<vmem>>, vector<1x4x128xf32>
    %77 = vector.shape_cast %76 : vector<1x4x128xf32> to vector<4x128xf32>
    %78 = vector.shape_cast %75 : vector<4x128xf32> to vector<1x4x128xf32>
    tpu.vector_store %arg4[%c0_71, %c8_72, %c0_73], %78 {strides = array<i32>} : memref<1x16x128xf32, #tpu.memory_space<vmem>>, vector<1x4x128xf32>,
    %79 = vector.extract_strided_slice %66 {offsets = [15, 0], sizes = [4, 128], strides = [1, 1]} : vector<20x128xf32> to vector<4x128xf32>
    %c0_74 = arith.constant 0 : index
    %c12 = arith.constant 12 : index
    %c0_75 = arith.constant 0 : index
    %80 = vector.load %arg4[%c0_74, %c12, %c0_75] : memref<1x16x128xf32, #tpu.memory_space<vmem>>, vector<1x4x128xf32>
    %81 = vector.shape_cast %80 : vector<1x4x128xf32> to vector<4x128xf32>
    %82 = vector.shape_cast %79 : vector<4x128xf32> to vector<1x4x128xf32>
    tpu.vector_store %arg4[%c0_74, %c12, %c0_75], %82 {strides = array<i32>} : memref<1x16x128xf32, #tpu.memory_space<vmem>>, vector<1x4x128xf32>,
    return
  }
  func.func @transform_0(%arg0: i32) -> (i32, i32, i32, i32) {
    %c0_i32 = arith.constant 0 : i32
    %c0_i32_0 = arith.constant 0 : i32
    %c0_i32_1 = arith.constant 0 : i32
    %c0_i32_2 = arith.constant 0 : i32
    return %arg0, %c0_i32, %c0_i32_0, %c0_i32_1 : i32, i32, i32, i32
  }
  func.func @transform_1(%arg0: i32) -> (i32, i32, i32) {
    %c0_i32 = arith.constant 0 : i32
    %c0_i32_0 = arith.constant 0 : i32
    %c0_i32_1 = arith.constant 0 : i32
    %c0_i32_2 = arith.constant 0 : i32
    return %c0_i32, %c0_i32_0, %c0_i32_1 : i32, i32, i32
  }
  func.func @transform_2(%arg0: i32) -> (i32, i32) {
    %c0_i32 = arith.constant 0 : i32
    %c0_i32_0 = arith.constant 0 : i32
    %c0_i32_1 = arith.constant 0 : i32
    return %c0_i32, %c0_i32_0 : i32, i32
  }
  func.func @transform_3(%arg0: i32) -> (i32, i32, i32) {
    %c0_i32 = arith.constant 0 : i32
    %c0_i32_0 = arith.constant 0 : i32
    %c0_i32_1 = arith.constant 0 : i32
    return %arg0, %c0_i32, %c0_i32_0 : i32, i32, i32
  }
}

module attributes {stable_mosaic.version = 11 : i64} {
  func.func @_gn_gelu_group_kernel(%arg0: i32, %arg1: memref<1x16x128xf32, #tpu.memory_space<vmem>>, %arg2: memref<1x128xf32, #tpu.memory_space<vmem>>, %arg3: memref<1x128xf32, #tpu.memory_space<vmem>>, %arg4: memref<128x128xf32, #tpu.memory_space<vmem>>, %arg5: memref<1x16x128xf32, #tpu.memory_space<vmem>>) attributes {dimension_semantics = [#tpu.dimension_semantics<parallel>], iteration_bounds = array<i64: 2>, scalar_prefetch = 0 : i64, scratch_operands = 0 : i64, tpu.core_type = #tpu.core_type<tc>, window_params = [{transform_indices = @transform_0, window_bounds = array<i64: 1, 16, 128>}, {pipeline_mode = #tpu.pipeline_mode<synchronous>, transform_indices = @transform_1, window_bounds = array<i64: 1, 128>}, {pipeline_mode = #tpu.pipeline_mode<synchronous>, transform_indices = @transform_2, window_bounds = array<i64: 1, 128>}, {pipeline_mode = #tpu.pipeline_mode<synchronous>, transform_indices = @transform_3, window_bounds = array<i64: 128, 128>}, {transform_indices = @transform_4, window_bounds = array<i64: 1, 16, 128>}]} {
    %c0 = arith.constant 0 : index
    %c0_0 = arith.constant 0 : index
    %c0_1 = arith.constant 0 : index
    %0 = vector.load %arg1[%c0, %c0_0, %c0_1] : memref<1x16x128xf32, #tpu.memory_space<vmem>>, vector<1x16x128xf32>
    %1 = vector.shape_cast %0 : vector<1x16x128xf32> to vector<16x128xf32>
    %cst = arith.constant dense<0.000000e+00> : vector<128xf32>
    %2 = vector.multi_reduction <add>, %1, %cst [0] : vector<16x128xf32> to vector<128xf32>
    %3 = vector.shape_cast %2 : vector<128xf32> to vector<1x128xf32>
    %c0_2 = arith.constant 0 : index
    %c0_3 = arith.constant 0 : index
    %4 = vector.load %arg4[%c0_2, %c0_3] : memref<128x128xf32, #tpu.memory_space<vmem>>, vector<128x128xf32>
    %cst_4 = arith.constant dense<0.000000e+00> : vector<1x128xf32>
    %5 = tpu.matmul %3, %4, %cst_4 {dimension_numbers = #tpu.dot_dimension_numbers<[1], [0], [0], [1], [0, 0, 1, 1], [], []>} : vector<1x128xf32>, vector<128x128xf32>, vector<1x128xf32> -> vector<1x128xf32>
    %cst_5 = arith.constant 3.125000e-02 : f32
    %6 = vector.broadcast %cst_5 : f32 to vector<1x128xf32>
    %7 = arith.mulf %5, %6 : vector<1x128xf32>
    %8 = vector.broadcast %7 : vector<1x128xf32> to vector<16x128xf32>
    %9 = arith.subf %1, %8 : vector<16x128xf32>
    %10 = arith.mulf %9, %9 : vector<16x128xf32>
    %cst_6 = arith.constant dense<0.000000e+00> : vector<128xf32>
    %11 = vector.multi_reduction <add>, %10, %cst_6 [0] : vector<16x128xf32> to vector<128xf32>
    %12 = vector.shape_cast %11 : vector<128xf32> to vector<1x128xf32>
    %c0_7 = arith.constant 0 : index
    %c0_8 = arith.constant 0 : index
    %13 = vector.load %arg4[%c0_7, %c0_8] : memref<128x128xf32, #tpu.memory_space<vmem>>, vector<128x128xf32>
    %cst_9 = arith.constant dense<0.000000e+00> : vector<1x128xf32>
    %14 = tpu.matmul %12, %13, %cst_9 {dimension_numbers = #tpu.dot_dimension_numbers<[1], [0], [0], [1], [0, 0, 1, 1], [], []>} : vector<1x128xf32>, vector<128x128xf32>, vector<1x128xf32> -> vector<1x128xf32>
    %cst_10 = arith.constant 3.125000e-02 : f32
    %15 = vector.broadcast %cst_10 : f32 to vector<1x128xf32>
    %16 = arith.mulf %14, %15 : vector<1x128xf32>
    %cst_11 = arith.constant 9.99999974E-6 : f32
    %17 = vector.broadcast %cst_11 : f32 to vector<1x128xf32>
    %18 = arith.addf %16, %17 : vector<1x128xf32>
    %19 = math.rsqrt %18 : vector<1x128xf32>
    %20 = vector.broadcast %19 : vector<1x128xf32> to vector<16x128xf32>
    %21 = arith.mulf %9, %20 : vector<16x128xf32>
    %c0_12 = arith.constant 0 : index
    %c0_13 = arith.constant 0 : index
    %22 = vector.load %arg2[%c0_12, %c0_13] : memref<1x128xf32, #tpu.memory_space<vmem>>, vector<1x128xf32>
    %23 = vector.broadcast %22 : vector<1x128xf32> to vector<16x128xf32>
    %24 = arith.mulf %21, %23 : vector<16x128xf32>
    %c0_14 = arith.constant 0 : index
    %c0_15 = arith.constant 0 : index
    %25 = vector.load %arg3[%c0_14, %c0_15] : memref<1x128xf32, #tpu.memory_space<vmem>>, vector<1x128xf32>
    %26 = vector.broadcast %25 : vector<1x128xf32> to vector<16x128xf32>
    %27 = arith.addf %24, %26 : vector<16x128xf32>
    %28 = arith.mulf %27, %27 : vector<16x128xf32>
    %29 = arith.mulf %27, %28 : vector<16x128xf32>
    %cst_16 = arith.constant 4.471500e-02 : f32
    %30 = vector.broadcast %cst_16 : f32 to vector<16x128xf32>
    %31 = arith.mulf %30, %29 : vector<16x128xf32>
    %32 = arith.addf %27, %31 : vector<16x128xf32>
    %cst_17 = arith.constant 0.797884583 : f32
    %33 = vector.broadcast %cst_17 : f32 to vector<16x128xf32>
    %34 = arith.mulf %33, %32 : vector<16x128xf32>
    %35 = math.tanh %34 : vector<16x128xf32>
    %cst_18 = arith.constant 1.000000e+00 : f32
    %36 = vector.broadcast %cst_18 : f32 to vector<16x128xf32>
    %37 = arith.addf %36, %35 : vector<16x128xf32>
    %cst_19 = arith.constant 5.000000e-01 : f32
    %38 = vector.broadcast %cst_19 : f32 to vector<16x128xf32>
    %39 = arith.mulf %38, %37 : vector<16x128xf32>
    %40 = arith.mulf %27, %39 : vector<16x128xf32>
    %c0_20 = arith.constant 0 : index
    %c0_21 = arith.constant 0 : index
    %c0_22 = arith.constant 0 : index
    %41 = vector.load %arg5[%c0_20, %c0_21, %c0_22] : memref<1x16x128xf32, #tpu.memory_space<vmem>>, vector<1x16x128xf32>
    %42 = vector.shape_cast %41 : vector<1x16x128xf32> to vector<16x128xf32>
    %43 = vector.shape_cast %40 : vector<16x128xf32> to vector<1x16x128xf32>
    tpu.vector_store %arg5[%c0_20, %c0_21, %c0_22], %43 {strides = array<i32>} : memref<1x16x128xf32, #tpu.memory_space<vmem>>, vector<1x16x128xf32>,
    return
  }
  func.func @transform_0(%arg0: i32) -> (i32, i32, i32) {
    %c0_i32 = arith.constant 0 : i32
    %c0_i32_0 = arith.constant 0 : i32
    %c0_i32_1 = arith.constant 0 : i32
    return %arg0, %c0_i32, %c0_i32_0 : i32, i32, i32
  }
  func.func @transform_1(%arg0: i32) -> (i32, i32) {
    %c0_i32 = arith.constant 0 : i32
    %c0_i32_0 = arith.constant 0 : i32
    %c0_i32_1 = arith.constant 0 : i32
    return %c0_i32, %c0_i32_0 : i32, i32
  }
  func.func @transform_2(%arg0: i32) -> (i32, i32) {
    %c0_i32 = arith.constant 0 : i32
    %c0_i32_0 = arith.constant 0 : i32
    %c0_i32_1 = arith.constant 0 : i32
    return %c0_i32, %c0_i32_0 : i32, i32
  }
  func.func @transform_3(%arg0: i32) -> (i32, i32) {
    %c0_i32 = arith.constant 0 : i32
    %c0_i32_0 = arith.constant 0 : i32
    %c0_i32_1 = arith.constant 0 : i32
    return %c0_i32, %c0_i32_0 : i32, i32
  }
  func.func @transform_4(%arg0: i32) -> (i32, i32, i32) {
    %c0_i32 = arith.constant 0 : i32
    %c0_i32_0 = arith.constant 0 : i32
    %c0_i32_1 = arith.constant 0 : i32
    return %arg0, %c0_i32, %c0_i32_0 : i32, i32, i32
  }
}

module attributes {stable_mosaic.version = 11 : i64} {
  func.func @_conv_kernel(%arg0: i32, %arg1: memref<1x1x42x128xf32, #tpu.memory_space<vmem>>, %arg2: memref<9x128x128xbf16, #tpu.memory_space<vmem>>, %arg3: memref<1x128xf32, #tpu.memory_space<vmem>>, %arg4: memref<1x16x128xf32, #tpu.memory_space<vmem>>) attributes {dimension_semantics = [#tpu.dimension_semantics<parallel>], iteration_bounds = array<i64: 2>, scalar_prefetch = 0 : i64, scratch_operands = 0 : i64, tpu.core_type = #tpu.core_type<tc>, window_params = [{transform_indices = @transform_0, window_bounds = array<i64: 1, 1, 42, 128>}, {pipeline_mode = #tpu.pipeline_mode<synchronous>, transform_indices = @transform_1, window_bounds = array<i64: 9, 128, 128>}, {pipeline_mode = #tpu.pipeline_mode<synchronous>, transform_indices = @transform_2, window_bounds = array<i64: 1, 128>}, {transform_indices = @transform_3, window_bounds = array<i64: 1, 16, 128>}]} {
    %cst = arith.constant 0.000000e+00 : f32
    %0 = vector.broadcast %cst : f32 to vector<24x128xf32>
    %c0 = arith.constant 0 : index
    %c0_0 = arith.constant 0 : index
    %c0_1 = arith.constant 0 : index
    %c0_2 = arith.constant 0 : index
    %1 = vector.load %arg1[%c0, %c0_0, %c0_1, %c0_2] : memref<1x1x42x128xf32, #tpu.memory_space<vmem>>, vector<1x1x24x128xf32>
    %2 = vector.shape_cast %1 : vector<1x1x24x128xf32> to vector<24x128xf32>
    %3 = arith.truncf %2 : vector<24x128xf32> to vector<24x128xbf16>
    %c0_3 = arith.constant 0 : index
    %c0_4 = arith.constant 0 : index
    %c0_5 = arith.constant 0 : index
    %4 = vector.load %arg2[%c0_3, %c0_4, %c0_5] : memref<9x128x128xbf16, #tpu.memory_space<vmem>>, vector<1x128x128xbf16>
    %5 = vector.shape_cast %4 : vector<1x128x128xbf16> to vector<128x128xbf16>
    %cst_6 = arith.constant dense<0.000000e+00> : vector<24x128xf32>
    %6 = tpu.matmul %3, %5, %cst_6 {dimension_numbers = #tpu.dot_dimension_numbers<[1], [0], [0], [1], [0, 0, 1, 1], [], []>} : vector<24x128xbf16>, vector<128x128xbf16>, vector<24x128xf32> -> vector<24x128xf32>
    %7 = arith.addf %0, %6 : vector<24x128xf32>
    %c0_7 = arith.constant 0 : index
    %c0_8 = arith.constant 0 : index
    %c1 = arith.constant 1 : index
    %c0_9 = arith.constant 0 : index
    %8 = vector.load %arg1[%c0_7, %c0_8, %c1, %c0_9] : memref<1x1x42x128xf32, #tpu.memory_space<vmem>>, vector<1x1x24x128xf32>
    %9 = vector.shape_cast %8 : vector<1x1x24x128xf32> to vector<24x128xf32>
    %10 = arith.truncf %9 : vector<24x128xf32> to vector<24x128xbf16>
    %c1_10 = arith.constant 1 : index
    %c0_11 = arith.constant 0 : index
    %c0_12 = arith.constant 0 : index
    %11 = vector.load %arg2[%c1_10, %c0_11, %c0_12] : memref<9x128x128xbf16, #tpu.memory_space<vmem>>, vector<1x128x128xbf16>
    %12 = vector.shape_cast %11 : vector<1x128x128xbf16> to vector<128x128xbf16>
    %cst_13 = arith.constant dense<0.000000e+00> : vector<24x128xf32>
    %13 = tpu.matmul %10, %12, %cst_13 {dimension_numbers = #tpu.dot_dimension_numbers<[1], [0], [0], [1], [0, 0, 1, 1], [], []>} : vector<24x128xbf16>, vector<128x128xbf16>, vector<24x128xf32> -> vector<24x128xf32>
    %14 = arith.addf %7, %13 : vector<24x128xf32>
    %c0_14 = arith.constant 0 : index
    %c0_15 = arith.constant 0 : index
    %c2 = arith.constant 2 : index
    %c0_16 = arith.constant 0 : index
    %15 = vector.load %arg1[%c0_14, %c0_15, %c2, %c0_16] : memref<1x1x42x128xf32, #tpu.memory_space<vmem>>, vector<1x1x24x128xf32>
    %16 = vector.shape_cast %15 : vector<1x1x24x128xf32> to vector<24x128xf32>
    %17 = arith.truncf %16 : vector<24x128xf32> to vector<24x128xbf16>
    %c2_17 = arith.constant 2 : index
    %c0_18 = arith.constant 0 : index
    %c0_19 = arith.constant 0 : index
    %18 = vector.load %arg2[%c2_17, %c0_18, %c0_19] : memref<9x128x128xbf16, #tpu.memory_space<vmem>>, vector<1x128x128xbf16>
    %19 = vector.shape_cast %18 : vector<1x128x128xbf16> to vector<128x128xbf16>
    %cst_20 = arith.constant dense<0.000000e+00> : vector<24x128xf32>
    %20 = tpu.matmul %17, %19, %cst_20 {dimension_numbers = #tpu.dot_dimension_numbers<[1], [0], [0], [1], [0, 0, 1, 1], [], []>} : vector<24x128xbf16>, vector<128x128xbf16>, vector<24x128xf32> -> vector<24x128xf32>
    %21 = arith.addf %14, %20 : vector<24x128xf32>
    %c0_21 = arith.constant 0 : index
    %c0_22 = arith.constant 0 : index
    %c6 = arith.constant 6 : index
    %c0_23 = arith.constant 0 : index
    %22 = vector.load %arg1[%c0_21, %c0_22, %c6, %c0_23] : memref<1x1x42x128xf32, #tpu.memory_space<vmem>>, vector<1x1x24x128xf32>
    %23 = vector.shape_cast %22 : vector<1x1x24x128xf32> to vector<24x128xf32>
    %24 = arith.truncf %23 : vector<24x128xf32> to vector<24x128xbf16>
    %c3 = arith.constant 3 : index
    %c0_24 = arith.constant 0 : index
    %c0_25 = arith.constant 0 : index
    %25 = vector.load %arg2[%c3, %c0_24, %c0_25] : memref<9x128x128xbf16, #tpu.memory_space<vmem>>, vector<1x128x128xbf16>
    %26 = vector.shape_cast %25 : vector<1x128x128xbf16> to vector<128x128xbf16>
    %cst_26 = arith.constant dense<0.000000e+00> : vector<24x128xf32>
    %27 = tpu.matmul %24, %26, %cst_26 {dimension_numbers = #tpu.dot_dimension_numbers<[1], [0], [0], [1], [0, 0, 1, 1], [], []>} : vector<24x128xbf16>, vector<128x128xbf16>, vector<24x128xf32> -> vector<24x128xf32>
    %28 = arith.addf %21, %27 : vector<24x128xf32>
    %c0_27 = arith.constant 0 : index
    %c0_28 = arith.constant 0 : index
    %c7 = arith.constant 7 : index
    %c0_29 = arith.constant 0 : index
    %29 = vector.load %arg1[%c0_27, %c0_28, %c7, %c0_29] : memref<1x1x42x128xf32, #tpu.memory_space<vmem>>, vector<1x1x24x128xf32>
    %30 = vector.shape_cast %29 : vector<1x1x24x128xf32> to vector<24x128xf32>
    %31 = arith.truncf %30 : vector<24x128xf32> to vector<24x128xbf16>
    %c4 = arith.constant 4 : index
    %c0_30 = arith.constant 0 : index
    %c0_31 = arith.constant 0 : index
    %32 = vector.load %arg2[%c4, %c0_30, %c0_31] : memref<9x128x128xbf16, #tpu.memory_space<vmem>>, vector<1x128x128xbf16>
    %33 = vector.shape_cast %32 : vector<1x128x128xbf16> to vector<128x128xbf16>
    %cst_32 = arith.constant dense<0.000000e+00> : vector<24x128xf32>
    %34 = tpu.matmul %31, %33, %cst_32 {dimension_numbers = #tpu.dot_dimension_numbers<[1], [0], [0], [1], [0, 0, 1, 1], [], []>} : vector<24x128xbf16>, vector<128x128xbf16>, vector<24x128xf32> -> vector<24x128xf32>
    %35 = arith.addf %28, %34 : vector<24x128xf32>
    %c0_33 = arith.constant 0 : index
    %c0_34 = arith.constant 0 : index
    %c8 = arith.constant 8 : index
    %c0_35 = arith.constant 0 : index
    %36 = vector.load %arg1[%c0_33, %c0_34, %c8, %c0_35] : memref<1x1x42x128xf32, #tpu.memory_space<vmem>>, vector<1x1x24x128xf32>
    %37 = vector.shape_cast %36 : vector<1x1x24x128xf32> to vector<24x128xf32>
    %38 = arith.truncf %37 : vector<24x128xf32> to vector<24x128xbf16>
    %c5 = arith.constant 5 : index
    %c0_36 = arith.constant 0 : index
    %c0_37 = arith.constant 0 : index
    %39 = vector.load %arg2[%c5, %c0_36, %c0_37] : memref<9x128x128xbf16, #tpu.memory_space<vmem>>, vector<1x128x128xbf16>
    %40 = vector.shape_cast %39 : vector<1x128x128xbf16> to vector<128x128xbf16>
    %cst_38 = arith.constant dense<0.000000e+00> : vector<24x128xf32>
    %41 = tpu.matmul %38, %40, %cst_38 {dimension_numbers = #tpu.dot_dimension_numbers<[1], [0], [0], [1], [0, 0, 1, 1], [], []>} : vector<24x128xbf16>, vector<128x128xbf16>, vector<24x128xf32> -> vector<24x128xf32>
    %42 = arith.addf %35, %41 : vector<24x128xf32>
    %c0_39 = arith.constant 0 : index
    %c0_40 = arith.constant 0 : index
    %c12 = arith.constant 12 : index
    %c0_41 = arith.constant 0 : index
    %43 = vector.load %arg1[%c0_39, %c0_40, %c12, %c0_41] : memref<1x1x42x128xf32, #tpu.memory_space<vmem>>, vector<1x1x24x128xf32>
    %44 = vector.shape_cast %43 : vector<1x1x24x128xf32> to vector<24x128xf32>
    %45 = arith.truncf %44 : vector<24x128xf32> to vector<24x128xbf16>
    %c6_42 = arith.constant 6 : index
    %c0_43 = arith.constant 0 : index
    %c0_44 = arith.constant 0 : index
    %46 = vector.load %arg2[%c6_42, %c0_43, %c0_44] : memref<9x128x128xbf16, #tpu.memory_space<vmem>>, vector<1x128x128xbf16>
    %47 = vector.shape_cast %46 : vector<1x128x128xbf16> to vector<128x128xbf16>
    %cst_45 = arith.constant dense<0.000000e+00> : vector<24x128xf32>
    %48 = tpu.matmul %45, %47, %cst_45 {dimension_numbers = #tpu.dot_dimension_numbers<[1], [0], [0], [1], [0, 0, 1, 1], [], []>} : vector<24x128xbf16>, vector<128x128xbf16>, vector<24x128xf32> -> vector<24x128xf32>
    %49 = arith.addf %42, %48 : vector<24x128xf32>
    %c0_46 = arith.constant 0 : index
    %c0_47 = arith.constant 0 : index
    %c13 = arith.constant 13 : index
    %c0_48 = arith.constant 0 : index
    %50 = vector.load %arg1[%c0_46, %c0_47, %c13, %c0_48] : memref<1x1x42x128xf32, #tpu.memory_space<vmem>>, vector<1x1x24x128xf32>
    %51 = vector.shape_cast %50 : vector<1x1x24x128xf32> to vector<24x128xf32>
    %52 = arith.truncf %51 : vector<24x128xf32> to vector<24x128xbf16>
    %c7_49 = arith.constant 7 : index
    %c0_50 = arith.constant 0 : index
    %c0_51 = arith.constant 0 : index
    %53 = vector.load %arg2[%c7_49, %c0_50, %c0_51] : memref<9x128x128xbf16, #tpu.memory_space<vmem>>, vector<1x128x128xbf16>
    %54 = vector.shape_cast %53 : vector<1x128x128xbf16> to vector<128x128xbf16>
    %cst_52 = arith.constant dense<0.000000e+00> : vector<24x128xf32>
    %55 = tpu.matmul %52, %54, %cst_52 {dimension_numbers = #tpu.dot_dimension_numbers<[1], [0], [0], [1], [0, 0, 1, 1], [], []>} : vector<24x128xbf16>, vector<128x128xbf16>, vector<24x128xf32> -> vector<24x128xf32>
    %56 = arith.addf %49, %55 : vector<24x128xf32>
    %c0_53 = arith.constant 0 : index
    %c0_54 = arith.constant 0 : index
    %c14 = arith.constant 14 : index
    %c0_55 = arith.constant 0 : index
    %57 = vector.load %arg1[%c0_53, %c0_54, %c14, %c0_55] : memref<1x1x42x128xf32, #tpu.memory_space<vmem>>, vector<1x1x24x128xf32>
    %58 = vector.shape_cast %57 : vector<1x1x24x128xf32> to vector<24x128xf32>
    %59 = arith.truncf %58 : vector<24x128xf32> to vector<24x128xbf16>
    %c8_56 = arith.constant 8 : index
    %c0_57 = arith.constant 0 : index
    %c0_58 = arith.constant 0 : index
    %60 = vector.load %arg2[%c8_56, %c0_57, %c0_58] : memref<9x128x128xbf16, #tpu.memory_space<vmem>>, vector<1x128x128xbf16>
    %61 = vector.shape_cast %60 : vector<1x128x128xbf16> to vector<128x128xbf16>
    %cst_59 = arith.constant dense<0.000000e+00> : vector<24x128xf32>
    %62 = tpu.matmul %59, %61, %cst_59 {dimension_numbers = #tpu.dot_dimension_numbers<[1], [0], [0], [1], [0, 0, 1, 1], [], []>} : vector<24x128xbf16>, vector<128x128xbf16>, vector<24x128xf32> -> vector<24x128xf32>
    %63 = arith.addf %56, %62 : vector<24x128xf32>
    %c0_60 = arith.constant 0 : index
    %c0_61 = arith.constant 0 : index
    %64 = vector.load %arg3[%c0_60, %c0_61] : memref<1x128xf32, #tpu.memory_space<vmem>>, vector<1x128xf32>
    %65 = vector.broadcast %64 : vector<1x128xf32> to vector<24x128xf32>
    %66 = arith.addf %63, %65 : vector<24x128xf32>
    %67 = vector.extract_strided_slice %66 {offsets = [0, 0], sizes = [4, 128], strides = [1, 1]} : vector<24x128xf32> to vector<4x128xf32>
    %c0_62 = arith.constant 0 : index
    %c0_63 = arith.constant 0 : index
    %c0_64 = arith.constant 0 : index
    %68 = vector.load %arg4[%c0_62, %c0_63, %c0_64] : memref<1x16x128xf32, #tpu.memory_space<vmem>>, vector<1x4x128xf32>
    %69 = vector.shape_cast %68 : vector<1x4x128xf32> to vector<4x128xf32>
    %70 = vector.shape_cast %67 : vector<4x128xf32> to vector<1x4x128xf32>
    tpu.vector_store %arg4[%c0_62, %c0_63, %c0_64], %70 {strides = array<i32>} : memref<1x16x128xf32, #tpu.memory_space<vmem>>, vector<1x4x128xf32>,
    %71 = vector.extract_strided_slice %66 {offsets = [6, 0], sizes = [4, 128], strides = [1, 1]} : vector<24x128xf32> to vector<4x128xf32>
    %c0_65 = arith.constant 0 : index
    %c4_66 = arith.constant 4 : index
    %c0_67 = arith.constant 0 : index
    %72 = vector.load %arg4[%c0_65, %c4_66, %c0_67] : memref<1x16x128xf32, #tpu.memory_space<vmem>>, vector<1x4x128xf32>
    %73 = vector.shape_cast %72 : vector<1x4x128xf32> to vector<4x128xf32>
    %74 = vector.shape_cast %71 : vector<4x128xf32> to vector<1x4x128xf32>
    tpu.vector_store %arg4[%c0_65, %c4_66, %c0_67], %74 {strides = array<i32>} : memref<1x16x128xf32, #tpu.memory_space<vmem>>, vector<1x4x128xf32>,
    %75 = vector.extract_strided_slice %66 {offsets = [12, 0], sizes = [4, 128], strides = [1, 1]} : vector<24x128xf32> to vector<4x128xf32>
    %c0_68 = arith.constant 0 : index
    %c8_69 = arith.constant 8 : index
    %c0_70 = arith.constant 0 : index
    %76 = vector.load %arg4[%c0_68, %c8_69, %c0_70] : memref<1x16x128xf32, #tpu.memory_space<vmem>>, vector<1x4x128xf32>
    %77 = vector.shape_cast %76 : vector<1x4x128xf32> to vector<4x128xf32>
    %78 = vector.shape_cast %75 : vector<4x128xf32> to vector<1x4x128xf32>
    tpu.vector_store %arg4[%c0_68, %c8_69, %c0_70], %78 {strides = array<i32>} : memref<1x16x128xf32, #tpu.memory_space<vmem>>, vector<1x4x128xf32>,
    %79 = vector.extract_strided_slice %66 {offsets = [18, 0], sizes = [4, 128], strides = [1, 1]} : vector<24x128xf32> to vector<4x128xf32>
    %c0_71 = arith.constant 0 : index
    %c12_72 = arith.constant 12 : index
    %c0_73 = arith.constant 0 : index
    %80 = vector.load %arg4[%c0_71, %c12_72, %c0_73] : memref<1x16x128xf32, #tpu.memory_space<vmem>>, vector<1x4x128xf32>
    %81 = vector.shape_cast %80 : vector<1x4x128xf32> to vector<4x128xf32>
    %82 = vector.shape_cast %79 : vector<4x128xf32> to vector<1x4x128xf32>
    tpu.vector_store %arg4[%c0_71, %c12_72, %c0_73], %82 {strides = array<i32>} : memref<1x16x128xf32, #tpu.memory_space<vmem>>, vector<1x4x128xf32>,
    return
  }
  func.func @transform_0(%arg0: i32) -> (i32, i32, i32, i32) {
    %c0_i32 = arith.constant 0 : i32
    %c0_i32_0 = arith.constant 0 : i32
    %c0_i32_1 = arith.constant 0 : i32
    %c0_i32_2 = arith.constant 0 : i32
    return %arg0, %c0_i32, %c0_i32_0, %c0_i32_1 : i32, i32, i32, i32
  }
  func.func @transform_1(%arg0: i32) -> (i32, i32, i32) {
    %c0_i32 = arith.constant 0 : i32
    %c0_i32_0 = arith.constant 0 : i32
    %c0_i32_1 = arith.constant 0 : i32
    %c0_i32_2 = arith.constant 0 : i32
    return %c0_i32, %c0_i32_0, %c0_i32_1 : i32, i32, i32
  }
  func.func @transform_2(%arg0: i32) -> (i32, i32) {
    %c0_i32 = arith.constant 0 : i32
    %c0_i32_0 = arith.constant 0 : i32
    %c0_i32_1 = arith.constant 0 : i32
    return %c0_i32, %c0_i32_0 : i32, i32
  }
  func.func @transform_3(%arg0: i32) -> (i32, i32, i32) {
    %c0_i32 = arith.constant 0 : i32
    %c0_i32_0 = arith.constant 0 : i32
    %c0_i32_1 = arith.constant 0 : i32
    return %arg0, %c0_i32, %c0_i32_0 : i32, i32, i32
  }
}

module attributes {stable_mosaic.version = 11 : i64} {
  func.func @_lateral_kernel(%arg0: i32, %arg1: memref<1x4x16x128xf32, #tpu.memory_space<vmem>>, %arg2: memref<128x128xbf16, #tpu.memory_space<vmem>>, %arg3: memref<1x128xf32, #tpu.memory_space<vmem>>, %arg4: memref<1x16x128xf32, #tpu.memory_space<vmem>>) attributes {dimension_semantics = [#tpu.dimension_semantics<parallel>], iteration_bounds = array<i64: 2>, scalar_prefetch = 0 : i64, scratch_operands = 0 : i64, tpu.core_type = #tpu.core_type<tc>, window_params = [{transform_indices = @transform_0, window_bounds = array<i64: 1, 4, 16, 128>}, {pipeline_mode = #tpu.pipeline_mode<synchronous>, transform_indices = @transform_1, window_bounds = array<i64: 128, 128>}, {pipeline_mode = #tpu.pipeline_mode<synchronous>, transform_indices = @transform_2, window_bounds = array<i64: 1, 128>}, {transform_indices = @transform_3, window_bounds = array<i64: 1, 16, 128>}]} {
    %c0 = arith.constant 0 : index
    %c0_0 = arith.constant 0 : index
    %c0_1 = arith.constant 0 : index
    %c0_2 = arith.constant 0 : index
    %0 = vector.load %arg1[%c0, %c0_0, %c0_1, %c0_2] : memref<1x4x16x128xf32, #tpu.memory_space<vmem>>, vector<1x1x16x128xf32>
    %1 = vector.shape_cast %0 : vector<1x1x16x128xf32> to vector<16x128xf32>
    %c0_3 = arith.constant 0 : index
    %c1 = arith.constant 1 : index
    %c0_4 = arith.constant 0 : index
    %c0_5 = arith.constant 0 : index
    %2 = vector.load %arg1[%c0_3, %c1, %c0_4, %c0_5] : memref<1x4x16x128xf32, #tpu.memory_space<vmem>>, vector<1x1x16x128xf32>
    %3 = vector.shape_cast %2 : vector<1x1x16x128xf32> to vector<16x128xf32>
    %4 = arith.addf %1, %3 : vector<16x128xf32>
    %c0_6 = arith.constant 0 : index
    %c2 = arith.constant 2 : index
    %c0_7 = arith.constant 0 : index
    %c0_8 = arith.constant 0 : index
    %5 = vector.load %arg1[%c0_6, %c2, %c0_7, %c0_8] : memref<1x4x16x128xf32, #tpu.memory_space<vmem>>, vector<1x1x16x128xf32>
    %6 = vector.shape_cast %5 : vector<1x1x16x128xf32> to vector<16x128xf32>
    %7 = arith.addf %4, %6 : vector<16x128xf32>
    %c0_9 = arith.constant 0 : index
    %c3 = arith.constant 3 : index
    %c0_10 = arith.constant 0 : index
    %c0_11 = arith.constant 0 : index
    %8 = vector.load %arg1[%c0_9, %c3, %c0_10, %c0_11] : memref<1x4x16x128xf32, #tpu.memory_space<vmem>>, vector<1x1x16x128xf32>
    %9 = vector.shape_cast %8 : vector<1x1x16x128xf32> to vector<16x128xf32>
    %10 = arith.addf %7, %9 : vector<16x128xf32>
    %cst = arith.constant 2.500000e-01 : f32
    %11 = vector.broadcast %cst : f32 to vector<16x128xf32>
    %12 = arith.mulf %11, %10 : vector<16x128xf32>
    %13 = arith.truncf %12 : vector<16x128xf32> to vector<16x128xbf16>
    %c0_12 = arith.constant 0 : index
    %c0_13 = arith.constant 0 : index
    %14 = vector.load %arg2[%c0_12, %c0_13] : memref<128x128xbf16, #tpu.memory_space<vmem>>, vector<128x128xbf16>
    %cst_14 = arith.constant dense<0.000000e+00> : vector<16x128xf32>
    %15 = tpu.matmul %13, %14, %cst_14 {dimension_numbers = #tpu.dot_dimension_numbers<[1], [0], [0], [1], [0, 0, 1, 1], [], []>} : vector<16x128xbf16>, vector<128x128xbf16>, vector<16x128xf32> -> vector<16x128xf32>
    %c0_15 = arith.constant 0 : index
    %c0_16 = arith.constant 0 : index
    %16 = vector.load %arg3[%c0_15, %c0_16] : memref<1x128xf32, #tpu.memory_space<vmem>>, vector<1x128xf32>
    %17 = vector.broadcast %16 : vector<1x128xf32> to vector<16x128xf32>
    %18 = arith.addf %15, %17 : vector<16x128xf32>
    %c0_17 = arith.constant 0 : index
    %c0_18 = arith.constant 0 : index
    %c0_19 = arith.constant 0 : index
    %19 = vector.load %arg4[%c0_17, %c0_18, %c0_19] : memref<1x16x128xf32, #tpu.memory_space<vmem>>, vector<1x16x128xf32>
    %20 = vector.shape_cast %19 : vector<1x16x128xf32> to vector<16x128xf32>
    %21 = vector.shape_cast %18 : vector<16x128xf32> to vector<1x16x128xf32>
    tpu.vector_store %arg4[%c0_17, %c0_18, %c0_19], %21 {strides = array<i32>} : memref<1x16x128xf32, #tpu.memory_space<vmem>>, vector<1x16x128xf32>,
    return
  }
  func.func @transform_0(%arg0: i32) -> (i32, i32, i32, i32) {
    %c0_i32 = arith.constant 0 : i32
    %c0_i32_0 = arith.constant 0 : i32
    %c0_i32_1 = arith.constant 0 : i32
    %c0_i32_2 = arith.constant 0 : i32
    return %arg0, %c0_i32, %c0_i32_0, %c0_i32_1 : i32, i32, i32, i32
  }
  func.func @transform_1(%arg0: i32) -> (i32, i32) {
    %c0_i32 = arith.constant 0 : i32
    %c0_i32_0 = arith.constant 0 : i32
    %c0_i32_1 = arith.constant 0 : i32
    return %c0_i32, %c0_i32_0 : i32, i32
  }
  func.func @transform_2(%arg0: i32) -> (i32, i32) {
    %c0_i32 = arith.constant 0 : i32
    %c0_i32_0 = arith.constant 0 : i32
    %c0_i32_1 = arith.constant 0 : i32
    return %c0_i32, %c0_i32_0 : i32, i32
  }
  func.func @transform_3(%arg0: i32) -> (i32, i32, i32) {
    %c0_i32 = arith.constant 0 : i32
    %c0_i32_0 = arith.constant 0 : i32
    %c0_i32_1 = arith.constant 0 : i32
    return %arg0, %c0_i32, %c0_i32_0 : i32, i32, i32
  }
}

module attributes {stable_mosaic.version = 11 : i64} {
  func.func @_se_kernel(%arg0: i32, %arg1: memref<1x16x128xf32, #tpu.memory_space<vmem>>, %arg2: memref<128x128xf32, #tpu.memory_space<vmem>>, %arg3: memref<1x128xf32, #tpu.memory_space<vmem>>, %arg4: memref<128x128xf32, #tpu.memory_space<vmem>>, %arg5: memref<1x128xf32, #tpu.memory_space<vmem>>, %arg6: memref<1x16x128xf32, #tpu.memory_space<vmem>>, %arg7: memref<1x1x128xf32, #tpu.memory_space<vmem>>) attributes {dimension_semantics = [#tpu.dimension_semantics<parallel>], iteration_bounds = array<i64: 2>, scalar_prefetch = 0 : i64, scratch_operands = 0 : i64, tpu.core_type = #tpu.core_type<tc>, window_params = [{transform_indices = @transform_0, window_bounds = array<i64: 1, 16, 128>}, {pipeline_mode = #tpu.pipeline_mode<synchronous>, transform_indices = @transform_1, window_bounds = array<i64: 128, 128>}, {pipeline_mode = #tpu.pipeline_mode<synchronous>, transform_indices = @transform_2, window_bounds = array<i64: 1, 128>}, {pipeline_mode = #tpu.pipeline_mode<synchronous>, transform_indices = @transform_3, window_bounds = array<i64: 128, 128>}, {pipeline_mode = #tpu.pipeline_mode<synchronous>, transform_indices = @transform_4, window_bounds = array<i64: 1, 128>}, {transform_indices = @transform_5, window_bounds = array<i64: 1, 16, 128>}, {transform_indices = @transform_6, window_bounds = array<i64: 1, 1, 128>}]} {
    %c0 = arith.constant 0 : index
    %c0_0 = arith.constant 0 : index
    %c0_1 = arith.constant 0 : index
    %0 = vector.load %arg1[%c0, %c0_0, %c0_1] : memref<1x16x128xf32, #tpu.memory_space<vmem>>, vector<1x16x128xf32>
    %1 = vector.shape_cast %0 : vector<1x16x128xf32> to vector<16x128xf32>
    %cst = arith.constant dense<0.000000e+00> : vector<128xf32>
    %2 = vector.multi_reduction <add>, %1, %cst [0] : vector<16x128xf32> to vector<128xf32>
    %3 = vector.shape_cast %2 : vector<128xf32> to vector<1x128xf32>
    %cst_2 = arith.constant 6.250000e-02 : f32
    %4 = vector.broadcast %cst_2 : f32 to vector<1x128xf32>
    %5 = arith.mulf %3, %4 : vector<1x128xf32>
    %c0_3 = arith.constant 0 : index
    %c0_4 = arith.constant 0 : index
    %6 = vector.load %arg2[%c0_3, %c0_4] : memref<128x128xf32, #tpu.memory_space<vmem>>, vector<128x128xf32>
    %cst_5 = arith.constant dense<0.000000e+00> : vector<1x128xf32>
    %7 = tpu.matmul %5, %6, %cst_5 {dimension_numbers = #tpu.dot_dimension_numbers<[1], [0], [0], [1], [0, 0, 1, 1], [], []>} : vector<1x128xf32>, vector<128x128xf32>, vector<1x128xf32> -> vector<1x128xf32>
    %c0_6 = arith.constant 0 : index
    %c0_7 = arith.constant 0 : index
    %8 = vector.load %arg3[%c0_6, %c0_7] : memref<1x128xf32, #tpu.memory_space<vmem>>, vector<1x128xf32>
    %9 = arith.addf %7, %8 : vector<1x128xf32>
    %cst_8 = arith.constant 0.000000e+00 : f32
    %10 = vector.broadcast %cst_8 : f32 to vector<1x128xf32>
    %11 = arith.maximumf %9, %10 : vector<1x128xf32>
    %c0_9 = arith.constant 0 : index
    %c0_10 = arith.constant 0 : index
    %12 = vector.load %arg4[%c0_9, %c0_10] : memref<128x128xf32, #tpu.memory_space<vmem>>, vector<128x128xf32>
    %cst_11 = arith.constant dense<0.000000e+00> : vector<1x128xf32>
    %13 = tpu.matmul %11, %12, %cst_11 {dimension_numbers = #tpu.dot_dimension_numbers<[1], [0], [0], [1], [0, 0, 1, 1], [], []>} : vector<1x128xf32>, vector<128x128xf32>, vector<1x128xf32> -> vector<1x128xf32>
    %c0_12 = arith.constant 0 : index
    %c0_13 = arith.constant 0 : index
    %14 = vector.load %arg5[%c0_12, %c0_13] : memref<1x128xf32, #tpu.memory_space<vmem>>, vector<1x128xf32>
    %15 = arith.addf %13, %14 : vector<1x128xf32>
    %16 = arith.negf %15 : vector<1x128xf32>
    %17 = math.exp %16 : vector<1x128xf32>
    %cst_14 = arith.constant 1.000000e+00 : f32
    %18 = vector.broadcast %cst_14 : f32 to vector<1x128xf32>
    %19 = arith.addf %18, %17 : vector<1x128xf32>
    %20 = arith.divf %18, %19 : vector<1x128xf32>
    %21 = vector.broadcast %20 : vector<1x128xf32> to vector<16x128xf32>
    %22 = arith.mulf %1, %21 : vector<16x128xf32>
    %c0_15 = arith.constant 0 : index
    %c0_16 = arith.constant 0 : index
    %c0_17 = arith.constant 0 : index
    %23 = vector.load %arg6[%c0_15, %c0_16, %c0_17] : memref<1x16x128xf32, #tpu.memory_space<vmem>>, vector<1x16x128xf32>
    %24 = vector.shape_cast %23 : vector<1x16x128xf32> to vector<16x128xf32>
    %25 = vector.shape_cast %22 : vector<16x128xf32> to vector<1x16x128xf32>
    tpu.vector_store %arg6[%c0_15, %c0_16, %c0_17], %25 {strides = array<i32>} : memref<1x16x128xf32, #tpu.memory_space<vmem>>, vector<1x16x128xf32>,
    %26 = arith.mulf %5, %20 : vector<1x128xf32>
    %c0_18 = arith.constant 0 : index
    %c0_19 = arith.constant 0 : index
    %c0_20 = arith.constant 0 : index
    %27 = vector.load %arg7[%c0_18, %c0_19, %c0_20] : memref<1x1x128xf32, #tpu.memory_space<vmem>>, vector<1x1x128xf32>
    %28 = vector.shape_cast %27 : vector<1x1x128xf32> to vector<1x128xf32>
    %29 = vector.shape_cast %26 : vector<1x128xf32> to vector<1x1x128xf32>
    tpu.vector_store %arg7[%c0_18, %c0_19, %c0_20], %29 {strides = array<i32>} : memref<1x1x128xf32, #tpu.memory_space<vmem>>, vector<1x1x128xf32>,
    return
  }
  func.func @transform_0(%arg0: i32) -> (i32, i32, i32) {
    %c0_i32 = arith.constant 0 : i32
    %c0_i32_0 = arith.constant 0 : i32
    %c0_i32_1 = arith.constant 0 : i32
    return %arg0, %c0_i32, %c0_i32_0 : i32, i32, i32
  }
  func.func @transform_1(%arg0: i32) -> (i32, i32) {
    %c0_i32 = arith.constant 0 : i32
    %c0_i32_0 = arith.constant 0 : i32
    %c0_i32_1 = arith.constant 0 : i32
    return %c0_i32, %c0_i32_0 : i32, i32
  }
  func.func @transform_2(%arg0: i32) -> (i32, i32) {
    %c0_i32 = arith.constant 0 : i32
    %c0_i32_0 = arith.constant 0 : i32
    %c0_i32_1 = arith.constant 0 : i32
    return %c0_i32, %c0_i32_0 : i32, i32
  }
  func.func @transform_3(%arg0: i32) -> (i32, i32) {
    %c0_i32 = arith.constant 0 : i32
    %c0_i32_0 = arith.constant 0 : i32
    %c0_i32_1 = arith.constant 0 : i32
    return %c0_i32, %c0_i32_0 : i32, i32
  }
  func.func @transform_4(%arg0: i32) -> (i32, i32) {
    %c0_i32 = arith.constant 0 : i32
    %c0_i32_0 = arith.constant 0 : i32
    %c0_i32_1 = arith.constant 0 : i32
    return %c0_i32, %c0_i32_0 : i32, i32
  }
  func.func @transform_5(%arg0: i32) -> (i32, i32, i32) {
    %c0_i32 = arith.constant 0 : i32
    %c0_i32_0 = arith.constant 0 : i32
    %c0_i32_1 = arith.constant 0 : i32
    return %arg0, %c0_i32, %c0_i32_0 : i32, i32, i32
  }
  func.func @transform_6(%arg0: i32) -> (i32, i32, i32) {
    %c0_i32 = arith.constant 0 : i32
    %c0_i32_0 = arith.constant 0 : i32
    %c0_i32_1 = arith.constant 0 : i32
    return %arg0, %c0_i32, %c0_i32_0 : i32, i32, i32
  }
}

module attributes {stable_mosaic.version = 11 : i64} {
  func.func @_conv_kernel(%arg0: i32, %arg1: memref<1x1x42x128xf32, #tpu.memory_space<vmem>>, %arg2: memref<1x1x42x128xf32, #tpu.memory_space<vmem>>, %arg3: memref<9x128x128xbf16, #tpu.memory_space<vmem>>, %arg4: memref<9x128x128xbf16, #tpu.memory_space<vmem>>, %arg5: memref<1x128xf32, #tpu.memory_space<vmem>>, %arg6: memref<1x16x128xf32, #tpu.memory_space<vmem>>) attributes {dimension_semantics = [#tpu.dimension_semantics<parallel>], iteration_bounds = array<i64: 2>, scalar_prefetch = 0 : i64, scratch_operands = 0 : i64, tpu.core_type = #tpu.core_type<tc>, window_params = [{transform_indices = @transform_0, window_bounds = array<i64: 1, 1, 42, 128>}, {transform_indices = @transform_1, window_bounds = array<i64: 1, 1, 42, 128>}, {pipeline_mode = #tpu.pipeline_mode<synchronous>, transform_indices = @transform_2, window_bounds = array<i64: 9, 128, 128>}, {pipeline_mode = #tpu.pipeline_mode<synchronous>, transform_indices = @transform_3, window_bounds = array<i64: 9, 128, 128>}, {pipeline_mode = #tpu.pipeline_mode<synchronous>, transform_indices = @transform_4, window_bounds = array<i64: 1, 128>}, {transform_indices = @transform_5, window_bounds = array<i64: 1, 16, 128>}]} {
    %cst = arith.constant 0.000000e+00 : f32
    %0 = vector.broadcast %cst : f32 to vector<24x128xf32>
    %c0 = arith.constant 0 : index
    %c0_0 = arith.constant 0 : index
    %c0_1 = arith.constant 0 : index
    %c0_2 = arith.constant 0 : index
    %1 = vector.load %arg1[%c0, %c0_0, %c0_1, %c0_2] : memref<1x1x42x128xf32, #tpu.memory_space<vmem>>, vector<1x1x24x128xf32>
    %2 = vector.shape_cast %1 : vector<1x1x24x128xf32> to vector<24x128xf32>
    %3 = arith.truncf %2 : vector<24x128xf32> to vector<24x128xbf16>
    %c0_3 = arith.constant 0 : index
    %c0_4 = arith.constant 0 : index
    %c0_5 = arith.constant 0 : index
    %4 = vector.load %arg3[%c0_3, %c0_4, %c0_5] : memref<9x128x128xbf16, #tpu.memory_space<vmem>>, vector<1x128x128xbf16>
    %5 = vector.shape_cast %4 : vector<1x128x128xbf16> to vector<128x128xbf16>
    %cst_6 = arith.constant dense<0.000000e+00> : vector<24x128xf32>
    %6 = tpu.matmul %3, %5, %cst_6 {dimension_numbers = #tpu.dot_dimension_numbers<[1], [0], [0], [1], [0, 0, 1, 1], [], []>} : vector<24x128xbf16>, vector<128x128xbf16>, vector<24x128xf32> -> vector<24x128xf32>
    %7 = arith.addf %0, %6 : vector<24x128xf32>
    %c0_7 = arith.constant 0 : index
    %c0_8 = arith.constant 0 : index
    %c1 = arith.constant 1 : index
    %c0_9 = arith.constant 0 : index
    %8 = vector.load %arg1[%c0_7, %c0_8, %c1, %c0_9] : memref<1x1x42x128xf32, #tpu.memory_space<vmem>>, vector<1x1x24x128xf32>
    %9 = vector.shape_cast %8 : vector<1x1x24x128xf32> to vector<24x128xf32>
    %10 = arith.truncf %9 : vector<24x128xf32> to vector<24x128xbf16>
    %c1_10 = arith.constant 1 : index
    %c0_11 = arith.constant 0 : index
    %c0_12 = arith.constant 0 : index
    %11 = vector.load %arg3[%c1_10, %c0_11, %c0_12] : memref<9x128x128xbf16, #tpu.memory_space<vmem>>, vector<1x128x128xbf16>
    %12 = vector.shape_cast %11 : vector<1x128x128xbf16> to vector<128x128xbf16>
    %cst_13 = arith.constant dense<0.000000e+00> : vector<24x128xf32>
    %13 = tpu.matmul %10, %12, %cst_13 {dimension_numbers = #tpu.dot_dimension_numbers<[1], [0], [0], [1], [0, 0, 1, 1], [], []>} : vector<24x128xbf16>, vector<128x128xbf16>, vector<24x128xf32> -> vector<24x128xf32>
    %14 = arith.addf %7, %13 : vector<24x128xf32>
    %c0_14 = arith.constant 0 : index
    %c0_15 = arith.constant 0 : index
    %c2 = arith.constant 2 : index
    %c0_16 = arith.constant 0 : index
    %15 = vector.load %arg1[%c0_14, %c0_15, %c2, %c0_16] : memref<1x1x42x128xf32, #tpu.memory_space<vmem>>, vector<1x1x24x128xf32>
    %16 = vector.shape_cast %15 : vector<1x1x24x128xf32> to vector<24x128xf32>
    %17 = arith.truncf %16 : vector<24x128xf32> to vector<24x128xbf16>
    %c2_17 = arith.constant 2 : index
    %c0_18 = arith.constant 0 : index
    %c0_19 = arith.constant 0 : index
    %18 = vector.load %arg3[%c2_17, %c0_18, %c0_19] : memref<9x128x128xbf16, #tpu.memory_space<vmem>>, vector<1x128x128xbf16>
    %19 = vector.shape_cast %18 : vector<1x128x128xbf16> to vector<128x128xbf16>
    %cst_20 = arith.constant dense<0.000000e+00> : vector<24x128xf32>
    %20 = tpu.matmul %17, %19, %cst_20 {dimension_numbers = #tpu.dot_dimension_numbers<[1], [0], [0], [1], [0, 0, 1, 1], [], []>} : vector<24x128xbf16>, vector<128x128xbf16>, vector<24x128xf32> -> vector<24x128xf32>
    %21 = arith.addf %14, %20 : vector<24x128xf32>
    %c0_21 = arith.constant 0 : index
    %c0_22 = arith.constant 0 : index
    %c6 = arith.constant 6 : index
    %c0_23 = arith.constant 0 : index
    %22 = vector.load %arg1[%c0_21, %c0_22, %c6, %c0_23] : memref<1x1x42x128xf32, #tpu.memory_space<vmem>>, vector<1x1x24x128xf32>
    %23 = vector.shape_cast %22 : vector<1x1x24x128xf32> to vector<24x128xf32>
    %24 = arith.truncf %23 : vector<24x128xf32> to vector<24x128xbf16>
    %c3 = arith.constant 3 : index
    %c0_24 = arith.constant 0 : index
    %c0_25 = arith.constant 0 : index
    %25 = vector.load %arg3[%c3, %c0_24, %c0_25] : memref<9x128x128xbf16, #tpu.memory_space<vmem>>, vector<1x128x128xbf16>
    %26 = vector.shape_cast %25 : vector<1x128x128xbf16> to vector<128x128xbf16>
    %cst_26 = arith.constant dense<0.000000e+00> : vector<24x128xf32>
    %27 = tpu.matmul %24, %26, %cst_26 {dimension_numbers = #tpu.dot_dimension_numbers<[1], [0], [0], [1], [0, 0, 1, 1], [], []>} : vector<24x128xbf16>, vector<128x128xbf16>, vector<24x128xf32> -> vector<24x128xf32>
    %28 = arith.addf %21, %27 : vector<24x128xf32>
    %c0_27 = arith.constant 0 : index
    %c0_28 = arith.constant 0 : index
    %c7 = arith.constant 7 : index
    %c0_29 = arith.constant 0 : index
    %29 = vector.load %arg1[%c0_27, %c0_28, %c7, %c0_29] : memref<1x1x42x128xf32, #tpu.memory_space<vmem>>, vector<1x1x24x128xf32>
    %30 = vector.shape_cast %29 : vector<1x1x24x128xf32> to vector<24x128xf32>
    %31 = arith.truncf %30 : vector<24x128xf32> to vector<24x128xbf16>
    %c4 = arith.constant 4 : index
    %c0_30 = arith.constant 0 : index
    %c0_31 = arith.constant 0 : index
    %32 = vector.load %arg3[%c4, %c0_30, %c0_31] : memref<9x128x128xbf16, #tpu.memory_space<vmem>>, vector<1x128x128xbf16>
    %33 = vector.shape_cast %32 : vector<1x128x128xbf16> to vector<128x128xbf16>
    %cst_32 = arith.constant dense<0.000000e+00> : vector<24x128xf32>
    %34 = tpu.matmul %31, %33, %cst_32 {dimension_numbers = #tpu.dot_dimension_numbers<[1], [0], [0], [1], [0, 0, 1, 1], [], []>} : vector<24x128xbf16>, vector<128x128xbf16>, vector<24x128xf32> -> vector<24x128xf32>
    %35 = arith.addf %28, %34 : vector<24x128xf32>
    %c0_33 = arith.constant 0 : index
    %c0_34 = arith.constant 0 : index
    %c8 = arith.constant 8 : index
    %c0_35 = arith.constant 0 : index
    %36 = vector.load %arg1[%c0_33, %c0_34, %c8, %c0_35] : memref<1x1x42x128xf32, #tpu.memory_space<vmem>>, vector<1x1x24x128xf32>
    %37 = vector.shape_cast %36 : vector<1x1x24x128xf32> to vector<24x128xf32>
    %38 = arith.truncf %37 : vector<24x128xf32> to vector<24x128xbf16>
    %c5 = arith.constant 5 : index
    %c0_36 = arith.constant 0 : index
    %c0_37 = arith.constant 0 : index
    %39 = vector.load %arg3[%c5, %c0_36, %c0_37] : memref<9x128x128xbf16, #tpu.memory_space<vmem>>, vector<1x128x128xbf16>
    %40 = vector.shape_cast %39 : vector<1x128x128xbf16> to vector<128x128xbf16>
    %cst_38 = arith.constant dense<0.000000e+00> : vector<24x128xf32>
    %41 = tpu.matmul %38, %40, %cst_38 {dimension_numbers = #tpu.dot_dimension_numbers<[1], [0], [0], [1], [0, 0, 1, 1], [], []>} : vector<24x128xbf16>, vector<128x128xbf16>, vector<24x128xf32> -> vector<24x128xf32>
    %42 = arith.addf %35, %41 : vector<24x128xf32>
    %c0_39 = arith.constant 0 : index
    %c0_40 = arith.constant 0 : index
    %c12 = arith.constant 12 : index
    %c0_41 = arith.constant 0 : index
    %43 = vector.load %arg1[%c0_39, %c0_40, %c12, %c0_41] : memref<1x1x42x128xf32, #tpu.memory_space<vmem>>, vector<1x1x24x128xf32>
    %44 = vector.shape_cast %43 : vector<1x1x24x128xf32> to vector<24x128xf32>
    %45 = arith.truncf %44 : vector<24x128xf32> to vector<24x128xbf16>
    %c6_42 = arith.constant 6 : index
    %c0_43 = arith.constant 0 : index
    %c0_44 = arith.constant 0 : index
    %46 = vector.load %arg3[%c6_42, %c0_43, %c0_44] : memref<9x128x128xbf16, #tpu.memory_space<vmem>>, vector<1x128x128xbf16>
    %47 = vector.shape_cast %46 : vector<1x128x128xbf16> to vector<128x128xbf16>
    %cst_45 = arith.constant dense<0.000000e+00> : vector<24x128xf32>
    %48 = tpu.matmul %45, %47, %cst_45 {dimension_numbers = #tpu.dot_dimension_numbers<[1], [0], [0], [1], [0, 0, 1, 1], [], []>} : vector<24x128xbf16>, vector<128x128xbf16>, vector<24x128xf32> -> vector<24x128xf32>
    %49 = arith.addf %42, %48 : vector<24x128xf32>
    %c0_46 = arith.constant 0 : index
    %c0_47 = arith.constant 0 : index
    %c13 = arith.constant 13 : index
    %c0_48 = arith.constant 0 : index
    %50 = vector.load %arg1[%c0_46, %c0_47, %c13, %c0_48] : memref<1x1x42x128xf32, #tpu.memory_space<vmem>>, vector<1x1x24x128xf32>
    %51 = vector.shape_cast %50 : vector<1x1x24x128xf32> to vector<24x128xf32>
    %52 = arith.truncf %51 : vector<24x128xf32> to vector<24x128xbf16>
    %c7_49 = arith.constant 7 : index
    %c0_50 = arith.constant 0 : index
    %c0_51 = arith.constant 0 : index
    %53 = vector.load %arg3[%c7_49, %c0_50, %c0_51] : memref<9x128x128xbf16, #tpu.memory_space<vmem>>, vector<1x128x128xbf16>
    %54 = vector.shape_cast %53 : vector<1x128x128xbf16> to vector<128x128xbf16>
    %cst_52 = arith.constant dense<0.000000e+00> : vector<24x128xf32>
    %55 = tpu.matmul %52, %54, %cst_52 {dimension_numbers = #tpu.dot_dimension_numbers<[1], [0], [0], [1], [0, 0, 1, 1], [], []>} : vector<24x128xbf16>, vector<128x128xbf16>, vector<24x128xf32> -> vector<24x128xf32>
    %56 = arith.addf %49, %55 : vector<24x128xf32>
    %c0_53 = arith.constant 0 : index
    %c0_54 = arith.constant 0 : index
    %c14 = arith.constant 14 : index
    %c0_55 = arith.constant 0 : index
    %57 = vector.load %arg1[%c0_53, %c0_54, %c14, %c0_55] : memref<1x1x42x128xf32, #tpu.memory_space<vmem>>, vector<1x1x24x128xf32>
    %58 = vector.shape_cast %57 : vector<1x1x24x128xf32> to vector<24x128xf32>
    %59 = arith.truncf %58 : vector<24x128xf32> to vector<24x128xbf16>
    %c8_56 = arith.constant 8 : index
    %c0_57 = arith.constant 0 : index
    %c0_58 = arith.constant 0 : index
    %60 = vector.load %arg3[%c8_56, %c0_57, %c0_58] : memref<9x128x128xbf16, #tpu.memory_space<vmem>>, vector<1x128x128xbf16>
    %61 = vector.shape_cast %60 : vector<1x128x128xbf16> to vector<128x128xbf16>
    %cst_59 = arith.constant dense<0.000000e+00> : vector<24x128xf32>
    %62 = tpu.matmul %59, %61, %cst_59 {dimension_numbers = #tpu.dot_dimension_numbers<[1], [0], [0], [1], [0, 0, 1, 1], [], []>} : vector<24x128xbf16>, vector<128x128xbf16>, vector<24x128xf32> -> vector<24x128xf32>
    %63 = arith.addf %56, %62 : vector<24x128xf32>
    %c0_60 = arith.constant 0 : index
    %c0_61 = arith.constant 0 : index
    %c0_62 = arith.constant 0 : index
    %c0_63 = arith.constant 0 : index
    %64 = vector.load %arg2[%c0_60, %c0_61, %c0_62, %c0_63] : memref<1x1x42x128xf32, #tpu.memory_space<vmem>>, vector<1x1x24x128xf32>
    %65 = vector.shape_cast %64 : vector<1x1x24x128xf32> to vector<24x128xf32>
    %66 = arith.truncf %65 : vector<24x128xf32> to vector<24x128xbf16>
    %c0_64 = arith.constant 0 : index
    %c0_65 = arith.constant 0 : index
    %c0_66 = arith.constant 0 : index
    %67 = vector.load %arg4[%c0_64, %c0_65, %c0_66] : memref<9x128x128xbf16, #tpu.memory_space<vmem>>, vector<1x128x128xbf16>
    %68 = vector.shape_cast %67 : vector<1x128x128xbf16> to vector<128x128xbf16>
    %cst_67 = arith.constant dense<0.000000e+00> : vector<24x128xf32>
    %69 = tpu.matmul %66, %68, %cst_67 {dimension_numbers = #tpu.dot_dimension_numbers<[1], [0], [0], [1], [0, 0, 1, 1], [], []>} : vector<24x128xbf16>, vector<128x128xbf16>, vector<24x128xf32> -> vector<24x128xf32>
    %70 = arith.addf %63, %69 : vector<24x128xf32>
    %c0_68 = arith.constant 0 : index
    %c0_69 = arith.constant 0 : index
    %c1_70 = arith.constant 1 : index
    %c0_71 = arith.constant 0 : index
    %71 = vector.load %arg2[%c0_68, %c0_69, %c1_70, %c0_71] : memref<1x1x42x128xf32, #tpu.memory_space<vmem>>, vector<1x1x24x128xf32>
    %72 = vector.shape_cast %71 : vector<1x1x24x128xf32> to vector<24x128xf32>
    %73 = arith.truncf %72 : vector<24x128xf32> to vector<24x128xbf16>
    %c1_72 = arith.constant 1 : index
    %c0_73 = arith.constant 0 : index
    %c0_74 = arith.constant 0 : index
    %74 = vector.load %arg4[%c1_72, %c0_73, %c0_74] : memref<9x128x128xbf16, #tpu.memory_space<vmem>>, vector<1x128x128xbf16>
    %75 = vector.shape_cast %74 : vector<1x128x128xbf16> to vector<128x128xbf16>
    %cst_75 = arith.constant dense<0.000000e+00> : vector<24x128xf32>
    %76 = tpu.matmul %73, %75, %cst_75 {dimension_numbers = #tpu.dot_dimension_numbers<[1], [0], [0], [1], [0, 0, 1, 1], [], []>} : vector<24x128xbf16>, vector<128x128xbf16>, vector<24x128xf32> -> vector<24x128xf32>
    %77 = arith.addf %70, %76 : vector<24x128xf32>
    %c0_76 = arith.constant 0 : index
    %c0_77 = arith.constant 0 : index
    %c2_78 = arith.constant 2 : index
    %c0_79 = arith.constant 0 : index
    %78 = vector.load %arg2[%c0_76, %c0_77, %c2_78, %c0_79] : memref<1x1x42x128xf32, #tpu.memory_space<vmem>>, vector<1x1x24x128xf32>
    %79 = vector.shape_cast %78 : vector<1x1x24x128xf32> to vector<24x128xf32>
    %80 = arith.truncf %79 : vector<24x128xf32> to vector<24x128xbf16>
    %c2_80 = arith.constant 2 : index
    %c0_81 = arith.constant 0 : index
    %c0_82 = arith.constant 0 : index
    %81 = vector.load %arg4[%c2_80, %c0_81, %c0_82] : memref<9x128x128xbf16, #tpu.memory_space<vmem>>, vector<1x128x128xbf16>
    %82 = vector.shape_cast %81 : vector<1x128x128xbf16> to vector<128x128xbf16>
    %cst_83 = arith.constant dense<0.000000e+00> : vector<24x128xf32>
    %83 = tpu.matmul %80, %82, %cst_83 {dimension_numbers = #tpu.dot_dimension_numbers<[1], [0], [0], [1], [0, 0, 1, 1], [], []>} : vector<24x128xbf16>, vector<128x128xbf16>, vector<24x128xf32> -> vector<24x128xf32>
    %84 = arith.addf %77, %83 : vector<24x128xf32>
    %c0_84 = arith.constant 0 : index
    %c0_85 = arith.constant 0 : index
    %c6_86 = arith.constant 6 : index
    %c0_87 = arith.constant 0 : index
    %85 = vector.load %arg2[%c0_84, %c0_85, %c6_86, %c0_87] : memref<1x1x42x128xf32, #tpu.memory_space<vmem>>, vector<1x1x24x128xf32>
    %86 = vector.shape_cast %85 : vector<1x1x24x128xf32> to vector<24x128xf32>
    %87 = arith.truncf %86 : vector<24x128xf32> to vector<24x128xbf16>
    %c3_88 = arith.constant 3 : index
    %c0_89 = arith.constant 0 : index
    %c0_90 = arith.constant 0 : index
    %88 = vector.load %arg4[%c3_88, %c0_89, %c0_90] : memref<9x128x128xbf16, #tpu.memory_space<vmem>>, vector<1x128x128xbf16>
    %89 = vector.shape_cast %88 : vector<1x128x128xbf16> to vector<128x128xbf16>
    %cst_91 = arith.constant dense<0.000000e+00> : vector<24x128xf32>
    %90 = tpu.matmul %87, %89, %cst_91 {dimension_numbers = #tpu.dot_dimension_numbers<[1], [0], [0], [1], [0, 0, 1, 1], [], []>} : vector<24x128xbf16>, vector<128x128xbf16>, vector<24x128xf32> -> vector<24x128xf32>
    %91 = arith.addf %84, %90 : vector<24x128xf32>
    %c0_92 = arith.constant 0 : index
    %c0_93 = arith.constant 0 : index
    %c7_94 = arith.constant 7 : index
    %c0_95 = arith.constant 0 : index
    %92 = vector.load %arg2[%c0_92, %c0_93, %c7_94, %c0_95] : memref<1x1x42x128xf32, #tpu.memory_space<vmem>>, vector<1x1x24x128xf32>
    %93 = vector.shape_cast %92 : vector<1x1x24x128xf32> to vector<24x128xf32>
    %94 = arith.truncf %93 : vector<24x128xf32> to vector<24x128xbf16>
    %c4_96 = arith.constant 4 : index
    %c0_97 = arith.constant 0 : index
    %c0_98 = arith.constant 0 : index
    %95 = vector.load %arg4[%c4_96, %c0_97, %c0_98] : memref<9x128x128xbf16, #tpu.memory_space<vmem>>, vector<1x128x128xbf16>
    %96 = vector.shape_cast %95 : vector<1x128x128xbf16> to vector<128x128xbf16>
    %cst_99 = arith.constant dense<0.000000e+00> : vector<24x128xf32>
    %97 = tpu.matmul %94, %96, %cst_99 {dimension_numbers = #tpu.dot_dimension_numbers<[1], [0], [0], [1], [0, 0, 1, 1], [], []>} : vector<24x128xbf16>, vector<128x128xbf16>, vector<24x128xf32> -> vector<24x128xf32>
    %98 = arith.addf %91, %97 : vector<24x128xf32>
    %c0_100 = arith.constant 0 : index
    %c0_101 = arith.constant 0 : index
    %c8_102 = arith.constant 8 : index
    %c0_103 = arith.constant 0 : index
    %99 = vector.load %arg2[%c0_100, %c0_101, %c8_102, %c0_103] : memref<1x1x42x128xf32, #tpu.memory_space<vmem>>, vector<1x1x24x128xf32>
    %100 = vector.shape_cast %99 : vector<1x1x24x128xf32> to vector<24x128xf32>
    %101 = arith.truncf %100 : vector<24x128xf32> to vector<24x128xbf16>
    %c5_104 = arith.constant 5 : index
    %c0_105 = arith.constant 0 : index
    %c0_106 = arith.constant 0 : index
    %102 = vector.load %arg4[%c5_104, %c0_105, %c0_106] : memref<9x128x128xbf16, #tpu.memory_space<vmem>>, vector<1x128x128xbf16>
    %103 = vector.shape_cast %102 : vector<1x128x128xbf16> to vector<128x128xbf16>
    %cst_107 = arith.constant dense<0.000000e+00> : vector<24x128xf32>
    %104 = tpu.matmul %101, %103, %cst_107 {dimension_numbers = #tpu.dot_dimension_numbers<[1], [0], [0], [1], [0, 0, 1, 1], [], []>} : vector<24x128xbf16>, vector<128x128xbf16>, vector<24x128xf32> -> vector<24x128xf32>
    %105 = arith.addf %98, %104 : vector<24x128xf32>
    %c0_108 = arith.constant 0 : index
    %c0_109 = arith.constant 0 : index
    %c12_110 = arith.constant 12 : index
    %c0_111 = arith.constant 0 : index
    %106 = vector.load %arg2[%c0_108, %c0_109, %c12_110, %c0_111] : memref<1x1x42x128xf32, #tpu.memory_space<vmem>>, vector<1x1x24x128xf32>
    %107 = vector.shape_cast %106 : vector<1x1x24x128xf32> to vector<24x128xf32>
    %108 = arith.truncf %107 : vector<24x128xf32> to vector<24x128xbf16>
    %c6_112 = arith.constant 6 : index
    %c0_113 = arith.constant 0 : index
    %c0_114 = arith.constant 0 : index
    %109 = vector.load %arg4[%c6_112, %c0_113, %c0_114] : memref<9x128x128xbf16, #tpu.memory_space<vmem>>, vector<1x128x128xbf16>
    %110 = vector.shape_cast %109 : vector<1x128x128xbf16> to vector<128x128xbf16>
    %cst_115 = arith.constant dense<0.000000e+00> : vector<24x128xf32>
    %111 = tpu.matmul %108, %110, %cst_115 {dimension_numbers = #tpu.dot_dimension_numbers<[1], [0], [0], [1], [0, 0, 1, 1], [], []>} : vector<24x128xbf16>, vector<128x128xbf16>, vector<24x128xf32> -> vector<24x128xf32>
    %112 = arith.addf %105, %111 : vector<24x128xf32>
    %c0_116 = arith.constant 0 : index
    %c0_117 = arith.constant 0 : index
    %c13_118 = arith.constant 13 : index
    %c0_119 = arith.constant 0 : index
    %113 = vector.load %arg2[%c0_116, %c0_117, %c13_118, %c0_119] : memref<1x1x42x128xf32, #tpu.memory_space<vmem>>, vector<1x1x24x128xf32>
    %114 = vector.shape_cast %113 : vector<1x1x24x128xf32> to vector<24x128xf32>
    %115 = arith.truncf %114 : vector<24x128xf32> to vector<24x128xbf16>
    %c7_120 = arith.constant 7 : index
    %c0_121 = arith.constant 0 : index
    %c0_122 = arith.constant 0 : index
    %116 = vector.load %arg4[%c7_120, %c0_121, %c0_122] : memref<9x128x128xbf16, #tpu.memory_space<vmem>>, vector<1x128x128xbf16>
    %117 = vector.shape_cast %116 : vector<1x128x128xbf16> to vector<128x128xbf16>
    %cst_123 = arith.constant dense<0.000000e+00> : vector<24x128xf32>
    %118 = tpu.matmul %115, %117, %cst_123 {dimension_numbers = #tpu.dot_dimension_numbers<[1], [0], [0], [1], [0, 0, 1, 1], [], []>} : vector<24x128xbf16>, vector<128x128xbf16>, vector<24x128xf32> -> vector<24x128xf32>
    %119 = arith.addf %112, %118 : vector<24x128xf32>
    %c0_124 = arith.constant 0 : index
    %c0_125 = arith.constant 0 : index
    %c14_126 = arith.constant 14 : index
    %c0_127 = arith.constant 0 : index
    %120 = vector.load %arg2[%c0_124, %c0_125, %c14_126, %c0_127] : memref<1x1x42x128xf32, #tpu.memory_space<vmem>>, vector<1x1x24x128xf32>
    %121 = vector.shape_cast %120 : vector<1x1x24x128xf32> to vector<24x128xf32>
    %122 = arith.truncf %121 : vector<24x128xf32> to vector<24x128xbf16>
    %c8_128 = arith.constant 8 : index
    %c0_129 = arith.constant 0 : index
    %c0_130 = arith.constant 0 : index
    %123 = vector.load %arg4[%c8_128, %c0_129, %c0_130] : memref<9x128x128xbf16, #tpu.memory_space<vmem>>, vector<1x128x128xbf16>
    %124 = vector.shape_cast %123 : vector<1x128x128xbf16> to vector<128x128xbf16>
    %cst_131 = arith.constant dense<0.000000e+00> : vector<24x128xf32>
    %125 = tpu.matmul %122, %124, %cst_131 {dimension_numbers = #tpu.dot_dimension_numbers<[1], [0], [0], [1], [0, 0, 1, 1], [], []>} : vector<24x128xbf16>, vector<128x128xbf16>, vector<24x128xf32> -> vector<24x128xf32>
    %126 = arith.addf %119, %125 : vector<24x128xf32>
    %c0_132 = arith.constant 0 : index
    %c0_133 = arith.constant 0 : index
    %127 = vector.load %arg5[%c0_132, %c0_133] : memref<1x128xf32, #tpu.memory_space<vmem>>, vector<1x128xf32>
    %128 = vector.broadcast %127 : vector<1x128xf32> to vector<24x128xf32>
    %129 = arith.addf %126, %128 : vector<24x128xf32>
    %130 = vector.extract_strided_slice %129 {offsets = [0, 0], sizes = [4, 128], strides = [1, 1]} : vector<24x128xf32> to vector<4x128xf32>
    %c0_134 = arith.constant 0 : index
    %c0_135 = arith.constant 0 : index
    %c0_136 = arith.constant 0 : index
    %131 = vector.load %arg6[%c0_134, %c0_135, %c0_136] : memref<1x16x128xf32, #tpu.memory_space<vmem>>, vector<1x4x128xf32>
    %132 = vector.shape_cast %131 : vector<1x4x128xf32> to vector<4x128xf32>
    %133 = vector.shape_cast %130 : vector<4x128xf32> to vector<1x4x128xf32>
    tpu.vector_store %arg6[%c0_134, %c0_135, %c0_136], %133 {strides = array<i32>} : memref<1x16x128xf32, #tpu.memory_space<vmem>>, vector<1x4x128xf32>,
    %134 = vector.extract_strided_slice %129 {offsets = [6, 0], sizes = [4, 128], strides = [1, 1]} : vector<24x128xf32> to vector<4x128xf32>
    %c0_137 = arith.constant 0 : index
    %c4_138 = arith.constant 4 : index
    %c0_139 = arith.constant 0 : index
    %135 = vector.load %arg6[%c0_137, %c4_138, %c0_139] : memref<1x16x128xf32, #tpu.memory_space<vmem>>, vector<1x4x128xf32>
    %136 = vector.shape_cast %135 : vector<1x4x128xf32> to vector<4x128xf32>
    %137 = vector.shape_cast %134 : vector<4x128xf32> to vector<1x4x128xf32>
    tpu.vector_store %arg6[%c0_137, %c4_138, %c0_139], %137 {strides = array<i32>} : memref<1x16x128xf32, #tpu.memory_space<vmem>>, vector<1x4x128xf32>,
    %138 = vector.extract_strided_slice %129 {offsets = [12, 0], sizes = [4, 128], strides = [1, 1]} : vector<24x128xf32> to vector<4x128xf32>
    %c0_140 = arith.constant 0 : index
    %c8_141 = arith.constant 8 : index
    %c0_142 = arith.constant 0 : index
    %139 = vector.load %arg6[%c0_140, %c8_141, %c0_142] : memref<1x16x128xf32, #tpu.memory_space<vmem>>, vector<1x4x128xf32>
    %140 = vector.shape_cast %139 : vector<1x4x128xf32> to vector<4x128xf32>
    %141 = vector.shape_cast %138 : vector<4x128xf32> to vector<1x4x128xf32>
    tpu.vector_store %arg6[%c0_140, %c8_141, %c0_142], %141 {strides = array<i32>} : memref<1x16x128xf32, #tpu.memory_space<vmem>>, vector<1x4x128xf32>,
    %142 = vector.extract_strided_slice %129 {offsets = [18, 0], sizes = [4, 128], strides = [1, 1]} : vector<24x128xf32> to vector<4x128xf32>
    %c0_143 = arith.constant 0 : index
    %c12_144 = arith.constant 12 : index
    %c0_145 = arith.constant 0 : index
    %143 = vector.load %arg6[%c0_143, %c12_144, %c0_145] : memref<1x16x128xf32, #tpu.memory_space<vmem>>, vector<1x4x128xf32>
    %144 = vector.shape_cast %143 : vector<1x4x128xf32> to vector<4x128xf32>
    %145 = vector.shape_cast %142 : vector<4x128xf32> to vector<1x4x128xf32>
    tpu.vector_store %arg6[%c0_143, %c12_144, %c0_145], %145 {strides = array<i32>} : memref<1x16x128xf32, #tpu.memory_space<vmem>>, vector<1x4x128xf32>,
    return
  }
  func.func @transform_0(%arg0: i32) -> (i32, i32, i32, i32) {
    %c0_i32 = arith.constant 0 : i32
    %c0_i32_0 = arith.constant 0 : i32
    %c0_i32_1 = arith.constant 0 : i32
    %c0_i32_2 = arith.constant 0 : i32
    return %arg0, %c0_i32, %c0_i32_0, %c0_i32_1 : i32, i32, i32, i32
  }
  func.func @transform_1(%arg0: i32) -> (i32, i32, i32, i32) {
    %c0_i32 = arith.constant 0 : i32
    %c0_i32_0 = arith.constant 0 : i32
    %c0_i32_1 = arith.constant 0 : i32
    %c0_i32_2 = arith.constant 0 : i32
    return %arg0, %c0_i32, %c0_i32_0, %c0_i32_1 : i32, i32, i32, i32
  }
  func.func @transform_2(%arg0: i32) -> (i32, i32, i32) {
    %c0_i32 = arith.constant 0 : i32
    %c0_i32_0 = arith.constant 0 : i32
    %c0_i32_1 = arith.constant 0 : i32
    %c0_i32_2 = arith.constant 0 : i32
    return %c0_i32, %c0_i32_0, %c0_i32_1 : i32, i32, i32
  }
  func.func @transform_3(%arg0: i32) -> (i32, i32, i32) {
    %c0_i32 = arith.constant 0 : i32
    %c0_i32_0 = arith.constant 0 : i32
    %c0_i32_1 = arith.constant 0 : i32
    %c0_i32_2 = arith.constant 0 : i32
    return %c0_i32, %c0_i32_0, %c0_i32_1 : i32, i32, i32
  }
  func.func @transform_4(%arg0: i32) -> (i32, i32) {
    %c0_i32 = arith.constant 0 : i32
    %c0_i32_0 = arith.constant 0 : i32
    %c0_i32_1 = arith.constant 0 : i32
    return %c0_i32, %c0_i32_0 : i32, i32
  }
  func.func @transform_5(%arg0: i32) -> (i32, i32, i32) {
    %c0_i32 = arith.constant 0 : i32
    %c0_i32_0 = arith.constant 0 : i32
    %c0_i32_1 = arith.constant 0 : i32
    return %arg0, %c0_i32, %c0_i32_0 : i32, i32, i32
  }
}

module attributes {stable_mosaic.version = 11 : i64} {
  func.func @_linear_kernel(%arg0: i32, %arg1: memref<2x96xf32, #tpu.memory_space<vmem>>, %arg2: memref<96x128xf32, #tpu.memory_space<vmem>>, %arg3: memref<1x128xf32, #tpu.memory_space<vmem>>, %arg4: memref<2x128xf32, #tpu.memory_space<vmem>>) attributes {dimension_semantics = [#tpu.dimension_semantics<arbitrary>], iteration_bounds = array<i64: 1>, scalar_prefetch = 0 : i64, scratch_operands = 0 : i64, tpu.core_type = #tpu.core_type<tc>, window_params = [{pipeline_mode = #tpu.pipeline_mode<synchronous>, transform_indices = @transform_0, window_bounds = array<i64: 2, 96>}, {pipeline_mode = #tpu.pipeline_mode<synchronous>, transform_indices = @transform_1, window_bounds = array<i64: 96, 128>}, {pipeline_mode = #tpu.pipeline_mode<synchronous>, transform_indices = @transform_2, window_bounds = array<i64: 1, 128>}, {pipeline_mode = #tpu.pipeline_mode<synchronous>, transform_indices = @transform_3, window_bounds = array<i64: 2, 128>}]} {
    %c0 = arith.constant 0 : index
    %c0_0 = arith.constant 0 : index
    %0 = vector.load %arg1[%c0, %c0_0] : memref<2x96xf32, #tpu.memory_space<vmem>>, vector<2x96xf32>
    %c0_1 = arith.constant 0 : index
    %c0_2 = arith.constant 0 : index
    %1 = vector.load %arg2[%c0_1, %c0_2] : memref<96x128xf32, #tpu.memory_space<vmem>>, vector<96x128xf32>
    %cst = arith.constant dense<0.000000e+00> : vector<2x128xf32>
    %2 = tpu.matmul %0, %1, %cst {dimension_numbers = #tpu.dot_dimension_numbers<[1], [0], [0], [1], [0, 0, 1, 1], [], []>} : vector<2x96xf32>, vector<96x128xf32>, vector<2x128xf32> -> vector<2x128xf32>
    %c0_3 = arith.constant 0 : index
    %c0_4 = arith.constant 0 : index
    %3 = vector.load %arg3[%c0_3, %c0_4] : memref<1x128xf32, #tpu.memory_space<vmem>>, vector<1x128xf32>
    %4 = vector.broadcast %3 : vector<1x128xf32> to vector<2x128xf32>
    %5 = arith.addf %2, %4 : vector<2x128xf32>
    %c0_5 = arith.constant 0 : index
    %c0_6 = arith.constant 0 : index
    %6 = vector.load %arg4[%c0_5, %c0_6] : memref<2x128xf32, #tpu.memory_space<vmem>>, vector<2x128xf32>
    tpu.vector_store %arg4[%c0_5, %c0_6], %5 {strides = array<i32>} : memref<2x128xf32, #tpu.memory_space<vmem>>, vector<2x128xf32>,
    return
  }
  func.func @transform_0(%arg0: i32) -> (i32, i32) {
    %c0_i32 = arith.constant 0 : i32
    %c0_i32_0 = arith.constant 0 : i32
    %c0_i32_1 = arith.constant 0 : i32
    return %c0_i32, %c0_i32_0 : i32, i32
  }
  func.func @transform_1(%arg0: i32) -> (i32, i32) {
    %c0_i32 = arith.constant 0 : i32
    %c0_i32_0 = arith.constant 0 : i32
    %c0_i32_1 = arith.constant 0 : i32
    return %c0_i32, %c0_i32_0 : i32, i32
  }
  func.func @transform_2(%arg0: i32) -> (i32, i32) {
    %c0_i32 = arith.constant 0 : i32
    %c0_i32_0 = arith.constant 0 : i32
    %c0_i32_1 = arith.constant 0 : i32
    return %c0_i32, %c0_i32_0 : i32, i32
  }
  func.func @transform_3(%arg0: i32) -> (i32, i32) {
    %c0_i32 = arith.constant 0 : i32
    %c0_i32_0 = arith.constant 0 : i32
    %c0_i32_1 = arith.constant 0 : i32
    return %c0_i32, %c0_i32_0 : i32, i32
  }
}

</mosaic_0001>

<bundles_post_ra>
// kernel: tpu_custom_call.1
= control target key start
LH: loop header
LB: loop body
LE: loop exit
PB: predicated region body
PF: predicated region fallthrough
CT: control target
= control target key end

     0   :  { %6 = vsyncpa [#allocation3], 0  ;;  %s131_s0 = inlined_call_operand.hbm [shape: f32[8,128], index: 0, kind: input, shape index: {}]   ;;  %s132_s1 = inlined_call_operand.hbm [shape: f32[8,128], index: 1, kind: output, shape index: {}]  }
   0x1   :  { %7 = vsyncpa [#allocation4], 0  ;;  %s95_s6 = smov [#allocation2]   ;;  %s47_s10 = scalar_lea.hbm %s131_s0, 128 }
   0x2   :  { %s14_s7 = sshll.u32 %s95_s6, 4  ;;  %p48_p0 = scmp.ne.s32.totalorder %s131_s0, %s47_s10  ;;  %s15_s7 = int_to_ptr.vmem [resolvable:$true] %s14_s7 }
   0x3   :  { %p51_p1 = scmp.lt.u32.totalorder %s47_s10, %s131_s0 }
   0x5   :  { %p53_p2 = pnand %p51_p1, %p48_p0 }
   0x7   :  { %56 = shalt.err (!%p53_p2)
}
   0x8   :  { %s57_s15 = scalar_lea.vmem %s15_s7, 128  ;;  %p62_p4 = scmp.lt.s32.totalorder %s15_s7, %s15_s7 }
   0x9   :  { %p58_p3 = scmp.ne.s32.totalorder %s15_s7, %s57_s15  ;;  %p63_p5 = scmp.lt.s32.totalorder %s57_s15, %s57_s15 }
   0xb   :  { %p64_p6 = por %p63_p5, %p62_p4 }
   0xd   :  { %p65_p7 = pnand %p64_p6, %p58_p3 }
   0xf   :  { %68 = shalt.err (!%p65_p7)
}
  0x10   :  { %17 = dma.hbm_to_vmem [thread:$0]  %s131_s0, 128, %s15_s7, [#allocation3]  }
  0x11   :  { %91 = dma.done.wait [#allocation3], 128  }
  0x12   :  { %92 = vsyncadd [#allocation3], 4294967168  ;;  %v21_v0 = vld [vmem:[#allocation2] sm:$0xff]  ;;  %s96_s18 = smov [#allocation5]  }
  0x13   :  { %v23_v1 = vmul.f32 0.70710677, %v21_v0  ;;  %v22_v2 = vmul.f32 0.5, %v21_v0  ;;  %s34_s19 = sshll.u32 %s96_s18, 4  ;;  %s35_s19 = int_to_ptr.vmem [resolvable:$true] %s34_s19 }
  0x14   :  { %s69_s20 = scalar_lea.vmem %s35_s19, 128  ;;  %p74_p9 = scmp.lt.s32.totalorder %s35_s19, %s35_s19 }
  0x15   :  { %45 = verf.f32 %v23_v1  ;;  %p70_p8 = scmp.ne.s32.totalorder %s35_s19, %s69_s20  ;;  %p75_p10 = scmp.lt.s32.totalorder %s69_s20, %s69_s20 }
  0x17   :  { %p76_p11 = por %p75_p10, %p74_p9 }
  0x19   :  { %p77_p12 = pnand %p76_p11, %p70_p8 }
  0x1f   :  { %v46_v3 = vpop.eup %45 }
  0x20   :  { %v25_v4 = vadd.f32 1.0, %v46_v3 }
  0x22   :  { %v26_v5 = vmul.f32 %v25_v4, %v22_v2 }
  0x24   :  { %27 = vst [vmem:[#allocation5] sm:$0xff] %v26_v5 }
  0x25   :  { %80 = shalt.err (!%p77_p12)
}
  0x26   :  { %s81_s22 = scalar_lea.hbm %s132_s1, 128 }
  0x27   :  { %p82_p13 = scmp.ne.s32.totalorder %s132_s1, %s81_s22  ;;  %p85_p0 = scmp.lt.u32.totalorder %s81_s22, %s132_s1 }
  0x29   :  { %p87_p1 = pnand %p85_p0, %p82_p13 }
  0x2b   :  { %90 = shalt.err (!%p87_p1)
}
  0x2c   :  { %37 = dma.vmem_to_hbm [thread:$0]  %s35_s19, 128, %s132_s1, [#allocation4]  }
  0x2d   :  { %93 = dma.done.wait [#allocation4], 128  }
  0x2e   :  { %94 = vsyncadd [#allocation4], 4294967168 }
  0x2f   :  { %41 = vsyncpa [#allocation3], 1 }
  0x30   :  { %42 = vsyncpa [#allocation4], 1 }

// kernel: _lambda_.17
= control target key start
LH: loop header
LB: loop body
LE: loop exit
PB: predicated region body
PF: predicated region fallthrough
CT: control target
= control target key end

     0   :  { %s467_s12 = smov 0   ;;  %s563_s0 = inlined_call_operand.vmem [shape: f32[2,64,128], index: 0, kind: input, shape index: {}]   ;;  %s564_s1 = inlined_call_operand.vmem [shape: f32[1,128], index: 1, kind: input, shape index: {}]   ;;  %s565_s2 = inlined_call_operand.vmem [shape: f32[1,128], index: 2, kind: input, shape index: {}]   ;;  %s566_s3 = inlined_call_operand.vmem [shape: f32[2,64,128], index: 3, kind: output, shape index: {}]  }
   0x1 LB: > { %s398_s13 = sadd.s32 4294967295, %s445_s12   ;;  %p402_p0 = scmp.ge.s32.totalorder %s445_s12, 1  ;;  %s445_s12 = sphi %s467_s12, %s13_s12  }
   0x2   : > { %p137_p1 = scmp.lt.s32.totalorder %s445_s12, 3 }
   0x4   : > { %p138_p2 = pnand %p402_p0, %p137_p1 }
   0x5   : > { %p161_p3 = scmp.lt.s32.totalorder (!%p138_p2), %s398_s13, 1  ;;  %v407_v54 = vld [vmem:[%s564_s1] ss:$0 sm:$0xff] (!%p138_p2) }
   0x6   : > { %141 = sbr.rel (%p138_p2) target bundleno = 131 (0x83), region = 32  ;;  %v408_v59 = vld [vmem:[%s565_s2] ss:$0 sm:$0xff] (!%p138_p2) }
   0xd   : > { %s568_s13 = smov (!%p161_p3, %s398_s13), 1 }
   0xe   : > { %s411_s14 = sshll.u32 %s568_s13, 6 }
   0xf   : > { %s165_s17 = scalar_lea.vmem %s563_s0, %s411_s14  ;;  %s542_s24 = scalar_lea.vmem %s566_s3, %s411_s14 }
  0x10   : > { %v171_v0 = vld [vmem:[%s165_s17] sm:$0xff]  ;;  %v172_v1 = vld [vmem:[%s165_s17 + $0x8] sm:$0xff]  ;;  %v173_v2 = vld [vmem:[%s165_s17 + $0x10] sm:$0xff] }
  0x11   : > { %v179_v3 = vadd.f32 %v172_v1, %v171_v0  ;;  %v174_v4 = vld [vmem:[%s165_s17 + $0x18] sm:$0xff]  ;;  %v175_v6 = vld [vmem:[%s165_s17 + $0x20] sm:$0xff]  ;;  %v176_v8 = vld [vmem:[%s165_s17 + $0x28] sm:$0xff] }
  0x12   : > { %v177_v10 = vld [vmem:[%s165_s17 + $0x30] sm:$0xff]  ;;  %v178_v12 = vld [vmem:[%s165_s17 + $0x38] sm:$0xff] }
  0x13   : > { %v180_v5 = vadd.f32 %v179_v3, %v173_v2 }
  0x15   : > { %v181_v7 = vadd.f32 %v180_v5, %v174_v4 }
  0x17   : > { %v182_v9 = vadd.f32 %v181_v7, %v175_v6 }
  0x19   : > { %v183_v11 = vadd.f32 %v182_v9, %v176_v8 }
  0x1b   : > { %v184_v13 = vadd.f32 %v183_v11, %v177_v10 }
  0x1d   : > { %v185_v14 = vadd.f32 %v184_v13, %v178_v12 }
  0x1f   : > { %v186_v15 = vrot.slane %v185_v14, 4 }
  0x21   : > { %v187_v16 = vadd.f32 %v186_v15, %v185_v14 }
  0x23   : > { %v188_v17 = vrot.slane %v187_v16, 2 }
  0x25   : > { %v189_v18 = vadd.f32 %v188_v17, %v187_v16 }
  0x27   : > { %v190_v19 = vrot.slane %v189_v18, 1 }
  0x29   : > { %v191_v20 = vadd.f32 %v190_v19, %v189_v18 }
  0x2b   : > { %v192_v21 = vmul.f32 0.015625, %v191_v20 }
  0x2d   : > { %v193_v22 = vsub.f32 %v171_v0, %v192_v21  ;;  %v194_v23 = vsub.f32 %v172_v1, %v192_v21  ;;  %v195_v24 = vsub.f32 %v173_v2, %v192_v21  ;;  %v196_v25 = vsub.f32 %v174_v4, %v192_v21 }
  0x2e   : > { %v197_v26 = vsub.f32 %v175_v6, %v192_v21  ;;  %v198_v30 = vsub.f32 %v176_v8, %v192_v21  ;;  %v199_v33 = vsub.f32 %v177_v10, %v192_v21  ;;  %v200_v36 = vsub.f32 %v178_v12, %v192_v21 }
  0x2f   : > { %v201_v27 = vmul.f32 %v193_v22, %v193_v22  ;;  %v202_v28 = vmul.f32 %v194_v23, %v194_v23  ;;  %v203_v29 = vmul.f32 %v195_v24, %v195_v24  ;;  %v204_v31 = vmul.f32 %v196_v25, %v196_v25 }
  0x30   : > { %v205_v34 = vmul.f32 %v197_v26, %v197_v26  ;;  %v206_v37 = vmul.f32 %v198_v30, %v198_v30  ;;  %v207_v39 = vmul.f32 %v199_v33, %v199_v33  ;;  %v208_v41 = vmul.f32 %v200_v36, %v200_v36 }
  0x31   : > { %v209_v32 = vadd.f32 %v202_v28, %v201_v27 }
  0x33   : > { %v210_v35 = vadd.f32 %v209_v32, %v203_v29 }
  0x35   : > { %v211_v38 = vadd.f32 %v210_v35, %v204_v31 }
  0x37   : > { %v212_v40 = vadd.f32 %v211_v38, %v205_v34 }
  0x39   : > { %v213_v42 = vadd.f32 %v212_v40, %v206_v37 }
  0x3b   : > { %v214_v43 = vadd.f32 %v213_v42, %v207_v39 }
  0x3d   : > { %v215_v44 = vadd.f32 %v214_v43, %v208_v41 }
  0x3f   : > { %v216_v45 = vrot.slane %v215_v44, 4 }
  0x41   : > { %v217_v46 = vadd.f32 %v216_v45, %v215_v44 }
  0x43   : > { %v218_v47 = vrot.slane %v217_v46, 2 }
  0x45   : > { %v219_v48 = vadd.f32 %v218_v47, %v217_v46 }
  0x47   : > { %v220_v49 = vrot.slane %v219_v48, 1 }
  0x49   : > { %v221_v50 = vadd.f32 %v220_v49, %v219_v48 }
  0x4b   : > { %v222_v51 = vmul.f32 0.015625, %v221_v50 }
  0x4d   : > { %v223_v52 = vadd.f32 1e-05, %v222_v51 }
  0x4f   : > { %421 = vrsqrt.f32 %v223_v52 }
  0x59   : > { %v422_v53 = vpop.eup %421 }
  0x5a   : > { %v225_v55 = vmul.f32 %v422_v53, %v193_v22  ;;  %v226_v56 = vmul.f32 %v422_v53, %v194_v23  ;;  %v227_v57 = vmul.f32 %v422_v53, %v195_v24  ;;  %v228_v58 = vmul.f32 %v422_v53, %v196_v25 }
  0x5b   : > { %v229_v60 = vmul.f32 %v422_v53, %v197_v26  ;;  %v230_v61 = vmul.f32 %v422_v53, %v198_v30  ;;  %v231_v62 = vmul.f32 %v422_v53, %v199_v33  ;;  %v232_v63 = vmul.f32 %v422_v53, %v200_v36 }
  0x5c   : > { %v240_v0 = vmul.f32 %v407_v54, %v225_v55  ;;  %v241_v1 = vmul.f32 %v407_v54, %v226_v56  ;;  %v242_v2 = vmul.f32 %v407_v54, %v227_v57  ;;  %v243_v3 = vmul.f32 %v407_v54, %v228_v58 }
  0x5d   : > { %v244_v4 = vmul.f32 %v407_v54, %v229_v60  ;;  %v245_v5 = vmul.f32 %v407_v54, %v230_v61  ;;  %v246_v6 = vmul.f32 %v407_v54, %v231_v62  ;;  %v247_v7 = vmul.f32 %v407_v54, %v232_v63 }
  0x5e   : > { %v489_v8 = vadd.f32 %v408_v59, %v240_v0  ;;  %v491_v9 = vadd.f32 %v408_v59, %v241_v1  ;;  %v493_v10 = vadd.f32 %v408_v59, %v242_v2  ;;  %v495_v11 = vadd.f32 %v408_v59, %v243_v3 }
  0x5f   : > { %v497_v12 = vadd.f32 %v408_v59, %v244_v4  ;;  %v499_v13 = vadd.f32 %v408_v59, %v245_v5  ;;  %v501_v14 = vadd.f32 %v408_v59, %v246_v6  ;;  %v503_v15 = vadd.f32 %v408_v59, %v247_v7 }
  0x60   : > { %v263_v16 = vmul.f32 %v489_v8, %v489_v8  ;;  %v264_v17 = vmul.f32 %v491_v9, %v491_v9  ;;  %v265_v18 = vmul.f32 %v493_v10, %v493_v10  ;;  %v266_v19 = vmul.f32 %v495_v11, %v495_v11 }
  0x61   : > { %v267_v20 = vmul.f32 %v497_v12, %v497_v12  ;;  %v268_v21 = vmul.f32 %v499_v13, %v499_v13  ;;  %v269_v22 = vmul.f32 %v501_v14, %v501_v14  ;;  %v270_v23 = vmul.f32 %v503_v15, %v503_v15 }
  0x62   : > { %v271_v24 = vmul.f32 %v263_v16, %v489_v8  ;;  %v272_v25 = vmul.f32 %v264_v17, %v491_v9  ;;  %v273_v26 = vmul.f32 %v265_v18, %v493_v10  ;;  %v274_v27 = vmul.f32 %v266_v19, %v495_v11 }
  0x63   : > { %v275_v28 = vmul.f32 %v267_v20, %v497_v12  ;;  %v276_v29 = vmul.f32 %v268_v21, %v499_v13  ;;  %v277_v30 = vmul.f32 %v269_v22, %v501_v14  ;;  %v278_v31 = vmul.f32 %v270_v23, %v503_v15 }
  0x64   : > { %v279_v32 = vmul.f32 0.044715, %v271_v24  ;;  %v280_v33 = vmul.f32 0.044715, %v272_v25  ;;  %v281_v34 = vmul.f32 0.044715, %v273_v26 }
  0x65   : > { %v282_v35 = vmul.f32 0.044715, %v274_v27  ;;  %v283_v36 = vmul.f32 0.044715, %v275_v28  ;;  %v284_v37 = vmul.f32 0.044715, %v276_v29 }
  0x66   : > { %v287_v38 = vadd.f32 %v279_v32, %v489_v8  ;;  %v288_v39 = vadd.f32 %v280_v33, %v491_v9  ;;  %v289_v40 = vadd.f32 %v281_v34, %v493_v10  ;;  %v285_v41 = vmul.f32 0.044715, %v277_v30 }
  0x67   : > { %v290_v42 = vadd.f32 %v282_v35, %v495_v11  ;;  %v291_v43 = vadd.f32 %v283_v36, %v497_v12  ;;  %v292_v44 = vadd.f32 %v284_v37, %v499_v13  ;;  %v286_v45 = vmul.f32 0.044715, %v278_v31 }
  0x68   : > { %v295_v46 = vmul.f32 0.7978846, %v287_v38  ;;  %v296_v47 = vmul.f32 0.7978846, %v288_v39  ;;  %v297_v48 = vmul.f32 0.7978846, %v289_v40  ;;  %v293_v49 = vadd.f32 %v285_v41, %v501_v14 }
  0x69   : > { %v298_v50 = vmul.f32 0.7978846, %v290_v42  ;;  %v294_v51 = vadd.f32 %v286_v45, %v503_v15  ;;  %v299_v52 = vmul.f32 0.7978846, %v291_v43  ;;  %v300_v53 = vmul.f32 0.7978846, %v292_v44 }
  0x6a   : > { %423 = vtanh.f32 %v295_v46  ;;  %v301_v54 = vmul.f32 0.7978846, %v293_v49 }
  0x6b   : > { %425 = vtanh.f32 %v296_v47  ;;  %v302_v55 = vmul.f32 0.7978846, %v294_v51 }
  0x6c   : > { %427 = vtanh.f32 %v297_v48 }
  0x6d   : > { %429 = vtanh.f32 %v298_v50 }
  0x6e   : > { %431 = vtanh.f32 %v299_v52 }
  0x6f   : > { %433 = vtanh.f32 %v300_v53 }
  0x70   : > { %435 = vtanh.f32 %v301_v54 }
  0x71   : > { %437 = vtanh.f32 %v302_v55 }
  0x74   : > { %v424_v56 = vpop.eup %423 }
  0x75   : > { %v426_v57 = vpop.eup %425  ;;  %v311_v58 = vadd.f32 1.0, %v424_v56 }
  0x76   : > { %v428_v59 = vpop.eup %427  ;;  %v312_v60 = vadd.f32 1.0, %v426_v57 }
  0x77   : > { %v430_v61 = vpop.eup %429  ;;  %v319_v62 = vmul.f32 0.5, %v311_v58  ;;  %v313_v63 = vadd.f32 1.0, %v428_v59 }
  0x78   : > { %v432_v0 = vpop.eup %431  ;;  %v320_v1 = vmul.f32 0.5, %v312_v60  ;;  %v314_v2 = vadd.f32 1.0, %v430_v61 }
  0x79   : > { %v434_v3 = vpop.eup %433  ;;  %v327_v4 = vmul.f32 %v319_v62, %v489_v8  ;;  %v321_v5 = vmul.f32 0.5, %v313_v63  ;;  %v315_v6 = vadd.f32 1.0, %v432_v0 }
  0x7a   : > { %v436_v7 = vpop.eup %435  ;;  %v328_v16 = vmul.f32 %v320_v1, %v491_v9  ;;  %v322_v17 = vmul.f32 0.5, %v314_v2  ;;  %v316_v18 = vadd.f32 1.0, %v434_v3 }
  0x7b   : > { %v438_v19 = vpop.eup %437  ;;  %335 = vst [vmem:[%s542_s24] sm:$0xff] %v327_v4  ;;  %v329_v20 = vmul.f32 %v321_v5, %v493_v10  ;;  %v323_v21 = vmul.f32 0.5, %v315_v6  ;;  %v317_v22 = vadd.f32 1.0, %v436_v7 }
  0x7c   : > { %336 = vst [vmem:[%s542_s24 + $0x8] sm:$0xff] %v328_v16  ;;  %v330_v8 = vmul.f32 %v322_v17, %v495_v11  ;;  %v324_v23 = vmul.f32 0.5, %v316_v18  ;;  %v318_v24 = vadd.f32 1.0, %v438_v19 }
  0x7d   : > { %337 = vst [vmem:[%s542_s24 + $0x10] sm:$0xff] %v329_v20  ;;  %v331_v9 = vmul.f32 %v323_v21, %v497_v12  ;;  %v325_v25 = vmul.f32 0.5, %v317_v22 }
  0x7e   : > { %338 = vst [vmem:[%s542_s24 + $0x18] sm:$0xff] %v330_v8  ;;  %v332_v26 = vmul.f32 %v324_v23, %v499_v13  ;;  %v326_v27 = vmul.f32 0.5, %v318_v24 }
  0x7f   : > { %339 = vst [vmem:[%s542_s24 + $0x20] sm:$0xff] %v331_v9  ;;  %v333_v10 = vmul.f32 %v325_v25, %v501_v14 }
  0x80   : > { %340 = vst [vmem:[%s542_s24 + $0x28] sm:$0xff] %v332_v26  ;;  %v334_v28 = vmul.f32 %v326_v27, %v503_v15 }
  0x81   : > { %341 = vst [vmem:[%s542_s24 + $0x30] sm:$0xff] %v333_v10 }
  0x82   : > { %342 = vst [vmem:[%s542_s24 + $0x38] sm:$0xff] %v334_v28 }
  0x83 PF: > { %s13_s12 = sadd.s32 1, %s445_s12  }
  0x84   : > { %p10_p4 = scmp.ge.s32.totalorder %s13_s12, 4  }
  0x86   :  { %12 = sbr.rel (!%p10_p4) target bundleno = 1 (0x1), region = 62 }

// kernel: _lambda_.22
= control target key start
LH: loop header
LB: loop body
LE: loop exit
PB: predicated region body
PF: predicated region fallthrough
CT: control target
= control target key end

     0   :  { %s793_s21 = smov 0   ;;  %s981_s0 = inlined_call_operand.vmem [shape: f32[2,64,128], index: 0, kind: input, shape index: {}]   ;;  %s982_s1 = inlined_call_operand.vmem [shape: f32[128,128], index: 1, kind: input, shape index: {}]   ;;  %s983_s2 = inlined_call_operand.vmem [shape: f32[1,128], index: 2, kind: input, shape index: {}, may-alias: {2,4}]   ;;  %s984_s3 = inlined_call_operand.vmem [shape: f32[128,128], index: 3, kind: input, shape index: {}]   ;;  %s985_s4 = inlined_call_operand.vmem [shape: f32[1,128], index: 4, kind: input, shape index: {}, may-alias: {2,4}]   ;;  %s986_s5 = inlined_call_operand.vmem [shape: f32[2,64,128], index: 5, kind: output, shape index: {0}]   ;;  %s987_s6 = inlined_call_operand.vmem [shape: f32[2,1,128], index: 6, kind: output, shape index: {1}]  }
   0x1 LB: > { %s566_s22 = sadd.s32 4294967295, %s753_s21   ;;  %p570_p0 = scmp.ge.s32.totalorder %s753_s21, 1  ;;  %s753_s21 = sphi %s793_s21, %s17_s21  }
   0x2   : > { %p215_p1 = scmp.lt.s32.totalorder %s753_s21, 3 }
   0x4   : > { %p216_p2 = pnand %p570_p0, %p215_p1 }
   0x5   : > { %v283_v0 = vld [vmem:[%s982_s1] sm:$0xff] (!%p216_p2)  ;;  %v284_v1 = vld [vmem:[%s982_s1 + $0x8] sm:$0xff] (!%p216_p2)  ;;  %v285_v2 = vld [vmem:[%s982_s1 + $0x10] sm:$0xff] (!%p216_p2)  ;;  %v755_v3 = vmov (!%p216_p2), 0.0|0.0   ;;  %vm756_vm0 = vmmov (!%p216_p2), 0   ;;  %v757_v6 = vmov (!%p216_p2), 0.0  }
   0x6   : > { %219 = sbr.rel (%p216_p2) target bundleno = 509 (0x1fd), region = 40  ;;  %684 = vmatprep.subr.bf16.mxu0 (!%p216_p2), %v755_v3  ;;  %v685_v4 = vpack.c.bf16 (!%p216_p2), %v284_v1, %v283_v0  ;;  %v286_v5 = vld [vmem:[%s982_s1 + $0x18] sm:$0xff] (!%p216_p2)  ;;  %646 = vmatprep.mubr.msk.f32.mxu0 (!%p216_p2), %vm756_vm0, %v757_v6  ;;  %p248_p3 = scmp.lt.s32.totalorder (!%p216_p2), %s566_s22, 1  ;;  %v287_v8 = vld [vmem:[%s982_s1 + $0x20] sm:$0xff] (!%p216_p2)  ;;  %v288_v9 = vld [vmem:[%s982_s1 + $0x28] sm:$0xff] (!%p216_p2) }
   0x7   : > { %708 = vmatprep.subr.bf16.mxu1 (!%p216_p2), %v755_v3  ;;  %681 = vmatprep.mubr.msk.f32.mxu1 (!%p216_p2), %vm756_vm0, %v757_v6  ;;  %v688_v7 = vpack.c.bf16 (!%p216_p2), %v286_v5, %v285_v2  ;;  %v371_v10 = vld [vmem:[%s984_s3] sm:$0xff] (!%p216_p2)  ;;  %v372_v11 = vld [vmem:[%s984_s3 + $0x8] sm:$0xff] (!%p216_p2)  ;;  %v373_v13 = vld [vmem:[%s984_s3 + $0x10] sm:$0xff] (!%p216_p2)  ;;  %v691_v15 = vpack.c.bf16 (!%p216_p2), %v288_v9, %v287_v8 }
   0x8   : > { %686 = vmatpush3.bf16.msra.mxu0 (!%p216_p2), %v685_v4  ;;  %v709_v12 = vpack.c.bf16 (!%p216_p2), %v372_v11, %v371_v10  ;;  %v374_v14 = vld [vmem:[%s984_s3 + $0x18] sm:$0xff] (!%p216_p2)  ;;  %v289_v19 = vld [vmem:[%s982_s1 + $0x30] sm:$0xff] (!%p216_p2)  ;;  %v375_v24 = vld [vmem:[%s984_s3 + $0x20] sm:$0xff] (!%p216_p2) }
   0x9   : > { %687 = vmatprep.subr.bf16.mxu0 (!%p216_p2), %v755_v3  ;;  %v290_v20 = vld [vmem:[%s982_s1 + $0x38] sm:$0xff] (!%p216_p2)  ;;  %v712_v22 = vpack.c.bf16 (!%p216_p2), %v374_v14, %v373_v13  ;;  %v376_v25 = vld [vmem:[%s984_s3 + $0x28] sm:$0xff] (!%p216_p2)  ;;  %v291_v29 = vld [vmem:[%s982_s1 + $0x40] sm:$0xff] (!%p216_p2) }
   0xa   : > { %710 = vmatpush3.bf16.msra.mxu1 (!%p216_p2), %v709_v12  ;;  %v694_v27 = vpack.c.bf16 (!%p216_p2), %v290_v20, %v289_v19  ;;  %v292_v30 = vld [vmem:[%s982_s1 + $0x48] sm:$0xff] (!%p216_p2)  ;;  %v715_v32 = vpack.c.bf16 (!%p216_p2), %v376_v25, %v375_v24  ;;  %v377_v34 = vld [vmem:[%s984_s3 + $0x30] sm:$0xff] (!%p216_p2)  ;;  %v378_v35 = vld [vmem:[%s984_s3 + $0x38] sm:$0xff] (!%p216_p2)  ;;  %v464_v24 = vlaneseq (!%p216_p2) }
   0xb   : > { %711 = vmatprep.subr.bf16.mxu1 (!%p216_p2), %v755_v3  ;;  %v697_v37 = vpack.c.bf16 (!%p216_p2), %v292_v30, %v291_v29  ;;  %v293_v39 = vld [vmem:[%s982_s1 + $0x50] sm:$0xff] (!%p216_p2)  ;;  %v294_v40 = vld [vmem:[%s982_s1 + $0x58] sm:$0xff] (!%p216_p2)  ;;  %v718_v42 = vpack.c.bf16 (!%p216_p2), %v378_v35, %v377_v34  ;;  %v379_v44 = vld [vmem:[%s984_s3 + $0x40] sm:$0xff] (!%p216_p2) }
   0xc   : > { %689 = vmatpush3.bf16.msra.mxu0 (!%p216_p2), %v688_v7  ;;  %v380_v45 = vld [vmem:[%s984_s3 + $0x48] sm:$0xff] (!%p216_p2)  ;;  %v700_v47 = vpack.c.bf16 (!%p216_p2), %v294_v40, %v293_v39  ;;  %v295_v48 = vld [vmem:[%s982_s1 + $0x60] sm:$0xff] (!%p216_p2)  ;;  %v381_v52 = vld [vmem:[%s984_s3 + $0x50] sm:$0xff] (!%p216_p2)  ;;  %v465_v25 = vshrl.u32 (!%p216_p2), %v464_v24, 7 }
   0xd   : > { %s989_s22 = smov (!%p248_p3, %s566_s22), 1  ;;  %690 = vmatprep.subr.bf16.mxu0 %v755_v3  ;;  %v296_v49 = vld [vmem:[%s982_s1 + $0x68] sm:$0xff]  ;;  %v721_v51 = vpack.c.bf16 %v380_v45, %v379_v44  ;;  %v382_v53 = vld [vmem:[%s984_s3 + $0x58] sm:$0xff]  ;;  %v297_v56 = vld [vmem:[%s982_s1 + $0x70] sm:$0xff] }
   0xe   : > { %s578_s11 = sshll.u32 %s989_s22, 6  ;;  %713 = vmatpush3.bf16.msra.mxu1 %v712_v22  ;;  %v703_v55 = vpack.c.bf16 %v296_v49, %v295_v48  ;;  %v298_v57 = vld [vmem:[%s982_s1 + $0x78] sm:$0xff]  ;;  %v724_v59 = vpack.c.bf16 %v382_v53, %v381_v52  ;;  %v383_v60 = vld [vmem:[%s984_s3 + $0x60] sm:$0xff]  ;;  %v384_v61 = vld [vmem:[%s984_s3 + $0x68] sm:$0xff]  ;;  %s260_s9 = scalar_lea.vmem %s987_s6, %s989_s22 }
   0xf   : > { %s836_s18 = scalar_lea.vmem %s981_s0, %s578_s11  ;;  %714 = vmatprep.subr.bf16.mxu1 %v755_v3  ;;  %v706_v63 = vpack.c.bf16 %v298_v57, %v297_v56  ;;  %v727_v1 = vpack.c.bf16 %v384_v61, %v383_v60  ;;  %v385_v6 = vld [vmem:[%s984_s3 + $0x70] sm:$0xff]  ;;  %v386_v7 = vld [vmem:[%s984_s3 + $0x78] sm:$0xff]  ;;  %v299_v9 = vld [vmem:[%s983_s2] sm:$0x1]  ;;  %s257_s13 = scalar_lea.vmem %s986_s5, %s578_s11 }
  0x10   : > { %v845_v16 = vld [vmem:[%s836_s18] sm:$0xff]  ;;  %v848_v17 = vld [vmem:[%s836_s18 + $0x8] sm:$0xff]  ;;  %v851_v18 = vld [vmem:[%s836_s18 + $0x10] sm:$0xff]  ;;  %692 = vmatpush3.bf16.msra.mxu0 %v691_v15  ;;  %v730_v8 = vpack.c.bf16 %v386_v7, %v385_v6 }
  0x11   : > { %v269_v21 = vadd.f32 %v848_v17, %v845_v16  ;;  %v863_v23 = vld [vmem:[%s836_s18 + $0x18] sm:$0xff]  ;;  %v874_v28 = vld [vmem:[%s836_s18 + $0x20] sm:$0xff]  ;;  %693 = vmatprep.subr.bf16.mxu0 %v755_v3  ;;  %v885_v33 = vld [vmem:[%s836_s18 + $0x28] sm:$0xff] }
  0x12   : > { %v896_v38 = vld [vmem:[%s836_s18 + $0x30] sm:$0xff]  ;;  %716 = vmatpush3.bf16.msra.mxu1 %v715_v32  ;;  %v907_v43 = vld [vmem:[%s836_s18 + $0x38] sm:$0xff]  ;;  %v387_v13 = vld [vmem:[%s985_s4] sm:$0x1] }
  0x13   : > { %v270_v26 = vadd.f32 %v269_v21, %v851_v18  ;;  %717 = vmatprep.subr.bf16.mxu1 %v755_v3 }
  0x14   : > { %695 = vmatpush3.bf16.msra.mxu0 %v694_v27 }
  0x15   : > { %v271_v31 = vadd.f32 %v270_v26, %v863_v23  ;;  %696 = vmatprep.subr.bf16.mxu0 %v755_v3  ;;  %v466_v26 = vsub.s32 0, %v465_v25 }
  0x16   : > { %719 = vmatpush3.bf16.msra.mxu1 %v718_v42 }
  0x17   : > { %v272_v36 = vadd.f32 %v271_v31, %v874_v28  ;;  %720 = vmatprep.subr.bf16.mxu1 %v755_v3 }
  0x18   : > { %698 = vmatpush3.bf16.msra.mxu0 %v697_v37 }
  0x19   : > { %v273_v41 = vadd.f32 %v272_v36, %v885_v33  ;;  %699 = vmatprep.subr.bf16.mxu0 %v755_v3 }
  0x1a   : > { %722 = vmatpush3.bf16.msra.mxu1 %v721_v51 }
  0x1b   : > { %v274_v46 = vadd.f32 %v273_v41, %v896_v38  ;;  %723 = vmatprep.subr.bf16.mxu1 %v755_v3 }
  0x1c   : > { %701 = vmatpush3.bf16.msra.mxu0 %v700_v47 }
  0x1d   : > { %v275_v50 = vadd.f32 %v274_v46, %v907_v43  ;;  %702 = vmatprep.subr.bf16.mxu0 %v755_v3 }
  0x1e   : > { %725 = vmatpush3.bf16.msra.mxu1 %v724_v59 }
  0x1f   : > { %v276_v54 = vrot.slane %v275_v50, 4  ;;  %726 = vmatprep.subr.bf16.mxu1 %v755_v3 }
  0x20   : > { %704 = vmatpush3.bf16.msra.mxu0 %v703_v55 }
  0x21   : > { %v277_v58 = vadd.f32 %v276_v54, %v275_v50  ;;  %705 = vmatprep.subr.bf16.mxu0 %v755_v3 }
  0x22   : > { %728 = vmatpush3.bf16.msra.mxu1 %v727_v1 }
  0x23   : > { %v278_v62 = vrot.slane %v277_v58, 2  ;;  %729 = vmatprep.subr.bf16.mxu1 %v755_v3 }
  0x24   : > { %707 = vmatpush3.bf16.msra.mxu0 %v706_v63 }
  0x25   : > { %v279_v0 = vadd.f32 %v278_v62, %v277_v58 }
  0x26   : > { %731 = vmatpush3.bf16.msra.mxu1 %v730_v8 }
  0x27   : > { %v280_v2 = vrot.slane %v279_v0, 1 }
  0x29   : > { %v281_v4 = vadd.f32 %v280_v2, %v279_v0 }
  0x2b   : > { %v282_v5 = vmul.f32 0.015625, %v281_v4 }
  0x2d   : > { %647 = vmatmul.mubr.f32.vlgmr.msra.gmra.mrb[0].mxu0 %v282_v5 }
 0x100   : > { %v366_v10 = vpop.f32.mrb[0].mxu0 }
 0x101   : > { %v367_v11 = vadd.f32 %v366_v10, %v299_v9  ;;  %v648_v12 = vpop.f32.mrb[1].mxu0 }
 0x103   : > { %v370_v3 = vmax.f32 %v367_v11, 0.0 }
 0x105   : > { %682 = vmatmul.mubr.f32.vlgmr.msra.gmra.mrb[0].mxu1 %v370_v3 }
 0x1d8   : > { %v454_v14 = vpop.f32.mrb[0].mxu1 }
 0x1d9   : > { %v455_v15 = vadd.f32 %v454_v14, %v387_v13  ;;  %v683_v19 = vpop.f32.mrb[1].mxu1 }
 0x1db   : > { %v575_v20 = vmul.f32 -1.442695, %v455_v15 }
 0x1dd   : > { %743 = vpow2.f32 %v575_v20 }
 0x1e7   : > { %v744_v21 = vpop.eup %743 }
 0x1e8   : > { %v461_v22 = vadd.f32 1.0, %v744_v21 }
 0x1ea   : > { %745 = vrcp.f32 %v461_v22 }
 0x1f4   : > { %v746_v27 = vpop.eup %745 }
 0x1f5   : > { %v467_v29 = vrot.slane %v746_v27, %v466_v26  ;;  %v484_v30 = vmul.f32 %v746_v27, %v282_v5 }
 0x1f7   : > { %v468_v31 = vmul.f32 %v467_v29, %v845_v16  ;;  %v469_v32 = vmul.f32 %v467_v29, %v848_v17  ;;  %v470_v34 = vmul.f32 %v467_v29, %v851_v18  ;;  %v471_v35 = vmul.f32 %v467_v29, %v863_v23  ;;  %485 = vst [vmem:[%s260_s9] sm:$0x1] %v484_v30 }
 0x1f8   : > { %v472_v36 = vmul.f32 %v467_v29, %v874_v28  ;;  %v473_v37 = vmul.f32 %v467_v29, %v885_v33  ;;  %v474_v39 = vmul.f32 %v467_v29, %v896_v38  ;;  %v475_v40 = vmul.f32 %v467_v29, %v907_v43 }
 0x1f9   : > { %476 = vst [vmem:[%s257_s13] sm:$0xff] %v468_v31  ;;  %477 = vst [vmem:[%s257_s13 + $0x8] sm:$0xff] %v469_v32 }
 0x1fa   : > { %478 = vst [vmem:[%s257_s13 + $0x10] sm:$0xff] %v470_v34  ;;  %479 = vst [vmem:[%s257_s13 + $0x18] sm:$0xff] %v471_v35 }
 0x1fb   : > { %480 = vst [vmem:[%s257_s13 + $0x20] sm:$0xff] %v472_v36  ;;  %481 = vst [vmem:[%s257_s13 + $0x28] sm:$0xff] %v473_v37 }
 0x1fc   : > { %482 = vst [vmem:[%s257_s13 + $0x30] sm:$0xff] %v474_v39  ;;  %483 = vst [vmem:[%s257_s13 + $0x38] sm:$0xff] %v475_v40 }
 0x1fd PF: > { %s17_s21 = sadd.s32 1, %s753_s21  }
 0x1fe   : > { %p14_p4 = scmp.ge.s32.totalorder %s17_s21, 4  }
 0x200   :  { %16 = sbr.rel (!%p14_p4) target bundleno = 1 (0x1), region = 82 }

// kernel: _lambda_.16
= control target key start
LH: loop header
LB: loop body
LE: loop exit
PB: predicated region body
PF: predicated region fallthrough
CT: control target
= control target key end

     0   :  { %s1689_s12 = smov 0   ;;  %s2050_s0 = inlined_call_operand.vmem [shape: f32[2,4,90,3], index: 0, kind: input, shape index: {}]   ;;  %s2051_s1 = inlined_call_operand.vmem [shape: bf16[9,3,128], index: 1, kind: input, shape index: {}]   ;;  %s2052_s2 = inlined_call_operand.vmem [shape: f32[1,128], index: 2, kind: input, shape index: {}]   ;;  %s2053_s3 = inlined_call_operand.vmem [shape: f32[2,64,128], index: 3, kind: output, shape index: {}]  }
   0x1 LB: > { %s1282_s13 = sadd.s32 4294967295, %s1664_s12   ;;  %p1286_p0 = scmp.ge.s32.totalorder %s1664_s12, 1  ;;  %s1664_s12 = sphi %s1689_s12, %s13_s12  }
   0x2   : > { %p137_p1 = scmp.lt.s32.totalorder %s1664_s12, 3 }
   0x4   : > { %p138_p2 = pnand %p1286_p0, %p137_p1 }
   0x5   : > { %v1299_v0 = vld [vmem:[%s2051_s1 + $0x2] sm:$0x3] (!%p138_p2)  ;;  %vm220_vm0 = vcmask (!%p138_p2), 1040384   ;;  %vm221_vm1 = vcmask (!%p138_p2), 1041408   ;;  %v1666_v1 = vmov (!%p138_p2), 0.0   ;;  %v1667_v2 = vmov (!%p138_p2), 65535  }
   0x6   : > { %141 = sbr.rel (%p138_p2) target bundleno = 413 (0x19d), region = 32  ;;  %1446 = vmatprep.subr.bf16.mxu0 (!%p138_p2), %v1666_v1  ;;  %1644 = vmatprep.subr.bf16.mxu1 (!%p138_p2), %v1666_v1  ;;  %v222_v3 = vsel (!%p138_p2), %vm220_vm0, 4294967295, %v1667_v2  ;;  %p161_p3 = scmp.lt.s32.totalorder (!%p138_p2), %s1282_s13, 1  ;;  %vm1668_vm2 = vmmov (!%p138_p2), 0   ;;  %v1310_v6 = vld [vmem:[%s2051_s1 + $0x4] sm:$0x3] (!%p138_p2) }
   0x7   : > { %v1702_v4 = vsel (!%p138_p2), %vm221_vm1, %v222_v3, 0  ;;  %1448 = vmatprep.mubr.msk.bf16.mxu0 (!%p138_p2), %vm1668_vm2, %v1666_v1  ;;  %1460 = vmatprep.mubr.msk.bf16.mxu1 (!%p138_p2), %vm1668_vm2, %v1666_v1  ;;  %v186_v7 = vld [vmem:[%s2051_s1] sm:$0x3] (!%p138_p2)  ;;  %vm204_vm3 = vcmask (!%p138_p2), 23552   ;;  %v1325_v37 = vld [vmem:[%s2051_s1 + $0x6] sm:$0x3] (!%p138_p2) }
   0x8   : > { %v225_v5 = vand.u32 (!%p138_p2), %v1299_v0, %v1702_v4  ;;  %v421_v11 = vand.u32 (!%p138_p2), %v1310_v6, %v1702_v4  ;;  %v315_v14 = vand.u32 (!%p138_p2), %v1702_v4, %v186_v7  ;;  %v537_v40 = vand.u32 (!%p138_p2), %v1325_v37, %v1702_v4  ;;  %v1340_v44 = vld [vmem:[%s2051_s1 + $0x8] sm:$0x3] (!%p138_p2)  ;;  %v1355_v61 = vld [vmem:[%s2051_s1 + $0xa] sm:$0x3] (!%p138_p2)  ;;  %v1361_v7 = vld [vmem:[%s2051_s1 + $0xc] sm:$0x3] (!%p138_p2) }
   0x9   : > { %v653_v47 = vand.u32 (!%p138_p2), %v1340_v44, %v1702_v4  ;;  %v768_v0 = vand.u32 (!%p138_p2), %v1355_v61, %v1702_v4 }
   0xa   : > { %1447 = vmatpush3.bf16.msra.mxu0 (!%p138_p2), %v225_v5  ;;  %1645 = vmatpush3.bf16.msra.mxu1 (!%p138_p2), %v225_v5 }
   0xb   : > { %1490 = vmatprep.subr.bf16.mxu0 (!%p138_p2), %v1666_v1  ;;  %1468 = vmatprep.subr.bf16.mxu1 (!%p138_p2), %v1666_v1 }
   0xd   : > { %s2055_s13 = smov (!%p161_p3, %s1282_s13), 1 }
   0xe   : > { %s1646_s16 = smul.u32 384, %s2055_s13  ;;  %s1391_s9 = sshll.u32 %s2055_s13, 6 }
  0x10   : > { %s1723_s23 = scalar_lea.vmem %s2050_s0, %s1646_s16  ;;  %s2019_s16 = scalar_lea.vmem %s2053_s3, %s1391_s9 }
  0x11   : > { %v1290_v8 = vld [vmem:[%s1723_s23 + $0x60] sm:$0xff]  ;;  %v1291_v9 = vld [vmem:[%s1723_s23 + $0x68] sm:$0xff]  ;;  %v1296_v10 = vld [vmem:[%s1723_s23 + $0x90] sm:$0xff] }
  0x12   : > { %v197_v12 = vpack.c.bf16 %v1291_v9, %v1290_v8  ;;  %v1297_v13 = vld [vmem:[%s1723_s23 + $0x98] sm:$0xff]  ;;  %v1292_v16 = vld [vmem:[%s1723_s23 + $0x70] sm:$0xff]  ;;  %v1298_v18 = vld [vmem:[%s1723_s23 + $0xa0] sm:$0xff] }
  0x13   : > { %v200_v15 = vpack.c.bf16 %v1297_v13, %v1296_v10  ;;  %v1293_v17 = vld [vmem:[%s1723_s23 + $0x78] sm:$0xff]  ;;  %v1739_v19 = vld [vmem:[%s1723_s23 + $0x9] sm:$0xff]  ;;  %v1754_v24 = vld [vmem:[%s1723_s23 + $0x21] sm:$0xff]  ;;  %v201_v26 = vpack.c.bf16 %v1298_v18, %v1298_v18  ;;  %v883_v10 = vand.u32 %v1361_v7, %v1702_v4 }
  0x14   : > { %1449 = vmatmul.mubr.msk.bf16.vlgmr.msra.gmra.mrb[0].mxu0 %vm204_vm3, %v197_v12  ;;  %v1742_v20 = vld [vmem:[%s1723_s23 + $0x11] sm:$0xff]  ;;  %v198_v22 = vpack.c.bf16 %v1293_v17, %v1292_v16  ;;  %v1751_v23 = vld [vmem:[%s1723_s23 + $0x19] sm:$0xff]  ;;  %v1757_v25 = vld [vmem:[%s1723_s23 + $0x29] sm:$0xff] }
  0x15   : > { %1461 = vmatmul.mubr.msk.bf16.vlgmr.msra.gmra.mrb[0].mxu1 %vm204_vm3, %v200_v15  ;;  %1491 = vmatpush3.bf16.msra.mxu0 %v421_v11  ;;  %v860_v21 = vpack.c.bf16 %v1742_v20, %v1739_v19  ;;  %v1760_v27 = vld [vmem:[%s1723_s23 + $0x31] sm:$0xff]  ;;  %v1763_v28 = vld [vmem:[%s1723_s23 + $0x39] sm:$0xff]  ;;  %v1766_v29 = vld [vmem:[%s1723_s23 + $0x41] sm:$0xff]  ;;  %v861_v30 = vpack.c.bf16 %v1754_v24, %v1751_v23  ;;  %v399_v50 = vpack.c.bf16 %v1751_v23, %v1742_v20 }
  0x16   : > { %1469 = vmatpush3.bf16.msra.mxu1 %v315_v14  ;;  %1452 = vmatprep.mubr.msk.bf16.mxu0 %vm1668_vm2, %v1666_v1  ;;  %v862_v31 = vpack.c.bf16 %v1760_v27, %v1757_v25  ;;  %v863_v32 = vpack.c.bf16 %v1766_v29, %v1763_v28  ;;  %v1294_v33 = vld [vmem:[%s1723_s23 + $0x80] sm:$0xff]  ;;  %v1295_v34 = vld [vmem:[%s1723_s23 + $0x88] sm:$0xff]  ;;  %v174_v42 = vld [vmem:[%s1723_s23 + $0x10] sm:$0xff]  ;;  %v400_v54 = vpack.c.bf16 %v1757_v25, %v1754_v24 }
  0x17   : > { %1464 = vmatprep.mubr.msk.bf16.mxu1 %vm1668_vm2, %v1666_v1  ;;  %1512 = vmatprep.subr.bf16.mxu1 %v1666_v1  ;;  %v172_v35 = vld [vmem:[%s1723_s23] sm:$0xff]  ;;  %v173_v36 = vld [vmem:[%s1723_s23 + $0x8] sm:$0xff]  ;;  %v199_v38 = vpack.c.bf16 %v1295_v34, %v1294_v33  ;;  %v175_v43 = vld [vmem:[%s1723_s23 + $0x18] sm:$0xff]  ;;  %v401_v57 = vpack.c.bf16 %v1763_v28, %v1760_v27  ;;  %v402_v62 = vpack.c.bf16 %v1766_v29, %v1766_v29 }
  0x18   : > { %1534 = vmatprep.subr.bf16.mxu0 %v1666_v1  ;;  %v181_v39 = vpack.c.bf16 %v173_v36, %v172_v35  ;;  %v389_v41 = vld [vmem:[%s1723_s23 + $0x1] sm:$0xff]  ;;  %v182_v46 = vpack.c.bf16 %v175_v43, %v174_v42  ;;  %v178_v52 = vld [vmem:[%s1723_s23 + $0x30] sm:$0xff]  ;;  %v179_v53 = vld [vmem:[%s1723_s23 + $0x38] sm:$0xff] }
  0x19   : > { %v398_v45 = vpack.c.bf16 %v1739_v19, %v389_v41  ;;  %v176_v48 = vld [vmem:[%s1723_s23 + $0x20] sm:$0xff]  ;;  %v177_v49 = vld [vmem:[%s1723_s23 + $0x28] sm:$0xff]  ;;  %v184_v55 = vpack.c.bf16 %v179_v53, %v178_v52  ;;  %v1318_v5 = vld [vmem:[%s1723_s23 + $0xd0] sm:$0xff] }
  0x1a   : > { %v183_v51 = vpack.c.bf16 %v177_v49, %v176_v48  ;;  %v180_v56 = vld [vmem:[%s1723_s23 + $0x40] sm:$0xff]  ;;  %v1317_v60 = vld [vmem:[%s1723_s23 + $0xc8] sm:$0xff]  ;;  %v1319_v6 = vld [vmem:[%s1723_s23 + $0xd8] sm:$0xff] }
  0x1b   : > { %v185_v58 = vpack.c.bf16 %v180_v56, %v180_v56  ;;  %v1316_v59 = vld [vmem:[%s1723_s23 + $0xc0] sm:$0xff]  ;;  %v1332_v3 = vld [vmem:[%s1723_s23 + $0x128] sm:$0xff]  ;;  %v515_v9 = vpack.c.bf16 %v1319_v6, %v1318_v5  ;;  %v1333_v11 = vld [vmem:[%s1723_s23 + $0x130] sm:$0xff] }
  0x1c   : > { %1453 = vmatmul.mubr.msk.bf16.gmra.mrb[4].mxu0 %vm204_vm3, %v198_v22  ;;  %v514_v63 = vpack.c.bf16 %v1317_v60, %v1316_v59  ;;  %v1331_v2 = vld [vmem:[%s1723_s23 + $0x120] sm:$0xff]  ;;  %v1334_v12 = vld [vmem:[%s1723_s23 + $0x138] sm:$0xff]  ;;  %v1321_v14 = vld [vmem:[%s1723_s23 + $0xe8] sm:$0xff] }
  0x1d   : > { %1465 = vmatmul.mubr.msk.bf16.gmra.mrb[4].mxu1 %vm204_vm3, %v201_v26  ;;  %1456 = vmatprep.mubr.msk.bf16.mxu0 %vm1668_vm2, %v1666_v1  ;;  %v630_v8 = vpack.c.bf16 %v1332_v3, %v1331_v2  ;;  %v1320_v13 = vld [vmem:[%s1723_s23 + $0xe0] sm:$0xff]  ;;  %v631_v15 = vpack.c.bf16 %v1334_v12, %v1333_v11  ;;  %v1336_v18 = vld [vmem:[%s1723_s23 + $0x148] sm:$0xff]  ;;  %v1322_v22 = vld [vmem:[%s1723_s23 + $0xf0] sm:$0xff] }
  0x1e   : > { %1470 = vmatprep.mubr.msk.bf16.mxu1 %vm1668_vm2, %v1666_v1  ;;  %v516_v16 = vpack.c.bf16 %v1321_v14, %v1320_v13  ;;  %v1335_v17 = vld [vmem:[%s1723_s23 + $0x140] sm:$0xff]  ;;  %v1323_v26 = vld [vmem:[%s1723_s23 + $0xf8] sm:$0xff]  ;;  %v1337_v35 = vld [vmem:[%s1723_s23 + $0x150] sm:$0xff] }
  0x1f   : > { %v632_v33 = vpack.c.bf16 %v1336_v18, %v1335_v17  ;;  %v517_v34 = vpack.c.bf16 %v1323_v26, %v1322_v22  ;;  %v1338_v36 = vld [vmem:[%s1723_s23 + $0x158] sm:$0xff]  ;;  %v1324_v37 = vld [vmem:[%s1723_s23 + $0x100] sm:$0xff]  ;;  %v1347_v42 = vld [vmem:[%s1723_s23 + $0xc9] sm:$0xff] }
  0x20   : > { %v1346_v41 = vld [vmem:[%s1723_s23 + $0xc1] sm:$0xff]  ;;  %v1376_v43 = vld [vmem:[%s2051_s1 + $0xe] sm:$0x3]  ;;  %v1349_v48 = vld [vmem:[%s1723_s23 + $0xd9] sm:$0xff] }
  0x21   : > { %v1382_v49 = vld [vmem:[%s2051_s1 + $0x10] sm:$0x3]  ;;  %v1350_v52 = vld [vmem:[%s1723_s23 + $0xe1] sm:$0xff]  ;;  %v1353_v19 = vld [vmem:[%s1723_s23 + $0xf9] sm:$0xff] }
  0x22   : > { %v1351_v53 = vld [vmem:[%s1723_s23 + $0xe9] sm:$0xff]  ;;  %v1368_v27 = vld [vmem:[%s1723_s23 + $0x71] sm:$0xff]  ;;  %v1373_v3 = vld [vmem:[%s1723_s23 + $0x99] sm:$0xff] }
  0x23   : > { %v859_v24 = vld [vmem:[%s1723_s23 + $0x49] sm:$0xff]  ;;  %v1082_v29 = vld [vmem:[%s1723_s23 + $0x12] sm:$0xff]  ;;  %v1374_v5 = vld [vmem:[%s1723_s23 + $0xa1] sm:$0xff] }
  0x24   : > { %1457 = vmatmul.mubr.msk.bf16.gmra.mrb[8].mxu0 %vm204_vm3, %v199_v38  ;;  %v633_v38 = vpack.c.bf16 %v1338_v36, %v1337_v35  ;;  %v1367_v25 = vld [vmem:[%s1723_s23 + $0x69] sm:$0xff]  ;;  %v1372_v61 = vld [vmem:[%s1723_s23 + $0x91] sm:$0xff]  ;;  %v978_v7 = vpack.c.bf16 %v1374_v5, %v1373_v3 }
  0x25   : > { %1471 = vmatmul.mubr.msk.bf16.vlgmr.msra.gmra.mrb[8].mxu1 %vm204_vm3, %v181_v39  ;;  %1492 = vmatprep.mubr.msk.bf16.mxu0 %vm1668_vm2, %v1666_v1  ;;  %v518_v39 = vpack.c.bf16 %v1324_v37, %v1324_v37  ;;  %v1081_v28 = vld [vmem:[%s1723_s23 + $0xa] sm:$0xff]  ;;  %v1084_v59 = vld [vmem:[%s1723_s23 + $0x22] sm:$0xff]  ;;  %v1086_v2 = vld [vmem:[%s1723_s23 + $0x32] sm:$0xff] }
  0x26   : > { %1513 = vmatpush3.bf16.msra.mxu1 %v537_v40  ;;  %1474 = vmatprep.mubr.msk.bf16.mxu1 %vm1668_vm2, %v1666_v1  ;;  %v1339_v40 = vld [vmem:[%s1723_s23 + $0x160] sm:$0xff]  ;;  %v1090_v56 = vpack.c.bf16 %v1082_v29, %v1081_v28  ;;  %v1371_v60 = vld [vmem:[%s1723_s23 + $0x89] sm:$0xff] }
  0x27   : > { %1556 = vmatprep.subr.bf16.mxu1 %v1666_v1  ;;  %v634_v44 = vpack.c.bf16 %v1339_v40, %v1339_v40  ;;  %v1089_v13 = vld [vmem:[%s1723_s23 + $0x4a] sm:$0xff] }
  0x28   : > { %v1094_v14 = vpack.c.bf16 %v1089_v13, %v1089_v13 }
  0x2c   : > { %1493 = vmatmul.mubr.msk.bf16.vlgmr.msra.gmra.mrb[12].mxu0 %vm204_vm3, %v398_v45  ;;  %v745_v45 = vpack.c.bf16 %v1347_v42, %v1346_v41 }
  0x2d   : > { %1475 = vmatmul.mubr.msk.bf16.gmra.mrb[12].mxu1 %vm204_vm3, %v182_v46  ;;  %1535 = vmatpush3.bf16.msra.mxu0 %v653_v47  ;;  %v998_v46 = vand.u32 %v1376_v43, %v1702_v4  ;;  %v1348_v47 = vld [vmem:[%s1723_s23 + $0xd1] sm:$0xff] }
  0x2e   : > { %1478 = vmatprep.mubr.msk.bf16.mxu1 %vm1668_vm2, %v1666_v1  ;;  %1496 = vmatprep.mubr.msk.bf16.mxu0 %vm1668_vm2, %v1666_v1 }
  0x2f   : > { %1578 = vmatprep.subr.bf16.mxu0 %v1666_v1 }
  0x34   : > { %1497 = vmatmul.mubr.msk.bf16.gmra.mrb[16].mxu0 %vm204_vm3, %v399_v50  ;;  %v746_v50 = vpack.c.bf16 %v1349_v48, %v1348_v47 }
  0x35   : > { %1479 = vmatmul.mubr.msk.bf16.gmra.mrb[16].mxu1 %vm204_vm3, %v183_v51  ;;  %1500 = vmatprep.mubr.msk.bf16.mxu0 %vm1668_vm2, %v1666_v1  ;;  %v1113_v51 = vand.u32 %v1382_v49, %v1702_v4  ;;  %v1352_v4 = vld [vmem:[%s1723_s23 + $0xf1] sm:$0xff] }
  0x36   : > { %1482 = vmatprep.mubr.msk.bf16.mxu1 %vm1668_vm2, %v1666_v1  ;;  %v748_v20 = vpack.c.bf16 %v1353_v19, %v1352_v4 }
  0x3c   : > { %1501 = vmatmul.mubr.msk.bf16.gmra.mrb[20].mxu0 %vm204_vm3, %v400_v54  ;;  %v747_v54 = vpack.c.bf16 %v1351_v53, %v1350_v52 }
  0x3d   : > { %1483 = vmatmul.mubr.msk.bf16.gmra.mrb[20].mxu1 %vm204_vm3, %v184_v55  ;;  %1504 = vmatprep.mubr.msk.bf16.mxu0 %vm1668_vm2, %v1666_v1  ;;  %v1370_v55 = vld [vmem:[%s1723_s23 + $0x81] sm:$0xff] }
  0x3e   : > { %1486 = vmatprep.mubr.msk.bf16.mxu1 %vm1668_vm2, %v1666_v1 }
  0x44   : > { %1505 = vmatmul.mubr.msk.bf16.gmra.mrb[24].mxu0 %vm204_vm3, %v401_v57 }
  0x45   : > { %1487 = vmatmul.mubr.msk.bf16.gmra.mrb[24].mxu1 %vm204_vm3, %v185_v58  ;;  %1508 = vmatprep.mubr.msk.bf16.mxu0 %vm1668_vm2, %v1666_v1  ;;  %v1083_v58 = vld [vmem:[%s1723_s23 + $0x1a] sm:$0xff] }
  0x46   : > { %1514 = vmatprep.mubr.msk.bf16.mxu1 %vm1668_vm2, %v1666_v1 }
  0x4c   : > { %1509 = vmatmul.mubr.msk.bf16.gmra.mrb[28].mxu0 %vm204_vm3, %v402_v62  ;;  %v1091_v62 = vpack.c.bf16 %v1084_v59, %v1083_v58 }
  0x4d   : > { %1515 = vmatmul.mubr.msk.bf16.vlgmr.msra.gmra.mrb[28].mxu1 %vm204_vm3, %v514_v63  ;;  %1536 = vmatprep.mubr.msk.bf16.mxu0 %vm1668_vm2, %v1666_v1  ;;  %v977_v63 = vpack.c.bf16 %v1372_v61, %v1371_v60 }
  0x4e   : > { %1557 = vmatpush3.bf16.msra.mxu1 %v768_v0  ;;  %1518 = vmatprep.mubr.msk.bf16.mxu1 %vm1668_vm2, %v1666_v1  ;;  %v1085_v0 = vld [vmem:[%s1723_s23 + $0x2a] sm:$0xff] }
  0x4f   : > { %1600 = vmatprep.subr.bf16.mxu1 %v1666_v1  ;;  %v1092_v6 = vpack.c.bf16 %v1086_v2, %v1085_v0 }
  0x54   : > { %1537 = vmatmul.mubr.msk.bf16.vlgmr.msra.gmra.mrb[32].mxu0 %vm204_vm3, %v630_v8  ;;  %v1087_v8 = vld [vmem:[%s1723_s23 + $0x3a] sm:$0xff] }
  0x55   : > { %1519 = vmatmul.mubr.msk.bf16.gmra.mrb[32].mxu1 %vm204_vm3, %v515_v9  ;;  %1579 = vmatpush3.bf16.msra.mxu0 %v883_v10  ;;  %v1088_v9 = vld [vmem:[%s1723_s23 + $0x42] sm:$0xff] }
  0x56   : > { %1522 = vmatprep.mubr.msk.bf16.mxu1 %vm1668_vm2, %v1666_v1  ;;  %1540 = vmatprep.mubr.msk.bf16.mxu0 %vm1668_vm2, %v1666_v1  ;;  %v1375_v10 = vld [vmem:[%s1723_s23 + $0xa9] sm:$0xff]  ;;  %v1093_v11 = vpack.c.bf16 %v1088_v9, %v1087_v8 }
  0x57   : > { %1622 = vmatprep.subr.bf16.mxu0 %v1666_v1  ;;  %v979_v12 = vpack.c.bf16 %v1375_v10, %v1375_v10 }
  0x5c   : > { %1541 = vmatmul.mubr.msk.bf16.gmra.mrb[36].mxu0 %vm204_vm3, %v631_v15 }
  0x5d   : > { %1523 = vmatmul.mubr.msk.bf16.gmra.mrb[36].mxu1 %vm204_vm3, %v516_v16  ;;  %1544 = vmatprep.mubr.msk.bf16.mxu0 %vm1668_vm2, %v1666_v1 }
  0x5e   : > { %1526 = vmatprep.mubr.msk.bf16.mxu1 %vm1668_vm2, %v1666_v1 }
  0x64   : > { %1545 = vmatmul.mubr.msk.bf16.gmra.mrb[40].mxu0 %vm204_vm3, %v632_v33 }
  0x65   : > { %1527 = vmatmul.mubr.msk.bf16.gmra.mrb[40].mxu1 %vm204_vm3, %v517_v34  ;;  %1548 = vmatprep.mubr.msk.bf16.mxu0 %vm1668_vm2, %v1666_v1 }
  0x66   : > { %1530 = vmatprep.mubr.msk.bf16.mxu1 %vm1668_vm2, %v1666_v1 }
  0x6c   : > { %1549 = vmatmul.mubr.msk.bf16.gmra.mrb[44].mxu0 %vm204_vm3, %v633_v38 }
  0x6d   : > { %1531 = vmatmul.mubr.msk.bf16.gmra.mrb[44].mxu1 %vm204_vm3, %v518_v39  ;;  %1552 = vmatprep.mubr.msk.bf16.mxu0 %vm1668_vm2, %v1666_v1 }
  0x6e   : > { %1558 = vmatprep.mubr.msk.bf16.mxu1 %vm1668_vm2, %v1666_v1 }
  0x74   : > { %1553 = vmatmul.mubr.msk.bf16.gmra.mrb[48].mxu0 %vm204_vm3, %v634_v44 }
  0x75   : > { %1559 = vmatmul.mubr.msk.bf16.vlgmr.msra.gmra.mrb[48].mxu1 %vm204_vm3, %v745_v45  ;;  %1580 = vmatprep.mubr.msk.bf16.mxu0 %vm1668_vm2, %v1666_v1 }
  0x76   : > { %1601 = vmatpush3.bf16.msra.mxu1 %v998_v46  ;;  %1562 = vmatprep.mubr.msk.bf16.mxu1 %vm1668_vm2, %v1666_v1 }
  0x7c   : > { %1581 = vmatmul.mubr.msk.bf16.vlgmr.msra.gmra.mrb[52].mxu0 %vm204_vm3, %v860_v21  ;;  %v1354_v21 = vld [vmem:[%s1723_s23 + $0x101] sm:$0xff] }
  0x7d   : > { %1563 = vmatmul.mubr.msk.bf16.gmra.mrb[52].mxu1 %vm204_vm3, %v746_v50  ;;  %1623 = vmatpush3.bf16.msra.mxu0 %v1113_v51  ;;  %v749_v23 = vpack.c.bf16 %v1354_v21, %v1354_v21 }
  0x7e   : > { %1566 = vmatprep.mubr.msk.bf16.mxu1 %vm1668_vm2, %v1666_v1  ;;  %1584 = vmatprep.mubr.msk.bf16.mxu0 %vm1668_vm2, %v1666_v1 }
  0x84   : > { %1585 = vmatmul.mubr.msk.bf16.gmra.mrb[56].mxu0 %vm204_vm3, %v861_v30  ;;  %v864_v30 = vpack.c.bf16 %v859_v24, %v859_v24 }
  0x85   : > { %1567 = vmatmul.mubr.msk.bf16.gmra.mrb[56].mxu1 %vm204_vm3, %v747_v54  ;;  %1588 = vmatprep.mubr.msk.bf16.mxu0 %vm1668_vm2, %v1666_v1 }
  0x86   : > { %1570 = vmatprep.mubr.msk.bf16.mxu1 %vm1668_vm2, %v1666_v1 }
  0x8c   : > { %1589 = vmatmul.mubr.msk.bf16.gmra.mrb[60].mxu0 %vm204_vm3, %v862_v31  ;;  %v975_v31 = vpack.c.bf16 %v1368_v27, %v1367_v25 }
  0x8d   : > { %1571 = vmatmul.mubr.msk.bf16.gmra.mrb[60].mxu1 %vm204_vm3, %v748_v20  ;;  %1592 = vmatprep.mubr.msk.bf16.mxu0 %vm1668_vm2, %v1666_v1 }
  0x8e   : > { %1574 = vmatprep.mubr.msk.bf16.mxu1 %vm1668_vm2, %v1666_v1 }
  0x94   : > { %1593 = vmatmul.mubr.msk.bf16.gmra.mrb[64].mxu0 %vm204_vm3, %v863_v32  ;;  %v1369_v32 = vld [vmem:[%s1723_s23 + $0x79] sm:$0xff] }
  0x95   : > { %1575 = vmatmul.mubr.msk.bf16.gmra.mrb[64].mxu1 %vm204_vm3, %v749_v23  ;;  %1596 = vmatprep.mubr.msk.bf16.mxu0 %vm1668_vm2, %v1666_v1  ;;  %v976_v57 = vpack.c.bf16 %v1370_v55, %v1369_v32 }
  0x96   : > { %1602 = vmatprep.mubr.msk.bf16.mxu1 %vm1668_vm2, %v1666_v1 }
  0x9c   : > { %1597 = vmatmul.mubr.msk.bf16.gmra.mrb[68].mxu0 %vm204_vm3, %v864_v30 }
  0x9d   : > { %1603 = vmatmul.mubr.msk.bf16.vlgmr.msra.gmra.mrb[68].mxu1 %vm204_vm3, %v975_v31  ;;  %1624 = vmatprep.mubr.msk.bf16.mxu0 %vm1668_vm2, %v1666_v1 }
  0x9e   : > { %1606 = vmatprep.mubr.msk.bf16.mxu1 %vm1668_vm2, %v1666_v1 }
  0xa4   : > { %1625 = vmatmul.mubr.msk.bf16.vlgmr.msra.gmra.mrb[72].mxu0 %vm204_vm3, %v1090_v56 }
  0xa5   : > { %1607 = vmatmul.mubr.msk.bf16.gmra.mrb[72].mxu1 %vm204_vm3, %v976_v57  ;;  %1628 = vmatprep.mubr.msk.bf16.mxu0 %vm1668_vm2, %v1666_v1 }
  0xa6   : > { %1610 = vmatprep.mubr.msk.bf16.mxu1 %vm1668_vm2, %v1666_v1 }
  0xac   : > { %1629 = vmatmul.mubr.msk.bf16.gmra.mrb[76].mxu0 %vm204_vm3, %v1091_v62 }
  0xad   : > { %1611 = vmatmul.mubr.msk.bf16.gmra.mrb[76].mxu1 %vm204_vm3, %v977_v63  ;;  %1632 = vmatprep.mubr.msk.bf16.mxu0 %vm1668_vm2, %v1666_v1 }
  0xae   : > { %1614 = vmatprep.mubr.msk.bf16.mxu1 %vm1668_vm2, %v1666_v1 }
  0xb4   : > { %1633 = vmatmul.mubr.msk.bf16.gmra.mrb[80].mxu0 %vm204_vm3, %v1092_v6 }
  0xb5   : > { %1615 = vmatmul.mubr.msk.bf16.gmra.mrb[80].mxu1 %vm204_vm3, %v978_v7  ;;  %1636 = vmatprep.mubr.msk.bf16.mxu0 %vm1668_vm2, %v1666_v1 }
  0xb6   : > { %1618 = vmatprep.mubr.msk.bf16.mxu1 %vm1668_vm2, %v1666_v1 }
  0xbc   : > { %1637 = vmatmul.mubr.msk.bf16.gmra.mrb[84].mxu0 %vm204_vm3, %v1093_v11 }
  0xbd   : > { %1619 = vmatmul.mubr.msk.bf16.gmra.mrb[84].mxu1 %vm204_vm3, %v979_v12  ;;  %1640 = vmatprep.mubr.msk.bf16.mxu0 %vm1668_vm2, %v1666_v1 }
  0xc4   : > { %1641 = vmatmul.mubr.msk.bf16.gmra.mrb[88].mxu0 %vm204_vm3, %v1094_v14 }
  0xe7   : > { %v261_v15 = vpop.f32.mrb[0].mxu0 }
  0xe8   : > { %v1450_v16 = vpop.f32.mrb[1].mxu0  ;;  %v285_v17 = vpop.f32.mrb[0].mxu1 }
  0xe9   : > { %v264_v18 = vpop.f32.mrb[2].mxu0  ;;  %v1462_v22 = vpop.f32.mrb[1].mxu1 }
  0xea   : > { %v1451_v26 = vpop.f32.mrb[3].mxu0  ;;  %v288_v33 = vpop.f32.mrb[2].mxu1 }
  0xeb   : > { %v1463_v34 = vpop.f32.mrb[3].mxu1 }
  0xef   : > { %v269_v35 = vpop.f32.mrb[4].mxu0 }
  0xf0   : > { %v1454_v36 = vpop.f32.mrb[5].mxu0  ;;  %v293_v37 = vpop.f32.mrb[4].mxu1 }
  0xf1   : > { %v272_v38 = vpop.f32.mrb[6].mxu0  ;;  %v1466_v39 = vpop.f32.mrb[5].mxu1 }
  0xf2   : > { %v1455_v40 = vpop.f32.mrb[7].mxu0  ;;  %v296_v41 = vpop.f32.mrb[6].mxu1 }
  0xf3   : > { %v1467_v1 = vpop.f32.mrb[7].mxu1 }
  0xf7   : > { %v277_v42 = vpop.f32.mrb[8].mxu0 }
  0xf8   : > { %v351_v43 = vpop.f32.mrb[8].mxu1  ;;  %v1458_v44 = vpop.f32.mrb[9].mxu0 }
  0xf9   : > { %v352_v45 = vadd.f32 %v351_v43, %v261_v15  ;;  %v1472_v46 = vpop.f32.mrb[9].mxu1  ;;  %v280_v47 = vpop.f32.mrb[10].mxu0 }
  0xfa   : > { %v354_v48 = vpop.f32.mrb[10].mxu1  ;;  %v1459_v49 = vpop.f32.mrb[11].mxu0 }
  0xfb   : > { %v355_v50 = vadd.f32 %v354_v48, %v264_v18  ;;  %v1473_v51 = vpop.f32.mrb[11].mxu1 }
  0xff   : > { %v457_v52 = vpop.f32.mrb[12].mxu0 }
 0x100   : > { %v359_v53 = vpop.f32.mrb[12].mxu1  ;;  %v495_v54 = vadd.f32 %v457_v52, %v352_v45  ;;  %v1494_v4 = vpop.f32.mrb[13].mxu0 }
 0x101   : > { %v360_v19 = vadd.f32 %v359_v53, %v269_v35  ;;  %v1476_v20 = vpop.f32.mrb[13].mxu1  ;;  %v460_v21 = vpop.f32.mrb[14].mxu0 }
 0x102   : > { %v362_v23 = vpop.f32.mrb[14].mxu1  ;;  %v496_v24 = vadd.f32 %v460_v21, %v355_v50  ;;  %v1495_v25 = vpop.f32.mrb[15].mxu0 }
 0x103   : > { %v363_v27 = vadd.f32 %v362_v23, %v272_v38  ;;  %v1477_v30 = vpop.f32.mrb[15].mxu1 }
 0x107   : > { %v465_v31 = vpop.f32.mrb[16].mxu0 }
 0x108   : > { %v367_v28 = vpop.f32.mrb[16].mxu1  ;;  %v497_v29 = vadd.f32 %v465_v31, %v360_v19  ;;  %v1498_v32 = vpop.f32.mrb[17].mxu0 }
 0x109   : > { %v368_v55 = vadd.f32 %v367_v28, %v277_v42  ;;  %v1480_v56 = vpop.f32.mrb[17].mxu1  ;;  %v468_v57 = vpop.f32.mrb[18].mxu0 }
 0x10a   : > { %v370_v58 = vpop.f32.mrb[18].mxu1  ;;  %v498_v59 = vadd.f32 %v468_v57, %v363_v27  ;;  %v1499_v60 = vpop.f32.mrb[19].mxu0 }
 0x10b   : > { %v371_v61 = vadd.f32 %v370_v58, %v280_v47  ;;  %v1481_v62 = vpop.f32.mrb[19].mxu1 }
 0x10f   : > { %v473_v63 = vpop.f32.mrb[20].mxu0 }
 0x110   : > { %v375_v0 = vpop.f32.mrb[20].mxu1  ;;  %v499_v2 = vadd.f32 %v473_v63, %v368_v55  ;;  %v1502_v3 = vpop.f32.mrb[21].mxu0 }
 0x111   : > { %v376_v5 = vadd.f32 %v375_v0, %v285_v17  ;;  %v1484_v6 = vpop.f32.mrb[21].mxu1  ;;  %v476_v7 = vpop.f32.mrb[22].mxu0 }
 0x112   : > { %v378_v8 = vpop.f32.mrb[22].mxu1  ;;  %v500_v9 = vadd.f32 %v476_v7, %v371_v61  ;;  %v1503_v10 = vpop.f32.mrb[23].mxu0 }
 0x113   : > { %v379_v11 = vadd.f32 %v378_v8, %v288_v33  ;;  %v1485_v12 = vpop.f32.mrb[23].mxu1 }
 0x117   : > { %v481_v13 = vpop.f32.mrb[24].mxu0 }
 0x118   : > { %v383_v14 = vpop.f32.mrb[24].mxu1  ;;  %v501_v15 = vadd.f32 %v481_v13, %v376_v5  ;;  %v1506_v16 = vpop.f32.mrb[25].mxu0 }
 0x119   : > { %v384_v18 = vadd.f32 %v383_v14, %v293_v37  ;;  %v484_v22 = vpop.f32.mrb[26].mxu0  ;;  %v1488_v26 = vpop.f32.mrb[25].mxu1 }
 0x11a   : > { %v502_v34 = vadd.f32 %v484_v22, %v379_v11  ;;  %v1507_v35 = vpop.f32.mrb[27].mxu0  ;;  %v386_v36 = vpop.f32.mrb[26].mxu1 }
 0x11b   : > { %v1489_v38 = vpop.f32.mrb[27].mxu1 }
 0x11f   : > { %v489_v39 = vpop.f32.mrb[28].mxu0 }
 0x120   : > { %v503_v17 = vadd.f32 %v489_v39, %v384_v18  ;;  %v573_v40 = vpop.f32.mrb[28].mxu1  ;;  %v1510_v41 = vpop.f32.mrb[29].mxu0 }
 0x121   : > { %v611_v1 = vadd.f32 %v573_v40, %v495_v54  ;;  %v1516_v42 = vpop.f32.mrb[29].mxu1  ;;  %v492_v43 = vpop.f32.mrb[30].mxu0 }
 0x122   : > { %v576_v33 = vpop.f32.mrb[30].mxu1  ;;  %v1511_v44 = vpop.f32.mrb[31].mxu0 }
 0x123   : > { %v612_v45 = vadd.f32 %v576_v33, %v496_v24  ;;  %v1517_v46 = vpop.f32.mrb[31].mxu1 }
 0x127   : > { %v689_v47 = vpop.f32.mrb[32].mxu0 }
 0x128   : > { %v581_v48 = vpop.f32.mrb[32].mxu1  ;;  %v727_v37 = vadd.f32 %v689_v47, %v611_v1  ;;  %v1538_v49 = vpop.f32.mrb[33].mxu0 }
 0x129   : > { %v613_v50 = vadd.f32 %v581_v48, %v497_v29  ;;  %v1520_v51 = vpop.f32.mrb[33].mxu1  ;;  %v692_v52 = vpop.f32.mrb[34].mxu0 }
 0x12a   : > { %v584_v53 = vpop.f32.mrb[34].mxu1  ;;  %v728_v4 = vadd.f32 %v692_v52, %v612_v45  ;;  %v1539_v19 = vpop.f32.mrb[35].mxu0 }
 0x12b   : > { %v614_v20 = vadd.f32 %v584_v53, %v498_v59  ;;  %v1521_v21 = vpop.f32.mrb[35].mxu1 }
 0x12f   : > { %v697_v23 = vpop.f32.mrb[36].mxu0 }
 0x130   : > { %v589_v54 = vpop.f32.mrb[36].mxu1  ;;  %v729_v25 = vadd.f32 %v697_v23, %v613_v50  ;;  %v1542_v27 = vpop.f32.mrb[37].mxu0 }
 0x131   : > { %v615_v30 = vadd.f32 %v589_v54, %v499_v2  ;;  %v1524_v31 = vpop.f32.mrb[37].mxu1  ;;  %v700_v24 = vpop.f32.mrb[38].mxu0 }
 0x132   : > { %v592_v28 = vpop.f32.mrb[38].mxu1  ;;  %v730_v32 = vadd.f32 %v700_v24, %v614_v20  ;;  %v1543_v55 = vpop.f32.mrb[39].mxu0 }
 0x133   : > { %v616_v56 = vadd.f32 %v592_v28, %v500_v9  ;;  %v1525_v57 = vpop.f32.mrb[39].mxu1 }
 0x137   : > { %v705_v29 = vpop.f32.mrb[40].mxu0 }
 0x138   : > { %v597_v58 = vpop.f32.mrb[40].mxu1  ;;  %v731_v60 = vadd.f32 %v705_v29, %v615_v30  ;;  %v1546_v61 = vpop.f32.mrb[41].mxu0 }
 0x139   : > { %v617_v62 = vadd.f32 %v597_v58, %v501_v15  ;;  %v1528_v63 = vpop.f32.mrb[41].mxu1  ;;  %v708_v59 = vpop.f32.mrb[42].mxu0 }
 0x13a   : > { %v600_v0 = vpop.f32.mrb[42].mxu1  ;;  %v732_v3 = vadd.f32 %v708_v59, %v616_v56  ;;  %v1547_v5 = vpop.f32.mrb[43].mxu0 }
 0x13b   : > { %v618_v6 = vadd.f32 %v600_v0, %v502_v34  ;;  %v1529_v7 = vpop.f32.mrb[43].mxu1 }
 0x13f   : > { %v713_v2 = vpop.f32.mrb[44].mxu0 }
 0x140   : > { %v605_v8 = vpop.f32.mrb[44].mxu1  ;;  %v733_v10 = vadd.f32 %v713_v2, %v617_v62  ;;  %v1550_v11 = vpop.f32.mrb[45].mxu0 }
 0x141   : > { %v619_v12 = vadd.f32 %v605_v8, %v503_v17  ;;  %v716_v13 = vpop.f32.mrb[46].mxu0  ;;  %v1532_v9 = vpop.f32.mrb[45].mxu1 }
 0x142   : > { %v734_v14 = vadd.f32 %v716_v13, %v618_v6  ;;  %v1551_v16 = vpop.f32.mrb[47].mxu0  ;;  %v608_v18 = vpop.f32.mrb[46].mxu1 }
 0x143   : > { %v1533_v22 = vpop.f32.mrb[47].mxu1 }
 0x147   : > { %v721_v26 = vpop.f32.mrb[48].mxu0 }
 0x148   : > { %v735_v15 = vadd.f32 %v721_v26, %v619_v12  ;;  %v804_v35 = vpop.f32.mrb[48].mxu1  ;;  %v1554_v36 = vpop.f32.mrb[49].mxu0 }
 0x149   : > { %v842_v38 = vadd.f32 %v804_v35, %v727_v37  ;;  %v1560_v39 = vpop.f32.mrb[49].mxu1  ;;  %v724_v40 = vpop.f32.mrb[50].mxu0 }
 0x14a   : > { %v807_v34 = vpop.f32.mrb[50].mxu1  ;;  %v1555_v41 = vpop.f32.mrb[51].mxu0  ;;  %v2014_v40 = vld [vmem:[%s2052_s2] ss:$0 sm:$0xff] }
 0x14b   : > { %v843_v1 = vadd.f32 %v807_v34, %v728_v4  ;;  %v1561_v42 = vpop.f32.mrb[51].mxu1 }
 0x14f   : > { %v919_v43 = vpop.f32.mrb[52].mxu0 }
 0x150   : > { %v812_v33 = vpop.f32.mrb[52].mxu1  ;;  %v957_v17 = vadd.f32 %v919_v43, %v842_v38  ;;  %v1582_v44 = vpop.f32.mrb[53].mxu0 }
 0x151   : > { %v844_v45 = vadd.f32 %v812_v33, %v729_v25  ;;  %v1564_v46 = vpop.f32.mrb[53].mxu1  ;;  %v922_v47 = vpop.f32.mrb[54].mxu0 }
 0x152   : > { %v815_v48 = vpop.f32.mrb[54].mxu1  ;;  %v958_v49 = vadd.f32 %v922_v47, %v843_v1  ;;  %v1583_v50 = vpop.f32.mrb[55].mxu0 }
 0x153   : > { %v845_v51 = vadd.f32 %v815_v48, %v730_v32  ;;  %v1565_v52 = vpop.f32.mrb[55].mxu1 }
 0x157   : > { %v927_v53 = vpop.f32.mrb[56].mxu0 }
 0x158   : > { %v820_v37 = vpop.f32.mrb[56].mxu1  ;;  %v959_v19 = vadd.f32 %v927_v53, %v844_v45  ;;  %v1586_v20 = vpop.f32.mrb[57].mxu0 }
 0x159   : > { %v846_v21 = vadd.f32 %v820_v37, %v731_v60  ;;  %v1568_v23 = vpop.f32.mrb[57].mxu1  ;;  %v930_v4 = vpop.f32.mrb[58].mxu0 }
 0x15a   : > { %v823_v54 = vpop.f32.mrb[58].mxu1  ;;  %v960_v27 = vadd.f32 %v930_v4, %v845_v51  ;;  %v1587_v30 = vpop.f32.mrb[59].mxu0 }
 0x15b   : > { %v847_v31 = vadd.f32 %v823_v54, %v732_v3  ;;  %v1569_v24 = vpop.f32.mrb[59].mxu1 }
 0x15f   : > { %v935_v25 = vpop.f32.mrb[60].mxu0 }
 0x160   : > { %v828_v28 = vpop.f32.mrb[60].mxu1  ;;  %v961_v55 = vadd.f32 %v935_v25, %v846_v21  ;;  %v1590_v56 = vpop.f32.mrb[61].mxu0 }
 0x161   : > { %v848_v57 = vadd.f32 %v828_v28, %v733_v10  ;;  %v1572_v29 = vpop.f32.mrb[61].mxu1  ;;  %v938_v32 = vpop.f32.mrb[62].mxu0 }
 0x162   : > { %v831_v58 = vpop.f32.mrb[62].mxu1  ;;  %v962_v61 = vadd.f32 %v938_v32, %v847_v31  ;;  %v1591_v62 = vpop.f32.mrb[63].mxu0 }
 0x163   : > { %v849_v63 = vadd.f32 %v831_v58, %v734_v14  ;;  %v1573_v59 = vpop.f32.mrb[63].mxu1 }
 0x167   : > { %v943_v60 = vpop.f32.mrb[64].mxu0 }
 0x168   : > { %v836_v0 = vpop.f32.mrb[64].mxu1  ;;  %v963_v5 = vadd.f32 %v943_v60, %v848_v57  ;;  %v1594_v6 = vpop.f32.mrb[65].mxu0 }
 0x169   : > { %v850_v7 = vadd.f32 %v836_v0, %v735_v15  ;;  %v946_v2 = vpop.f32.mrb[66].mxu0  ;;  %v1576_v3 = vpop.f32.mrb[65].mxu1 }
 0x16a   : > { %v2006_v8 = vadd.f32 %v946_v2, %v849_v63  ;;  %v1595_v11 = vpop.f32.mrb[67].mxu0  ;;  %v839_v12 = vpop.f32.mrb[66].mxu1 }
 0x16b   : > { %v1577_v10 = vpop.f32.mrb[67].mxu1 }
 0x16f   : > { %v951_v13 = vpop.f32.mrb[68].mxu0 }
 0x170   : > { %v2008_v9 = vadd.f32 %v951_v13, %v850_v7  ;;  %v1034_v16 = vpop.f32.mrb[68].mxu1  ;;  %v1598_v18 = vpop.f32.mrb[69].mxu0 }
 0x171   : > { %v1072_v14 = vadd.f32 %v1034_v16, %v957_v17  ;;  %v1604_v22 = vpop.f32.mrb[69].mxu1  ;;  %v954_v26 = vpop.f32.mrb[70].mxu0 }
 0x172   : > { %v1037_v35 = vpop.f32.mrb[70].mxu1  ;;  %v1599_v36 = vpop.f32.mrb[71].mxu0 }
 0x173   : > { %v1073_v38 = vadd.f32 %v1037_v35, %v958_v49  ;;  %v1605_v15 = vpop.f32.mrb[71].mxu1 }
 0x177   : > { %v1149_v39 = vpop.f32.mrb[72].mxu0 }
 0x178   : > { %v1042_v34 = vpop.f32.mrb[72].mxu1  ;;  %v1187_v41 = vadd.f32 %v1149_v39, %v1072_v14  ;;  %v1626_v1 = vpop.f32.mrb[73].mxu0 }
 0x179   : > { %v1074_v42 = vadd.f32 %v1042_v34, %v959_v19  ;;  %v1608_v43 = vpop.f32.mrb[73].mxu1  ;;  %v1152_v33 = vpop.f32.mrb[74].mxu0 }
 0x17a   : > { %v1203_v17 = vadd.f32 %v2014_v40, %v1187_v41  ;;  %v1045_v44 = vpop.f32.mrb[74].mxu1  ;;  %v1188_v45 = vadd.f32 %v1152_v33, %v1073_v38  ;;  %v1627_v46 = vpop.f32.mrb[75].mxu0 }
 0x17b   : > { %v1075_v47 = vadd.f32 %v1045_v44, %v960_v27  ;;  %v1609_v48 = vpop.f32.mrb[75].mxu1 }
 0x17c   : > { %1212 = vst [vmem:[%s2019_s16] sm:$0xff] %v1203_v17  ;;  %v1204_v49 = vadd.f32 %v2014_v40, %v1188_v45 }
 0x17e   : > { %1213 = vst [vmem:[%s2019_s16 + $0x7] sm:$0xfe] %v1204_v49 }
 0x17f   : > { %v1157_v50 = vpop.f32.mrb[76].mxu0 }
 0x180   : > { %v1050_v51 = vpop.f32.mrb[76].mxu1  ;;  %v1189_v52 = vadd.f32 %v1157_v50, %v1074_v42  ;;  %v1630_v53 = vpop.f32.mrb[77].mxu0 }
 0x181   : > { %v1076_v37 = vadd.f32 %v1050_v51, %v961_v55  ;;  %v1612_v19 = vpop.f32.mrb[77].mxu1  ;;  %v1160_v20 = vpop.f32.mrb[78].mxu0 }
 0x182   : > { %v1205_v21 = vadd.f32 %v2014_v40, %v1189_v52  ;;  %v1053_v23 = vpop.f32.mrb[78].mxu1  ;;  %v1190_v4 = vadd.f32 %v1160_v20, %v1075_v47  ;;  %v1631_v54 = vpop.f32.mrb[79].mxu0 }
 0x183   : > { %v1077_v27 = vadd.f32 %v1053_v23, %v962_v61  ;;  %v1613_v30 = vpop.f32.mrb[79].mxu1 }
 0x184   : > { %1214 = vst [vmem:[%s2019_s16 + $0xf] sm:$0x1] %v1205_v21  ;;  %1215 = vst [vmem:[%s2019_s16 + $0xe] sm:$0xfc] %v1205_v21  ;;  %v1206_v31 = vadd.f32 %v2014_v40, %v1190_v4 }
 0x186   : > { %1216 = vst [vmem:[%s2019_s16 + $0x16] sm:$0x3] %v1206_v31  ;;  %1217 = vst [vmem:[%s2019_s16 + $0x15] sm:$0xf8] %v1206_v31 }
 0x187   : > { %v1165_v24 = vpop.f32.mrb[80].mxu0 }
 0x188   : > { %v1058_v25 = vpop.f32.mrb[80].mxu1  ;;  %v1191_v28 = vadd.f32 %v1165_v24, %v1076_v37  ;;  %v1634_v55 = vpop.f32.mrb[81].mxu0 }
 0x189   : > { %v1078_v56 = vadd.f32 %v1058_v25, %v963_v5  ;;  %v1616_v57 = vpop.f32.mrb[81].mxu1  ;;  %v1168_v29 = vpop.f32.mrb[82].mxu0 }
 0x18a   : > { %v1207_v32 = vadd.f32 %v2014_v40, %v1191_v28  ;;  %v1061_v58 = vpop.f32.mrb[82].mxu1  ;;  %v1192_v61 = vadd.f32 %v1168_v29, %v1077_v27  ;;  %v1635_v62 = vpop.f32.mrb[83].mxu0 }
 0x18b   : > { %v1079_v63 = vadd.f32 %v1061_v58, %v2006_v8  ;;  %v1617_v59 = vpop.f32.mrb[83].mxu1 }
 0x18c   : > { %1218 = vst [vmem:[%s2019_s16 + $0x1d] sm:$0x7] %v1207_v32  ;;  %1219 = vst [vmem:[%s2019_s16 + $0x1c] sm:$0xf0] %v1207_v32  ;;  %v1208_v60 = vadd.f32 %v2014_v40, %v1192_v61 }
 0x18e   : > { %1220 = vst [vmem:[%s2019_s16 + $0x24] sm:$0xf] %v1208_v60  ;;  %1221 = vst [vmem:[%s2019_s16 + $0x23] sm:$0xe0] %v1208_v60 }
 0x18f   : > { %v1173_v0 = vpop.f32.mrb[84].mxu0 }
 0x190   : > { %v1066_v5 = vpop.f32.mrb[84].mxu1  ;;  %v1193_v6 = vadd.f32 %v1173_v0, %v1078_v56  ;;  %v1638_v7 = vpop.f32.mrb[85].mxu0 }
 0x191   : > { %v1080_v2 = vadd.f32 %v1066_v5, %v2008_v9  ;;  %v1176_v3 = vpop.f32.mrb[86].mxu0  ;;  %v1620_v11 = vpop.f32.mrb[85].mxu1 }
 0x192   : > { %v1209_v8 = vadd.f32 %v2014_v40, %v1193_v6  ;;  %v1194_v12 = vadd.f32 %v1176_v3, %v1079_v63  ;;  %v1639_v10 = vpop.f32.mrb[87].mxu0  ;;  %v1069_v13 = vpop.f32.mrb[86].mxu1 }
 0x193   : > { %v1621_v16 = vpop.f32.mrb[87].mxu1 }
 0x194   : > { %1222 = vst [vmem:[%s2019_s16 + $0x2b] sm:$0x1f] %v1209_v8  ;;  %1223 = vst [vmem:[%s2019_s16 + $0x2a] sm:$0xc0] %v1209_v8  ;;  %v1210_v18 = vadd.f32 %v2014_v40, %v1194_v12 }
 0x196   : > { %1224 = vst [vmem:[%s2019_s16 + $0x32] sm:$0x3f] %v1210_v18  ;;  %1225 = vst [vmem:[%s2019_s16 + $0x31] sm:$0x80] %v1210_v18 }
 0x197   : > { %v1181_v14 = vpop.f32.mrb[88].mxu0 }
 0x198   : > { %v1195_v22 = vadd.f32 %v1181_v14, %v1080_v2  ;;  %v1642_v26 = vpop.f32.mrb[89].mxu0 }
 0x199   : > { %v1184_v35 = vpop.f32.mrb[90].mxu0 }
 0x19a   : > { %v1211_v9 = vadd.f32 %v2014_v40, %v1195_v22  ;;  %v1643_v36 = vpop.f32.mrb[91].mxu0 }
 0x19c   : > { %1226 = vst [vmem:[%s2019_s16 + $0x39] sm:$0x7f] %v1211_v9 }
 0x19d PF: > { %s13_s12 = sadd.s32 1, %s1664_s12  }
 0x19e   : > { %p10_p4 = scmp.ge.s32.totalorder %s13_s12, 4  }
 0x1a0   :  { %12 = sbr.rel (!%p10_p4) target bundleno = 1 (0x1), region = 73 }

// kernel: _lambda_.18
= control target key start
LH: loop header
LB: loop body
LE: loop exit
PB: predicated region body
PF: predicated region fallthrough
CT: control target
= control target key end

     0   :  { %s2486_s12 = smov 0   ;;  %s3038_s0 = inlined_call_operand.vmem [shape: f32[2,1,110,128], index: 0, kind: input, shape index: {}]   ;;  %s3039_s1 = inlined_call_operand.vmem [shape: bf16[9,128,128], index: 1, kind: input, shape index: {}]   ;;  %s3040_s2 = inlined_call_operand.vmem [shape: f32[1,128], index: 2, kind: input, shape index: {}]   ;;  %s3041_s3 = inlined_call_operand.vmem [shape: f32[2,64,128], index: 3, kind: output, shape index: {}]  }
   0x1 LB: > { %s1704_s13 = sadd.s32 4294967295, %s2462_s12   ;;  %p1708_p0 = scmp.ge.s32.totalorder %s2462_s12, 1  ;;  %s2462_s12 = sphi %s2486_s12, %s13_s12  }
   0x2   : > { %p137_p1 = scmp.lt.s32.totalorder %s2462_s12, 3 }
   0x4   : > { %p138_p2 = pnand %p1708_p0, %p137_p1 }
   0x5   : > { %v2384_v0 = vld [vmem:[%s3039_s1 + $0x40] sm:$0xff] (!%p138_p2)   ;;  %v2464_v1 = vmov (!%p138_p2), 0.0   ;;  %v2386_v3 = vld [vmem:[%s3039_s1 + $0x48] sm:$0xff] (!%p138_p2)   ;;  %vm2465_vm0 = vmmov (!%p138_p2), 0   ;;  %v2388_v5 = vld [vmem:[%s3039_s1 + $0x50] sm:$0xff] (!%p138_p2)   ;;  %p161_p3 = scmp.lt.s32.totalorder (!%p138_p2), %s1704_s13, 1 }
   0x6   : > { %141 = sbr.rel (%p138_p2) target bundleno = 433 (0x1b1), region = 32  ;;  %2033 = vmatprep.subr.bf16.mxu0 (!%p138_p2), %v2464_v1  ;;  %2069 = vmatprep.subr.bf16.mxu1 (!%p138_p2), %v2464_v1  ;;  %v2385_v2 = vld [vmem:[%s3039_s1] sm:$0xff] (!%p138_p2)   ;;  %v2387_v4 = vld [vmem:[%s3039_s1 + $0x8] sm:$0xff] (!%p138_p2)   ;;  %v2389_v6 = vld [vmem:[%s3039_s1 + $0x10] sm:$0xff] (!%p138_p2)  }
   0x7   : > { %2034 = vmatpush3.bf16.msra.mxu0 (!%p138_p2), %v2384_v0  ;;  %2049 = vmatprep.mubr.msk.bf16.mxu0 (!%p138_p2), %vm2465_vm0, %v2464_v1  ;;  %v2390_v7 = vld [vmem:[%s3039_s1 + $0x58] sm:$0xff] (!%p138_p2)   ;;  %v2392_v9 = vld [vmem:[%s3039_s1 + $0x60] sm:$0xff] (!%p138_p2)   ;;  %v2394_v11 = vld [vmem:[%s3039_s1 + $0x68] sm:$0xff] (!%p138_p2)  }
   0x8   : > { %2070 = vmatpush3.bf16.msra.mxu1 (!%p138_p2), %v2385_v2  ;;  %2035 = vmatprep.subr.bf16.mxu0 (!%p138_p2), %v2464_v1  ;;  %v2391_v8 = vld [vmem:[%s3039_s1 + $0x18] sm:$0xff] (!%p138_p2)   ;;  %v2393_v10 = vld [vmem:[%s3039_s1 + $0x20] sm:$0xff] (!%p138_p2)   ;;  %v2395_v12 = vld [vmem:[%s3039_s1 + $0x28] sm:$0xff] (!%p138_p2)  }
   0x9   : > { %2071 = vmatprep.subr.bf16.mxu1 (!%p138_p2), %v2464_v1  ;;  %2085 = vmatprep.mubr.msk.bf16.mxu1 (!%p138_p2), %vm2465_vm0, %v2464_v1  ;;  %v2396_v13 = vld [vmem:[%s3039_s1 + $0x70] sm:$0xff] (!%p138_p2)   ;;  %v2398_v15 = vld [vmem:[%s3039_s1 + $0x78] sm:$0xff] (!%p138_p2)   ;;  %v2400_v23 = vld [vmem:[%s3039_s1 + $0x80] sm:$0xff] (!%p138_p2)  }
   0xa   : > { %v2397_v14 = vld [vmem:[%s3039_s1 + $0x30] sm:$0xff] (!%p138_p2)   ;;  %v2399_v17 = vld [vmem:[%s3039_s1 + $0x38] sm:$0xff] (!%p138_p2)   ;;  %v2402_v24 = vld [vmem:[%s3039_s1 + $0xc0] sm:$0xff] (!%p138_p2)  }
   0xb   : > { %2036 = vmatpush3.bf16.msra.mxu0 (!%p138_p2), %v2386_v3  ;;  %v2401_v25 = vld [vmem:[%s3039_s1 + $0x88] sm:$0xff] (!%p138_p2)   ;;  %v2403_v33 = vld [vmem:[%s3039_s1 + $0x90] sm:$0xff] (!%p138_p2)   ;;  %v2405_v38 = vld [vmem:[%s3039_s1 + $0x98] sm:$0xff] (!%p138_p2)  }
   0xc   : > { %2072 = vmatpush3.bf16.msra.mxu1 (!%p138_p2), %v2387_v4  ;;  %2037 = vmatprep.subr.bf16.mxu0 (!%p138_p2), %v2464_v1  ;;  %v2404_v30 = vld [vmem:[%s3039_s1 + $0xc8] sm:$0xff] (!%p138_p2)   ;;  %v2406_v35 = vld [vmem:[%s3039_s1 + $0xd0] sm:$0xff] (!%p138_p2)   ;;  %v2408_v40 = vld [vmem:[%s3039_s1 + $0xd8] sm:$0xff] (!%p138_p2)  }
   0xd   : > { %2073 = vmatprep.subr.bf16.mxu1 %v2464_v1  ;;  %s3043_s13 = smov (!%p161_p3, %s1704_s13), 1  ;;  %v2407_v43 = vld [vmem:[%s3039_s1 + $0xa0] sm:$0xff]   ;;  %v2410_v48 = vld [vmem:[%s3039_s1 + $0xa8] sm:$0xff]   ;;  %v2412_v53 = vld [vmem:[%s3039_s1 + $0xb0] sm:$0xff]  }
   0xe   : > { %s2373_s7 = smul.u32 112, %s3043_s13  ;;  %v2409_v45 = vld [vmem:[%s3039_s1 + $0xe0] sm:$0xff]   ;;  %v2411_v50 = vld [vmem:[%s3039_s1 + $0xe8] sm:$0xff]   ;;  %v2413_v54 = vld [vmem:[%s3039_s1 + $0xf0] sm:$0xff]  }
   0xf   : > { %2038 = vmatpush3.bf16.msra.mxu0 %v2388_v5  ;;  %v2414_v59 = vld [vmem:[%s3039_s1 + $0xb8] sm:$0xff]   ;;  %v2416_v5 = vld [vmem:[%s3039_s1 + $0x100] sm:$0xff]  }
  0x10   : > { %2074 = vmatpush3.bf16.msra.mxu1 %v2389_v6  ;;  %2039 = vmatprep.subr.bf16.mxu0 %v2464_v1  ;;  %s2556_s16 = scalar_lea.vmem %s3038_s0, %s2373_s7  ;;  %v2415_v60 = vld [vmem:[%s3039_s1 + $0xf8] sm:$0xff]   ;;  %v2418_v6 = vld [vmem:[%s3039_s1 + $0x140] sm:$0xff]  }
  0x11   : > { %2075 = vmatprep.subr.bf16.mxu1 %v2464_v1  ;;  %v203_v16 = vld [vmem:[%s2556_s16 + $0x1] sm:$0xff]  ;;  %v204_v18 = vld [vmem:[%s2556_s16 + $0x9] sm:$0xff]  ;;  %v205_v26 = vld [vmem:[%s2556_s16 + $0x11] sm:$0xff] }
  0x12   : > { %v172_v19 = vld [vmem:[%s2556_s16] sm:$0xff]  ;;  %v173_v20 = vld [vmem:[%s2556_s16 + $0x8] sm:$0xff]  ;;  %v213_v21 = vpack.c.bf16 %v204_v18, %v203_v16  ;;  %v174_v28 = vld [vmem:[%s2556_s16 + $0x10] sm:$0xff] }
  0x13   : > { %2040 = vmatpush3.bf16.msra.mxu0 %v2390_v7  ;;  %v182_v22 = vpack.c.bf16 %v173_v20, %v172_v19  ;;  %v206_v27 = vld [vmem:[%s2556_s16 + $0x19] sm:$0xff]  ;;  %v207_v34 = vld [vmem:[%s2556_s16 + $0x21] sm:$0xff]  ;;  %v208_v36 = vld [vmem:[%s2556_s16 + $0x29] sm:$0xff] }
  0x14   : > { %2076 = vmatpush3.bf16.msra.mxu1 %v2391_v8  ;;  %2041 = vmatprep.subr.bf16.mxu0 %v2464_v1  ;;  %v175_v29 = vld [vmem:[%s2556_s16 + $0x18] sm:$0xff]  ;;  %v214_v31 = vpack.c.bf16 %v206_v27, %v205_v26  ;;  %v176_v37 = vld [vmem:[%s2556_s16 + $0x20] sm:$0xff]  ;;  %v177_v39 = vld [vmem:[%s2556_s16 + $0x28] sm:$0xff]  ;;  %v215_v41 = vpack.c.bf16 %v208_v36, %v207_v34 }
  0x15   : > { %2077 = vmatprep.subr.bf16.mxu1 %v2464_v1  ;;  %v183_v32 = vpack.c.bf16 %v175_v29, %v174_v28  ;;  %v184_v42 = vpack.c.bf16 %v177_v39, %v176_v37  ;;  %v209_v44 = vld [vmem:[%s2556_s16 + $0x31] sm:$0xff]  ;;  %v210_v46 = vld [vmem:[%s2556_s16 + $0x39] sm:$0xff]  ;;  %v211_v55 = vld [vmem:[%s2556_s16 + $0x41] sm:$0xff] }
  0x16   : > { %v178_v47 = vld [vmem:[%s2556_s16 + $0x30] sm:$0xff]  ;;  %v179_v49 = vld [vmem:[%s2556_s16 + $0x38] sm:$0xff]  ;;  %v216_v51 = vpack.c.bf16 %v210_v46, %v209_v44  ;;  %v180_v57 = vld [vmem:[%s2556_s16 + $0x40] sm:$0xff] }
  0x17   : > { %2042 = vmatpush3.bf16.msra.mxu0 %v2392_v9  ;;  %v185_v52 = vpack.c.bf16 %v179_v49, %v178_v47  ;;  %v212_v56 = vld [vmem:[%s2556_s16 + $0x49] sm:$0xff]  ;;  %v641_v2 = vld [vmem:[%s2556_s16 + $0x12] sm:$0xff]  ;;  %v480_v8 = vld [vmem:[%s2556_s16 + $0x1a] sm:$0xff] }
  0x18   : > { %2078 = vmatpush3.bf16.msra.mxu1 %v2393_v10  ;;  %2043 = vmatprep.subr.bf16.mxu0 %v2464_v1  ;;  %v181_v58 = vld [vmem:[%s2556_s16 + $0x48] sm:$0xff]  ;;  %v217_v61 = vpack.c.bf16 %v212_v56, %v211_v55  ;;  %v2421_v16 = vld [vmem:[%s3039_s1 + $0x118] sm:$0xff]   ;;  %v2428_v29 = vld [vmem:[%s3039_s1 + $0x130] sm:$0xff]  }
  0x19   : > { %2079 = vmatprep.subr.bf16.mxu1 %v2464_v1  ;;  %v186_v62 = vpack.c.bf16 %v181_v58, %v180_v57  ;;  %v477_v63 = vld [vmem:[%s2556_s16 + $0x2] sm:$0xff]  ;;  %v478_v0 = vld [vmem:[%s2556_s16 + $0xa] sm:$0xff]  ;;  %v2424_v18 = vld [vmem:[%s3039_s1 + $0x158] sm:$0xff]  }
  0x1a   : > { %v487_v3 = vpack.c.bf16 %v478_v0, %v477_v63  ;;  %v650_v4 = vpack.c.bf16 %v641_v2, %v478_v0  ;;  %v2417_v7 = vld [vmem:[%s3039_s1 + $0x108] sm:$0xff]   ;;  %v2431_v34 = vld [vmem:[%s3039_s1 + $0x178] sm:$0xff]   ;;  %v2434_v44 = vld [vmem:[%s3039_s1 + $0x1c0] sm:$0xff]  }
  0x1b   : > { %2044 = vmatpush3.bf16.msra.mxu0 %v2394_v11  ;;  %v643_v9 = vld [vmem:[%s2556_s16 + $0x22] sm:$0xff]  ;;  %v488_v11 = vpack.c.bf16 %v480_v8, %v641_v2  ;;  %v803_v37 = vld [vmem:[%s2556_s16 + $0xb] sm:$0xff]  ;;  %v808_v56 = vld [vmem:[%s2556_s16 + $0x33] sm:$0xff] }
  0x1c   : > { %2080 = vmatpush3.bf16.msra.mxu1 %v2395_v12  ;;  %2045 = vmatprep.subr.bf16.mxu0 %v2464_v1  ;;  %v2420_v10 = vld [vmem:[%s3039_s1 + $0x148] sm:$0xff]   ;;  %v651_v12 = vpack.c.bf16 %v643_v9, %v480_v8  ;;  %v805_v46 = vld [vmem:[%s2556_s16 + $0x1b] sm:$0xff] }
  0x1d   : > { %2081 = vmatprep.subr.bf16.mxu1 %v2464_v1  ;;  %v2427_v26 = vld [vmem:[%s3039_s1 + $0x168] sm:$0xff]   ;;  %v2437_v57 = vld [vmem:[%s3039_s1 + $0x198] sm:$0xff]   ;;  %v2439_v63 = vld [vmem:[%s3039_s1 + $0x1a0] sm:$0xff]  }
  0x1e   : > { %v966_v39 = vld [vmem:[%s2556_s16 + $0xc] sm:$0xff]  ;;  %v806_v47 = vld [vmem:[%s2556_s16 + $0x23] sm:$0xff]  ;;  %v809_v2 = vld [vmem:[%s2556_s16 + $0x3b] sm:$0xff] }
  0x1f   : > { %2046 = vmatpush3.bf16.msra.mxu0 %v2396_v13  ;;  %v2419_v13 = vld [vmem:[%s3039_s1 + $0x110] sm:$0xff]   ;;  %v2800_v49 = vld [vmem:[%s2556_s16 + $0x24] sm:$0xff] }
  0x20   : > { %2082 = vmatpush3.bf16.msra.mxu1 %v2397_v14  ;;  %2047 = vmatprep.subr.bf16.mxu0 %v2464_v1  ;;  %v2422_v14 = vld [vmem:[%s3039_s1 + $0x150] sm:$0xff]   ;;  %v2441_v0 = vld [vmem:[%s3039_s1 + $0x1e0] sm:$0xff]  }
  0x21   : > { %2083 = vmatprep.subr.bf16.mxu1 %v2464_v1  ;;  %v807_v55 = vld [vmem:[%s2556_s16 + $0x2b] sm:$0xff] }
  0x22   : > { %v2828_v58 = vld [vmem:[%s2556_s16 + $0x2c] sm:$0xff] }
  0x23   : > { %2048 = vmatpush3.bf16.msra.mxu0 %v2398_v15  ;;  %v482_v15 = vld [vmem:[%s2556_s16 + $0x2a] sm:$0xff] }
  0x24   : > { %2084 = vmatpush3.bf16.msra.mxu1 %v2399_v17  ;;  %2105 = vmatprep.subr.bf16.mxu0 %v2464_v1  ;;  %v645_v17 = vld [vmem:[%s2556_s16 + $0x32] sm:$0xff]  ;;  %v489_v19 = vpack.c.bf16 %v482_v15, %v643_v9 }
  0x25   : > { %2141 = vmatprep.subr.bf16.mxu1 %v2464_v1  ;;  %v652_v20 = vpack.c.bf16 %v645_v17, %v482_v15  ;;  %v2888_v15 = vld [vmem:[%s2556_s16 + $0x54] sm:$0xff] }
  0x26   : > { %2050 = vmatmul.mubr.bf16.vlgmr.msra.gmra.mrb[0].mxu0 %v213_v21  ;;  %v2423_v21 = vld [vmem:[%s3039_s1 + $0x120] sm:$0xff]  }
  0x27   : > { %2086 = vmatmul.mubr.bf16.vlgmr.msra.gmra.mrb[0].mxu1 %v182_v22  ;;  %2106 = vmatpush3.bf16.msra.mxu0 %v2400_v23  ;;  %v2425_v22 = vld [vmem:[%s3039_s1 + $0x160] sm:$0xff]  }
  0x28   : > { %2107 = vmatprep.subr.bf16.mxu0 %v2464_v1  ;;  %2053 = vmatprep.mubr.msk.bf16.mxu0 %vm2465_vm0, %v2464_v1  ;;  %v484_v23 = vld [vmem:[%s2556_s16 + $0x3a] sm:$0xff] }
  0x29   : > { %2089 = vmatprep.mubr.msk.bf16.mxu1 %vm2465_vm0, %v2464_v1  ;;  %2142 = vmatpush3.bf16.msra.mxu1 %v2402_v24  ;;  %v2426_v24 = vld [vmem:[%s3039_s1 + $0x128] sm:$0xff]   ;;  %v490_v27 = vpack.c.bf16 %v484_v23, %v645_v17  ;;  %v2447_v17 = vld [vmem:[%s3039_s1 + $0x1f8] sm:$0xff]  }
  0x2a   : > { %2143 = vmatprep.subr.bf16.mxu1 %v2464_v1 }
  0x2b   : > { %2108 = vmatpush3.bf16.msra.mxu0 %v2401_v25  ;;  %v647_v25 = vld [vmem:[%s2556_s16 + $0x42] sm:$0xff] }
  0x2c   : > { %2109 = vmatprep.subr.bf16.mxu0 %v2464_v1  ;;  %v653_v28 = vpack.c.bf16 %v647_v25, %v484_v23 }
  0x2d   : > { %2144 = vmatpush3.bf16.msra.mxu1 %v2404_v30  ;;  %v2429_v30 = vld [vmem:[%s3039_s1 + $0x170] sm:$0xff]  }
  0x2e   : > { %2054 = vmatmul.mubr.bf16.gmra.mrb[4].mxu0 %v214_v31  ;;  %2145 = vmatprep.subr.bf16.mxu1 %v2464_v1  ;;  %v486_v31 = vld [vmem:[%s2556_s16 + $0x4a] sm:$0xff] }
  0x2f   : > { %2090 = vmatmul.mubr.bf16.gmra.mrb[4].mxu1 %v183_v32  ;;  %2110 = vmatpush3.bf16.msra.mxu0 %v2403_v33  ;;  %v649_v32 = vld [vmem:[%s2556_s16 + $0x52] sm:$0xff] }
  0x30   : > { %2057 = vmatprep.mubr.msk.bf16.mxu0 %vm2465_vm0, %v2464_v1  ;;  %2093 = vmatprep.mubr.msk.bf16.mxu1 %vm2465_vm0, %v2464_v1  ;;  %v2430_v33 = vld [vmem:[%s3039_s1 + $0x138] sm:$0xff]   ;;  %v654_v36 = vpack.c.bf16 %v649_v32, %v486_v31 }
  0x31   : > { %2111 = vmatprep.subr.bf16.mxu0 %v2464_v1  ;;  %2146 = vmatpush3.bf16.msra.mxu1 %v2406_v35  ;;  %v491_v35 = vpack.c.bf16 %v486_v31, %v647_v25  ;;  %v2449_v25 = vld [vmem:[%s3039_s1 + $0x208] sm:$0xff]   ;;  %v2451_v31 = vld [vmem:[%s3039_s1 + $0x218] sm:$0xff]  }
  0x32   : > { %2147 = vmatprep.subr.bf16.mxu1 %v2464_v1  ;;  %v1296_v32 = vld [vmem:[%s2556_s16 + $0x35] sm:$0xff] }
  0x33   : > { %2112 = vmatpush3.bf16.msra.mxu0 %v2405_v38  ;;  %v804_v38 = vld [vmem:[%s2556_s16 + $0x13] sm:$0xff] }
  0x34   : > { %2113 = vmatprep.subr.bf16.mxu0 %v2464_v1 }
  0x35   : > { %2148 = vmatpush3.bf16.msra.mxu1 %v2408_v40  ;;  %v2779_v40 = vld [vmem:[%s2556_s16 + $0x14] sm:$0xff] }
  0x36   : > { %2058 = vmatmul.mubr.bf16.gmra.mrb[8].mxu0 %v215_v41  ;;  %2149 = vmatprep.subr.bf16.mxu1 %v2464_v1  ;;  %v813_v41 = vpack.c.bf16 %v804_v38, %v803_v37  ;;  %v2453_v37 = vld [vmem:[%s3039_s1 + $0x228] sm:$0xff]  }
  0x37   : > { %2094 = vmatmul.mubr.bf16.gmra.mrb[8].mxu1 %v184_v42  ;;  %2114 = vmatpush3.bf16.msra.mxu0 %v2407_v43  ;;  %v976_v42 = vpack.c.bf16 %v2779_v40, %v966_v39  ;;  %v2432_v43 = vld [vmem:[%s3039_s1 + $0x180] sm:$0xff]   ;;  %v1299_v39 = vld [vmem:[%s2556_s16 + $0x4d] sm:$0xff] }
  0x38   : > { %2061 = vmatprep.mubr.msk.bf16.mxu0 %vm2465_vm0, %v2464_v1  ;;  %2097 = vmatprep.mubr.msk.bf16.mxu1 %vm2465_vm0, %v2464_v1  ;;  %v1298_v38 = vld [vmem:[%s2556_s16 + $0x45] sm:$0xff] }
  0x39   : > { %2115 = vmatprep.subr.bf16.mxu0 %v2464_v1  ;;  %2150 = vmatpush3.bf16.msra.mxu1 %v2409_v45  ;;  %v2433_v45 = vld [vmem:[%s3039_s1 + $0x188] sm:$0xff]  }
  0x3a   : > { %2151 = vmatprep.subr.bf16.mxu1 %v2464_v1 }
  0x3b   : > { %2116 = vmatpush3.bf16.msra.mxu0 %v2410_v48  ;;  %v2797_v48 = vld [vmem:[%s2556_s16 + $0x1c] sm:$0xff] }
  0x3c   : > { %2117 = vmatprep.subr.bf16.mxu0 %v2464_v1 }
  0x3d   : > { %2152 = vmatpush3.bf16.msra.mxu1 %v2411_v50  ;;  %v2436_v50 = vld [vmem:[%s3039_s1 + $0x1c8] sm:$0xff]  }
  0x3e   : > { %2062 = vmatmul.mubr.bf16.gmra.mrb[12].mxu0 %v216_v51  ;;  %2153 = vmatprep.subr.bf16.mxu1 %v2464_v1  ;;  %v814_v51 = vpack.c.bf16 %v806_v47, %v805_v46  ;;  %v2455_v46 = vld [vmem:[%s3039_s1 + $0x238] sm:$0xff]  }
  0x3f   : > { %2098 = vmatmul.mubr.bf16.gmra.mrb[12].mxu1 %v185_v52  ;;  %2065 = vmatprep.mubr.msk.bf16.mxu0 %vm2465_vm0, %v2464_v1  ;;  %v977_v52 = vpack.c.bf16 %v2800_v49, %v2797_v48 }
  0x40   : > { %2101 = vmatprep.mubr.msk.bf16.mxu1 %vm2465_vm0, %v2464_v1  ;;  %2118 = vmatpush3.bf16.msra.mxu0 %v2412_v53  ;;  %v2435_v53 = vld [vmem:[%s3039_s1 + $0x190] sm:$0xff]  }
  0x41   : > { %2154 = vmatpush3.bf16.msra.mxu1 %v2413_v54  ;;  %2119 = vmatprep.subr.bf16.mxu0 %v2464_v1  ;;  %v2438_v54 = vld [vmem:[%s3039_s1 + $0x1d0] sm:$0xff]  }
  0x42   : > { %2155 = vmatprep.subr.bf16.mxu1 %v2464_v1 }
  0x44   : > { %2120 = vmatpush3.bf16.msra.mxu0 %v2414_v59  ;;  %v2831_v59 = vld [vmem:[%s2556_s16 + $0x34] sm:$0xff] }
  0x45   : > { %2156 = vmatpush3.bf16.msra.mxu1 %v2415_v60  ;;  %2177 = vmatprep.subr.bf16.mxu0 %v2464_v1  ;;  %v2440_v60 = vld [vmem:[%s3039_s1 + $0x1d8] sm:$0xff]  }
  0x46   : > { %2066 = vmatmul.mubr.bf16.gmra.mrb[16].mxu0 %v217_v61  ;;  %2213 = vmatprep.subr.bf16.mxu1 %v2464_v1  ;;  %v815_v61 = vpack.c.bf16 %v808_v56, %v807_v55  ;;  %v1457_v55 = vld [vmem:[%s2556_s16 + $0x26] sm:$0xff]  ;;  %v1458_v56 = vld [vmem:[%s2556_s16 + $0x2e] sm:$0xff] }
  0x47   : > { %2102 = vmatmul.mubr.bf16.gmra.mrb[16].mxu1 %v186_v62  ;;  %2121 = vmatprep.mubr.msk.bf16.mxu0 %vm2465_vm0, %v2464_v1  ;;  %v978_v62 = vpack.c.bf16 %v2831_v59, %v2828_v58 }
  0x48   : > { %2157 = vmatprep.mubr.msk.bf16.mxu1 %vm2465_vm0, %v2464_v1 }
  0x4e   : > { %2122 = vmatmul.mubr.bf16.vlgmr.msra.gmra.mrb[20].mxu0 %v487_v3  ;;  %v810_v3 = vld [vmem:[%s2556_s16 + $0x43] sm:$0xff] }
  0x4f   : > { %2158 = vmatmul.mubr.bf16.vlgmr.msra.gmra.mrb[20].mxu1 %v650_v4  ;;  %2178 = vmatpush3.bf16.msra.mxu0 %v2416_v5  ;;  %v2442_v4 = vld [vmem:[%s3039_s1 + $0x1a8] sm:$0xff]   ;;  %v2858_v5 = vld [vmem:[%s2556_s16 + $0x3c] sm:$0xff]  ;;  %v816_v8 = vpack.c.bf16 %v810_v3, %v809_v2 }
  0x50   : > { %2179 = vmatprep.subr.bf16.mxu0 %v2464_v1  ;;  %2125 = vmatprep.mubr.msk.bf16.mxu0 %vm2465_vm0, %v2464_v1 }
  0x51   : > { %2161 = vmatprep.mubr.msk.bf16.mxu1 %vm2465_vm0, %v2464_v1  ;;  %2214 = vmatpush3.bf16.msra.mxu1 %v2418_v6  ;;  %v2861_v6 = vld [vmem:[%s2556_s16 + $0x44] sm:$0xff] }
  0x52   : > { %2215 = vmatprep.subr.bf16.mxu1 %v2464_v1  ;;  %v979_v9 = vpack.c.bf16 %v2861_v6, %v2858_v5 }
  0x53   : > { %2180 = vmatpush3.bf16.msra.mxu0 %v2417_v7  ;;  %v2443_v7 = vld [vmem:[%s3039_s1 + $0x1e8] sm:$0xff]  }
  0x54   : > { %2181 = vmatprep.subr.bf16.mxu0 %v2464_v1 }
  0x55   : > { %2216 = vmatpush3.bf16.msra.mxu1 %v2420_v10  ;;  %v2444_v10 = vld [vmem:[%s3039_s1 + $0x1b0] sm:$0xff]  }
  0x56   : > { %2126 = vmatmul.mubr.bf16.gmra.mrb[24].mxu0 %v488_v11  ;;  %2217 = vmatprep.subr.bf16.mxu1 %v2464_v1  ;;  %v2445_v11 = vld [vmem:[%s3039_s1 + $0x1f0] sm:$0xff]  }
  0x57   : > { %2162 = vmatmul.mubr.bf16.gmra.mrb[24].mxu1 %v651_v12  ;;  %2182 = vmatpush3.bf16.msra.mxu0 %v2419_v13  ;;  %v811_v12 = vld [vmem:[%s2556_s16 + $0x4b] sm:$0xff]  ;;  %v812_v13 = vld [vmem:[%s2556_s16 + $0x53] sm:$0xff] }
  0x58   : > { %2129 = vmatprep.mubr.msk.bf16.mxu0 %vm2465_vm0, %v2464_v1  ;;  %2165 = vmatprep.mubr.msk.bf16.mxu1 %vm2465_vm0, %v2464_v1 }
  0x59   : > { %2183 = vmatprep.subr.bf16.mxu0 %v2464_v1  ;;  %2218 = vmatpush3.bf16.msra.mxu1 %v2422_v14  ;;  %v2885_v14 = vld [vmem:[%s2556_s16 + $0x4c] sm:$0xff] }
  0x5a   : > { %2219 = vmatprep.subr.bf16.mxu1 %v2464_v1 }
  0x5b   : > { %2184 = vmatpush3.bf16.msra.mxu0 %v2421_v16  ;;  %v2446_v16 = vld [vmem:[%s3039_s1 + $0x1b8] sm:$0xff]  }
  0x5c   : > { %2185 = vmatprep.subr.bf16.mxu0 %v2464_v1 }
  0x5d   : > { %2220 = vmatpush3.bf16.msra.mxu1 %v2424_v18  ;;  %v817_v18 = vpack.c.bf16 %v812_v13, %v811_v12 }
  0x5e   : > { %2130 = vmatmul.mubr.bf16.gmra.mrb[28].mxu0 %v489_v19  ;;  %2221 = vmatprep.subr.bf16.mxu1 %v2464_v1  ;;  %v980_v19 = vpack.c.bf16 %v2888_v15, %v2885_v14 }
  0x5f   : > { %2166 = vmatmul.mubr.bf16.gmra.mrb[28].mxu1 %v652_v20  ;;  %2186 = vmatpush3.bf16.msra.mxu0 %v2423_v21  ;;  %v1292_v20 = vld [vmem:[%s2556_s16 + $0x15] sm:$0xff]  ;;  %v1293_v21 = vld [vmem:[%s2556_s16 + $0x1d] sm:$0xff] }
  0x60   : > { %2133 = vmatprep.mubr.msk.bf16.mxu0 %vm2465_vm0, %v2464_v1  ;;  %2169 = vmatprep.mubr.msk.bf16.mxu1 %vm2465_vm0, %v2464_v1  ;;  %v1302_v23 = vpack.c.bf16 %v1293_v21, %v1292_v20 }
  0x61   : > { %2187 = vmatprep.subr.bf16.mxu0 %v2464_v1  ;;  %2222 = vmatpush3.bf16.msra.mxu1 %v2425_v22  ;;  %v1139_v22 = vpack.c.bf16 %v2797_v48, %v2779_v40  ;;  %v1142_v40 = vpack.c.bf16 %v2885_v14, %v2861_v6 }
  0x62   : > { %2223 = vmatprep.subr.bf16.mxu1 %v2464_v1 }
  0x63   : > { %2188 = vmatpush3.bf16.msra.mxu0 %v2426_v24  ;;  %v2448_v24 = vld [vmem:[%s3039_s1 + $0x200] sm:$0xff]  }
  0x64   : > { %2189 = vmatprep.subr.bf16.mxu0 %v2464_v1 }
  0x65   : > { %2224 = vmatpush3.bf16.msra.mxu1 %v2427_v26  ;;  %v1294_v26 = vld [vmem:[%s2556_s16 + $0x25] sm:$0xff] }
  0x66   : > { %2134 = vmatmul.mubr.bf16.gmra.mrb[32].mxu0 %v490_v27  ;;  %2225 = vmatprep.subr.bf16.mxu1 %v2464_v1  ;;  %v1295_v27 = vld [vmem:[%s2556_s16 + $0x2d] sm:$0xff] }
  0x67   : > { %2170 = vmatmul.mubr.bf16.gmra.mrb[32].mxu1 %v653_v28  ;;  %2137 = vmatprep.mubr.msk.bf16.mxu0 %vm2465_vm0, %v2464_v1  ;;  %v1140_v28 = vpack.c.bf16 %v2828_v58, %v2800_v49  ;;  %v1455_v49 = vld [vmem:[%s2556_s16 + $0x16] sm:$0xff]  ;;  %v1464_v58 = vld [vmem:[%s2556_s16 + $0x5e] sm:$0xff] }
  0x68   : > { %2173 = vmatprep.mubr.msk.bf16.mxu1 %vm2465_vm0, %v2464_v1  ;;  %2190 = vmatpush3.bf16.msra.mxu0 %v2428_v29  ;;  %v1303_v29 = vpack.c.bf16 %v1295_v27, %v1294_v26 }
  0x69   : > { %2226 = vmatpush3.bf16.msra.mxu1 %v2429_v30  ;;  %2191 = vmatprep.subr.bf16.mxu0 %v2464_v1  ;;  %v2450_v30 = vld [vmem:[%s3039_s1 + $0x210] sm:$0xff]  }
  0x6a   : > { %2227 = vmatprep.subr.bf16.mxu1 %v2464_v1 }
  0x6c   : > { %2192 = vmatpush3.bf16.msra.mxu0 %v2430_v33  ;;  %v1297_v33 = vld [vmem:[%s2556_s16 + $0x3d] sm:$0xff] }
  0x6d   : > { %2228 = vmatpush3.bf16.msra.mxu1 %v2431_v34  ;;  %2249 = vmatprep.subr.bf16.mxu0 %v2464_v1  ;;  %v1141_v34 = vpack.c.bf16 %v2858_v5, %v2831_v59  ;;  %v1466_v59 = vpack.c.bf16 %v1458_v56, %v1457_v55 }
  0x6e   : > { %2138 = vmatmul.mubr.bf16.gmra.mrb[36].mxu0 %v491_v35  ;;  %2285 = vmatprep.subr.bf16.mxu1 %v2464_v1  ;;  %v1304_v35 = vpack.c.bf16 %v1297_v33, %v1296_v32 }
  0x6f   : > { %2174 = vmatmul.mubr.bf16.gmra.mrb[36].mxu1 %v654_v36  ;;  %2193 = vmatprep.mubr.msk.bf16.mxu0 %vm2465_vm0, %v2464_v1  ;;  %v2452_v36 = vld [vmem:[%s3039_s1 + $0x220] sm:$0xff]  }
  0x70   : > { %2229 = vmatprep.mubr.msk.bf16.mxu1 %vm2465_vm0, %v2464_v1 }
  0x76   : > { %2194 = vmatmul.mubr.bf16.vlgmr.msra.gmra.mrb[40].mxu0 %v813_v41  ;;  %v1305_v41 = vpack.c.bf16 %v1299_v39, %v1298_v38 }
  0x77   : > { %2230 = vmatmul.mubr.bf16.vlgmr.msra.gmra.mrb[40].mxu1 %v976_v42  ;;  %2250 = vmatpush3.bf16.msra.mxu0 %v2432_v43  ;;  %v2454_v42 = vld [vmem:[%s3039_s1 + $0x230] sm:$0xff]   ;;  %v1138_v43 = vld [vmem:[%s2556_s16 + $0x5c] sm:$0xff] }
  0x78   : > { %2251 = vmatprep.subr.bf16.mxu0 %v2464_v1  ;;  %2197 = vmatprep.mubr.msk.bf16.mxu0 %vm2465_vm0, %v2464_v1  ;;  %v1143_v47 = vpack.c.bf16 %v1138_v43, %v2888_v15 }
  0x79   : > { %2233 = vmatprep.mubr.msk.bf16.mxu1 %vm2465_vm0, %v2464_v1  ;;  %2286 = vmatpush3.bf16.msra.mxu1 %v2434_v44  ;;  %v1300_v44 = vld [vmem:[%s2556_s16 + $0x55] sm:$0xff] }
  0x7a   : > { %2287 = vmatprep.subr.bf16.mxu1 %v2464_v1 }
  0x7b   : > { %2252 = vmatpush3.bf16.msra.mxu0 %v2433_v45  ;;  %v1301_v45 = vld [vmem:[%s2556_s16 + $0x5d] sm:$0xff] }
  0x7c   : > { %2253 = vmatprep.subr.bf16.mxu0 %v2464_v1  ;;  %v1306_v48 = vpack.c.bf16 %v1301_v45, %v1300_v44 }
  0x7d   : > { %2288 = vmatpush3.bf16.msra.mxu1 %v2436_v50  ;;  %v1456_v50 = vld [vmem:[%s2556_s16 + $0x1e] sm:$0xff] }
  0x7e   : > { %2198 = vmatmul.mubr.bf16.gmra.mrb[44].mxu0 %v814_v51  ;;  %2289 = vmatprep.subr.bf16.mxu1 %v2464_v1  ;;  %v1461_v51 = vld [vmem:[%s2556_s16 + $0x46] sm:$0xff] }
  0x7f   : > { %2234 = vmatmul.mubr.bf16.gmra.mrb[44].mxu1 %v977_v52  ;;  %2254 = vmatpush3.bf16.msra.mxu0 %v2435_v53  ;;  %v1462_v52 = vld [vmem:[%s2556_s16 + $0x4e] sm:$0xff]  ;;  %v1465_v53 = vpack.c.bf16 %v1456_v50, %v1455_v49 }
  0x80   : > { %2201 = vmatprep.mubr.msk.bf16.mxu0 %vm2465_vm0, %v2464_v1  ;;  %2237 = vmatprep.mubr.msk.bf16.mxu1 %vm2465_vm0, %v2464_v1 }
  0x81   : > { %2255 = vmatprep.subr.bf16.mxu0 %v2464_v1  ;;  %2290 = vmatpush3.bf16.msra.mxu1 %v2438_v54  ;;  %v1468_v54 = vpack.c.bf16 %v1462_v52, %v1461_v51 }
  0x82   : > { %2291 = vmatprep.subr.bf16.mxu1 %v2464_v1 }
  0x83   : > { %2256 = vmatpush3.bf16.msra.mxu0 %v2437_v57  ;;  %v1463_v57 = vld [vmem:[%s2556_s16 + $0x56] sm:$0xff] }
  0x84   : > { %2257 = vmatprep.subr.bf16.mxu0 %v2464_v1 }
  0x85   : > { %2292 = vmatpush3.bf16.msra.mxu1 %v2440_v60  ;;  %v1469_v60 = vpack.c.bf16 %v1464_v58, %v1463_v57 }
  0x86   : > { %2202 = vmatmul.mubr.bf16.gmra.mrb[48].mxu0 %v815_v61  ;;  %2293 = vmatprep.subr.bf16.mxu1 %v2464_v1  ;;  %v1459_v61 = vld [vmem:[%s2556_s16 + $0x36] sm:$0xff] }
  0x87   : > { %2238 = vmatmul.mubr.bf16.gmra.mrb[48].mxu1 %v978_v62  ;;  %2258 = vmatpush3.bf16.msra.mxu0 %v2439_v63  ;;  %v1460_v62 = vld [vmem:[%s2556_s16 + $0x3e] sm:$0xff]  ;;  %s1915_s16 = sshll.u32 %s3043_s13, 6 }
  0x88   : > { %2205 = vmatprep.mubr.msk.bf16.mxu0 %vm2465_vm0, %v2464_v1  ;;  %2241 = vmatprep.mubr.msk.bf16.mxu1 %vm2465_vm0, %v2464_v1  ;;  %v1467_v63 = vpack.c.bf16 %v1460_v62, %v1459_v61  ;;  %s3015_s21 = scalar_lea.vmem %s3041_s3, %s1915_s16 }
  0x89   : > { %2259 = vmatprep.subr.bf16.mxu0 %v2464_v1  ;;  %2294 = vmatpush3.bf16.msra.mxu1 %v2441_v0 }
  0x8a   : > { %2295 = vmatprep.subr.bf16.mxu1 %v2464_v1 }
  0x8b   : > { %2260 = vmatpush3.bf16.msra.mxu0 %v2442_v4 }
  0x8c   : > { %2261 = vmatprep.subr.bf16.mxu0 %v2464_v1 }
  0x8d   : > { %2296 = vmatpush3.bf16.msra.mxu1 %v2443_v7 }
  0x8e   : > { %2206 = vmatmul.mubr.bf16.gmra.mrb[52].mxu0 %v816_v8  ;;  %2297 = vmatprep.subr.bf16.mxu1 %v2464_v1 }
  0x8f   : > { %2242 = vmatmul.mubr.bf16.gmra.mrb[52].mxu1 %v979_v9  ;;  %2209 = vmatprep.mubr.msk.bf16.mxu0 %vm2465_vm0, %v2464_v1 }
  0x90   : > { %2245 = vmatprep.mubr.msk.bf16.mxu1 %vm2465_vm0, %v2464_v1  ;;  %2262 = vmatpush3.bf16.msra.mxu0 %v2444_v10 }
  0x91   : > { %2298 = vmatpush3.bf16.msra.mxu1 %v2445_v11  ;;  %2263 = vmatprep.subr.bf16.mxu0 %v2464_v1 }
  0x92   : > { %2299 = vmatprep.subr.bf16.mxu1 %v2464_v1 }
  0x94   : > { %2264 = vmatpush3.bf16.msra.mxu0 %v2446_v16 }
  0x95   : > { %2300 = vmatpush3.bf16.msra.mxu1 %v2447_v17  ;;  %2321 = vmatprep.subr.bf16.mxu0 %v2464_v1 }
  0x96   : > { %2210 = vmatmul.mubr.bf16.gmra.mrb[56].mxu0 %v817_v18  ;;  %2357 = vmatprep.subr.bf16.mxu1 %v2464_v1 }
  0x97   : > { %2246 = vmatmul.mubr.bf16.gmra.mrb[56].mxu1 %v980_v19  ;;  %2265 = vmatprep.mubr.msk.bf16.mxu0 %vm2465_vm0, %v2464_v1 }
  0x98   : > { %2301 = vmatprep.mubr.msk.bf16.mxu1 %vm2465_vm0, %v2464_v1 }
  0x9e   : > { %2266 = vmatmul.mubr.bf16.vlgmr.msra.gmra.mrb[60].mxu0 %v1139_v22 }
  0x9f   : > { %2302 = vmatmul.mubr.bf16.vlgmr.msra.gmra.mrb[60].mxu1 %v1302_v23  ;;  %2322 = vmatpush3.bf16.msra.mxu0 %v2448_v24 }
  0xa0   : > { %2323 = vmatprep.subr.bf16.mxu0 %v2464_v1  ;;  %2269 = vmatprep.mubr.msk.bf16.mxu0 %vm2465_vm0, %v2464_v1 }
  0xa1   : > { %2305 = vmatprep.mubr.msk.bf16.mxu1 %vm2465_vm0, %v2464_v1  ;;  %2365 = vmatpush3.bf16.msra.mxu1 %v2448_v24 }
  0xa2   : > { %2358 = vmatprep.subr.bf16.mxu1 %v2464_v1 }
  0xa3   : > { %2324 = vmatpush3.bf16.msra.mxu0 %v2449_v25 }
  0xa4   : > { %2325 = vmatprep.subr.bf16.mxu0 %v2464_v1 }
  0xa5   : > { %2366 = vmatpush3.bf16.msra.mxu1 %v2449_v25 }
  0xa6   : > { %2270 = vmatmul.mubr.bf16.gmra.mrb[64].mxu0 %v1140_v28  ;;  %2359 = vmatprep.subr.bf16.mxu1 %v2464_v1 }
  0xa7   : > { %2306 = vmatmul.mubr.bf16.gmra.mrb[64].mxu1 %v1303_v29  ;;  %2326 = vmatpush3.bf16.msra.mxu0 %v2450_v30 }
  0xa8   : > { %2273 = vmatprep.mubr.msk.bf16.mxu0 %vm2465_vm0, %v2464_v1  ;;  %2309 = vmatprep.mubr.msk.bf16.mxu1 %vm2465_vm0, %v2464_v1 }
  0xa9   : > { %2327 = vmatprep.subr.bf16.mxu0 %v2464_v1  ;;  %2367 = vmatpush3.bf16.msra.mxu1 %v2450_v30 }
  0xaa   : > { %2360 = vmatprep.subr.bf16.mxu1 %v2464_v1 }
  0xab   : > { %2328 = vmatpush3.bf16.msra.mxu0 %v2451_v31 }
  0xac   : > { %2329 = vmatprep.subr.bf16.mxu0 %v2464_v1 }
  0xad   : > { %2368 = vmatpush3.bf16.msra.mxu1 %v2451_v31 }
  0xae   : > { %2274 = vmatmul.mubr.bf16.gmra.mrb[68].mxu0 %v1141_v34  ;;  %2361 = vmatprep.subr.bf16.mxu1 %v2464_v1 }
  0xaf   : > { %2310 = vmatmul.mubr.bf16.gmra.mrb[68].mxu1 %v1304_v35  ;;  %2330 = vmatpush3.bf16.msra.mxu0 %v2452_v36 }
  0xb0   : > { %2277 = vmatprep.mubr.msk.bf16.mxu0 %vm2465_vm0, %v2464_v1  ;;  %2313 = vmatprep.mubr.msk.bf16.mxu1 %vm2465_vm0, %v2464_v1 }
  0xb1   : > { %2369 = vmatpush3.bf16.msra.mxu1 %v2452_v36  ;;  %2331 = vmatprep.subr.bf16.mxu0 %v2464_v1 }
  0xb2   : > { %2362 = vmatprep.subr.bf16.mxu1 %v2464_v1 }
  0xb3   : > { %2332 = vmatpush3.bf16.msra.mxu0 %v2453_v37 }
  0xb4   : > { %2333 = vmatprep.subr.bf16.mxu0 %v2464_v1 }
  0xb5   : > { %2370 = vmatpush3.bf16.msra.mxu1 %v2453_v37 }
  0xb6   : > { %2278 = vmatmul.mubr.bf16.gmra.mrb[72].mxu0 %v1142_v40  ;;  %2363 = vmatprep.subr.bf16.mxu1 %v2464_v1 }
  0xb7   : > { %2314 = vmatmul.mubr.bf16.gmra.mrb[72].mxu1 %v1305_v41  ;;  %2281 = vmatprep.mubr.msk.bf16.mxu0 %vm2465_vm0, %v2464_v1 }
  0xb8   : > { %2317 = vmatprep.mubr.msk.bf16.mxu1 %vm2465_vm0, %v2464_v1  ;;  %2334 = vmatpush3.bf16.msra.mxu0 %v2454_v42 }
  0xb9   : > { %2371 = vmatpush3.bf16.msra.mxu1 %v2454_v42  ;;  %2335 = vmatprep.subr.bf16.mxu0 %v2464_v1 }
  0xba   : > { %2364 = vmatprep.subr.bf16.mxu1 %v2464_v1 }
  0xbc   : > { %2336 = vmatpush3.bf16.msra.mxu0 %v2455_v46 }
  0xbd   : > { %2372 = vmatpush3.bf16.msra.mxu1 %v2455_v46 }
  0xbe   : > { %2282 = vmatmul.mubr.bf16.gmra.mrb[76].mxu0 %v1143_v47 }
  0xbf   : > { %2318 = vmatmul.mubr.bf16.gmra.mrb[76].mxu1 %v1306_v48  ;;  %2337 = vmatprep.mubr.msk.bf16.mxu0 %vm2465_vm0, %v2464_v1 }
  0xc0   : > { %2349 = vmatprep.mubr.msk.bf16.mxu1 %vm2465_vm0, %v2464_v1 }
  0xc6   : > { %2338 = vmatmul.mubr.bf16.vlgmr.msra.gmra.mrb[80].mxu0 %v1465_v53 }
  0xc7   : > { %2350 = vmatmul.mubr.bf16.vlgmr.msra.gmra.mrb[80].mxu1 %v1468_v54  ;;  %2341 = vmatprep.mubr.msk.bf16.mxu0 %vm2465_vm0, %v2464_v1 }
  0xc8   : > { %2353 = vmatprep.mubr.msk.bf16.mxu1 %vm2465_vm0, %v2464_v1 }
  0xce   : > { %2342 = vmatmul.mubr.bf16.gmra.mrb[84].mxu0 %v1466_v59 }
  0xcf   : > { %2354 = vmatmul.mubr.bf16.gmra.mrb[84].mxu1 %v1469_v60  ;;  %2345 = vmatprep.mubr.msk.bf16.mxu0 %vm2465_vm0, %v2464_v1 }
  0xd6   : > { %2346 = vmatmul.mubr.bf16.gmra.mrb[88].mxu0 %v1467_v63 }
  0xf9   : > { %v317_v0 = vpop.f32.mrb[0].mxu0 }
  0xfa   : > { %v438_v2 = vpop.f32.mrb[0].mxu1  ;;  %v2051_v3 = vpop.f32.mrb[1].mxu0 }
  0xfb   : > { %v439_v4 = vadd.f32 %v438_v2, %v317_v0  ;;  %v2087_v5 = vpop.f32.mrb[1].mxu1  ;;  %v320_v6 = vpop.f32.mrb[2].mxu0 }
  0xfc   : > { %v441_v7 = vpop.f32.mrb[2].mxu1  ;;  %v2052_v8 = vpop.f32.mrb[3].mxu0 }
  0xfd   : > { %v442_v9 = vadd.f32 %v441_v7, %v320_v6  ;;  %v2088_v10 = vpop.f32.mrb[3].mxu1 }
 0x101   : > { %v325_v11 = vpop.f32.mrb[4].mxu0 }
 0x102   : > { %v446_v12 = vpop.f32.mrb[4].mxu1  ;;  %v2055_v13 = vpop.f32.mrb[5].mxu0 }
 0x103   : > { %v447_v14 = vadd.f32 %v446_v12, %v325_v11  ;;  %v2091_v15 = vpop.f32.mrb[5].mxu1  ;;  %v328_v1 = vpop.f32.mrb[6].mxu0 }
 0x104   : > { %v449_v16 = vpop.f32.mrb[6].mxu1  ;;  %v2056_v17 = vpop.f32.mrb[7].mxu0 }
 0x105   : > { %v450_v18 = vadd.f32 %v449_v16, %v328_v1  ;;  %v2092_v19 = vpop.f32.mrb[7].mxu1 }
 0x109   : > { %v333_v20 = vpop.f32.mrb[8].mxu0 }
 0x10a   : > { %v454_v21 = vpop.f32.mrb[8].mxu1  ;;  %v2059_v22 = vpop.f32.mrb[9].mxu0 }
 0x10b   : > { %v455_v23 = vadd.f32 %v454_v21, %v333_v20  ;;  %v2095_v24 = vpop.f32.mrb[9].mxu1  ;;  %v336_v25 = vpop.f32.mrb[10].mxu0 }
 0x10c   : > { %v457_v26 = vpop.f32.mrb[10].mxu1  ;;  %v2060_v27 = vpop.f32.mrb[11].mxu0 }
 0x10d   : > { %v458_v28 = vadd.f32 %v457_v26, %v336_v25  ;;  %v2096_v29 = vpop.f32.mrb[11].mxu1 }
 0x111   : > { %v341_v30 = vpop.f32.mrb[12].mxu0 }
 0x112   : > { %v462_v31 = vpop.f32.mrb[12].mxu1  ;;  %v2063_v32 = vpop.f32.mrb[13].mxu0 }
 0x113   : > { %v463_v33 = vadd.f32 %v462_v31, %v341_v30  ;;  %v2099_v34 = vpop.f32.mrb[13].mxu1  ;;  %v344_v35 = vpop.f32.mrb[14].mxu0 }
 0x114   : > { %v465_v36 = vpop.f32.mrb[14].mxu1  ;;  %v2064_v37 = vpop.f32.mrb[15].mxu0 }
 0x115   : > { %v466_v38 = vadd.f32 %v465_v36, %v344_v35  ;;  %v2100_v39 = vpop.f32.mrb[15].mxu1 }
 0x119   : > { %v349_v40 = vpop.f32.mrb[16].mxu0 }
 0x11a   : > { %v470_v41 = vpop.f32.mrb[16].mxu1  ;;  %v2067_v42 = vpop.f32.mrb[17].mxu0 }
 0x11b   : > { %v471_v43 = vadd.f32 %v470_v41, %v349_v40  ;;  %v2103_v44 = vpop.f32.mrb[17].mxu1  ;;  %v352_v45 = vpop.f32.mrb[18].mxu0 }
 0x11c   : > { %v473_v46 = vpop.f32.mrb[18].mxu1  ;;  %v2068_v47 = vpop.f32.mrb[19].mxu0 }
 0x11d   : > { %v474_v48 = vadd.f32 %v473_v46, %v352_v45  ;;  %v2104_v49 = vpop.f32.mrb[19].mxu1 }
 0x121   : > { %v591_v50 = vpop.f32.mrb[20].mxu0 }
 0x122   : > { %v630_v51 = vadd.f32 %v591_v50, %v439_v4  ;;  %v2123_v52 = vpop.f32.mrb[21].mxu0  ;;  %v754_v53 = vpop.f32.mrb[20].mxu1 }
 0x123   : > { %v594_v54 = vpop.f32.mrb[22].mxu0  ;;  %v2159_v55 = vpop.f32.mrb[21].mxu1 }
 0x124   : > { %v631_v56 = vadd.f32 %v594_v54, %v442_v9  ;;  %v793_v57 = vadd.f32 %v754_v53, %v630_v51  ;;  %v2124_v58 = vpop.f32.mrb[23].mxu0  ;;  %v757_v59 = vpop.f32.mrb[22].mxu1 }
 0x125   : > { %v2160_v60 = vpop.f32.mrb[23].mxu1 }
 0x126   : > { %v794_v61 = vadd.f32 %v757_v59, %v631_v56 }
 0x129   : > { %v599_v62 = vpop.f32.mrb[24].mxu0 }
 0x12a   : > { %v632_v63 = vadd.f32 %v599_v62, %v447_v14  ;;  %v2127_v0 = vpop.f32.mrb[25].mxu0  ;;  %v762_v2 = vpop.f32.mrb[24].mxu1 }
 0x12b   : > { %v602_v3 = vpop.f32.mrb[26].mxu0  ;;  %v2163_v5 = vpop.f32.mrb[25].mxu1 }
 0x12c   : > { %v633_v6 = vadd.f32 %v602_v3, %v450_v18  ;;  %v795_v7 = vadd.f32 %v762_v2, %v632_v63  ;;  %v2128_v8 = vpop.f32.mrb[27].mxu0  ;;  %v765_v4 = vpop.f32.mrb[26].mxu1 }
 0x12d   : > { %v2164_v10 = vpop.f32.mrb[27].mxu1 }
 0x12e   : > { %v796_v11 = vadd.f32 %v765_v4, %v633_v6 }
 0x131   : > { %v607_v12 = vpop.f32.mrb[28].mxu0 }
 0x132   : > { %v634_v13 = vadd.f32 %v607_v12, %v455_v23  ;;  %v2131_v9 = vpop.f32.mrb[29].mxu0  ;;  %v770_v15 = vpop.f32.mrb[28].mxu1 }
 0x133   : > { %v610_v1 = vpop.f32.mrb[30].mxu0  ;;  %v2167_v16 = vpop.f32.mrb[29].mxu1 }
 0x134   : > { %v635_v17 = vadd.f32 %v610_v1, %v458_v28  ;;  %v797_v19 = vadd.f32 %v770_v15, %v634_v13  ;;  %v2132_v20 = vpop.f32.mrb[31].mxu0  ;;  %v773_v14 = vpop.f32.mrb[30].mxu1 }
 0x135   : > { %v2168_v21 = vpop.f32.mrb[31].mxu1 }
 0x136   : > { %v798_v22 = vadd.f32 %v773_v14, %v635_v17 }
 0x139   : > { %v615_v24 = vpop.f32.mrb[32].mxu0 }
 0x13a   : > { %v636_v25 = vadd.f32 %v615_v24, %v463_v33  ;;  %v2135_v18 = vpop.f32.mrb[33].mxu0  ;;  %v778_v26 = vpop.f32.mrb[32].mxu1 }
 0x13b   : > { %v618_v27 = vpop.f32.mrb[34].mxu0  ;;  %v2171_v29 = vpop.f32.mrb[33].mxu1 }
 0x13c   : > { %v637_v30 = vadd.f32 %v618_v27, %v466_v38  ;;  %v799_v31 = vadd.f32 %v778_v26, %v636_v25  ;;  %v2136_v32 = vpop.f32.mrb[35].mxu0  ;;  %v781_v23 = vpop.f32.mrb[34].mxu1 }
 0x13d   : > { %v2172_v34 = vpop.f32.mrb[35].mxu1 }
 0x13e   : > { %v800_v35 = vadd.f32 %v781_v23, %v637_v30 }
 0x141   : > { %v623_v36 = vpop.f32.mrb[36].mxu0 }
 0x142   : > { %v638_v37 = vadd.f32 %v623_v36, %v471_v43  ;;  %v2139_v28 = vpop.f32.mrb[37].mxu0  ;;  %v786_v39 = vpop.f32.mrb[36].mxu1 }
 0x143   : > { %v626_v40 = vpop.f32.mrb[38].mxu0  ;;  %v2175_v41 = vpop.f32.mrb[37].mxu1 }
 0x144   : > { %v639_v42 = vadd.f32 %v626_v40, %v474_v48  ;;  %v801_v44 = vadd.f32 %v786_v39, %v638_v37  ;;  %v2140_v45 = vpop.f32.mrb[39].mxu0  ;;  %v789_v33 = vpop.f32.mrb[38].mxu1 }
 0x145   : > { %v2176_v46 = vpop.f32.mrb[39].mxu1 }
 0x146   : > { %v802_v47 = vadd.f32 %v789_v33, %v639_v42 }
 0x149   : > { %v917_v49 = vpop.f32.mrb[40].mxu0 }
 0x14a   : > { %v956_v50 = vadd.f32 %v917_v49, %v793_v57  ;;  %v2195_v38 = vpop.f32.mrb[41].mxu0  ;;  %v1080_v51 = vpop.f32.mrb[40].mxu1 }
 0x14b   : > { %v920_v52 = vpop.f32.mrb[42].mxu0  ;;  %v2231_v53 = vpop.f32.mrb[41].mxu1 }
 0x14c   : > { %v957_v54 = vadd.f32 %v920_v52, %v794_v61  ;;  %v1119_v55 = vadd.f32 %v1080_v51, %v956_v50  ;;  %v2196_v56 = vpop.f32.mrb[43].mxu0  ;;  %v1083_v43 = vpop.f32.mrb[42].mxu1 }
 0x14d   : > { %v2232_v58 = vpop.f32.mrb[43].mxu1 }
 0x14e   : > { %v1120_v59 = vadd.f32 %v1083_v43, %v957_v54 }
 0x151   : > { %v925_v60 = vpop.f32.mrb[44].mxu0 }
 0x152   : > { %v958_v62 = vadd.f32 %v925_v60, %v795_v7  ;;  %v2199_v48 = vpop.f32.mrb[45].mxu0  ;;  %v1088_v63 = vpop.f32.mrb[44].mxu1 }
 0x153   : > { %v928_v0 = vpop.f32.mrb[46].mxu0  ;;  %v2235_v2 = vpop.f32.mrb[45].mxu1 }
 0x154   : > { %v959_v3 = vadd.f32 %v928_v0, %v796_v11  ;;  %v1121_v5 = vadd.f32 %v1088_v63, %v958_v62  ;;  %v2200_v6 = vpop.f32.mrb[47].mxu0  ;;  %v1091_v57 = vpop.f32.mrb[46].mxu1 }
 0x155   : > { %v2236_v8 = vpop.f32.mrb[47].mxu1 }
 0x156   : > { %v1122_v4 = vadd.f32 %v1091_v57, %v959_v3 }
 0x159   : > { %v933_v10 = vpop.f32.mrb[48].mxu0 }
 0x15a   : > { %v960_v12 = vadd.f32 %v933_v10, %v797_v19  ;;  %v2203_v61 = vpop.f32.mrb[49].mxu0  ;;  %v1096_v13 = vpop.f32.mrb[48].mxu1 }
 0x15b   : > { %v936_v9 = vpop.f32.mrb[50].mxu0  ;;  %v2239_v15 = vpop.f32.mrb[49].mxu1 }
 0x15c   : > { %v961_v1 = vadd.f32 %v936_v9, %v798_v22  ;;  %v1123_v16 = vadd.f32 %v1096_v13, %v960_v12  ;;  %v2204_v17 = vpop.f32.mrb[51].mxu0  ;;  %v1099_v7 = vpop.f32.mrb[50].mxu1 }
 0x15d   : > { %v2240_v20 = vpop.f32.mrb[51].mxu1 }
 0x15e   : > { %v1124_v14 = vadd.f32 %v1099_v7, %v961_v1 }
 0x161   : > { %v941_v21 = vpop.f32.mrb[52].mxu0 }
 0x162   : > { %v962_v24 = vadd.f32 %v941_v21, %v799_v31  ;;  %v2207_v11 = vpop.f32.mrb[53].mxu0  ;;  %v1104_v25 = vpop.f32.mrb[52].mxu1 }
 0x163   : > { %v944_v18 = vpop.f32.mrb[54].mxu0  ;;  %v2243_v26 = vpop.f32.mrb[53].mxu1 }
 0x164   : > { %v963_v27 = vadd.f32 %v944_v18, %v800_v35  ;;  %v1125_v29 = vadd.f32 %v1104_v25, %v962_v24  ;;  %v2208_v30 = vpop.f32.mrb[55].mxu0  ;;  %v1107_v19 = vpop.f32.mrb[54].mxu1 }
 0x165   : > { %v2244_v32 = vpop.f32.mrb[55].mxu1 }
 0x166   : > { %v1126_v23 = vadd.f32 %v1107_v19, %v963_v27 }
 0x169   : > { %v949_v34 = vpop.f32.mrb[56].mxu0 }
 0x16a   : > { %v964_v36 = vadd.f32 %v949_v34, %v801_v44  ;;  %v2211_v22 = vpop.f32.mrb[57].mxu0  ;;  %v1112_v37 = vpop.f32.mrb[56].mxu1 }
 0x16b   : > { %v952_v28 = vpop.f32.mrb[58].mxu0  ;;  %v2247_v39 = vpop.f32.mrb[57].mxu1 }
 0x16c   : > { %v965_v40 = vadd.f32 %v952_v28, %v802_v47  ;;  %v1127_v41 = vadd.f32 %v1112_v37, %v964_v36  ;;  %v2212_v42 = vpop.f32.mrb[59].mxu0  ;;  %v1115_v31 = vpop.f32.mrb[58].mxu1 }
 0x16d   : > { %v2248_v45 = vpop.f32.mrb[59].mxu1 }
 0x16e   : > { %v1128_v33 = vadd.f32 %v1115_v31, %v965_v40  ;;  %v1912_v45 = vld [vmem:[%s3040_s2] ss:$0 sm:$0xff] }
 0x171   : > { %v1243_v46 = vpop.f32.mrb[60].mxu0 }
 0x172   : > { %v1282_v49 = vadd.f32 %v1243_v46, %v1119_v55  ;;  %v2267_v35 = vpop.f32.mrb[61].mxu0  ;;  %v1406_v50 = vpop.f32.mrb[60].mxu1 }
 0x173   : > { %v1246_v38 = vpop.f32.mrb[62].mxu0  ;;  %v2303_v51 = vpop.f32.mrb[61].mxu1 }
 0x174   : > { %v1283_v52 = vadd.f32 %v1246_v38, %v1120_v59  ;;  %v1445_v53 = vadd.f32 %v1406_v50, %v1282_v49  ;;  %v2268_v54 = vpop.f32.mrb[63].mxu0  ;;  %v1409_v44 = vpop.f32.mrb[62].mxu1 }
 0x175   : > { %v2304_v56 = vpop.f32.mrb[63].mxu1 }
 0x176   : > { %v1446_v43 = vadd.f32 %v1409_v44, %v1283_v52 }
 0x179   : > { %v1251_v58 = vpop.f32.mrb[64].mxu0 }
 0x17a   : > { %v1284_v60 = vadd.f32 %v1251_v58, %v1121_v5  ;;  %v2271_v47 = vpop.f32.mrb[65].mxu0  ;;  %v1414_v62 = vpop.f32.mrb[64].mxu1 }
 0x17b   : > { %v1254_v48 = vpop.f32.mrb[66].mxu0  ;;  %v2307_v63 = vpop.f32.mrb[65].mxu1 }
 0x17c   : > { %v1285_v0 = vadd.f32 %v1254_v48, %v1122_v4  ;;  %v3000_v2 = vadd.f32 %v1414_v62, %v1284_v60  ;;  %v2272_v55 = vpop.f32.mrb[67].mxu0  ;;  %v1417_v3 = vpop.f32.mrb[66].mxu1 }
 0x17d   : > { %v2308_v6 = vpop.f32.mrb[67].mxu1 }
 0x17e   : > { %v3002_v57 = vadd.f32 %v1417_v3, %v1285_v0 }
 0x181   : > { %v1259_v59 = vpop.f32.mrb[68].mxu0 }
 0x182   : > { %v1286_v8 = vadd.f32 %v1259_v59, %v1123_v16  ;;  %v2275_v10 = vpop.f32.mrb[69].mxu0  ;;  %v1422_v12 = vpop.f32.mrb[68].mxu1 }
 0x183   : > { %v1262_v61 = vpop.f32.mrb[70].mxu0  ;;  %v2311_v13 = vpop.f32.mrb[69].mxu1 }
 0x184   : > { %v1287_v9 = vadd.f32 %v1262_v61, %v1124_v14  ;;  %v3004_v5 = vadd.f32 %v1422_v12, %v1286_v8  ;;  %v2276_v15 = vpop.f32.mrb[71].mxu0  ;;  %v1425_v1 = vpop.f32.mrb[70].mxu1 }
 0x185   : > { %v2312_v17 = vpop.f32.mrb[71].mxu1 }
 0x186   : > { %v3006_v4 = vadd.f32 %v1425_v1, %v1287_v9 }
 0x189   : > { %v1267_v7 = vpop.f32.mrb[72].mxu0 }
 0x18a   : > { %v1288_v20 = vadd.f32 %v1267_v7, %v1125_v29  ;;  %v2279_v21 = vpop.f32.mrb[73].mxu0  ;;  %v1430_v24 = vpop.f32.mrb[72].mxu1 }
 0x18b   : > { %v1270_v11 = vpop.f32.mrb[74].mxu0  ;;  %v2315_v25 = vpop.f32.mrb[73].mxu1 }
 0x18c   : > { %v1289_v18 = vadd.f32 %v1270_v11, %v1126_v23  ;;  %v1451_v16 = vadd.f32 %v1430_v24, %v1288_v20  ;;  %v2280_v26 = vpop.f32.mrb[75].mxu0  ;;  %v1433_v27 = vpop.f32.mrb[74].mxu1 }
 0x18d   : > { %v2316_v30 = vpop.f32.mrb[75].mxu1 }
 0x18e   : > { %v1452_v14 = vadd.f32 %v1433_v27, %v1289_v18 }
 0x191   : > { %v1275_v19 = vpop.f32.mrb[76].mxu0 }
 0x192   : > { %v1290_v32 = vadd.f32 %v1275_v19, %v1127_v41  ;;  %v2283_v34 = vpop.f32.mrb[77].mxu0  ;;  %v1438_v36 = vpop.f32.mrb[76].mxu1 }
 0x193   : > { %v1278_v22 = vpop.f32.mrb[78].mxu0  ;;  %v2319_v37 = vpop.f32.mrb[77].mxu1 }
 0x194   : > { %v1291_v28 = vadd.f32 %v1278_v22, %v1128_v33  ;;  %v1453_v39 = vadd.f32 %v1438_v36, %v1290_v32  ;;  %v2284_v29 = vpop.f32.mrb[79].mxu0  ;;  %v1441_v40 = vpop.f32.mrb[78].mxu1 }
 0x195   : > { %v2320_v42 = vpop.f32.mrb[79].mxu1 }
 0x196   : > { %v1454_v31 = vadd.f32 %v1441_v40, %v1291_v28 }
 0x199   : > { %v1569_v23 = vpop.f32.mrb[80].mxu0 }
 0x19a   : > { %v1608_v46 = vadd.f32 %v1569_v23, %v1445_v53  ;;  %v1593_v49 = vpop.f32.mrb[80].mxu1  ;;  %v2339_v35 = vpop.f32.mrb[81].mxu0 }
 0x19b   : > { %v1614_v41 = vadd.f32 %v1593_v49, %v1451_v16  ;;  %v2351_v33 = vpop.f32.mrb[81].mxu1  ;;  %v1572_v50 = vpop.f32.mrb[82].mxu0 }
 0x19c   : > { %v1625_v38 = vadd.f32 %v1912_v45, %v1608_v46  ;;  %v1609_v51 = vadd.f32 %v1572_v50, %v1446_v43  ;;  %v1596_v52 = vpop.f32.mrb[82].mxu1  ;;  %v2340_v54 = vpop.f32.mrb[83].mxu0 }
 0x19d   : > { %v1631_v53 = vadd.f32 %v1912_v45, %v1614_v41  ;;  %v1615_v44 = vadd.f32 %v1596_v52, %v1452_v14  ;;  %v2352_v56 = vpop.f32.mrb[83].mxu1 }
 0x19e   : > { %1635 = vst [vmem:[%s3015_s21] sm:$0xff] %v1625_v38  ;;  %v1626_v58 = vadd.f32 %v1912_v45, %v1609_v51 }
 0x19f   : > { %1643 = vst [vmem:[%s3015_s21 + $0x26] sm:$0xfc] %v1631_v53  ;;  %v1632_v60 = vadd.f32 %v1912_v45, %v1615_v44 }
 0x1a0   : > { %1636 = vst [vmem:[%s3015_s21 + $0x6] sm:$0xfc] %v1626_v58 }
 0x1a1   : > { %1644 = vst [vmem:[%s3015_s21 + $0x2e] sm:$0x3] %v1632_v60  ;;  %1645 = vst [vmem:[%s3015_s21 + $0x2c] sm:$0xf0] %v1632_v60  ;;  %v1577_v47 = vpop.f32.mrb[84].mxu0 }
 0x1a2   : > { %v1610_v62 = vadd.f32 %v1577_v47, %v3000_v2  ;;  %v1601_v48 = vpop.f32.mrb[84].mxu1  ;;  %v2343_v43 = vpop.f32.mrb[85].mxu0 }
 0x1a3   : > { %v1616_v63 = vadd.f32 %v1601_v48, %v1453_v39  ;;  %v2355_v0 = vpop.f32.mrb[85].mxu1  ;;  %v1580_v55 = vpop.f32.mrb[86].mxu0 }
 0x1a4   : > { %v1627_v3 = vadd.f32 %v1912_v45, %v1610_v62  ;;  %v1611_v6 = vadd.f32 %v1580_v55, %v3002_v57  ;;  %v1604_v59 = vpop.f32.mrb[86].mxu1  ;;  %v2344_v8 = vpop.f32.mrb[87].mxu0 }
 0x1a5   : > { %v1633_v10 = vadd.f32 %v1912_v45, %v1616_v63  ;;  %v1617_v12 = vadd.f32 %v1604_v59, %v1454_v31  ;;  %v2356_v61 = vpop.f32.mrb[87].mxu1 }
 0x1a6   : > { %1637 = vst [vmem:[%s3015_s21 + $0xe] sm:$0x3] %v1627_v3  ;;  %1638 = vst [vmem:[%s3015_s21 + $0xc] sm:$0xf0] %v1627_v3  ;;  %v1628_v2 = vadd.f32 %v1912_v45, %v1611_v6 }
 0x1a7   : > { %1646 = vst [vmem:[%s3015_s21 + $0x34] sm:$0xf] %v1633_v10  ;;  %1647 = vst [vmem:[%s3015_s21 + $0x32] sm:$0xc0] %v1633_v10  ;;  %v1634_v13 = vadd.f32 %v1912_v45, %v1617_v12 }
 0x1a8   : > { %1639 = vst [vmem:[%s3015_s21 + $0x14] sm:$0xf] %v1628_v2  ;;  %1640 = vst [vmem:[%s3015_s21 + $0x12] sm:$0xc0] %v1628_v2 }
 0x1a9   : > { %1648 = vst [vmem:[%s3015_s21 + $0x3a] sm:$0x3f] %v1634_v13  ;;  %v1585_v9 = vpop.f32.mrb[88].mxu0 }
 0x1aa   : > { %v1612_v15 = vadd.f32 %v1585_v9, %v3004_v5  ;;  %v2347_v57 = vpop.f32.mrb[89].mxu0 }
 0x1ab   : > { %v1588_v1 = vpop.f32.mrb[90].mxu0 }
 0x1ac   : > { %v1629_v17 = vadd.f32 %v1912_v45, %v1612_v15  ;;  %v1613_v7 = vadd.f32 %v1588_v1, %v3006_v4  ;;  %v2348_v20 = vpop.f32.mrb[91].mxu0 }
 0x1ae   : > { %1641 = vst [vmem:[%s3015_s21 + $0x1a] sm:$0x3f] %v1629_v17  ;;  %v1630_v21 = vadd.f32 %v1912_v45, %v1613_v7 }
 0x1b0   : > { %1642 = vst [vmem:[%s3015_s21 + $0x20] sm:$0xff] %v1630_v21 }
 0x1b1 PF: > { %s13_s12 = sadd.s32 1, %s2462_s12  }
 0x1b2   : > { %p10_p4 = scmp.ge.s32.totalorder %s13_s12, 4  }
 0x1b4   :  { %12 = sbr.rel (!%p10_p4) target bundleno = 1 (0x1), region = 70 }

// kernel: _lambda_.24
= control target key start
LH: loop header
LB: loop body
LE: loop exit
PB: predicated region body
PF: predicated region fallthrough
CT: control target
= control target key end

     0   :  { %s701_s15 = smov 0   ;;  %s795_s0 = inlined_call_operand.vmem [shape: f32[2,16,128], index: 0, kind: input, shape index: {}]   ;;  %s796_s1 = inlined_call_operand.vmem [shape: f32[1,128], index: 1, kind: input, shape index: {}]   ;;  %s797_s2 = inlined_call_operand.vmem [shape: f32[1,128], index: 2, kind: input, shape index: {}]   ;;  %s798_s3 = inlined_call_operand.vmem [shape: f32[128,128], index: 3, kind: input, shape index: {}]   ;;  %s799_s4 = inlined_call_operand.vmem [shape: f32[2,16,128], index: 4, kind: output, shape index: {}]  }
   0x1 LB: > { %s481_s16 = sadd.s32 4294967295, %s671_s15   ;;  %p485_p0 = scmp.ge.s32.totalorder %s671_s15, 1  ;;  %s671_s15 = sphi %s701_s15, %s14_s15  }
   0x2   : > { %p162_p1 = scmp.lt.s32.totalorder %s671_s15, 3 }
   0x4   : > { %p163_p2 = pnand %p485_p0, %p162_p1 }
   0x5   : > { %v207_v0 = vld [vmem:[%s798_s3] sm:$0xff] (!%p163_p2)  ;;  %v208_v1 = vld [vmem:[%s798_s3 + $0x8] sm:$0xff] (!%p163_p2)  ;;  %v209_v2 = vld [vmem:[%s798_s3 + $0x10] sm:$0xff] (!%p163_p2)  ;;  %v673_v3 = vmov (!%p163_p2), 0.0|0.0   ;;  %vm674_vm0 = vmmov (!%p163_p2), 0   ;;  %v675_v6 = vmov (!%p163_p2), 0.0   ;;  %v294_v35 = vlaneseq (!%p163_p2) }
   0x6   : > { %166 = sbr.rel (%p163_p2) target bundleno = 537 (0x219), region = 36  ;;  %600 = vmatprep.subr.bf16.mxu0 (!%p163_p2), %v673_v3  ;;  %v601_v4 = vpack.c.bf16 (!%p163_p2), %v208_v1, %v207_v0  ;;  %v210_v5 = vld [vmem:[%s798_s3 + $0x18] sm:$0xff] (!%p163_p2)  ;;  %562 = vmatprep.mubr.msk.f32.mxu0 (!%p163_p2), %vm674_vm0, %v675_v6  ;;  %p188_p3 = scmp.lt.s32.totalorder (!%p163_p2), %s481_s16, 1  ;;  %v211_v8 = vld [vmem:[%s798_s3 + $0x20] sm:$0xff] (!%p163_p2)  ;;  %v212_v9 = vld [vmem:[%s798_s3 + $0x28] sm:$0xff] (!%p163_p2) }
   0x7   : > { %624 = vmatprep.subr.bf16.mxu1 (!%p163_p2), %v673_v3  ;;  %597 = vmatprep.mubr.msk.f32.mxu1 (!%p163_p2), %vm674_vm0, %v675_v6  ;;  %v604_v7 = vpack.c.bf16 (!%p163_p2), %v210_v5, %v209_v2  ;;  %v607_v10 = vpack.c.bf16 (!%p163_p2), %v212_v9, %v211_v8  ;;  %v213_v13 = vld [vmem:[%s798_s3 + $0x30] sm:$0xff] (!%p163_p2)  ;;  %v214_v14 = vld [vmem:[%s798_s3 + $0x38] sm:$0xff] (!%p163_p2)  ;;  %v215_v18 = vld [vmem:[%s798_s3 + $0x40] sm:$0xff] (!%p163_p2)  ;;  %v295_v36 = vshrl.u32 (!%p163_p2), %v294_v35, 7 }
   0x8   : > { %602 = vmatpush3.bf16.msra.mxu0 (!%p163_p2), %v601_v4  ;;  %626 = vmatpush3.bf16.msra.mxu1 (!%p163_p2), %v601_v4  ;;  %v610_v17 = vpack.c.bf16 (!%p163_p2), %v214_v14, %v213_v13  ;;  %v216_v19 = vld [vmem:[%s798_s3 + $0x48] sm:$0xff] (!%p163_p2)  ;;  %v217_v22 = vld [vmem:[%s798_s3 + $0x50] sm:$0xff] (!%p163_p2)  ;;  %v218_v23 = vld [vmem:[%s798_s3 + $0x58] sm:$0xff] (!%p163_p2) }
   0x9   : > { %603 = vmatprep.subr.bf16.mxu0 (!%p163_p2), %v673_v3  ;;  %627 = vmatprep.subr.bf16.mxu1 (!%p163_p2), %v673_v3  ;;  %v613_v21 = vpack.c.bf16 (!%p163_p2), %v216_v19, %v215_v18  ;;  %v616_v25 = vpack.c.bf16 (!%p163_p2), %v218_v23, %v217_v22  ;;  %v219_v26 = vld [vmem:[%s798_s3 + $0x60] sm:$0xff] (!%p163_p2)  ;;  %v220_v27 = vld [vmem:[%s798_s3 + $0x68] sm:$0xff] (!%p163_p2)  ;;  %v221_v30 = vld [vmem:[%s798_s3 + $0x70] sm:$0xff] (!%p163_p2)  ;;  %v296_v37 = vsub.s32 (!%p163_p2), 0, %v295_v36 }
   0xa   : > { %v619_v29 = vpack.c.bf16 (!%p163_p2), %v220_v27, %v219_v26  ;;  %v222_v31 = vld [vmem:[%s798_s3 + $0x78] sm:$0xff] (!%p163_p2)  ;;  %v490_v59 = vld [vmem:[%s796_s1] ss:$0 sm:$0xff] (!%p163_p2) }
   0xb   : > { %v622_v33 = vpack.c.bf16 (!%p163_p2), %v222_v31, %v221_v30  ;;  %v491_v62 = vld [vmem:[%s797_s2] ss:$0 sm:$0xff] (!%p163_p2) }
   0xc   : > { %605 = vmatpush3.bf16.msra.mxu0 (!%p163_p2), %v604_v7  ;;  %629 = vmatpush3.bf16.msra.mxu1 (!%p163_p2), %v604_v7 }
   0xd   : > { %s801_s16 = smov (!%p188_p3, %s481_s16), 1  ;;  %606 = vmatprep.subr.bf16.mxu0 %v673_v3  ;;  %630 = vmatprep.subr.bf16.mxu1 %v673_v3 }
   0xe   : > { %s494_s29 = sshll.u32 %s801_s16, 4 }
   0xf   : > { %s192_s6 = scalar_lea.vmem %s795_s0, %s494_s29  ;;  %s197_s10 = scalar_lea.vmem %s799_s4, %s494_s29 }
  0x10   : > { %v198_v11 = vld [vmem:[%s192_s6] sm:$0xff]  ;;  %v199_v12 = vld [vmem:[%s192_s6 + $0x8] sm:$0xff]  ;;  %608 = vmatpush3.bf16.msra.mxu0 %v607_v10  ;;  %632 = vmatpush3.bf16.msra.mxu1 %v607_v10 }
  0x11   : > { %v200_v15 = vadd.f32 %v199_v12, %v198_v11  ;;  %609 = vmatprep.subr.bf16.mxu0 %v673_v3  ;;  %633 = vmatprep.subr.bf16.mxu1 %v673_v3 }
  0x13   : > { %v201_v16 = vrot.slane %v200_v15, 4 }
  0x14   : > { %611 = vmatpush3.bf16.msra.mxu0 %v610_v17  ;;  %635 = vmatpush3.bf16.msra.mxu1 %v610_v17 }
  0x15   : > { %v202_v20 = vadd.f32 %v201_v16, %v200_v15  ;;  %612 = vmatprep.subr.bf16.mxu0 %v673_v3  ;;  %636 = vmatprep.subr.bf16.mxu1 %v673_v3 }
  0x17   : > { %v203_v24 = vrot.slane %v202_v20, 2 }
  0x18   : > { %614 = vmatpush3.bf16.msra.mxu0 %v613_v21  ;;  %638 = vmatpush3.bf16.msra.mxu1 %v613_v21 }
  0x19   : > { %615 = vmatprep.subr.bf16.mxu0 %v673_v3  ;;  %639 = vmatprep.subr.bf16.mxu1 %v673_v3  ;;  %v204_v28 = vadd.f32 %v203_v24, %v202_v20 }
  0x1b   : > { %v205_v32 = vrot.slane %v204_v28, 1 }
  0x1c   : > { %617 = vmatpush3.bf16.msra.mxu0 %v616_v25  ;;  %641 = vmatpush3.bf16.msra.mxu1 %v616_v25 }
  0x1d   : > { %618 = vmatprep.subr.bf16.mxu0 %v673_v3  ;;  %642 = vmatprep.subr.bf16.mxu1 %v673_v3  ;;  %v206_v34 = vadd.f32 %v205_v32, %v204_v28 }
  0x20   : > { %620 = vmatpush3.bf16.msra.mxu0 %v619_v29  ;;  %644 = vmatpush3.bf16.msra.mxu1 %v619_v29 }
  0x21   : > { %621 = vmatprep.subr.bf16.mxu0 %v673_v3  ;;  %645 = vmatprep.subr.bf16.mxu1 %v673_v3 }
  0x24   : > { %623 = vmatpush3.bf16.msra.mxu0 %v622_v33  ;;  %647 = vmatpush3.bf16.msra.mxu1 %v622_v33 }
  0x27   : > { %563 = vmatmul.mubr.f32.vlgmr.msra.gmra.mrb[0].mxu0 %v206_v34 }
  0xfa   : > { %v289_v38 = vpop.f32.mrb[0].mxu0 }
  0xfb   : > { %v293_v39 = vmul.f32 0.03125, %v289_v38  ;;  %v564_v40 = vpop.f32.mrb[1].mxu0 }
  0xfd   : > { %v297_v41 = vrot.slane %v293_v39, %v296_v37 }
  0xff   : > { %v298_v42 = vsub.f32 %v198_v11, %v297_v41  ;;  %v299_v43 = vsub.f32 %v199_v12, %v297_v41 }
 0x101   : > { %v300_v44 = vmul.f32 %v298_v42, %v298_v42  ;;  %v301_v45 = vmul.f32 %v299_v43, %v299_v43 }
 0x103   : > { %v302_v46 = vadd.f32 %v301_v45, %v300_v44 }
 0x105   : > { %v303_v47 = vrot.slane %v302_v46, 4 }
 0x107   : > { %v304_v48 = vadd.f32 %v303_v47, %v302_v46 }
 0x109   : > { %v305_v49 = vrot.slane %v304_v48, 2 }
 0x10b   : > { %v306_v50 = vadd.f32 %v305_v49, %v304_v48 }
 0x10d   : > { %v307_v51 = vrot.slane %v306_v50, 1 }
 0x10f   : > { %v308_v52 = vadd.f32 %v307_v51, %v306_v50 }
 0x111   : > { %598 = vmatmul.mubr.f32.vlgmr.msra.gmra.mrb[0].mxu1 %v308_v52 }
 0x1e4   : > { %v375_v53 = vpop.f32.mrb[0].mxu1 }
 0x1e5   : > { %v379_v54 = vmul.f32 0.03125, %v375_v53  ;;  %v599_v55 = vpop.f32.mrb[1].mxu1 }
 0x1e7   : > { %v380_v56 = vadd.f32 1e-05, %v379_v54 }
 0x1e9   : > { %659 = vrsqrt.f32 %v380_v56 }
 0x1f3   : > { %v660_v57 = vpop.eup %659 }
 0x1f4   : > { %v385_v58 = vrot.slane %v660_v57, %v296_v37 }
 0x1f6   : > { %v386_v60 = vmul.f32 %v385_v58, %v298_v42  ;;  %v387_v61 = vmul.f32 %v385_v58, %v299_v43 }
 0x1f8   : > { %v395_v63 = vmul.f32 %v490_v59, %v386_v60  ;;  %v396_v0 = vmul.f32 %v490_v59, %v387_v61 }
 0x1fa   : > { %v404_v1 = vadd.f32 %v491_v62, %v395_v63  ;;  %v405_v2 = vadd.f32 %v491_v62, %v396_v0 }
 0x1fc   : > { %v406_v3 = vmul.f32 %v404_v1, %v404_v1  ;;  %v407_v4 = vmul.f32 %v405_v2, %v405_v2 }
 0x1fe   : > { %v408_v5 = vmul.f32 %v406_v3, %v404_v1  ;;  %v409_v6 = vmul.f32 %v407_v4, %v405_v2 }
 0x200   : > { %v410_v7 = vmul.f32 0.044715, %v408_v5  ;;  %v411_v8 = vmul.f32 0.044715, %v409_v6 }
 0x202   : > { %v412_v9 = vadd.f32 %v410_v7, %v404_v1  ;;  %v413_v10 = vadd.f32 %v411_v8, %v405_v2 }
 0x204   : > { %v414_v11 = vmul.f32 0.7978846, %v412_v9  ;;  %v415_v12 = vmul.f32 0.7978846, %v413_v10 }
 0x206   : > { %661 = vtanh.f32 %v414_v11 }
 0x207   : > { %663 = vtanh.f32 %v415_v12 }
 0x210   : > { %v662_v13 = vpop.eup %661 }
 0x211   : > { %v664_v14 = vpop.eup %663  ;;  %v418_v15 = vadd.f32 1.0, %v662_v13 }
 0x212   : > { %v419_v16 = vadd.f32 1.0, %v664_v14 }
 0x213   : > { %v420_v17 = vmul.f32 0.5, %v418_v15 }
 0x214   : > { %v421_v18 = vmul.f32 0.5, %v419_v16 }
 0x215   : > { %v422_v19 = vmul.f32 %v420_v17, %v404_v1 }
 0x216   : > { %v423_v20 = vmul.f32 %v421_v18, %v405_v2 }
 0x217   : > { %424 = vst [vmem:[%s197_s10] sm:$0xff] %v422_v19 }
 0x218   : > { %425 = vst [vmem:[%s197_s10 + $0x8] sm:$0xff] %v423_v20 }
 0x219 PF: > { %s14_s15 = sadd.s32 1, %s671_s15  }
 0x21a   : > { %p11_p4 = scmp.ge.s32.totalorder %s14_s15, 4  }
 0x21c   :  { %13 = sbr.rel (!%p11_p4) target bundleno = 1 (0x1), region = 66 }

// kernel: _lambda_.25
= control target key start
LH: loop header
LB: loop body
LE: loop exit
PB: predicated region body
PF: predicated region fallthrough
CT: control target
= control target key end

     0   :  { %s1915_s12 = smov 0   ;;  %s2201_s0 = inlined_call_operand.vmem [shape: f32[2,1,42,128], index: 0, kind: input, shape index: {}]   ;;  %s2202_s1 = inlined_call_operand.vmem [shape: bf16[9,128,128], index: 1, kind: input, shape index: {}]   ;;  %s2203_s2 = inlined_call_operand.vmem [shape: f32[1,128], index: 2, kind: input, shape index: {}]   ;;  %s2204_s3 = inlined_call_operand.vmem [shape: f32[2,16,128], index: 3, kind: output, shape index: {}]  }
   0x1 LB: > { %s1324_s13 = sadd.s32 4294967295, %s1893_s12   ;;  %p1328_p0 = scmp.ge.s32.totalorder %s1893_s12, 1  ;;  %s1893_s12 = sphi %s1915_s12, %s13_s12  }
   0x2   : > { %p137_p1 = scmp.lt.s32.totalorder %s1893_s12, 3 }
   0x4   : > { %p138_p2 = pnand %p1328_p0, %p137_p1 }
   0x5   : > { %v1815_v0 = vld [vmem:[%s2202_s1 + $0x40] sm:$0xff] (!%p138_p2)   ;;  %p161_p3 = scmp.lt.s32.totalorder (!%p138_p2), %s1324_s13, 1  ;;  %v1817_v2 = vld [vmem:[%s2202_s1 + $0x48] sm:$0xff] (!%p138_p2)   ;;  %v1819_v4 = vld [vmem:[%s2202_s1 + $0x50] sm:$0xff] (!%p138_p2)  }
   0x6   : > { %141 = sbr.rel (%p138_p2) target bundleno = 386 (0x182), region = 32  ;;  %v1816_v1 = vld [vmem:[%s2202_s1] sm:$0xff] (!%p138_p2)   ;;  %1626 = vmatprep.subr.bf16.mxu0 (!%p138_p2), %v1815_v0  ;;  %v1818_v3 = vld [vmem:[%s2202_s1 + $0x8] sm:$0xff] (!%p138_p2)   ;;  %v1820_v5 = vld [vmem:[%s2202_s1 + $0x10] sm:$0xff] (!%p138_p2)  }
   0x7   : > { %1646 = vmatprep.subr.bf16.mxu1 (!%p138_p2), %v1816_v1  ;;  %1627 = vmatpush3.bf16.msra.mxu0 (!%p138_p2), %v1815_v0  ;;  %v1821_v6 = vld [vmem:[%s2202_s1 + $0x58] sm:$0xff] (!%p138_p2)   ;;  %v1823_v8 = vld [vmem:[%s2202_s1 + $0x60] sm:$0xff] (!%p138_p2)   ;;  %v1825_v10 = vld [vmem:[%s2202_s1 + $0x68] sm:$0xff] (!%p138_p2)  }
   0x8   : > { %1647 = vmatpush3.bf16.msra.mxu1 (!%p138_p2), %v1816_v1  ;;  %1628 = vmatprep.subr.bf16.mxu0 (!%p138_p2), %v1817_v2  ;;  %v1822_v7 = vld [vmem:[%s2202_s1 + $0x18] sm:$0xff] (!%p138_p2)   ;;  %v1824_v9 = vld [vmem:[%s2202_s1 + $0x20] sm:$0xff] (!%p138_p2)   ;;  %v1826_v14 = vld [vmem:[%s2202_s1 + $0x28] sm:$0xff] (!%p138_p2)  }
   0x9   : > { %1648 = vmatprep.subr.bf16.mxu1 (!%p138_p2), %v1818_v3  ;;  %v1827_v18 = vld [vmem:[%s2202_s1 + $0x70] sm:$0xff] (!%p138_p2)   ;;  %v1829_v20 = vld [vmem:[%s2202_s1 + $0x78] sm:$0xff] (!%p138_p2)   ;;  %v1831_v24 = vld [vmem:[%s2202_s1 + $0x80] sm:$0xff] (!%p138_p2)  }
   0xa   : > { %v1828_v19 = vld [vmem:[%s2202_s1 + $0x30] sm:$0xff] (!%p138_p2)   ;;  %v1830_v21 = vld [vmem:[%s2202_s1 + $0x38] sm:$0xff] (!%p138_p2)   ;;  %v1832_v25 = vld [vmem:[%s2202_s1 + $0xc0] sm:$0xff] (!%p138_p2)  }
   0xb   : > { %1629 = vmatpush3.bf16.msra.mxu0 (!%p138_p2), %v1817_v2  ;;  %v1833_v28 = vld [vmem:[%s2202_s1 + $0x88] sm:$0xff] (!%p138_p2)   ;;  %v1835_v32 = vld [vmem:[%s2202_s1 + $0x90] sm:$0xff] (!%p138_p2)   ;;  %v1837_v40 = vld [vmem:[%s2202_s1 + $0x98] sm:$0xff] (!%p138_p2)  }
   0xc   : > { %1649 = vmatpush3.bf16.msra.mxu1 (!%p138_p2), %v1818_v3  ;;  %1630 = vmatprep.subr.bf16.mxu0 (!%p138_p2), %v1819_v4  ;;  %v1834_v29 = vld [vmem:[%s2202_s1 + $0xc8] sm:$0xff] (!%p138_p2)   ;;  %v1836_v37 = vld [vmem:[%s2202_s1 + $0xd0] sm:$0xff] (!%p138_p2)   ;;  %v1838_v41 = vld [vmem:[%s2202_s1 + $0xd8] sm:$0xff] (!%p138_p2)  }
   0xd   : > { %s2206_s13 = smov (!%p161_p3, %s1324_s13), 1  ;;  %1650 = vmatprep.subr.bf16.mxu1 %v1820_v5  ;;  %v1839_v42 = vld [vmem:[%s2202_s1 + $0xa0] sm:$0xff]   ;;  %v1841_v44 = vld [vmem:[%s2202_s1 + $0xa8] sm:$0xff]   ;;  %v1843_v46 = vld [vmem:[%s2202_s1 + $0xb0] sm:$0xff]  }
   0xe   : > { %s1806_s30 = smul.u32 48, %s2206_s13  ;;  %v1840_v43 = vld [vmem:[%s2202_s1 + $0xe0] sm:$0xff]   ;;  %v1842_v45 = vld [vmem:[%s2202_s1 + $0xe8] sm:$0xff]   ;;  %v1844_v47 = vld [vmem:[%s2202_s1 + $0xf0] sm:$0xff]  }
   0xf   : > { %1631 = vmatpush3.bf16.msra.mxu0 %v1819_v4  ;;  %v1845_v48 = vld [vmem:[%s2202_s1 + $0xb8] sm:$0xff]   ;;  %v1847_v51 = vld [vmem:[%s2202_s1 + $0x100] sm:$0xff]   ;;  %v1849_v57 = vld [vmem:[%s2202_s1 + $0x108] sm:$0xff]  }
  0x10   : > { %1651 = vmatpush3.bf16.msra.mxu1 %v1820_v5  ;;  %1632 = vmatprep.subr.bf16.mxu0 %v1821_v6  ;;  %s1959_s10 = scalar_lea.vmem %s2201_s0, %s1806_s30  ;;  %v1846_v49 = vld [vmem:[%s2202_s1 + $0xf8] sm:$0xff]   ;;  %v1848_v52 = vld [vmem:[%s2202_s1 + $0x140] sm:$0xff]   ;;  %v1850_v58 = vld [vmem:[%s2202_s1 + $0x148] sm:$0xff]  }
  0x11   : > { %1652 = vmatprep.subr.bf16.mxu1 %v1822_v7  ;;  %v193_v11 = vld [vmem:[%s1959_s10 + $0x1] sm:$0xff]  ;;  %v194_v12 = vld [vmem:[%s1959_s10 + $0x9] sm:$0xff]  ;;  %v195_v22 = vld [vmem:[%s1959_s10 + $0x11] sm:$0xff] }
  0x12   : > { %v172_v13 = vld [vmem:[%s1959_s10] sm:$0xff]  ;;  %v196_v15 = vpack.c.bf16 %v194_v12, %v193_v11  ;;  %v1971_v16 = vld [vmem:[%s1959_s10 + $0x8] sm:$0xff]  ;;  %v1988_v23 = vld [vmem:[%s1959_s10 + $0x10] sm:$0xff]  ;;  %v197_v26 = vpack.c.bf16 %v195_v22, %v195_v22 }
  0x13   : > { %1633 = vmatpush3.bf16.msra.mxu0 %v1821_v6  ;;  %v175_v17 = vpack.c.bf16 %v1971_v16, %v172_v13  ;;  %v176_v27 = vpack.c.bf16 %v1988_v23, %v1988_v23  ;;  %v407_v30 = vld [vmem:[%s1959_s10 + $0x2] sm:$0xff]  ;;  %v408_v31 = vld [vmem:[%s1959_s10 + $0xa] sm:$0xff]  ;;  %v2014_v36 = vld [vmem:[%s1959_s10 + $0x16] sm:$0xff]  ;;  %v773_v60 = vpack.c.bf16 %v1988_v23, %v1971_v16 }
  0x14   : > { %1653 = vmatpush3.bf16.msra.mxu1 %v1822_v7  ;;  %1634 = vmatprep.subr.bf16.mxu0 %v1823_v8  ;;  %v410_v33 = vpack.c.bf16 %v408_v31, %v407_v30  ;;  %v528_v34 = vld [vmem:[%s1959_s10 + $0x6] sm:$0xff]  ;;  %v2011_v35 = vld [vmem:[%s1959_s10 + $0xe] sm:$0xff]  ;;  %v532_v56 = vpack.c.bf16 %v2014_v36, %v2014_v36  ;;  %v1853_v63 = vld [vmem:[%s2202_s1 + $0x118] sm:$0xff]  }
  0x15   : > { %1654 = vmatprep.subr.bf16.mxu1 %v1824_v9  ;;  %1642 = vmatprep.mubr.bf16.mxu0 %v196_v15  ;;  %v531_v38 = vpack.c.bf16 %v2011_v35, %v528_v34  ;;  %v1136_v39 = vpack.c.bf16 %v2014_v36, %v2011_v35  ;;  %v409_v50 = vld [vmem:[%s1959_s10 + $0x12] sm:$0xff]  ;;  %v649_v53 = vld [vmem:[%s1959_s10 + $0x7] sm:$0xff] }
  0x16   : > { %1662 = vmatprep.mubr.bf16.mxu1 %v175_v17  ;;  %v411_v54 = vpack.c.bf16 %v409_v50, %v409_v50  ;;  %v650_v55 = vld [vmem:[%s1959_s10 + $0xf] sm:$0xff]  ;;  %v1854_v0 = vld [vmem:[%s2202_s1 + $0x158] sm:$0xff]   ;;  %v1855_v1 = vld [vmem:[%s2202_s1 + $0x120] sm:$0xff]  }
  0x17   : > { %1635 = vmatpush3.bf16.msra.mxu0 %v1823_v8  ;;  %v652_v59 = vpack.c.bf16 %v650_v55, %v649_v53  ;;  %v1851_v61 = vld [vmem:[%s2202_s1 + $0x110] sm:$0xff]   ;;  %v1856_v2 = vld [vmem:[%s2202_s1 + $0x160] sm:$0xff]   ;;  %v1857_v3 = vld [vmem:[%s2202_s1 + $0x128] sm:$0xff]  }
  0x18   : > { %1655 = vmatpush3.bf16.msra.mxu1 %v1824_v9  ;;  %1636 = vmatprep.subr.bf16.mxu0 %v1825_v10  ;;  %v1852_v62 = vld [vmem:[%s2202_s1 + $0x150] sm:$0xff]   ;;  %v1858_v4 = vld [vmem:[%s2202_s1 + $0x168] sm:$0xff]   ;;  %v1861_v7 = vld [vmem:[%s2202_s1 + $0x138] sm:$0xff]  }
  0x19   : > { %1656 = vmatprep.subr.bf16.mxu1 %v1826_v14  ;;  %v1859_v5 = vld [vmem:[%s2202_s1 + $0x130] sm:$0xff]   ;;  %v1862_v8 = vld [vmem:[%s2202_s1 + $0x178] sm:$0xff]   ;;  %v1864_v12 = vld [vmem:[%s2202_s1 + $0x1c0] sm:$0xff]  }
  0x1a   : > { %v1860_v6 = vld [vmem:[%s2202_s1 + $0x170] sm:$0xff]   ;;  %v772_v11 = vld [vmem:[%s1959_s10 + $0x18] sm:$0xff]  ;;  %v1874_v30 = vld [vmem:[%s2202_s1 + $0x1e8] sm:$0xff]  }
  0x1b   : > { %1637 = vmatpush3.bf16.msra.mxu0 %v1825_v10  ;;  %v651_v9 = vld [vmem:[%s1959_s10 + $0x17] sm:$0xff]  ;;  %v1863_v10 = vld [vmem:[%s2202_s1 + $0x180] sm:$0xff]   ;;  %v774_v16 = vpack.c.bf16 %v772_v11, %v772_v11  ;;  %v1012_v17 = vld [vmem:[%s1959_s10 + $0xd] sm:$0xff] }
  0x1c   : > { %1657 = vmatpush3.bf16.msra.mxu1 %v1826_v14  ;;  %1638 = vmatprep.subr.bf16.mxu0 %v1827_v18  ;;  %v653_v13 = vpack.c.bf16 %v651_v9, %v651_v9  ;;  %v891_v14 = vld [vmem:[%s1959_s10 + $0xc] sm:$0xff]  ;;  %v892_v15 = vld [vmem:[%s1959_s10 + $0x14] sm:$0xff] }
  0x1d   : > { %1658 = vmatprep.subr.bf16.mxu1 %v1828_v19  ;;  %v1867_v23 = vld [vmem:[%s2202_s1 + $0x190] sm:$0xff]   ;;  %v1878_v34 = vld [vmem:[%s2202_s1 + $0x1f8] sm:$0xff]   ;;  %v1884_v35 = vld [vmem:[%s2202_s1 + $0x228] sm:$0xff]  }
  0x1e   : > { %v1875_v31 = vld [vmem:[%s2202_s1 + $0x1b0] sm:$0xff]  }
  0x1f   : > { %1639 = vmatpush3.bf16.msra.mxu0 %v1827_v18  ;;  %v1013_v18 = vld [vmem:[%s1959_s10 + $0x15] sm:$0xff] }
  0x20   : > { %1659 = vmatpush3.bf16.msra.mxu1 %v1828_v19  ;;  %1640 = vmatprep.subr.bf16.mxu0 %v1829_v20  ;;  %v1865_v19 = vld [vmem:[%s2202_s1 + $0x188] sm:$0xff]   ;;  %v1015_v22 = vpack.c.bf16 %v1013_v18, %v1012_v17  ;;  %v1885_v36 = vld [vmem:[%s2202_s1 + $0x230] sm:$0xff]  }
  0x21   : > { %1660 = vmatprep.subr.bf16.mxu1 %v1830_v21 }
  0x23   : > { %1641 = vmatpush3.bf16.msra.mxu0 %v1829_v20  ;;  %v1866_v20 = vld [vmem:[%s2202_s1 + $0x1c8] sm:$0xff]  }
  0x24   : > { %1661 = vmatpush3.bf16.msra.mxu1 %v1830_v21  ;;  %1666 = vmatprep.subr.bf16.mxu0 %v1831_v24  ;;  %v894_v21 = vpack.c.bf16 %v892_v15, %v891_v14 }
  0x25   : > { %1686 = vmatprep.subr.bf16.mxu1 %v1832_v25 }
  0x26   : > { %1643 = vmatmul.mubr.bf16.vlgmr.msra.gmra.mrb[0].mxu0 %v197_v26  ;;  %v1870_v26 = vld [vmem:[%s2202_s1 + $0x1d8] sm:$0xff]  }
  0x27   : > { %1663 = vmatmul.mubr.bf16.vlgmr.msra.gmra.mrb[0].mxu1 %v176_v27  ;;  %1667 = vmatpush3.bf16.msra.mxu0 %v1831_v24  ;;  %v1868_v24 = vld [vmem:[%s2202_s1 + $0x1d0] sm:$0xff]   ;;  %v1871_v27 = vld [vmem:[%s2202_s1 + $0x1a0] sm:$0xff]  }
  0x28   : > { %1687 = vmatpush3.bf16.msra.mxu1 %v1832_v25  ;;  %1668 = vmatprep.subr.bf16.mxu0 %v1833_v28  ;;  %v1869_v25 = vld [vmem:[%s2202_s1 + $0x198] sm:$0xff]  }
  0x29   : > { %1688 = vmatprep.subr.bf16.mxu1 %v1834_v29  ;;  %1682 = vmatprep.mubr.bf16.mxu0 %v410_v33  ;;  %v1877_v33 = vld [vmem:[%s2202_s1 + $0x1b8] sm:$0xff]  }
  0x2a   : > { %1702 = vmatprep.mubr.bf16.mxu1 %v531_v38  ;;  %v1879_v38 = vld [vmem:[%s2202_s1 + $0x200] sm:$0xff]  }
  0x2b   : > { %1669 = vmatpush3.bf16.msra.mxu0 %v1833_v28  ;;  %v1872_v28 = vld [vmem:[%s2202_s1 + $0x1e0] sm:$0xff]  }
  0x2c   : > { %1689 = vmatpush3.bf16.msra.mxu1 %v1834_v29  ;;  %1670 = vmatprep.subr.bf16.mxu0 %v1835_v32  ;;  %v1873_v29 = vld [vmem:[%s2202_s1 + $0x1a8] sm:$0xff]  }
  0x2d   : > { %1690 = vmatprep.subr.bf16.mxu1 %v1836_v37 }
  0x2f   : > { %1671 = vmatpush3.bf16.msra.mxu0 %v1835_v32  ;;  %v1876_v32 = vld [vmem:[%s2202_s1 + $0x1f0] sm:$0xff]  }
  0x30   : > { %1691 = vmatpush3.bf16.msra.mxu1 %v1836_v37  ;;  %1672 = vmatprep.subr.bf16.mxu0 %v1837_v40  ;;  %v893_v37 = vld [vmem:[%s1959_s10 + $0x1c] sm:$0xff] }
  0x31   : > { %1692 = vmatprep.subr.bf16.mxu1 %v1838_v41 }
  0x33   : > { %1673 = vmatpush3.bf16.msra.mxu0 %v1837_v40  ;;  %v1014_v40 = vld [vmem:[%s1959_s10 + $0x1d] sm:$0xff] }
  0x34   : > { %1693 = vmatpush3.bf16.msra.mxu1 %v1838_v41  ;;  %1674 = vmatprep.subr.bf16.mxu0 %v1839_v42  ;;  %v895_v41 = vpack.c.bf16 %v893_v37, %v893_v37 }
  0x35   : > { %1694 = vmatprep.subr.bf16.mxu1 %v1840_v43 }
  0x37   : > { %1675 = vmatpush3.bf16.msra.mxu0 %v1839_v42  ;;  %v1016_v42 = vpack.c.bf16 %v1014_v40, %v1014_v40 }
  0x38   : > { %1695 = vmatpush3.bf16.msra.mxu1 %v1840_v43  ;;  %1676 = vmatprep.subr.bf16.mxu0 %v1841_v44  ;;  %v1880_v43 = vld [vmem:[%s2202_s1 + $0x208] sm:$0xff]  }
  0x39   : > { %1696 = vmatprep.subr.bf16.mxu1 %v1842_v45 }
  0x3b   : > { %1677 = vmatpush3.bf16.msra.mxu0 %v1841_v44  ;;  %v1881_v44 = vld [vmem:[%s2202_s1 + $0x210] sm:$0xff]  }
  0x3c   : > { %1697 = vmatpush3.bf16.msra.mxu1 %v1842_v45  ;;  %1678 = vmatprep.subr.bf16.mxu0 %v1843_v46  ;;  %v1882_v45 = vld [vmem:[%s2202_s1 + $0x218] sm:$0xff]  }
  0x3d   : > { %1698 = vmatprep.subr.bf16.mxu1 %v1844_v47 }
  0x3f   : > { %1679 = vmatpush3.bf16.msra.mxu0 %v1843_v46  ;;  %v1883_v46 = vld [vmem:[%s2202_s1 + $0x220] sm:$0xff]  }
  0x40   : > { %1699 = vmatpush3.bf16.msra.mxu1 %v1844_v47  ;;  %1680 = vmatprep.subr.bf16.mxu0 %v1845_v48  ;;  %v1135_v47 = vld [vmem:[%s1959_s10 + $0x1e] sm:$0xff]  ;;  %s1535_s10 = sshll.u32 %s2206_s13, 4 }
  0x41   : > { %1700 = vmatprep.subr.bf16.mxu1 %v1846_v49  ;;  %s170_s21 = scalar_lea.vmem %s2204_s3, %s1535_s10 }
  0x43   : > { %1681 = vmatpush3.bf16.msra.mxu0 %v1845_v48  ;;  %v1137_v48 = vpack.c.bf16 %v1135_v47, %v1135_v47 }
  0x44   : > { %1701 = vmatpush3.bf16.msra.mxu1 %v1846_v49  ;;  %1706 = vmatprep.subr.bf16.mxu0 %v1847_v51 }
  0x45   : > { %1726 = vmatprep.subr.bf16.mxu1 %v1848_v52 }
  0x46   : > { %1683 = vmatmul.mubr.bf16.vlgmr.msra.gmra.mrb[4].mxu0 %v411_v54 }
  0x47   : > { %1707 = vmatpush3.bf16.msra.mxu0 %v1847_v51  ;;  %1703 = vmatmul.mubr.bf16.vlgmr.msra.gmra.mrb[4].mxu1 %v532_v56 }
  0x48   : > { %1727 = vmatpush3.bf16.msra.mxu1 %v1848_v52  ;;  %1708 = vmatprep.subr.bf16.mxu0 %v1849_v57 }
  0x49   : > { %1728 = vmatprep.subr.bf16.mxu1 %v1850_v58  ;;  %1722 = vmatprep.mubr.bf16.mxu0 %v652_v59 }
  0x4a   : > { %1742 = vmatprep.mubr.bf16.mxu1 %v773_v60 }
  0x4b   : > { %1709 = vmatpush3.bf16.msra.mxu0 %v1849_v57 }
  0x4c   : > { %1729 = vmatpush3.bf16.msra.mxu1 %v1850_v58  ;;  %1710 = vmatprep.subr.bf16.mxu0 %v1851_v61 }
  0x4d   : > { %1730 = vmatprep.subr.bf16.mxu1 %v1852_v62 }
  0x4f   : > { %1711 = vmatpush3.bf16.msra.mxu0 %v1851_v61 }
  0x50   : > { %1731 = vmatpush3.bf16.msra.mxu1 %v1852_v62  ;;  %1712 = vmatprep.subr.bf16.mxu0 %v1853_v63 }
  0x51   : > { %1732 = vmatprep.subr.bf16.mxu1 %v1854_v0 }
  0x53   : > { %1713 = vmatpush3.bf16.msra.mxu0 %v1853_v63 }
  0x54   : > { %1733 = vmatpush3.bf16.msra.mxu1 %v1854_v0  ;;  %1714 = vmatprep.subr.bf16.mxu0 %v1855_v1 }
  0x55   : > { %1734 = vmatprep.subr.bf16.mxu1 %v1856_v2 }
  0x57   : > { %1715 = vmatpush3.bf16.msra.mxu0 %v1855_v1 }
  0x58   : > { %1735 = vmatpush3.bf16.msra.mxu1 %v1856_v2  ;;  %1716 = vmatprep.subr.bf16.mxu0 %v1857_v3 }
  0x59   : > { %1736 = vmatprep.subr.bf16.mxu1 %v1858_v4 }
  0x5b   : > { %1717 = vmatpush3.bf16.msra.mxu0 %v1857_v3 }
  0x5c   : > { %1737 = vmatpush3.bf16.msra.mxu1 %v1858_v4  ;;  %1718 = vmatprep.subr.bf16.mxu0 %v1859_v5 }
  0x5d   : > { %1738 = vmatprep.subr.bf16.mxu1 %v1860_v6 }
  0x5f   : > { %1719 = vmatpush3.bf16.msra.mxu0 %v1859_v5 }
  0x60   : > { %1739 = vmatpush3.bf16.msra.mxu1 %v1860_v6  ;;  %1720 = vmatprep.subr.bf16.mxu0 %v1861_v7 }
  0x61   : > { %1740 = vmatprep.subr.bf16.mxu1 %v1862_v8 }
  0x63   : > { %1721 = vmatpush3.bf16.msra.mxu0 %v1861_v7 }
  0x64   : > { %1741 = vmatpush3.bf16.msra.mxu1 %v1862_v8  ;;  %1746 = vmatprep.subr.bf16.mxu0 %v1863_v10 }
  0x65   : > { %1766 = vmatprep.subr.bf16.mxu1 %v1864_v12 }
  0x66   : > { %1723 = vmatmul.mubr.bf16.vlgmr.msra.gmra.mrb[8].mxu0 %v653_v13 }
  0x67   : > { %1747 = vmatpush3.bf16.msra.mxu0 %v1863_v10  ;;  %1743 = vmatmul.mubr.bf16.vlgmr.msra.gmra.mrb[8].mxu1 %v774_v16 }
  0x68   : > { %1767 = vmatpush3.bf16.msra.mxu1 %v1864_v12  ;;  %1748 = vmatprep.subr.bf16.mxu0 %v1865_v19 }
  0x69   : > { %1768 = vmatprep.subr.bf16.mxu1 %v1866_v20  ;;  %1762 = vmatprep.mubr.bf16.mxu0 %v894_v21 }
  0x6a   : > { %1782 = vmatprep.mubr.bf16.mxu1 %v1015_v22 }
  0x6b   : > { %1749 = vmatpush3.bf16.msra.mxu0 %v1865_v19 }
  0x6c   : > { %1769 = vmatpush3.bf16.msra.mxu1 %v1866_v20  ;;  %1750 = vmatprep.subr.bf16.mxu0 %v1867_v23 }
  0x6d   : > { %1770 = vmatprep.subr.bf16.mxu1 %v1868_v24 }
  0x6f   : > { %1751 = vmatpush3.bf16.msra.mxu0 %v1867_v23 }
  0x70   : > { %1771 = vmatpush3.bf16.msra.mxu1 %v1868_v24  ;;  %1752 = vmatprep.subr.bf16.mxu0 %v1869_v25 }
  0x71   : > { %1772 = vmatprep.subr.bf16.mxu1 %v1870_v26 }
  0x73   : > { %1753 = vmatpush3.bf16.msra.mxu0 %v1869_v25 }
  0x74   : > { %1773 = vmatpush3.bf16.msra.mxu1 %v1870_v26  ;;  %1754 = vmatprep.subr.bf16.mxu0 %v1871_v27 }
  0x75   : > { %1774 = vmatprep.subr.bf16.mxu1 %v1872_v28 }
  0x77   : > { %1755 = vmatpush3.bf16.msra.mxu0 %v1871_v27 }
  0x78   : > { %1775 = vmatpush3.bf16.msra.mxu1 %v1872_v28  ;;  %1756 = vmatprep.subr.bf16.mxu0 %v1873_v29 }
  0x79   : > { %1776 = vmatprep.subr.bf16.mxu1 %v1874_v30 }
  0x7b   : > { %1757 = vmatpush3.bf16.msra.mxu0 %v1873_v29 }
  0x7c   : > { %1777 = vmatpush3.bf16.msra.mxu1 %v1874_v30  ;;  %1758 = vmatprep.subr.bf16.mxu0 %v1875_v31 }
  0x7d   : > { %1778 = vmatprep.subr.bf16.mxu1 %v1876_v32 }
  0x7f   : > { %1759 = vmatpush3.bf16.msra.mxu0 %v1875_v31 }
  0x80   : > { %1779 = vmatpush3.bf16.msra.mxu1 %v1876_v32  ;;  %1760 = vmatprep.subr.bf16.mxu0 %v1877_v33 }
  0x81   : > { %1780 = vmatprep.subr.bf16.mxu1 %v1878_v34 }
  0x83   : > { %1761 = vmatpush3.bf16.msra.mxu0 %v1877_v33 }
  0x84   : > { %1781 = vmatpush3.bf16.msra.mxu1 %v1878_v34  ;;  %1786 = vmatprep.subr.bf16.mxu0 %v1879_v38 }
  0x86   : > { %1763 = vmatmul.mubr.bf16.vlgmr.msra.gmra.mrb[12].mxu0 %v895_v41 }
  0x87   : > { %1787 = vmatpush3.bf16.msra.mxu0 %v1879_v38  ;;  %1783 = vmatmul.mubr.bf16.vlgmr.msra.gmra.mrb[12].mxu1 %v1016_v42  ;;  %v1532_v42 = vld [vmem:[%s2203_s2] ss:$0 sm:$0xff] }
  0x88   : > { %1788 = vmatprep.subr.bf16.mxu0 %v1880_v43  ;;  %1802 = vmatprep.mubr.bf16.mxu0 %v1136_v39  ;;  %v1886_v39 = vld [vmem:[%s2202_s1 + $0x238] sm:$0xff]  }
  0x8b   : > { %1789 = vmatpush3.bf16.msra.mxu0 %v1880_v43 }
  0x8c   : > { %1790 = vmatprep.subr.bf16.mxu0 %v1881_v44 }
  0x8f   : > { %1791 = vmatpush3.bf16.msra.mxu0 %v1881_v44 }
  0x90   : > { %1792 = vmatprep.subr.bf16.mxu0 %v1882_v45 }
  0x93   : > { %1793 = vmatpush3.bf16.msra.mxu0 %v1882_v45 }
  0x94   : > { %1794 = vmatprep.subr.bf16.mxu0 %v1883_v46 }
  0x97   : > { %1795 = vmatpush3.bf16.msra.mxu0 %v1883_v46 }
  0x98   : > { %1796 = vmatprep.subr.bf16.mxu0 %v1884_v35 }
  0x9b   : > { %1797 = vmatpush3.bf16.msra.mxu0 %v1884_v35 }
  0x9c   : > { %1798 = vmatprep.subr.bf16.mxu0 %v1885_v36 }
  0x9f   : > { %1799 = vmatpush3.bf16.msra.mxu0 %v1885_v36 }
  0xa0   : > { %1800 = vmatprep.subr.bf16.mxu0 %v1886_v39 }
  0xa3   : > { %1801 = vmatpush3.bf16.msra.mxu0 %v1886_v39 }
  0xa6   : > { %1803 = vmatmul.mubr.bf16.vlgmr.msra.gmra.mrb[16].mxu0 %v1137_v48 }
  0xf9   : > { %v1644_v49 = vpop.f32.mrb[0].mxu0 }
  0xfa   : > { %v1664_v50 = vpop.f32.mrb[0].mxu1  ;;  %v297_v51 = vpop.f32.mrb[1].mxu0 }
  0xfb   : > { %v402_v52 = vadd.f32 %v1664_v50, %v1644_v49  ;;  %v393_v53 = vpop.f32.mrb[1].mxu1  ;;  %v1645_v54 = vpop.f32.mrb[2].mxu0 }
  0xfc   : > { %v394_v55 = vadd.f32 %v393_v53, %v297_v51  ;;  %v1665_v56 = vpop.f32.mrb[2].mxu1  ;;  %v300_v57 = vpop.f32.mrb[3].mxu0 }
  0xfd   : > { %v396_v58 = vpop.f32.mrb[3].mxu1 }
  0xfe   : > { %v397_v59 = vadd.f32 %v396_v58, %v300_v57 }
 0x119   : > { %v1684_v60 = vpop.f32.mrb[4].mxu0 }
 0x11a   : > { %v527_v61 = vadd.f32 %v1684_v60, %v402_v52  ;;  %v511_v62 = vpop.f32.mrb[5].mxu0  ;;  %v1704_v63 = vpop.f32.mrb[4].mxu1 }
 0x11b   : > { %v525_v0 = vadd.f32 %v511_v62, %v394_v55  ;;  %v1685_v1 = vpop.f32.mrb[6].mxu0  ;;  %v632_v2 = vpop.f32.mrb[5].mxu1 }
 0x11c   : > { %v648_v3 = vadd.f32 %v1704_v63, %v527_v61  ;;  %v514_v4 = vpop.f32.mrb[7].mxu0  ;;  %v1705_v5 = vpop.f32.mrb[6].mxu1 }
 0x11d   : > { %v526_v6 = vadd.f32 %v514_v4, %v397_v59  ;;  %v646_v7 = vadd.f32 %v632_v2, %v525_v0  ;;  %v635_v8 = vpop.f32.mrb[7].mxu1 }
 0x11f   : > { %v647_v9 = vadd.f32 %v635_v8, %v526_v6 }
 0x139   : > { %v1724_v10 = vpop.f32.mrb[8].mxu0 }
 0x13a   : > { %v769_v11 = vadd.f32 %v1724_v10, %v648_v3  ;;  %v753_v12 = vpop.f32.mrb[9].mxu0  ;;  %v1744_v13 = vpop.f32.mrb[8].mxu1 }
 0x13b   : > { %v767_v14 = vadd.f32 %v753_v12, %v646_v7  ;;  %v1725_v15 = vpop.f32.mrb[10].mxu0  ;;  %v874_v16 = vpop.f32.mrb[9].mxu1 }
 0x13c   : > { %v890_v17 = vadd.f32 %v1744_v13, %v769_v11  ;;  %v756_v18 = vpop.f32.mrb[11].mxu0  ;;  %v1745_v19 = vpop.f32.mrb[10].mxu1 }
 0x13d   : > { %v768_v20 = vadd.f32 %v756_v18, %v647_v9  ;;  %v888_v21 = vadd.f32 %v874_v16, %v767_v14  ;;  %v877_v22 = vpop.f32.mrb[11].mxu1 }
 0x13f   : > { %v889_v23 = vadd.f32 %v877_v22, %v768_v20 }
 0x159   : > { %v1764_v24 = vpop.f32.mrb[12].mxu0 }
 0x15a   : > { %v1011_v25 = vadd.f32 %v1764_v24, %v890_v17  ;;  %v995_v26 = vpop.f32.mrb[13].mxu0  ;;  %v1784_v27 = vpop.f32.mrb[12].mxu1 }
 0x15b   : > { %v1009_v28 = vadd.f32 %v995_v26, %v888_v21  ;;  %v1765_v29 = vpop.f32.mrb[14].mxu0  ;;  %v1116_v30 = vpop.f32.mrb[13].mxu1 }
 0x15c   : > { %v1132_v31 = vadd.f32 %v1784_v27, %v1011_v25  ;;  %v998_v32 = vpop.f32.mrb[15].mxu0  ;;  %v1785_v33 = vpop.f32.mrb[14].mxu1 }
 0x15d   : > { %v1010_v34 = vadd.f32 %v998_v32, %v889_v23  ;;  %v1130_v37 = vadd.f32 %v1116_v30, %v1009_v28  ;;  %v1119_v38 = vpop.f32.mrb[15].mxu1 }
 0x15f   : > { %v1131_v40 = vadd.f32 %v1119_v38, %v1010_v34 }
 0x179   : > { %v1804_v41 = vpop.f32.mrb[16].mxu0 }
 0x17a   : > { %v1253_v43 = vadd.f32 %v1804_v41, %v1132_v31  ;;  %v1237_v44 = vpop.f32.mrb[17].mxu0 }
 0x17b   : > { %v1251_v45 = vadd.f32 %v1237_v44, %v1130_v37  ;;  %v1805_v46 = vpop.f32.mrb[18].mxu0 }
 0x17c   : > { %v1263_v35 = vadd.f32 %v1532_v42, %v1253_v43  ;;  %v1240_v36 = vpop.f32.mrb[19].mxu0 }
 0x17d   : > { %v1261_v39 = vadd.f32 %v1532_v42, %v1251_v45  ;;  %v1252_v47 = vadd.f32 %v1240_v36, %v1131_v40 }
 0x17e   : > { %1268 = vst [vmem:[%s170_s21 + $0xa] sm:$0x3c] %v1263_v35 }
 0x17f   : > { %1264 = vst [vmem:[%s170_s21] sm:$0xf] %v1261_v39  ;;  %1265 = vst [vmem:[%s170_s21 - $0x2] sm:$0xc0] %v1261_v39  ;;  %v1262_v48 = vadd.f32 %v1532_v42, %v1252_v47 }
 0x181   : > { %1266 = vst [vmem:[%s170_s21 + $0x6] sm:$0x3] %v1262_v48  ;;  %1267 = vst [vmem:[%s170_s21 + $0x4] sm:$0xf0] %v1262_v48 }
 0x182 PF: > { %s13_s12 = sadd.s32 1, %s1893_s12  }
 0x183   : > { %p10_p4 = scmp.ge.s32.totalorder %s13_s12, 4  }
 0x185   :  { %12 = sbr.rel (!%p10_p4) target bundleno = 1 (0x1), region = 70 }

// kernel: _lambda_.23
= control target key start
LH: loop header
LB: loop body
LE: loop exit
PB: predicated region body
PF: predicated region fallthrough
CT: control target
= control target key end

     0   :  { %s1935_s12 = smov 0   ;;  %s2204_s0 = inlined_call_operand.vmem [shape: f32[2,4,30,128], index: 0, kind: input, shape index: {}]   ;;  %s2205_s1 = inlined_call_operand.vmem [shape: bf16[9,128,128], index: 1, kind: input, shape index: {}]   ;;  %s2206_s2 = inlined_call_operand.vmem [shape: f32[1,128], index: 2, kind: input, shape index: {}]   ;;  %s2207_s3 = inlined_call_operand.vmem [shape: f32[2,16,128], index: 3, kind: output, shape index: {}]  }
   0x1 LB: > { %s1328_s13 = sadd.s32 4294967295, %s1913_s12   ;;  %p1332_p0 = scmp.ge.s32.totalorder %s1913_s12, 1  ;;  %s1913_s12 = sphi %s1935_s12, %s13_s12  }
   0x2   : > { %p137_p1 = scmp.lt.s32.totalorder %s1913_s12, 3 }
   0x4   : > { %p138_p2 = pnand %p1332_p0, %p137_p1 }
   0x5   : > { %v1835_v0 = vld [vmem:[%s2205_s1 + $0x40] sm:$0xff] (!%p138_p2)   ;;  %v1837_v2 = vld [vmem:[%s2205_s1 + $0x48] sm:$0xff] (!%p138_p2)   ;;  %p161_p3 = scmp.lt.s32.totalorder (!%p138_p2), %s1328_s13, 1  ;;  %v1839_v4 = vld [vmem:[%s2205_s1 + $0x50] sm:$0xff] (!%p138_p2)  }
   0x6   : > { %141 = sbr.rel (%p138_p2) target bundleno = 387 (0x183), region = 32  ;;  %v1836_v1 = vld [vmem:[%s2205_s1] sm:$0xff] (!%p138_p2)   ;;  %1647 = vmatprep.subr.bf16.mxu0 (!%p138_p2), %v1835_v0  ;;  %v1838_v3 = vld [vmem:[%s2205_s1 + $0x8] sm:$0xff] (!%p138_p2)   ;;  %v1840_v5 = vld [vmem:[%s2205_s1 + $0x10] sm:$0xff] (!%p138_p2)  }
   0x7   : > { %1667 = vmatprep.subr.bf16.mxu1 (!%p138_p2), %v1836_v1  ;;  %1648 = vmatpush3.bf16.msra.mxu0 (!%p138_p2), %v1835_v0  ;;  %v1841_v6 = vld [vmem:[%s2205_s1 + $0x58] sm:$0xff] (!%p138_p2)   ;;  %v1843_v8 = vld [vmem:[%s2205_s1 + $0x60] sm:$0xff] (!%p138_p2)   ;;  %v1845_v10 = vld [vmem:[%s2205_s1 + $0x68] sm:$0xff] (!%p138_p2)  }
   0x8   : > { %1668 = vmatpush3.bf16.msra.mxu1 (!%p138_p2), %v1836_v1  ;;  %1649 = vmatprep.subr.bf16.mxu0 (!%p138_p2), %v1837_v2  ;;  %v1842_v7 = vld [vmem:[%s2205_s1 + $0x18] sm:$0xff] (!%p138_p2)   ;;  %v1844_v9 = vld [vmem:[%s2205_s1 + $0x20] sm:$0xff] (!%p138_p2)   ;;  %v1846_v14 = vld [vmem:[%s2205_s1 + $0x28] sm:$0xff] (!%p138_p2)  }
   0x9   : > { %1669 = vmatprep.subr.bf16.mxu1 (!%p138_p2), %v1838_v3  ;;  %v1847_v18 = vld [vmem:[%s2205_s1 + $0x70] sm:$0xff] (!%p138_p2)   ;;  %v1849_v20 = vld [vmem:[%s2205_s1 + $0x78] sm:$0xff] (!%p138_p2)   ;;  %v1851_v24 = vld [vmem:[%s2205_s1 + $0x80] sm:$0xff] (!%p138_p2)  }
   0xa   : > { %v1848_v19 = vld [vmem:[%s2205_s1 + $0x30] sm:$0xff] (!%p138_p2)   ;;  %v1850_v21 = vld [vmem:[%s2205_s1 + $0x38] sm:$0xff] (!%p138_p2)   ;;  %v1852_v25 = vld [vmem:[%s2205_s1 + $0xc0] sm:$0xff] (!%p138_p2)  }
   0xb   : > { %1650 = vmatpush3.bf16.msra.mxu0 (!%p138_p2), %v1837_v2  ;;  %v1853_v28 = vld [vmem:[%s2205_s1 + $0x88] sm:$0xff] (!%p138_p2)   ;;  %v1855_v33 = vld [vmem:[%s2205_s1 + $0x90] sm:$0xff] (!%p138_p2)   ;;  %v1857_v38 = vld [vmem:[%s2205_s1 + $0x98] sm:$0xff] (!%p138_p2)  }
   0xc   : > { %1670 = vmatpush3.bf16.msra.mxu1 (!%p138_p2), %v1838_v3  ;;  %1651 = vmatprep.subr.bf16.mxu0 (!%p138_p2), %v1839_v4  ;;  %v1854_v29 = vld [vmem:[%s2205_s1 + $0xc8] sm:$0xff] (!%p138_p2)   ;;  %v1856_v36 = vld [vmem:[%s2205_s1 + $0xd0] sm:$0xff] (!%p138_p2)   ;;  %v1858_v39 = vld [vmem:[%s2205_s1 + $0xd8] sm:$0xff] (!%p138_p2)  }
   0xd   : > { %s2209_s13 = smov (!%p161_p3, %s1328_s13), 1  ;;  %1671 = vmatprep.subr.bf16.mxu1 %v1840_v5  ;;  %v1859_v40 = vld [vmem:[%s2205_s1 + $0xa0] sm:$0xff]   ;;  %v1861_v42 = vld [vmem:[%s2205_s1 + $0xa8] sm:$0xff]   ;;  %v1863_v44 = vld [vmem:[%s2205_s1 + $0xb0] sm:$0xff]  }
   0xe   : > { %s1555_s30 = sshll.u32 %s2209_s13, 7  ;;  %v1860_v41 = vld [vmem:[%s2205_s1 + $0xe0] sm:$0xff]   ;;  %v1862_v43 = vld [vmem:[%s2205_s1 + $0xe8] sm:$0xff]   ;;  %v1864_v45 = vld [vmem:[%s2205_s1 + $0xf0] sm:$0xff]  }
   0xf   : > { %1652 = vmatpush3.bf16.msra.mxu0 %v1839_v4  ;;  %s1979_s10 = scalar_lea.vmem %s2204_s0, %s1555_s30  ;;  %v1865_v46 = vld [vmem:[%s2205_s1 + $0xb8] sm:$0xff]   ;;  %v1867_v49 = vld [vmem:[%s2205_s1 + $0x100] sm:$0xff]   ;;  %v1869_v58 = vld [vmem:[%s2205_s1 + $0x108] sm:$0xff]  }
  0x10   : > { %1672 = vmatpush3.bf16.msra.mxu1 %v1840_v5  ;;  %1653 = vmatprep.subr.bf16.mxu0 %v1841_v6  ;;  %v1337_v11 = vld [vmem:[%s1979_s10 + $0x20] sm:$0xff]  ;;  %v1338_v12 = vld [vmem:[%s1979_s10 + $0x28] sm:$0xff]  ;;  %v1339_v22 = vld [vmem:[%s1979_s10 + $0x30] sm:$0xf] }
  0x11   : > { %1673 = vmatprep.subr.bf16.mxu1 %v1842_v7  ;;  %v172_v13 = vld [vmem:[%s1979_s10] sm:$0xff]  ;;  %v197_v15 = vpack.c.bf16 %v1338_v12, %v1337_v11  ;;  %v173_v16 = vld [vmem:[%s1979_s10 + $0x8] sm:$0xff]  ;;  %v174_v23 = vld [vmem:[%s1979_s10 + $0x10] sm:$0xf]  ;;  %v198_v26 = vpack.c.bf16 %v1339_v22, %v1339_v22 }
  0x12   : > { %v175_v17 = vpack.c.bf16 %v173_v16, %v172_v13  ;;  %v176_v27 = vpack.c.bf16 %v174_v23, %v174_v23  ;;  %v408_v30 = vld [vmem:[%s1979_s10 + $0x1] sm:$0xff]  ;;  %v409_v31 = vld [vmem:[%s1979_s10 + $0x9] sm:$0xff]  ;;  %v1866_v47 = vld [vmem:[%s2205_s1 + $0xf8] sm:$0xff]  }
  0x13   : > { %1654 = vmatpush3.bf16.msra.mxu0 %v1841_v6  ;;  %1663 = vmatprep.mubr.bf16.mxu0 %v197_v15  ;;  %v411_v32 = vpack.c.bf16 %v409_v31, %v408_v30  ;;  %v1396_v34 = vld [vmem:[%s1979_s10 + $0x40] sm:$0xff]  ;;  %v1397_v35 = vld [vmem:[%s1979_s10 + $0x48] sm:$0xff]  ;;  %v410_v48 = vld [vmem:[%s1979_s10 + $0x11] sm:$0xf] }
  0x14   : > { %1674 = vmatpush3.bf16.msra.mxu1 %v1842_v7  ;;  %1655 = vmatprep.subr.bf16.mxu0 %v1843_v8  ;;  %v533_v37 = vpack.c.bf16 %v1397_v35, %v1396_v34  ;;  %v1398_v50 = vld [vmem:[%s1979_s10 + $0x50] sm:$0xf]  ;;  %v1868_v51 = vld [vmem:[%s2205_s1 + $0x140] sm:$0xff]   ;;  %v1424_v53 = vld [vmem:[%s1979_s10 + $0x68] sm:$0xff]  ;;  %v412_v54 = vpack.c.bf16 %v410_v48, %v410_v48 }
  0x15   : > { %1675 = vmatprep.subr.bf16.mxu1 %v1844_v9  ;;  %1683 = vmatprep.mubr.bf16.mxu1 %v175_v17  ;;  %v1423_v52 = vld [vmem:[%s1979_s10 + $0x60] sm:$0xff]  ;;  %v534_v56 = vpack.c.bf16 %v1398_v50, %v1398_v50  ;;  %v1451_v57 = vld [vmem:[%s1979_s10 + $0x49] sm:$0xff]  ;;  %v1873_v0 = vld [vmem:[%s2205_s1 + $0x118] sm:$0xff]  }
  0x16   : > { %v1450_v55 = vld [vmem:[%s1979_s10 + $0x41] sm:$0xff]  ;;  %v655_v60 = vpack.c.bf16 %v1424_v53, %v1423_v52  ;;  %v1871_v62 = vld [vmem:[%s2205_s1 + $0x110] sm:$0xff]   ;;  %v1874_v1 = vld [vmem:[%s2205_s1 + $0x158] sm:$0xff]  }
  0x17   : > { %1656 = vmatpush3.bf16.msra.mxu0 %v1843_v8  ;;  %v1870_v59 = vld [vmem:[%s2205_s1 + $0x148] sm:$0xff]   ;;  %v776_v61 = vpack.c.bf16 %v1451_v57, %v1450_v55  ;;  %v1872_v63 = vld [vmem:[%s2205_s1 + $0x150] sm:$0xff]   ;;  %v1875_v2 = vld [vmem:[%s2205_s1 + $0x120] sm:$0xff]  }
  0x18   : > { %1676 = vmatpush3.bf16.msra.mxu1 %v1844_v9  ;;  %1657 = vmatprep.subr.bf16.mxu0 %v1845_v10  ;;  %v1876_v3 = vld [vmem:[%s2205_s1 + $0x160] sm:$0xff]   ;;  %v1877_v4 = vld [vmem:[%s2205_s1 + $0x128] sm:$0xff]   ;;  %v1879_v6 = vld [vmem:[%s2205_s1 + $0x130] sm:$0xff]  }
  0x19   : > { %1677 = vmatprep.subr.bf16.mxu1 %v1846_v14  ;;  %v1878_v5 = vld [vmem:[%s2205_s1 + $0x168] sm:$0xff]   ;;  %v1880_v7 = vld [vmem:[%s2205_s1 + $0x170] sm:$0xff]   ;;  %v1881_v8 = vld [vmem:[%s2205_s1 + $0x138] sm:$0xff]  }
  0x1a   : > { %v1882_v9 = vld [vmem:[%s2205_s1 + $0x178] sm:$0xff]   ;;  %v1883_v11 = vld [vmem:[%s2205_s1 + $0x180] sm:$0xff]   ;;  %v1452_v12 = vld [vmem:[%s1979_s10 + $0x51] sm:$0xf] }
  0x1b   : > { %1658 = vmatpush3.bf16.msra.mxu0 %v1845_v10  ;;  %v1425_v10 = vld [vmem:[%s1979_s10 + $0x70] sm:$0xf]  ;;  %v1884_v13 = vld [vmem:[%s2205_s1 + $0x1c0] sm:$0xff]   ;;  %v777_v17 = vpack.c.bf16 %v1452_v12, %v1452_v12  ;;  %v1893_v30 = vld [vmem:[%s2205_s1 + $0x1a8] sm:$0xff]  }
  0x1c   : > { %1678 = vmatpush3.bf16.msra.mxu1 %v1846_v14  ;;  %1659 = vmatprep.subr.bf16.mxu0 %v1847_v18  ;;  %v656_v14 = vpack.c.bf16 %v1425_v10, %v1425_v10  ;;  %v894_v15 = vld [vmem:[%s1979_s10 + $0x5] sm:$0xff]  ;;  %v895_v16 = vld [vmem:[%s1979_s10 + $0xd] sm:$0xff]  ;;  %v1897_v34 = vld [vmem:[%s2205_s1 + $0x1b8] sm:$0xff]  }
  0x1d   : > { %1679 = vmatprep.subr.bf16.mxu1 %v1848_v19  ;;  %v897_v22 = vpack.c.bf16 %v895_v16, %v894_v15  ;;  %v1894_v31 = vld [vmem:[%s2205_s1 + $0x1e8] sm:$0xff]   ;;  %v1898_v35 = vld [vmem:[%s2205_s1 + $0x1f8] sm:$0xff]  }
  0x1e   : > { %v1904_v48 = vld [vmem:[%s2205_s1 + $0x228] sm:$0xff]   ;;  %v1906_v50 = vld [vmem:[%s2205_s1 + $0x238] sm:$0xff]  }
  0x1f   : > { %1660 = vmatpush3.bf16.msra.mxu0 %v1847_v18  ;;  %v1501_v18 = vld [vmem:[%s1979_s10 + $0x25] sm:$0xff] }
  0x20   : > { %1680 = vmatpush3.bf16.msra.mxu1 %v1848_v19  ;;  %1661 = vmatprep.subr.bf16.mxu0 %v1849_v20  ;;  %v1502_v19 = vld [vmem:[%s1979_s10 + $0x2d] sm:$0xff] }
  0x21   : > { %1681 = vmatprep.subr.bf16.mxu1 %v1850_v21  ;;  %v1018_v23 = vpack.c.bf16 %v1502_v19, %v1501_v18 }
  0x23   : > { %1662 = vmatpush3.bf16.msra.mxu0 %v1849_v20  ;;  %v1885_v20 = vld [vmem:[%s2205_s1 + $0x188] sm:$0xff]  }
  0x24   : > { %1682 = vmatpush3.bf16.msra.mxu1 %v1850_v21  ;;  %1687 = vmatprep.subr.bf16.mxu0 %v1851_v24  ;;  %v1886_v21 = vld [vmem:[%s2205_s1 + $0x1c8] sm:$0xff]  }
  0x25   : > { %1707 = vmatprep.subr.bf16.mxu1 %v1852_v25 }
  0x26   : > { %1664 = vmatmul.mubr.bf16.vlgmr.msra.gmra.mrb[0].mxu0 %v198_v26  ;;  %v1889_v26 = vld [vmem:[%s2205_s1 + $0x198] sm:$0xff]  }
  0x27   : > { %1684 = vmatmul.mubr.bf16.vlgmr.msra.gmra.mrb[0].mxu1 %v176_v27  ;;  %1688 = vmatpush3.bf16.msra.mxu0 %v1851_v24  ;;  %v1887_v24 = vld [vmem:[%s2205_s1 + $0x190] sm:$0xff]   ;;  %v1890_v27 = vld [vmem:[%s2205_s1 + $0x1d8] sm:$0xff]  }
  0x28   : > { %1708 = vmatpush3.bf16.msra.mxu1 %v1852_v25  ;;  %1689 = vmatprep.subr.bf16.mxu0 %v1853_v28  ;;  %v1888_v25 = vld [vmem:[%s2205_s1 + $0x1d0] sm:$0xff]  }
  0x29   : > { %1709 = vmatprep.subr.bf16.mxu1 %v1854_v29  ;;  %1703 = vmatprep.mubr.bf16.mxu0 %v411_v32  ;;  %v1895_v32 = vld [vmem:[%s2205_s1 + $0x1b0] sm:$0xff]  }
  0x2a   : > { %1723 = vmatprep.mubr.bf16.mxu1 %v533_v37  ;;  %v1899_v37 = vld [vmem:[%s2205_s1 + $0x200] sm:$0xff]  }
  0x2b   : > { %1690 = vmatpush3.bf16.msra.mxu0 %v1853_v28  ;;  %v1891_v28 = vld [vmem:[%s2205_s1 + $0x1a0] sm:$0xff]  }
  0x2c   : > { %1710 = vmatpush3.bf16.msra.mxu1 %v1854_v29  ;;  %1691 = vmatprep.subr.bf16.mxu0 %v1855_v33  ;;  %v1892_v29 = vld [vmem:[%s2205_s1 + $0x1e0] sm:$0xff]  }
  0x2d   : > { %1711 = vmatprep.subr.bf16.mxu1 %v1856_v36 }
  0x2f   : > { %1692 = vmatpush3.bf16.msra.mxu0 %v1855_v33  ;;  %v1896_v33 = vld [vmem:[%s2205_s1 + $0x1f0] sm:$0xff]  }
  0x30   : > { %1712 = vmatpush3.bf16.msra.mxu1 %v1856_v36  ;;  %1693 = vmatprep.subr.bf16.mxu0 %v1857_v38  ;;  %v896_v36 = vld [vmem:[%s1979_s10 + $0x15] sm:$0xf] }
  0x31   : > { %1713 = vmatprep.subr.bf16.mxu1 %v1858_v39 }
  0x33   : > { %1694 = vmatpush3.bf16.msra.mxu0 %v1857_v38  ;;  %v1503_v38 = vld [vmem:[%s1979_s10 + $0x35] sm:$0xf] }
  0x34   : > { %1714 = vmatpush3.bf16.msra.mxu1 %v1858_v39  ;;  %1695 = vmatprep.subr.bf16.mxu0 %v1859_v40  ;;  %v1136_v39 = vld [vmem:[%s1979_s10 + $0x6] sm:$0xff] }
  0x35   : > { %1715 = vmatprep.subr.bf16.mxu1 %v1860_v41 }
  0x37   : > { %1696 = vmatpush3.bf16.msra.mxu0 %v1859_v40  ;;  %v1137_v40 = vld [vmem:[%s1979_s10 + $0xe] sm:$0xff] }
  0x38   : > { %1716 = vmatpush3.bf16.msra.mxu1 %v1860_v41  ;;  %1697 = vmatprep.subr.bf16.mxu0 %v1861_v42  ;;  %v898_v41 = vpack.c.bf16 %v896_v36, %v896_v36 }
  0x39   : > { %1717 = vmatprep.subr.bf16.mxu1 %v1862_v43 }
  0x3b   : > { %1698 = vmatpush3.bf16.msra.mxu0 %v1861_v42  ;;  %v1019_v42 = vpack.c.bf16 %v1503_v38, %v1503_v38 }
  0x3c   : > { %1718 = vmatpush3.bf16.msra.mxu1 %v1862_v43  ;;  %1699 = vmatprep.subr.bf16.mxu0 %v1863_v44  ;;  %v1900_v43 = vld [vmem:[%s2205_s1 + $0x208] sm:$0xff]  }
  0x3d   : > { %1719 = vmatprep.subr.bf16.mxu1 %v1864_v45 }
  0x3f   : > { %1700 = vmatpush3.bf16.msra.mxu0 %v1863_v44  ;;  %v1139_v44 = vpack.c.bf16 %v1137_v40, %v1136_v39 }
  0x40   : > { %1720 = vmatpush3.bf16.msra.mxu1 %v1864_v45  ;;  %1701 = vmatprep.subr.bf16.mxu0 %v1865_v46  ;;  %v1901_v45 = vld [vmem:[%s2205_s1 + $0x210] sm:$0xff]  }
  0x41   : > { %1721 = vmatprep.subr.bf16.mxu1 %v1866_v47 }
  0x43   : > { %1702 = vmatpush3.bf16.msra.mxu0 %v1865_v46  ;;  %v1902_v46 = vld [vmem:[%s2205_s1 + $0x218] sm:$0xff]  }
  0x44   : > { %1722 = vmatpush3.bf16.msra.mxu1 %v1866_v47  ;;  %1727 = vmatprep.subr.bf16.mxu0 %v1867_v49  ;;  %v1903_v47 = vld [vmem:[%s2205_s1 + $0x220] sm:$0xff]  }
  0x45   : > { %1747 = vmatprep.subr.bf16.mxu1 %v1868_v51 }
  0x46   : > { %1704 = vmatmul.mubr.bf16.vlgmr.msra.gmra.mrb[4].mxu0 %v412_v54 }
  0x47   : > { %1728 = vmatpush3.bf16.msra.mxu0 %v1867_v49  ;;  %1724 = vmatmul.mubr.bf16.vlgmr.msra.gmra.mrb[4].mxu1 %v534_v56  ;;  %v1905_v49 = vld [vmem:[%s2205_s1 + $0x230] sm:$0xff]  }
  0x48   : > { %1748 = vmatpush3.bf16.msra.mxu1 %v1868_v51  ;;  %1729 = vmatprep.subr.bf16.mxu0 %v1869_v58  ;;  %v1138_v51 = vld [vmem:[%s1979_s10 + $0x16] sm:$0xf]  ;;  %s1556_s10 = sshll.u32 %s2209_s13, 4 }
  0x49   : > { %1749 = vmatprep.subr.bf16.mxu1 %v1870_v59  ;;  %1743 = vmatprep.mubr.bf16.mxu0 %v655_v60  ;;  %v1140_v52 = vpack.c.bf16 %v1138_v51, %v1138_v51  ;;  %s170_s21 = scalar_lea.vmem %s2207_s3, %s1556_s10 }
  0x4a   : > { %1763 = vmatprep.mubr.bf16.mxu1 %v776_v61 }
  0x4b   : > { %1730 = vmatpush3.bf16.msra.mxu0 %v1869_v58 }
  0x4c   : > { %1750 = vmatpush3.bf16.msra.mxu1 %v1870_v59  ;;  %1731 = vmatprep.subr.bf16.mxu0 %v1871_v62 }
  0x4d   : > { %1751 = vmatprep.subr.bf16.mxu1 %v1872_v63 }
  0x4f   : > { %1732 = vmatpush3.bf16.msra.mxu0 %v1871_v62 }
  0x50   : > { %1752 = vmatpush3.bf16.msra.mxu1 %v1872_v63  ;;  %1733 = vmatprep.subr.bf16.mxu0 %v1873_v0 }
  0x51   : > { %1753 = vmatprep.subr.bf16.mxu1 %v1874_v1 }
  0x53   : > { %1734 = vmatpush3.bf16.msra.mxu0 %v1873_v0 }
  0x54   : > { %1754 = vmatpush3.bf16.msra.mxu1 %v1874_v1  ;;  %1735 = vmatprep.subr.bf16.mxu0 %v1875_v2 }
  0x55   : > { %1755 = vmatprep.subr.bf16.mxu1 %v1876_v3 }
  0x57   : > { %1736 = vmatpush3.bf16.msra.mxu0 %v1875_v2 }
  0x58   : > { %1756 = vmatpush3.bf16.msra.mxu1 %v1876_v3  ;;  %1737 = vmatprep.subr.bf16.mxu0 %v1877_v4 }
  0x59   : > { %1757 = vmatprep.subr.bf16.mxu1 %v1878_v5 }
  0x5b   : > { %1738 = vmatpush3.bf16.msra.mxu0 %v1877_v4 }
  0x5c   : > { %1758 = vmatpush3.bf16.msra.mxu1 %v1878_v5  ;;  %1739 = vmatprep.subr.bf16.mxu0 %v1879_v6 }
  0x5d   : > { %1759 = vmatprep.subr.bf16.mxu1 %v1880_v7 }
  0x5f   : > { %1740 = vmatpush3.bf16.msra.mxu0 %v1879_v6 }
  0x60   : > { %1760 = vmatpush3.bf16.msra.mxu1 %v1880_v7  ;;  %1741 = vmatprep.subr.bf16.mxu0 %v1881_v8 }
  0x61   : > { %1761 = vmatprep.subr.bf16.mxu1 %v1882_v9 }
  0x63   : > { %1742 = vmatpush3.bf16.msra.mxu0 %v1881_v8 }
  0x64   : > { %1762 = vmatpush3.bf16.msra.mxu1 %v1882_v9  ;;  %1767 = vmatprep.subr.bf16.mxu0 %v1883_v11 }
  0x65   : > { %1787 = vmatprep.subr.bf16.mxu1 %v1884_v13 }
  0x66   : > { %1744 = vmatmul.mubr.bf16.vlgmr.msra.gmra.mrb[8].mxu0 %v656_v14 }
  0x67   : > { %1768 = vmatpush3.bf16.msra.mxu0 %v1883_v11  ;;  %1764 = vmatmul.mubr.bf16.vlgmr.msra.gmra.mrb[8].mxu1 %v777_v17 }
  0x68   : > { %1788 = vmatpush3.bf16.msra.mxu1 %v1884_v13  ;;  %1769 = vmatprep.subr.bf16.mxu0 %v1885_v20 }
  0x69   : > { %1789 = vmatprep.subr.bf16.mxu1 %v1886_v21  ;;  %1783 = vmatprep.mubr.bf16.mxu0 %v897_v22 }
  0x6a   : > { %1803 = vmatprep.mubr.bf16.mxu1 %v1018_v23 }
  0x6b   : > { %1770 = vmatpush3.bf16.msra.mxu0 %v1885_v20 }
  0x6c   : > { %1790 = vmatpush3.bf16.msra.mxu1 %v1886_v21  ;;  %1771 = vmatprep.subr.bf16.mxu0 %v1887_v24 }
  0x6d   : > { %1791 = vmatprep.subr.bf16.mxu1 %v1888_v25 }
  0x6f   : > { %1772 = vmatpush3.bf16.msra.mxu0 %v1887_v24 }
  0x70   : > { %1792 = vmatpush3.bf16.msra.mxu1 %v1888_v25  ;;  %1773 = vmatprep.subr.bf16.mxu0 %v1889_v26 }
  0x71   : > { %1793 = vmatprep.subr.bf16.mxu1 %v1890_v27 }
  0x73   : > { %1774 = vmatpush3.bf16.msra.mxu0 %v1889_v26 }
  0x74   : > { %1794 = vmatpush3.bf16.msra.mxu1 %v1890_v27  ;;  %1775 = vmatprep.subr.bf16.mxu0 %v1891_v28 }
  0x75   : > { %1795 = vmatprep.subr.bf16.mxu1 %v1892_v29 }
  0x77   : > { %1776 = vmatpush3.bf16.msra.mxu0 %v1891_v28 }
  0x78   : > { %1796 = vmatpush3.bf16.msra.mxu1 %v1892_v29  ;;  %1777 = vmatprep.subr.bf16.mxu0 %v1893_v30 }
  0x79   : > { %1797 = vmatprep.subr.bf16.mxu1 %v1894_v31 }
  0x7b   : > { %1778 = vmatpush3.bf16.msra.mxu0 %v1893_v30 }
  0x7c   : > { %1798 = vmatpush3.bf16.msra.mxu1 %v1894_v31  ;;  %1779 = vmatprep.subr.bf16.mxu0 %v1895_v32 }
  0x7d   : > { %1799 = vmatprep.subr.bf16.mxu1 %v1896_v33 }
  0x7f   : > { %1780 = vmatpush3.bf16.msra.mxu0 %v1895_v32 }
  0x80   : > { %1800 = vmatpush3.bf16.msra.mxu1 %v1896_v33  ;;  %1781 = vmatprep.subr.bf16.mxu0 %v1897_v34 }
  0x81   : > { %1801 = vmatprep.subr.bf16.mxu1 %v1898_v35 }
  0x83   : > { %1782 = vmatpush3.bf16.msra.mxu0 %v1897_v34 }
  0x84   : > { %1802 = vmatpush3.bf16.msra.mxu1 %v1898_v35  ;;  %1807 = vmatprep.subr.bf16.mxu0 %v1899_v37 }
  0x86   : > { %1784 = vmatmul.mubr.bf16.vlgmr.msra.gmra.mrb[12].mxu0 %v898_v41 }
  0x87   : > { %1808 = vmatpush3.bf16.msra.mxu0 %v1899_v37  ;;  %1804 = vmatmul.mubr.bf16.vlgmr.msra.gmra.mrb[12].mxu1 %v1019_v42 }
  0x88   : > { %1809 = vmatprep.subr.bf16.mxu0 %v1900_v43  ;;  %1823 = vmatprep.mubr.bf16.mxu0 %v1139_v44 }
  0x8b   : > { %1810 = vmatpush3.bf16.msra.mxu0 %v1900_v43  ;;  %v1552_v43 = vld [vmem:[%s2206_s2] ss:$0 sm:$0xff] }
  0x8c   : > { %1811 = vmatprep.subr.bf16.mxu0 %v1901_v45 }
  0x8f   : > { %1812 = vmatpush3.bf16.msra.mxu0 %v1901_v45 }
  0x90   : > { %1813 = vmatprep.subr.bf16.mxu0 %v1902_v46 }
  0x93   : > { %1814 = vmatpush3.bf16.msra.mxu0 %v1902_v46 }
  0x94   : > { %1815 = vmatprep.subr.bf16.mxu0 %v1903_v47 }
  0x97   : > { %1816 = vmatpush3.bf16.msra.mxu0 %v1903_v47 }
  0x98   : > { %1817 = vmatprep.subr.bf16.mxu0 %v1904_v48 }
  0x9b   : > { %1818 = vmatpush3.bf16.msra.mxu0 %v1904_v48 }
  0x9c   : > { %1819 = vmatprep.subr.bf16.mxu0 %v1905_v49 }
  0x9f   : > { %1820 = vmatpush3.bf16.msra.mxu0 %v1905_v49 }
  0xa0   : > { %1821 = vmatprep.subr.bf16.mxu0 %v1906_v50 }
  0xa3   : > { %1822 = vmatpush3.bf16.msra.mxu0 %v1906_v50 }
  0xa6   : > { %1824 = vmatmul.mubr.bf16.vlgmr.msra.gmra.mrb[16].mxu0 %v1140_v52 }
  0xf9   : > { %v1665_v53 = vpop.f32.mrb[0].mxu0 }
  0xfa   : > { %v1685_v54 = vpop.f32.mrb[0].mxu1  ;;  %v298_v55 = vpop.f32.mrb[1].mxu0 }
  0xfb   : > { %v403_v56 = vadd.f32 %v1685_v54, %v1665_v53  ;;  %v394_v57 = vpop.f32.mrb[1].mxu1  ;;  %v1666_v58 = vpop.f32.mrb[2].mxu0 }
  0xfc   : > { %v395_v59 = vadd.f32 %v394_v57, %v298_v55  ;;  %v1686_v60 = vpop.f32.mrb[2].mxu1  ;;  %v301_v61 = vpop.f32.mrb[3].mxu0 }
  0xfd   : > { %v397_v62 = vpop.f32.mrb[3].mxu1 }
  0xfe   : > { %v398_v63 = vadd.f32 %v397_v62, %v301_v61 }
 0x119   : > { %v1705_v0 = vpop.f32.mrb[4].mxu0 }
 0x11a   : > { %v528_v1 = vadd.f32 %v1705_v0, %v403_v56  ;;  %v512_v2 = vpop.f32.mrb[5].mxu0  ;;  %v1725_v3 = vpop.f32.mrb[4].mxu1 }
 0x11b   : > { %v526_v4 = vadd.f32 %v512_v2, %v395_v59  ;;  %v1706_v5 = vpop.f32.mrb[6].mxu0  ;;  %v634_v6 = vpop.f32.mrb[5].mxu1 }
 0x11c   : > { %v650_v7 = vadd.f32 %v1725_v3, %v528_v1  ;;  %v515_v8 = vpop.f32.mrb[7].mxu0  ;;  %v1726_v9 = vpop.f32.mrb[6].mxu1 }
 0x11d   : > { %v527_v10 = vadd.f32 %v515_v8, %v398_v63  ;;  %v648_v11 = vadd.f32 %v634_v6, %v526_v4  ;;  %v637_v12 = vpop.f32.mrb[7].mxu1 }
 0x11f   : > { %v649_v13 = vadd.f32 %v637_v12, %v527_v10 }
 0x139   : > { %v1745_v14 = vpop.f32.mrb[8].mxu0 }
 0x13a   : > { %v772_v15 = vadd.f32 %v1745_v14, %v650_v7  ;;  %v756_v16 = vpop.f32.mrb[9].mxu0  ;;  %v1765_v17 = vpop.f32.mrb[8].mxu1 }
 0x13b   : > { %v770_v18 = vadd.f32 %v756_v16, %v648_v11  ;;  %v1746_v19 = vpop.f32.mrb[10].mxu0  ;;  %v877_v20 = vpop.f32.mrb[9].mxu1 }
 0x13c   : > { %v893_v21 = vadd.f32 %v1765_v17, %v772_v15  ;;  %v759_v22 = vpop.f32.mrb[11].mxu0  ;;  %v1766_v23 = vpop.f32.mrb[10].mxu1 }
 0x13d   : > { %v771_v24 = vadd.f32 %v759_v22, %v649_v13  ;;  %v891_v25 = vadd.f32 %v877_v20, %v770_v18  ;;  %v880_v26 = vpop.f32.mrb[11].mxu1 }
 0x13f   : > { %v892_v27 = vadd.f32 %v880_v26, %v771_v24 }
 0x159   : > { %v1785_v28 = vpop.f32.mrb[12].mxu0 }
 0x15a   : > { %v1014_v29 = vadd.f32 %v1785_v28, %v893_v21  ;;  %v998_v30 = vpop.f32.mrb[13].mxu0  ;;  %v1805_v31 = vpop.f32.mrb[12].mxu1 }
 0x15b   : > { %v1012_v32 = vadd.f32 %v998_v30, %v891_v25  ;;  %v1786_v33 = vpop.f32.mrb[14].mxu0  ;;  %v1119_v34 = vpop.f32.mrb[13].mxu1 }
 0x15c   : > { %v1135_v35 = vadd.f32 %v1805_v31, %v1014_v29  ;;  %v1001_v36 = vpop.f32.mrb[15].mxu0  ;;  %v1806_v37 = vpop.f32.mrb[14].mxu1 }
 0x15d   : > { %v1013_v38 = vadd.f32 %v1001_v36, %v892_v27  ;;  %v1133_v39 = vadd.f32 %v1119_v34, %v1012_v32  ;;  %v1122_v40 = vpop.f32.mrb[15].mxu1 }
 0x15f   : > { %v1134_v41 = vadd.f32 %v1122_v40, %v1013_v38 }
 0x179   : > { %v1825_v42 = vpop.f32.mrb[16].mxu0 }
 0x17a   : > { %v1256_v44 = vadd.f32 %v1825_v42, %v1135_v35  ;;  %v1240_v45 = vpop.f32.mrb[17].mxu0 }
 0x17b   : > { %v1254_v46 = vadd.f32 %v1240_v45, %v1133_v39  ;;  %v1826_v47 = vpop.f32.mrb[18].mxu0 }
 0x17c   : > { %v1266_v48 = vadd.f32 %v1552_v43, %v1256_v44  ;;  %v1243_v49 = vpop.f32.mrb[19].mxu0 }
 0x17d   : > { %v1264_v50 = vadd.f32 %v1552_v43, %v1254_v46  ;;  %v1255_v51 = vadd.f32 %v1243_v49, %v1134_v41 }
 0x17e   : > { %1272 = vst [vmem:[%s170_s21 + $0xd] sm:$0x7] %v1266_v48 }
 0x17f   : > { %1267 = vst [vmem:[%s170_s21] sm:$0xf] %v1264_v50  ;;  %1268 = vst [vmem:[%s170_s21 - $0x1] sm:$0xe0] %v1264_v50  ;;  %v1265_v52 = vadd.f32 %v1552_v43, %v1255_v51 }
 0x181   : > { %1269 = vst [vmem:[%s170_s21 + $0x7] sm:$0x1] %v1265_v52  ;;  %1270 = vst [vmem:[%s170_s21 + $0x6] sm:$0x3c] %v1265_v52 }
 0x182   : > { %1271 = vst [vmem:[%s170_s21 + $0x5] sm:$0x80] %v1265_v52 }
 0x183 PF: > { %s13_s12 = sadd.s32 1, %s1913_s12  }
 0x184   : > { %p10_p4 = scmp.ge.s32.totalorder %s13_s12, 4  }
 0x186   :  { %12 = sbr.rel (!%p10_p4) target bundleno = 1 (0x1), region = 73 }

// kernel: _lambda_.27
= control target key start
LH: loop header
LB: loop body
LE: loop exit
PB: predicated region body
PF: predicated region fallthrough
CT: control target
= control target key end

     0   :  { %s466_s12 = smov 0   ;;  %s514_s0 = inlined_call_operand.vmem [shape: f32[2,4,16,128], index: 0, kind: input, shape index: {}]   ;;  %s515_s1 = inlined_call_operand.vmem [shape: bf16[128,128], index: 1, kind: input, shape index: {}]   ;;  %s516_s2 = inlined_call_operand.vmem [shape: f32[1,128], index: 2, kind: input, shape index: {}]   ;;  %s517_s3 = inlined_call_operand.vmem [shape: f32[2,16,128], index: 3, kind: output, shape index: {}]  }
   0x1 LB: > { %s361_s13 = sadd.s32 4294967295, %s442_s12   ;;  %p365_p0 = scmp.ge.s32.totalorder %s442_s12, 1  ;;  %s442_s12 = sphi %s466_s12, %s13_s12  }
   0x2   : > { %p137_p1 = scmp.lt.s32.totalorder %s442_s12, 3 }
   0x4   : > { %p138_p2 = pnand %p365_p0, %p137_p1 }
   0x5   : > { %v428_v0 = vld [vmem:[%s515_s1] sm:$0xff] (!%p138_p2)   ;;  %v444_v1 = vmov (!%p138_p2), 0.0   ;;  %v429_v2 = vld [vmem:[%s515_s1 + $0x8] sm:$0xff] (!%p138_p2)   ;;  %vm445_vm0 = vmmov (!%p138_p2), 0   ;;  %p161_p3 = scmp.lt.s32.totalorder (!%p138_p2), %s361_s13, 1  ;;  %v430_v3 = vld [vmem:[%s515_s1 + $0x10] sm:$0xff] (!%p138_p2)  }
   0x6   : > { %141 = sbr.rel (%p138_p2) target bundleno = 255 (0xff), region = 32  ;;  %398 = vmatprep.subr.bf16.mxu0 (!%p138_p2), %v444_v1  ;;  %414 = vmatprep.mubr.msk.bf16.mxu0 (!%p138_p2), %vm445_vm0, %v444_v1  ;;  %v431_v4 = vld [vmem:[%s515_s1 + $0x18] sm:$0xff] (!%p138_p2)   ;;  %v432_v11 = vld [vmem:[%s515_s1 + $0x20] sm:$0xff] (!%p138_p2)   ;;  %v433_v16 = vld [vmem:[%s515_s1 + $0x28] sm:$0xff] (!%p138_p2)  }
   0x7   : > { %399 = vmatpush3.bf16.msra.mxu0 (!%p138_p2), %v428_v0  ;;  %v434_v21 = vld [vmem:[%s515_s1 + $0x30] sm:$0xff] (!%p138_p2)   ;;  %v435_v24 = vld [vmem:[%s515_s1 + $0x38] sm:$0xff] (!%p138_p2)   ;;  %v376_v26 = vld [vmem:[%s516_s2] ss:$0 sm:$0xff] (!%p138_p2) }
   0x8   : > { %400 = vmatprep.subr.bf16.mxu0 (!%p138_p2), %v444_v1 }
   0xb   : > { %401 = vmatpush3.bf16.msra.mxu0 (!%p138_p2), %v429_v2 }
   0xc   : > { %402 = vmatprep.subr.bf16.mxu0 (!%p138_p2), %v444_v1 }
   0xd   : > { %s519_s13 = smov (!%p161_p3, %s361_s13), 1 }
   0xe   : > { %s387_s20 = sshll.u32 %s519_s13, 6  ;;  %s388_s7 = sshll.u32 %s519_s13, 4 }
   0xf   : > { %s165_s23 = scalar_lea.vmem %s514_s0, %s387_s20  ;;  %403 = vmatpush3.bf16.msra.mxu0 %v430_v3  ;;  %s170_s14 = scalar_lea.vmem %s517_s3, %s388_s7 }
  0x10   : > { %v172_v5 = vld [vmem:[%s165_s23] sm:$0xff]  ;;  %v173_v6 = vld [vmem:[%s165_s23 + $0x8] sm:$0xff]  ;;  %v370_v7 = vld [vmem:[%s165_s23 + $0x10] sm:$0xff]  ;;  %404 = vmatprep.subr.bf16.mxu0 %v444_v1 }
  0x11   : > { %v371_v8 = vld [vmem:[%s165_s23 + $0x18] sm:$0xff]  ;;  %v177_v9 = vadd.f32 %v370_v7, %v172_v5  ;;  %v372_v12 = vld [vmem:[%s165_s23 + $0x20] sm:$0xff]  ;;  %v373_v13 = vld [vmem:[%s165_s23 + $0x28] sm:$0xff] }
  0x12   : > { %v178_v10 = vadd.f32 %v371_v8, %v173_v6  ;;  %v374_v17 = vld [vmem:[%s165_s23 + $0x30] sm:$0xff]  ;;  %v375_v18 = vld [vmem:[%s165_s23 + $0x38] sm:$0xff] }
  0x13   : > { %405 = vmatpush3.bf16.msra.mxu0 %v431_v4  ;;  %v182_v14 = vadd.f32 %v372_v12, %v177_v9 }
  0x14   : > { %406 = vmatprep.subr.bf16.mxu0 %v444_v1  ;;  %v183_v15 = vadd.f32 %v373_v13, %v178_v10 }
  0x15   : > { %v187_v19 = vadd.f32 %v374_v17, %v182_v14 }
  0x16   : > { %v188_v20 = vadd.f32 %v375_v18, %v183_v15 }
  0x17   : > { %407 = vmatpush3.bf16.msra.mxu0 %v432_v11  ;;  %v189_v22 = vmul.f32 0.25, %v187_v19 }
  0x18   : > { %408 = vmatprep.subr.bf16.mxu0 %v444_v1  ;;  %v190_v23 = vmul.f32 0.25, %v188_v20 }
  0x1a   : > { %v191_v25 = vpack.c.bf16 %v190_v23, %v189_v22 }
  0x1b   : > { %409 = vmatpush3.bf16.msra.mxu0 %v433_v16 }
  0x1c   : > { %410 = vmatprep.subr.bf16.mxu0 %v444_v1 }
  0x1f   : > { %411 = vmatpush3.bf16.msra.mxu0 %v434_v21 }
  0x20   : > { %412 = vmatprep.subr.bf16.mxu0 %v444_v1 }
  0x23   : > { %413 = vmatpush3.bf16.msra.mxu0 %v435_v24 }
  0x26   : > { %415 = vmatmul.mubr.bf16.vlgmr.msra.gmra.mrb[0].mxu0 %v191_v25 }
  0xf9   : > { %v297_v27 = vpop.f32.mrb[0].mxu0 }
  0xfa   : > { %v298_v28 = vadd.f32 %v376_v26, %v297_v27  ;;  %v416_v29 = vpop.f32.mrb[1].mxu0 }
  0xfb   : > { %v300_v30 = vpop.f32.mrb[2].mxu0 }
  0xfc   : > { %304 = vst [vmem:[%s170_s14] sm:$0xff] %v298_v28  ;;  %v301_v31 = vadd.f32 %v376_v26, %v300_v30  ;;  %v417_v32 = vpop.f32.mrb[3].mxu0 }
  0xfe   : > { %305 = vst [vmem:[%s170_s14 + $0x8] sm:$0xff] %v301_v31 }
  0xff PF: > { %s13_s12 = sadd.s32 1, %s442_s12  }
 0x100   : > { %p10_p4 = scmp.ge.s32.totalorder %s13_s12, 4  }
 0x102   :  { %12 = sbr.rel (!%p10_p4) target bundleno = 1 (0x1), region = 65 }

// kernel: _lambda_.30
= control target key start
LH: loop header
LB: loop body
LE: loop exit
PB: predicated region body
PF: predicated region fallthrough
CT: control target
= control target key end

     0   :  { %s769_s21 = smov 0   ;;  %s923_s0 = inlined_call_operand.vmem [shape: f32[2,16,128], index: 0, kind: input, shape index: {}]   ;;  %s924_s1 = inlined_call_operand.vmem [shape: f32[128,128], index: 1, kind: input, shape index: {}]   ;;  %s925_s2 = inlined_call_operand.vmem [shape: f32[1,128], index: 2, kind: input, shape index: {}, may-alias: {2,4}]   ;;  %s926_s3 = inlined_call_operand.vmem [shape: f32[128,128], index: 3, kind: input, shape index: {}]   ;;  %s927_s4 = inlined_call_operand.vmem [shape: f32[1,128], index: 4, kind: input, shape index: {}, may-alias: {2,4}]   ;;  %s928_s5 = inlined_call_operand.vmem [shape: f32[2,16,128], index: 5, kind: output, shape index: {0}]   ;;  %s929_s6 = inlined_call_operand.vmem [shape: f32[2,1,128], index: 6, kind: output, shape index: {1}]  }
   0x1 LB: > { %s542_s22 = sadd.s32 4294967295, %s729_s21   ;;  %p546_p0 = scmp.ge.s32.totalorder %s729_s21, 1  ;;  %s729_s21 = sphi %s769_s21, %s17_s21  }
   0x2   : > { %p215_p1 = scmp.lt.s32.totalorder %s729_s21, 3 }
   0x4   : > { %p216_p2 = pnand %p546_p0, %p215_p1 }
   0x5   : > { %v271_v0 = vld [vmem:[%s924_s1] sm:$0xff] (!%p216_p2)  ;;  %v272_v1 = vld [vmem:[%s924_s1 + $0x8] sm:$0xff] (!%p216_p2)  ;;  %v273_v2 = vld [vmem:[%s924_s1 + $0x10] sm:$0xff] (!%p216_p2)  ;;  %v731_v3 = vmov (!%p216_p2), 0.0|0.0   ;;  %vm732_vm0 = vmmov (!%p216_p2), 0   ;;  %v733_v6 = vmov (!%p216_p2), 0.0  }
   0x6   : > { %219 = sbr.rel (%p216_p2) target bundleno = 500 (0x1f4), region = 40  ;;  %660 = vmatprep.subr.bf16.mxu0 (!%p216_p2), %v731_v3  ;;  %v661_v4 = vpack.c.bf16 (!%p216_p2), %v272_v1, %v271_v0  ;;  %v274_v5 = vld [vmem:[%s924_s1 + $0x18] sm:$0xff] (!%p216_p2)  ;;  %622 = vmatprep.mubr.msk.f32.mxu0 (!%p216_p2), %vm732_vm0, %v733_v6  ;;  %p248_p3 = scmp.lt.s32.totalorder (!%p216_p2), %s542_s22, 1  ;;  %v275_v8 = vld [vmem:[%s924_s1 + $0x20] sm:$0xff] (!%p216_p2)  ;;  %v276_v9 = vld [vmem:[%s924_s1 + $0x28] sm:$0xff] (!%p216_p2) }
   0x7   : > { %684 = vmatprep.subr.bf16.mxu1 (!%p216_p2), %v731_v3  ;;  %657 = vmatprep.mubr.msk.f32.mxu1 (!%p216_p2), %vm732_vm0, %v733_v6  ;;  %v664_v7 = vpack.c.bf16 (!%p216_p2), %v274_v5, %v273_v2  ;;  %v359_v10 = vld [vmem:[%s926_s3] sm:$0xff] (!%p216_p2)  ;;  %v360_v11 = vld [vmem:[%s926_s3 + $0x8] sm:$0xff] (!%p216_p2)  ;;  %v361_v13 = vld [vmem:[%s926_s3 + $0x10] sm:$0xff] (!%p216_p2)  ;;  %v667_v15 = vpack.c.bf16 (!%p216_p2), %v276_v9, %v275_v8  ;;  %v452_v8 = vlaneseq (!%p216_p2) }
   0x8   : > { %662 = vmatpush3.bf16.msra.mxu0 (!%p216_p2), %v661_v4  ;;  %v685_v12 = vpack.c.bf16 (!%p216_p2), %v360_v11, %v359_v10  ;;  %v362_v14 = vld [vmem:[%s926_s3 + $0x18] sm:$0xff] (!%p216_p2)  ;;  %v277_v18 = vld [vmem:[%s924_s1 + $0x30] sm:$0xff] (!%p216_p2)  ;;  %v363_v22 = vld [vmem:[%s926_s3 + $0x20] sm:$0xff] (!%p216_p2) }
   0x9   : > { %663 = vmatprep.subr.bf16.mxu0 (!%p216_p2), %v731_v3  ;;  %v278_v19 = vld [vmem:[%s924_s1 + $0x38] sm:$0xff] (!%p216_p2)  ;;  %v688_v21 = vpack.c.bf16 (!%p216_p2), %v362_v14, %v361_v13  ;;  %v364_v23 = vld [vmem:[%s926_s3 + $0x28] sm:$0xff] (!%p216_p2)  ;;  %v279_v26 = vld [vmem:[%s924_s1 + $0x40] sm:$0xff] (!%p216_p2)  ;;  %v453_v9 = vshrl.u32 (!%p216_p2), %v452_v8, 7 }
   0xa   : > { %686 = vmatpush3.bf16.msra.mxu1 (!%p216_p2), %v685_v12  ;;  %v670_v25 = vpack.c.bf16 (!%p216_p2), %v278_v19, %v277_v18  ;;  %v280_v27 = vld [vmem:[%s924_s1 + $0x48] sm:$0xff] (!%p216_p2)  ;;  %v691_v29 = vpack.c.bf16 (!%p216_p2), %v364_v23, %v363_v22  ;;  %v365_v30 = vld [vmem:[%s926_s3 + $0x30] sm:$0xff] (!%p216_p2)  ;;  %v366_v31 = vld [vmem:[%s926_s3 + $0x38] sm:$0xff] (!%p216_p2) }
   0xb   : > { %687 = vmatprep.subr.bf16.mxu1 (!%p216_p2), %v731_v3  ;;  %v673_v33 = vpack.c.bf16 (!%p216_p2), %v280_v27, %v279_v26  ;;  %v281_v34 = vld [vmem:[%s924_s1 + $0x50] sm:$0xff] (!%p216_p2)  ;;  %v282_v35 = vld [vmem:[%s924_s1 + $0x58] sm:$0xff] (!%p216_p2)  ;;  %v694_v36 = vpack.c.bf16 (!%p216_p2), %v366_v31, %v365_v30  ;;  %v367_v37 = vld [vmem:[%s926_s3 + $0x40] sm:$0xff] (!%p216_p2)  ;;  %v454_v10 = vsub.s32 (!%p216_p2), 0, %v453_v9 }
   0xc   : > { %665 = vmatpush3.bf16.msra.mxu0 (!%p216_p2), %v664_v7  ;;  %v368_v38 = vld [vmem:[%s926_s3 + $0x48] sm:$0xff] (!%p216_p2)  ;;  %v676_v40 = vpack.c.bf16 (!%p216_p2), %v282_v35, %v281_v34  ;;  %v283_v41 = vld [vmem:[%s924_s1 + $0x60] sm:$0xff] (!%p216_p2)  ;;  %v369_v44 = vld [vmem:[%s926_s3 + $0x50] sm:$0xff] (!%p216_p2) }
   0xd   : > { %s931_s22 = smov (!%p248_p3, %s542_s22), 1  ;;  %666 = vmatprep.subr.bf16.mxu0 %v731_v3  ;;  %v284_v42 = vld [vmem:[%s924_s1 + $0x68] sm:$0xff]  ;;  %v697_v43 = vpack.c.bf16 %v368_v38, %v367_v37  ;;  %v370_v45 = vld [vmem:[%s926_s3 + $0x58] sm:$0xff]  ;;  %v285_v48 = vld [vmem:[%s924_s1 + $0x70] sm:$0xff] }
   0xe   : > { %s554_s11 = sshll.u32 %s931_s22, 4  ;;  %689 = vmatpush3.bf16.msra.mxu1 %v688_v21  ;;  %v679_v47 = vpack.c.bf16 %v284_v42, %v283_v41  ;;  %v286_v49 = vld [vmem:[%s924_s1 + $0x78] sm:$0xff]  ;;  %v700_v50 = vpack.c.bf16 %v370_v45, %v369_v44  ;;  %v371_v51 = vld [vmem:[%s926_s3 + $0x60] sm:$0xff]  ;;  %v372_v52 = vld [vmem:[%s926_s3 + $0x68] sm:$0xff]  ;;  %s260_s9 = scalar_lea.vmem %s929_s6, %s931_s22 }
   0xf   : > { %s252_s18 = scalar_lea.vmem %s923_s0, %s554_s11  ;;  %690 = vmatprep.subr.bf16.mxu1 %v731_v3  ;;  %v682_v54 = vpack.c.bf16 %v286_v49, %v285_v48  ;;  %v703_v55 = vpack.c.bf16 %v372_v52, %v371_v51  ;;  %v373_v57 = vld [vmem:[%s926_s3 + $0x70] sm:$0xff]  ;;  %v374_v58 = vld [vmem:[%s926_s3 + $0x78] sm:$0xff]  ;;  %v287_v60 = vld [vmem:[%s925_s2] sm:$0x1]  ;;  %s257_s13 = scalar_lea.vmem %s928_s5, %s554_s11 }
  0x10   : > { %v818_v16 = vld [vmem:[%s252_s18] sm:$0xff]  ;;  %v820_v17 = vld [vmem:[%s252_s18 + $0x8] sm:$0xff]  ;;  %668 = vmatpush3.bf16.msra.mxu0 %v667_v15  ;;  %v706_v59 = vpack.c.bf16 %v374_v58, %v373_v57 }
  0x11   : > { %v263_v20 = vadd.f32 %v820_v17, %v818_v16  ;;  %669 = vmatprep.subr.bf16.mxu0 %v731_v3  ;;  %v375_v1 = vld [vmem:[%s927_s4] sm:$0x1] }
  0x12   : > { %692 = vmatpush3.bf16.msra.mxu1 %v691_v29 }
  0x13   : > { %v264_v24 = vrot.slane %v263_v20, 4  ;;  %693 = vmatprep.subr.bf16.mxu1 %v731_v3 }
  0x14   : > { %671 = vmatpush3.bf16.msra.mxu0 %v670_v25 }
  0x15   : > { %v265_v28 = vadd.f32 %v264_v24, %v263_v20  ;;  %672 = vmatprep.subr.bf16.mxu0 %v731_v3 }
  0x16   : > { %695 = vmatpush3.bf16.msra.mxu1 %v694_v36 }
  0x17   : > { %v266_v32 = vrot.slane %v265_v28, 2  ;;  %696 = vmatprep.subr.bf16.mxu1 %v731_v3 }
  0x18   : > { %674 = vmatpush3.bf16.msra.mxu0 %v673_v33 }
  0x19   : > { %v267_v39 = vadd.f32 %v266_v32, %v265_v28  ;;  %675 = vmatprep.subr.bf16.mxu0 %v731_v3 }
  0x1a   : > { %698 = vmatpush3.bf16.msra.mxu1 %v697_v43 }
  0x1b   : > { %v268_v46 = vrot.slane %v267_v39, 1  ;;  %699 = vmatprep.subr.bf16.mxu1 %v731_v3 }
  0x1c   : > { %677 = vmatpush3.bf16.msra.mxu0 %v676_v40 }
  0x1d   : > { %678 = vmatprep.subr.bf16.mxu0 %v731_v3  ;;  %v269_v53 = vadd.f32 %v268_v46, %v267_v39 }
  0x1e   : > { %701 = vmatpush3.bf16.msra.mxu1 %v700_v50 }
  0x1f   : > { %702 = vmatprep.subr.bf16.mxu1 %v731_v3  ;;  %v270_v56 = vmul.f32 0.0625, %v269_v53 }
  0x20   : > { %680 = vmatpush3.bf16.msra.mxu0 %v679_v47 }
  0x21   : > { %681 = vmatprep.subr.bf16.mxu0 %v731_v3 }
  0x22   : > { %704 = vmatpush3.bf16.msra.mxu1 %v703_v55 }
  0x23   : > { %705 = vmatprep.subr.bf16.mxu1 %v731_v3 }
  0x24   : > { %683 = vmatpush3.bf16.msra.mxu0 %v682_v54 }
  0x26   : > { %707 = vmatpush3.bf16.msra.mxu1 %v706_v59 }
  0x27   : > { %623 = vmatmul.mubr.f32.vlgmr.msra.gmra.mrb[0].mxu0 %v270_v56 }
  0xfa   : > { %v354_v61 = vpop.f32.mrb[0].mxu0 }
  0xfb   : > { %v355_v62 = vadd.f32 %v354_v61, %v287_v60  ;;  %v624_v63 = vpop.f32.mrb[1].mxu0 }
  0xfd   : > { %v358_v0 = vmax.f32 %v355_v62, 0.0 }
  0xff   : > { %658 = vmatmul.mubr.f32.vlgmr.msra.gmra.mrb[0].mxu1 %v358_v0 }
 0x1d2   : > { %v442_v2 = vpop.f32.mrb[0].mxu1 }
 0x1d3   : > { %v443_v3 = vadd.f32 %v442_v2, %v375_v1  ;;  %v659_v4 = vpop.f32.mrb[1].mxu1 }
 0x1d5   : > { %v551_v5 = vmul.f32 -1.442695, %v443_v3 }
 0x1d7   : > { %719 = vpow2.f32 %v551_v5 }
 0x1e1   : > { %v720_v6 = vpop.eup %719 }
 0x1e2   : > { %v449_v7 = vadd.f32 1.0, %v720_v6 }
 0x1e4   : > { %721 = vrcp.f32 %v449_v7 }
 0x1ee   : > { %v722_v11 = vpop.eup %721 }
 0x1ef   : > { %v455_v12 = vrot.slane %v722_v11, %v454_v10  ;;  %v460_v13 = vmul.f32 %v722_v11, %v270_v56 }
 0x1f1   : > { %v456_v14 = vmul.f32 %v455_v12, %v818_v16  ;;  %v457_v15 = vmul.f32 %v455_v12, %v820_v17  ;;  %461 = vst [vmem:[%s260_s9] sm:$0x1] %v460_v13 }
 0x1f3   : > { %458 = vst [vmem:[%s257_s13] sm:$0xff] %v456_v14  ;;  %459 = vst [vmem:[%s257_s13 + $0x8] sm:$0xff] %v457_v15 }
 0x1f4 PF: > { %s17_s21 = sadd.s32 1, %s729_s21  }
 0x1f5   : > { %p14_p4 = scmp.ge.s32.totalorder %s17_s21, 4  }
 0x1f7   :  { %16 = sbr.rel (!%p14_p4) target bundleno = 1 (0x1), region = 82 }

// kernel: _lambda_.31
= control target key start
LH: loop header
LB: loop body
LE: loop exit
PB: predicated region body
PF: predicated region fallthrough
CT: control target
= control target key end

     0   :  { %v212_v3 = vmov 0.0|0.0   ;;  %vm213_vm0 = vmmov 0   ;;  %v214_v6 = vmov 0.0   ;;  %s290_s0 = inlined_call_operand.vmem [shape: f32[2,96], index: 0, kind: input, shape index: {}]   ;;  %s291_s1 = inlined_call_operand.vmem [shape: f32[96,128], index: 1, kind: input, shape index: {}]   ;;  %s292_s2 = inlined_call_operand.vmem [shape: f32[1,128], index: 2, kind: input, shape index: {}]   ;;  %s293_s3 = inlined_call_operand.hbm [shape: f32[2,128], index: 3, kind: output, shape index: {}]  }
   0x1   :  { %v16_v0 = vld [vmem:[%s291_s1] sm:$0xff]  ;;  %v17_v1 = vld [vmem:[%s291_s1 + $0x8] sm:$0xff]  ;;  %v18_v2 = vld [vmem:[%s291_s1 + $0x10] sm:$0xff]  ;;  %166 = vmatprep.subr.bf16.mxu0 %v212_v3  ;;  %163 = vmatprep.mubr.msk.f32.mxu0 %vm213_vm0, %v214_v6 }
   0x2   :  { %v167_v4 = vpack.c.bf16 %v17_v1, %v16_v0  ;;  %v19_v5 = vld [vmem:[%s291_s1 + $0x18] sm:$0xff]  ;;  %v20_v8 = vld [vmem:[%s291_s1 + $0x20] sm:$0xff]  ;;  %v21_v9 = vld [vmem:[%s291_s1 + $0x28] sm:$0xff] }
   0x3   :  { %v170_v7 = vpack.c.bf16 %v19_v5, %v18_v2 }
   0x4   :  { %168 = vmatpush3.bf16.msra.mxu0 %v167_v4 }
   0x5   :  { %169 = vmatprep.subr.bf16.mxu0 %v212_v3 }
   0x6   :  { %8 = vsyncpa [#allocation3], 0  ;;  %v173_v10 = vpack.c.bf16 %v21_v9, %v20_v8  ;;  %v22_v11 = vld [vmem:[%s291_s1 + $0x30] sm:$0xff]  ;;  %v23_v12 = vld [vmem:[%s291_s1 + $0x38] sm:$0xff]  ;;  %vm35_vm1 = vcmask 785408   ;;  %s215_s13 = smov [#allocation2]  }
   0x7   :  { %v176_v13 = vpack.c.bf16 %v23_v12, %v22_v11  ;;  %v24_v14 = vld [vmem:[%s291_s1 + $0x40] sm:$0xff]  ;;  %v25_v15 = vld [vmem:[%s291_s1 + $0x48] sm:$0xff]  ;;  %v26_v17 = vld [vmem:[%s291_s1 + $0x50] sm:$0xff]  ;;  %s116_s14 = sshll.u32 %s215_s13, 4  ;;  %s117_s14 = int_to_ptr.vmem [resolvable:$true] %s116_s14 }
   0x8   :  { %171 = vmatpush3.bf16.msra.mxu0 %v170_v7  ;;  %v179_v16 = vpack.c.bf16 %v25_v15, %v24_v14  ;;  %v27_v18 = vld [vmem:[%s291_s1 + $0x58] sm:$0xff]  ;;  %v15_v20 = vld [vmem:[%s290_s0] sm:$0x3]  ;;  %s188_s1 = scalar_lea.vmem %s117_s14, 32  ;;  %p193_p1 = scmp.lt.s32.totalorder %s117_s14, %s117_s14 }
   0x9   :  { %172 = vmatprep.subr.bf16.mxu0 %v212_v3  ;;  %v182_v19 = vpack.c.bf16 %v27_v18, %v26_v17  ;;  %v124_v21 = vld [vmem:[%s292_s2] ss:$0 sm:$0xff]  ;;  %p189_p0 = scmp.ne.s32.totalorder %s117_s14, %s188_s1  ;;  %p194_p2 = scmp.lt.s32.totalorder %s188_s1, %s188_s1 }
   0xb   :  { %p195_p3 = por %p194_p2, %p193_p1 }
   0xc   :  { %174 = vmatpush3.bf16.msra.mxu0 %v173_v10 }
   0xd   :  { %175 = vmatprep.subr.bf16.mxu0 %v212_v3  ;;  %p196_p4 = pnand %p195_p3, %p189_p0 }
  0x10   :  { %177 = vmatpush3.bf16.msra.mxu0 %v176_v13 }
  0x11   :  { %178 = vmatprep.subr.bf16.mxu0 %v212_v3 }
  0x14   :  { %180 = vmatpush3.bf16.msra.mxu0 %v179_v16 }
  0x15   :  { %181 = vmatprep.subr.bf16.mxu0 %v212_v3 }
  0x18   :  { %183 = vmatpush3.bf16.msra.mxu0 %v182_v19 }
  0x1b   :  { %164 = vmatmul.mubr.msk.f32.vlgmr.msra.gmra.mrb[0].mxu0 %vm35_vm1, %v15_v20 }
  0xee   :  { %v105_v22 = vpop.f32.mrb[0].mxu0 }
  0xef   :  { %v106_v23 = vadd.f32 %v124_v21, %v105_v22  ;;  %v165_v24 = vpop.f32.mrb[1].mxu0 }
  0xf1   :  { %109 = vst [vmem:[#allocation2] sm:$0x3] %v106_v23 }
  0xf2   :  { %199 = shalt.err (!%p196_p4)
}
  0xf3   :  { %s200_s16 = scalar_lea.hbm %s293_s3, 32 }
  0xf4   :  { %p201_p5 = scmp.ne.s32.totalorder %s293_s3, %s200_s16  ;;  %p204_p6 = scmp.lt.u32.totalorder %s200_s16, %s293_s3 }
  0xf6   :  { %p206_p7 = pnand %p204_p6, %p201_p5 }
  0xf8   :  { %209 = shalt.err (!%p206_p7)
}
  0xf9   :  { %119 = dma.vmem_to_hbm [thread:$0]  %s117_s14, 32, %s293_s3, [#allocation3]  }
  0xfa   :  { %210 = dma.done.wait [#allocation3], 32  }
  0xfb   :  { %211 = vsyncadd [#allocation3], 4294967264 }
  0xfc   :  { %123 = vsyncpa [#allocation3], 1 }

// kernel: _lambda_.28
= control target key start
LH: loop header
LB: loop body
LE: loop exit
PB: predicated region body
PF: predicated region fallthrough
CT: control target
= control target key end

     0   :  { %s3642_s18 = smov 0   ;;  %s4206_s0 = inlined_call_operand.vmem [shape: f32[2,1,42,128], index: 0, kind: input, shape index: {}]   ;;  %s4207_s1 = inlined_call_operand.vmem [shape: f32[2,1,42,128], index: 1, kind: input, shape index: {}]   ;;  %s4208_s2 = inlined_call_operand.vmem [shape: bf16[9,128,128], index: 2, kind: input, shape index: {}]   ;;  %s4209_s3 = inlined_call_operand.vmem [shape: bf16[9,128,128], index: 3, kind: input, shape index: {}]   ;;  %s4210_s4 = inlined_call_operand.vmem [shape: f32[1,128], index: 4, kind: input, shape index: {}]   ;;  %s4211_s5 = inlined_call_operand.vmem [shape: f32[2,16,128], index: 5, kind: output, shape index: {}]  }
   0x1 LB: > { %s2498_s19 = sadd.s32 4294967295, %s3610_s18   ;;  %p2502_p0 = scmp.ge.s32.totalorder %s3610_s18, 1  ;;  %s3610_s18 = sphi %s3642_s18, %s15_s18  }
   0x2   : > { %p197_p1 = scmp.lt.s32.totalorder %s3610_s18, 3 }
   0x4   : > { %p198_p2 = pnand %p2502_p0, %p197_p1 }
   0x5   : > { %v3460_v0 = vld [vmem:[%s4208_s2 + $0x40] sm:$0xff] (!%p198_p2)   ;;  %p230_p3 = scmp.lt.s32.totalorder (!%p198_p2), %s2498_s19, 1  ;;  %v3462_v2 = vld [vmem:[%s4208_s2 + $0x48] sm:$0xff] (!%p198_p2)   ;;  %v3464_v4 = vld [vmem:[%s4208_s2 + $0x50] sm:$0xff] (!%p198_p2)  }
   0x6   : > { %201 = sbr.rel (%p198_p2) target bundleno = 516 (0x204), region = 40  ;;  %v3461_v1 = vld [vmem:[%s4208_s2] sm:$0xff] (!%p198_p2)   ;;  %3091 = vmatprep.subr.bf16.mxu0 (!%p198_p2), %v3460_v0  ;;  %v3463_v3 = vld [vmem:[%s4208_s2 + $0x8] sm:$0xff] (!%p198_p2)   ;;  %v3465_v5 = vld [vmem:[%s4208_s2 + $0x10] sm:$0xff] (!%p198_p2)  }
   0x7   : > { %3111 = vmatprep.subr.bf16.mxu1 (!%p198_p2), %v3461_v1  ;;  %3092 = vmatpush3.bf16.msra.mxu0 (!%p198_p2), %v3460_v0  ;;  %v3466_v6 = vld [vmem:[%s4208_s2 + $0x58] sm:$0xff] (!%p198_p2)   ;;  %v3468_v8 = vld [vmem:[%s4208_s2 + $0x60] sm:$0xff] (!%p198_p2)   ;;  %v3470_v10 = vld [vmem:[%s4208_s2 + $0x68] sm:$0xff] (!%p198_p2)  }
   0x8   : > { %3112 = vmatpush3.bf16.msra.mxu1 (!%p198_p2), %v3461_v1  ;;  %3093 = vmatprep.subr.bf16.mxu0 (!%p198_p2), %v3462_v2  ;;  %v3467_v7 = vld [vmem:[%s4208_s2 + $0x18] sm:$0xff] (!%p198_p2)   ;;  %v3469_v9 = vld [vmem:[%s4208_s2 + $0x20] sm:$0xff] (!%p198_p2)   ;;  %v3471_v14 = vld [vmem:[%s4208_s2 + $0x28] sm:$0xff] (!%p198_p2)  }
   0x9   : > { %3113 = vmatprep.subr.bf16.mxu1 (!%p198_p2), %v3463_v3  ;;  %v3472_v18 = vld [vmem:[%s4208_s2 + $0x70] sm:$0xff] (!%p198_p2)   ;;  %v3474_v20 = vld [vmem:[%s4208_s2 + $0x78] sm:$0xff] (!%p198_p2)   ;;  %v3476_v24 = vld [vmem:[%s4208_s2 + $0x80] sm:$0xff] (!%p198_p2)  }
   0xa   : > { %v3473_v19 = vld [vmem:[%s4208_s2 + $0x30] sm:$0xff] (!%p198_p2)   ;;  %v3475_v21 = vld [vmem:[%s4208_s2 + $0x38] sm:$0xff] (!%p198_p2)   ;;  %v3477_v25 = vld [vmem:[%s4208_s2 + $0xc0] sm:$0xff] (!%p198_p2)  }
   0xb   : > { %3094 = vmatpush3.bf16.msra.mxu0 (!%p198_p2), %v3462_v2  ;;  %v3478_v28 = vld [vmem:[%s4208_s2 + $0x88] sm:$0xff] (!%p198_p2)   ;;  %v3480_v33 = vld [vmem:[%s4208_s2 + $0x90] sm:$0xff] (!%p198_p2)   ;;  %v3482_v40 = vld [vmem:[%s4208_s2 + $0x98] sm:$0xff] (!%p198_p2)  }
   0xc   : > { %3114 = vmatpush3.bf16.msra.mxu1 (!%p198_p2), %v3463_v3  ;;  %3095 = vmatprep.subr.bf16.mxu0 (!%p198_p2), %v3464_v4  ;;  %v3479_v29 = vld [vmem:[%s4208_s2 + $0xc8] sm:$0xff] (!%p198_p2)   ;;  %v3481_v38 = vld [vmem:[%s4208_s2 + $0xd0] sm:$0xff] (!%p198_p2)   ;;  %v3483_v41 = vld [vmem:[%s4208_s2 + $0xd8] sm:$0xff] (!%p198_p2)  }
   0xd   : > { %s4213_s19 = smov (!%p230_p3, %s2498_s19), 1  ;;  %3115 = vmatprep.subr.bf16.mxu1 %v3465_v5  ;;  %v3484_v42 = vld [vmem:[%s4208_s2 + $0xa0] sm:$0xff]   ;;  %v3486_v44 = vld [vmem:[%s4208_s2 + $0xa8] sm:$0xff]   ;;  %v3488_v46 = vld [vmem:[%s4208_s2 + $0xb0] sm:$0xff]  }
   0xe   : > { %s3451_s11 = smul.u32 48, %s4213_s19  ;;  %v3485_v43 = vld [vmem:[%s4208_s2 + $0xe0] sm:$0xff]   ;;  %v3487_v45 = vld [vmem:[%s4208_s2 + $0xe8] sm:$0xff]   ;;  %v3489_v47 = vld [vmem:[%s4208_s2 + $0xf0] sm:$0xff]  }
   0xf   : > { %3096 = vmatpush3.bf16.msra.mxu0 %v3464_v4  ;;  %v3490_v48 = vld [vmem:[%s4208_s2 + $0xb8] sm:$0xff]   ;;  %v3492_v51 = vld [vmem:[%s4208_s2 + $0x100] sm:$0xff]   ;;  %v3494_v57 = vld [vmem:[%s4208_s2 + $0x108] sm:$0xff]  }
  0x10   : > { %3116 = vmatpush3.bf16.msra.mxu1 %v3465_v5  ;;  %3097 = vmatprep.subr.bf16.mxu0 %v3466_v6  ;;  %s3688_s20 = scalar_lea.vmem %s4206_s0, %s3451_s11  ;;  %v3491_v49 = vld [vmem:[%s4208_s2 + $0xf8] sm:$0xff]   ;;  %v3493_v52 = vld [vmem:[%s4208_s2 + $0x140] sm:$0xff]   ;;  %v3495_v58 = vld [vmem:[%s4208_s2 + $0x148] sm:$0xff]   ;;  %s3895_s26 = scalar_lea.vmem %s4207_s1, %s3451_s11 }
  0x11   : > { %3117 = vmatprep.subr.bf16.mxu1 %v3467_v7  ;;  %v267_v11 = vld [vmem:[%s3688_s20 + $0x1] sm:$0xff]  ;;  %v268_v12 = vld [vmem:[%s3688_s20 + $0x9] sm:$0xff]  ;;  %v269_v22 = vld [vmem:[%s3688_s20 + $0x11] sm:$0xff] }
  0x12   : > { %v246_v13 = vld [vmem:[%s3688_s20] sm:$0xff]  ;;  %v270_v15 = vpack.c.bf16 %v268_v12, %v267_v11  ;;  %v3700_v16 = vld [vmem:[%s3688_s20 + $0x8] sm:$0xff]  ;;  %v3717_v23 = vld [vmem:[%s3688_s20 + $0x10] sm:$0xff]  ;;  %v271_v26 = vpack.c.bf16 %v269_v22, %v269_v22 }
  0x13   : > { %3098 = vmatpush3.bf16.msra.mxu0 %v3466_v6  ;;  %v249_v17 = vpack.c.bf16 %v3700_v16, %v246_v13  ;;  %v250_v27 = vpack.c.bf16 %v3717_v23, %v3717_v23  ;;  %v481_v30 = vld [vmem:[%s3688_s20 + $0x2] sm:$0xff]  ;;  %v482_v31 = vld [vmem:[%s3688_s20 + $0xa] sm:$0xff]  ;;  %v3744_v37 = vld [vmem:[%s3688_s20 + $0x16] sm:$0xff]  ;;  %v847_v60 = vpack.c.bf16 %v3717_v23, %v3700_v16 }
  0x14   : > { %3118 = vmatpush3.bf16.msra.mxu1 %v3467_v7  ;;  %3099 = vmatprep.subr.bf16.mxu0 %v3468_v8  ;;  %v602_v32 = vld [vmem:[%s3688_s20 + $0x6] sm:$0xff]  ;;  %v484_v34 = vpack.c.bf16 %v482_v31, %v481_v30  ;;  %v3740_v35 = vld [vmem:[%s3688_s20 + $0xe] sm:$0xff]  ;;  %v606_v56 = vpack.c.bf16 %v3744_v37, %v3744_v37  ;;  %v3498_v63 = vld [vmem:[%s4208_s2 + $0x118] sm:$0xff]  }
  0x15   : > { %3119 = vmatprep.subr.bf16.mxu1 %v3469_v9  ;;  %3107 = vmatprep.mubr.bf16.mxu0 %v270_v15  ;;  %v605_v36 = vpack.c.bf16 %v3740_v35, %v602_v32  ;;  %v1210_v39 = vpack.c.bf16 %v3744_v37, %v3740_v35  ;;  %v483_v50 = vld [vmem:[%s3688_s20 + $0x12] sm:$0xff]  ;;  %v723_v53 = vld [vmem:[%s3688_s20 + $0x7] sm:$0xff] }
  0x16   : > { %3127 = vmatprep.mubr.bf16.mxu1 %v249_v17  ;;  %v485_v54 = vpack.c.bf16 %v483_v50, %v483_v50  ;;  %v724_v55 = vld [vmem:[%s3688_s20 + $0xf] sm:$0xff]  ;;  %v3499_v0 = vld [vmem:[%s4208_s2 + $0x158] sm:$0xff]   ;;  %v3500_v1 = vld [vmem:[%s4208_s2 + $0x120] sm:$0xff]  }
  0x17   : > { %3100 = vmatpush3.bf16.msra.mxu0 %v3468_v8  ;;  %v726_v59 = vpack.c.bf16 %v724_v55, %v723_v53  ;;  %v3496_v61 = vld [vmem:[%s4208_s2 + $0x110] sm:$0xff]   ;;  %v3501_v2 = vld [vmem:[%s4208_s2 + $0x160] sm:$0xff]   ;;  %v3502_v3 = vld [vmem:[%s4208_s2 + $0x128] sm:$0xff]  }
  0x18   : > { %3120 = vmatpush3.bf16.msra.mxu1 %v3469_v9  ;;  %3101 = vmatprep.subr.bf16.mxu0 %v3470_v10  ;;  %v3497_v62 = vld [vmem:[%s4208_s2 + $0x150] sm:$0xff]   ;;  %v3503_v4 = vld [vmem:[%s4208_s2 + $0x168] sm:$0xff]   ;;  %v3506_v7 = vld [vmem:[%s4208_s2 + $0x138] sm:$0xff]  }
  0x19   : > { %3121 = vmatprep.subr.bf16.mxu1 %v3471_v14  ;;  %v3504_v5 = vld [vmem:[%s4208_s2 + $0x130] sm:$0xff]   ;;  %v3507_v8 = vld [vmem:[%s4208_s2 + $0x178] sm:$0xff]   ;;  %v3508_v11 = vld [vmem:[%s4208_s2 + $0x180] sm:$0xff]  }
  0x1a   : > { %v3505_v6 = vld [vmem:[%s4208_s2 + $0x170] sm:$0xff]   ;;  %v3509_v12 = vld [vmem:[%s4208_s2 + $0x1c0] sm:$0xff]   ;;  %v3519_v30 = vld [vmem:[%s4208_s2 + $0x1e8] sm:$0xff]  }
  0x1b   : > { %3102 = vmatpush3.bf16.msra.mxu0 %v3470_v10  ;;  %v725_v9 = vld [vmem:[%s3688_s20 + $0x17] sm:$0xff]  ;;  %v965_v13 = vld [vmem:[%s3688_s20 + $0xc] sm:$0xff]  ;;  %v3532_v35 = vld [vmem:[%s4208_s2 + $0x220] sm:$0xff]  }
  0x1c   : > { %3122 = vmatpush3.bf16.msra.mxu1 %v3471_v14  ;;  %3103 = vmatprep.subr.bf16.mxu0 %v3472_v18  ;;  %v846_v10 = vld [vmem:[%s3688_s20 + $0x18] sm:$0xff]  ;;  %v727_v15 = vpack.c.bf16 %v725_v9, %v725_v9  ;;  %v1086_v16 = vld [vmem:[%s3688_s20 + $0xd] sm:$0xff]  ;;  %v3533_v37 = vld [vmem:[%s4209_s3 + $0x20] sm:$0xff]  }
  0x1d   : > { %3123 = vmatprep.subr.bf16.mxu1 %v3473_v19  ;;  %v966_v14 = vld [vmem:[%s3688_s20 + $0x14] sm:$0xff]  ;;  %v848_v17 = vpack.c.bf16 %v846_v10, %v846_v10  ;;  %v3535_v55 = vld [vmem:[%s4209_s3 + $0x28] sm:$0xff]  }
  0x1e   : > { %v3512_v23 = vld [vmem:[%s4208_s2 + $0x190] sm:$0xff]   ;;  %v3530_v53 = vld [vmem:[%s4208_s2 + $0x218] sm:$0xff]  }
  0x1f   : > { %3104 = vmatpush3.bf16.msra.mxu0 %v3472_v18  ;;  %v1087_v18 = vld [vmem:[%s3688_s20 + $0x15] sm:$0xff] }
  0x20   : > { %3124 = vmatpush3.bf16.msra.mxu1 %v3473_v19  ;;  %3105 = vmatprep.subr.bf16.mxu0 %v3474_v20  ;;  %v3510_v19 = vld [vmem:[%s4208_s2 + $0x188] sm:$0xff]   ;;  %v1089_v22 = vpack.c.bf16 %v1087_v18, %v1086_v16  ;;  %v3520_v31 = vld [vmem:[%s4208_s2 + $0x1b0] sm:$0xff]  }
  0x21   : > { %3125 = vmatprep.subr.bf16.mxu1 %v3475_v21  ;;  %v3521_v32 = vld [vmem:[%s4208_s2 + $0x1f0] sm:$0xff]   ;;  %v3551_v16 = vld [vmem:[%s4209_s3 + $0xa8] sm:$0xff]  }
  0x22   : > { %v3544_v9 = vld [vmem:[%s4209_s3 + $0x50] sm:$0xff]  }
  0x23   : > { %3106 = vmatpush3.bf16.msra.mxu0 %v3474_v20  ;;  %v3511_v20 = vld [vmem:[%s4208_s2 + $0x1c8] sm:$0xff]   ;;  %v3545_v10 = vld [vmem:[%s4209_s3 + $0x90] sm:$0xff]  }
  0x24   : > { %3126 = vmatpush3.bf16.msra.mxu1 %v3475_v21  ;;  %3131 = vmatprep.subr.bf16.mxu0 %v3476_v24  ;;  %v968_v21 = vpack.c.bf16 %v966_v14, %v965_v13  ;;  %v3548_v13 = vld [vmem:[%s4209_s3 + $0x60] sm:$0xff]   ;;  %v3553_v18 = vld [vmem:[%s4209_s3 + $0xb0] sm:$0xff]  }
  0x25   : > { %3151 = vmatprep.subr.bf16.mxu1 %v3477_v25  ;;  %v3549_v14 = vld [vmem:[%s4209_s3 + $0xa0] sm:$0xff]  }
  0x26   : > { %3108 = vmatmul.mubr.bf16.vlgmr.msra.gmra.mrb[0].mxu0 %v271_v26  ;;  %v3515_v26 = vld [vmem:[%s4208_s2 + $0x1d8] sm:$0xff]  }
  0x27   : > { %3128 = vmatmul.mubr.bf16.vlgmr.msra.gmra.mrb[0].mxu1 %v250_v27  ;;  %3132 = vmatpush3.bf16.msra.mxu0 %v3476_v24  ;;  %v3513_v24 = vld [vmem:[%s4208_s2 + $0x1d0] sm:$0xff]   ;;  %v3516_v27 = vld [vmem:[%s4208_s2 + $0x1a0] sm:$0xff]  }
  0x28   : > { %3152 = vmatpush3.bf16.msra.mxu1 %v3477_v25  ;;  %3133 = vmatprep.subr.bf16.mxu0 %v3478_v28  ;;  %v3514_v25 = vld [vmem:[%s4208_s2 + $0x198] sm:$0xff]  }
  0x29   : > { %3153 = vmatprep.subr.bf16.mxu1 %v3479_v29  ;;  %3147 = vmatprep.mubr.bf16.mxu0 %v484_v34  ;;  %v3523_v34 = vld [vmem:[%s4208_s2 + $0x1f8] sm:$0xff]  }
  0x2a   : > { %3167 = vmatprep.mubr.bf16.mxu1 %v605_v36  ;;  %v967_v36 = vld [vmem:[%s3688_s20 + $0x1c] sm:$0xff] }
  0x2b   : > { %3134 = vmatpush3.bf16.msra.mxu0 %v3478_v28  ;;  %v3517_v28 = vld [vmem:[%s4208_s2 + $0x1e0] sm:$0xff]  }
  0x2c   : > { %3154 = vmatpush3.bf16.msra.mxu1 %v3479_v29  ;;  %3135 = vmatprep.subr.bf16.mxu0 %v3480_v33  ;;  %v3518_v29 = vld [vmem:[%s4208_s2 + $0x1a8] sm:$0xff]  }
  0x2d   : > { %3155 = vmatprep.subr.bf16.mxu1 %v3481_v38 }
  0x2f   : > { %3136 = vmatpush3.bf16.msra.mxu0 %v3480_v33  ;;  %v3522_v33 = vld [vmem:[%s4208_s2 + $0x1b8] sm:$0xff]  }
  0x30   : > { %3156 = vmatpush3.bf16.msra.mxu1 %v3481_v38  ;;  %3137 = vmatprep.subr.bf16.mxu0 %v3482_v40  ;;  %v1088_v38 = vld [vmem:[%s3688_s20 + $0x1d] sm:$0xff] }
  0x31   : > { %3157 = vmatprep.subr.bf16.mxu1 %v3483_v41 }
  0x33   : > { %3138 = vmatpush3.bf16.msra.mxu0 %v3482_v40  ;;  %v3524_v40 = vld [vmem:[%s4208_s2 + $0x200] sm:$0xff]  }
  0x34   : > { %3158 = vmatpush3.bf16.msra.mxu1 %v3483_v41  ;;  %3139 = vmatprep.subr.bf16.mxu0 %v3484_v42  ;;  %v3525_v41 = vld [vmem:[%s4209_s3] sm:$0xff]  }
  0x35   : > { %3159 = vmatprep.subr.bf16.mxu1 %v3485_v43 }
  0x37   : > { %3140 = vmatpush3.bf16.msra.mxu0 %v3484_v42  ;;  %v1328_v42 = vld [vmem:[%s3895_s26] sm:$0xff] }
  0x38   : > { %3160 = vmatpush3.bf16.msra.mxu1 %v3485_v43  ;;  %3141 = vmatprep.subr.bf16.mxu0 %v3486_v44  ;;  %v969_v43 = vpack.c.bf16 %v967_v36, %v967_v36  ;;  %v3560_v36 = vld [vmem:[%s4209_s3 + $0xd0] sm:$0xff]  }
  0x39   : > { %3161 = vmatprep.subr.bf16.mxu1 %v3487_v45 }
  0x3b   : > { %3142 = vmatpush3.bf16.msra.mxu0 %v3486_v44  ;;  %v3907_v44 = vld [vmem:[%s3895_s26 + $0x8] sm:$0xff] }
  0x3c   : > { %3162 = vmatpush3.bf16.msra.mxu1 %v3487_v45  ;;  %3143 = vmatprep.subr.bf16.mxu0 %v3488_v46  ;;  %v1090_v45 = vpack.c.bf16 %v1088_v38, %v1088_v38  ;;  %v1331_v50 = vpack.c.bf16 %v3907_v44, %v1328_v42  ;;  %v3561_v38 = vld [vmem:[%s4209_s3 + $0x110] sm:$0xff]   ;;  %v3564_v42 = vld [vmem:[%s4209_s3 + $0xe0] sm:$0xff]  }
  0x3d   : > { %3163 = vmatprep.subr.bf16.mxu1 %v3489_v47 }
  0x3f   : > { %3144 = vmatpush3.bf16.msra.mxu0 %v3488_v46  ;;  %v3910_v46 = vld [vmem:[%s3895_s26 + $0x10] sm:$0xff] }
  0x40   : > { %3164 = vmatpush3.bf16.msra.mxu1 %v3489_v47  ;;  %3145 = vmatprep.subr.bf16.mxu0 %v3490_v48  ;;  %v3526_v47 = vld [vmem:[%s4208_s2 + $0x208] sm:$0xff]  }
  0x41   : > { %3165 = vmatprep.subr.bf16.mxu1 %v3491_v49 }
  0x43   : > { %3146 = vmatpush3.bf16.msra.mxu0 %v3490_v48  ;;  %v1935_v48 = vpack.c.bf16 %v3910_v46, %v3907_v44  ;;  %v3580_v44 = vld [vmem:[%s4209_s3 + $0x160] sm:$0xff]  }
  0x44   : > { %3166 = vmatpush3.bf16.msra.mxu1 %v3491_v49  ;;  %3171 = vmatprep.subr.bf16.mxu0 %v3492_v51  ;;  %v3527_v49 = vld [vmem:[%s4209_s3 + $0x8] sm:$0xff]  }
  0x45   : > { %3191 = vmatprep.subr.bf16.mxu1 %v3493_v52 }
  0x46   : > { %3148 = vmatmul.mubr.bf16.vlgmr.msra.gmra.mrb[4].mxu0 %v485_v54  ;;  %v3531_v54 = vld [vmem:[%s4209_s3 + $0x18] sm:$0xff]  }
  0x47   : > { %3168 = vmatmul.mubr.bf16.vlgmr.msra.gmra.mrb[4].mxu1 %v606_v56  ;;  %3172 = vmatpush3.bf16.msra.mxu0 %v3492_v51  ;;  %v3528_v51 = vld [vmem:[%s4208_s2 + $0x210] sm:$0xff]  }
  0x48   : > { %3192 = vmatpush3.bf16.msra.mxu1 %v3493_v52  ;;  %3173 = vmatprep.subr.bf16.mxu0 %v3494_v57  ;;  %v3529_v52 = vld [vmem:[%s4209_s3 + $0x10] sm:$0xff]  }
  0x49   : > { %3193 = vmatprep.subr.bf16.mxu1 %v3495_v58  ;;  %3187 = vmatprep.mubr.bf16.mxu0 %v726_v59  ;;  %v3536_v56 = vld [vmem:[%s4208_s2 + $0x230] sm:$0xff]   ;;  %v3539_v59 = vld [vmem:[%s4209_s3 + $0x38] sm:$0xff]  }
  0x4a   : > { %3207 = vmatprep.mubr.bf16.mxu1 %v847_v60  ;;  %v1209_v60 = vld [vmem:[%s3688_s20 + $0x1e] sm:$0xff] }
  0x4b   : > { %3174 = vmatpush3.bf16.msra.mxu0 %v3494_v57  ;;  %v3537_v57 = vld [vmem:[%s4209_s3 + $0x30] sm:$0xff]  }
  0x4c   : > { %3194 = vmatpush3.bf16.msra.mxu1 %v3495_v58  ;;  %3175 = vmatprep.subr.bf16.mxu0 %v3496_v61  ;;  %v3538_v58 = vld [vmem:[%s4208_s2 + $0x238] sm:$0xff]  }
  0x4d   : > { %3195 = vmatprep.subr.bf16.mxu1 %v3497_v62 }
  0x4f   : > { %3176 = vmatpush3.bf16.msra.mxu0 %v3496_v61  ;;  %v3540_v61 = vld [vmem:[%s4209_s3 + $0x40] sm:$0xff]  }
  0x50   : > { %3196 = vmatpush3.bf16.msra.mxu1 %v3497_v62  ;;  %3177 = vmatprep.subr.bf16.mxu0 %v3498_v63  ;;  %v3541_v62 = vld [vmem:[%s4209_s3 + $0x80] sm:$0xff]  }
  0x51   : > { %3197 = vmatprep.subr.bf16.mxu1 %v3499_v0 }
  0x53   : > { %3178 = vmatpush3.bf16.msra.mxu0 %v3498_v63  ;;  %v1211_v63 = vpack.c.bf16 %v1209_v60, %v1209_v60 }
  0x54   : > { %3198 = vmatpush3.bf16.msra.mxu1 %v3499_v0  ;;  %3179 = vmatprep.subr.bf16.mxu0 %v3500_v1  ;;  %v1448_v0 = vld [vmem:[%s3895_s26 + $0x1] sm:$0xff] }
  0x55   : > { %3199 = vmatprep.subr.bf16.mxu1 %v3501_v2 }
  0x57   : > { %3180 = vmatpush3.bf16.msra.mxu0 %v3500_v1  ;;  %v1449_v1 = vld [vmem:[%s3895_s26 + $0x9] sm:$0xff] }
  0x58   : > { %3200 = vmatpush3.bf16.msra.mxu1 %v3501_v2  ;;  %3181 = vmatprep.subr.bf16.mxu0 %v3502_v3  ;;  %v1332_v2 = vpack.c.bf16 %v3910_v46, %v3910_v46  ;;  %v3581_v46 = vld [vmem:[%s4209_s3 + $0x1a0] sm:$0xff]  }
  0x59   : > { %3201 = vmatprep.subr.bf16.mxu1 %v3503_v4 }
  0x5b   : > { %3182 = vmatpush3.bf16.msra.mxu0 %v3502_v3  ;;  %v1569_v3 = vld [vmem:[%s3895_s26 + $0x2] sm:$0xff] }
  0x5c   : > { %3202 = vmatpush3.bf16.msra.mxu1 %v3503_v4  ;;  %3183 = vmatprep.subr.bf16.mxu0 %v3504_v5  ;;  %v1570_v4 = vld [vmem:[%s3895_s26 + $0xa] sm:$0xff] }
  0x5d   : > { %3203 = vmatprep.subr.bf16.mxu1 %v3505_v6 }
  0x5f   : > { %3184 = vmatpush3.bf16.msra.mxu0 %v3504_v5  ;;  %v3542_v5 = vld [vmem:[%s4209_s3 + $0x48] sm:$0xff]  }
  0x60   : > { %3204 = vmatpush3.bf16.msra.mxu1 %v3505_v6  ;;  %3185 = vmatprep.subr.bf16.mxu0 %v3506_v7  ;;  %v3543_v6 = vld [vmem:[%s4209_s3 + $0x88] sm:$0xff]  }
  0x61   : > { %3205 = vmatprep.subr.bf16.mxu1 %v3507_v8 }
  0x63   : > { %3186 = vmatpush3.bf16.msra.mxu0 %v3506_v7  ;;  %v1451_v7 = vpack.c.bf16 %v1449_v1, %v1448_v0  ;;  %v3579_v0 = vld [vmem:[%s4209_s3 + $0x198] sm:$0xff]   ;;  %v3583_v1 = vld [vmem:[%s4209_s3 + $0x1a8] sm:$0xff]  }
  0x64   : > { %3206 = vmatpush3.bf16.msra.mxu1 %v3507_v8  ;;  %3211 = vmatprep.subr.bf16.mxu0 %v3508_v11  ;;  %v1572_v8 = vpack.c.bf16 %v1570_v4, %v1569_v3  ;;  %v3585_v4 = vld [vmem:[%s4209_s3 + $0x1b0] sm:$0xff]  }
  0x65   : > { %3231 = vmatprep.subr.bf16.mxu1 %v3509_v12 }
  0x66   : > { %3188 = vmatmul.mubr.bf16.vlgmr.msra.gmra.mrb[8].mxu0 %v727_v15  ;;  %v3550_v15 = vld [vmem:[%s4209_s3 + $0x68] sm:$0xff]  }
  0x67   : > { %3208 = vmatmul.mubr.bf16.vlgmr.msra.gmra.mrb[8].mxu1 %v848_v17  ;;  %3212 = vmatpush3.bf16.msra.mxu0 %v3508_v11  ;;  %v3546_v11 = vld [vmem:[%s4209_s3 + $0x58] sm:$0xff]   ;;  %v3552_v17 = vld [vmem:[%s4209_s3 + $0x70] sm:$0xff]  }
  0x68   : > { %3232 = vmatpush3.bf16.msra.mxu1 %v3509_v12  ;;  %3213 = vmatprep.subr.bf16.mxu0 %v3510_v19  ;;  %v3547_v12 = vld [vmem:[%s4209_s3 + $0x98] sm:$0xff]  }
  0x69   : > { %3233 = vmatprep.subr.bf16.mxu1 %v3511_v20  ;;  %3227 = vmatprep.mubr.bf16.mxu0 %v968_v21  ;;  %v1450_v21 = vld [vmem:[%s3895_s26 + $0x11] sm:$0xff] }
  0x6a   : > { %3247 = vmatprep.mubr.bf16.mxu1 %v1089_v22  ;;  %v1571_v22 = vld [vmem:[%s3895_s26 + $0x12] sm:$0xff] }
  0x6b   : > { %3214 = vmatpush3.bf16.msra.mxu0 %v3510_v19  ;;  %v3554_v19 = vld [vmem:[%s4209_s3 + $0x78] sm:$0xff]  }
  0x6c   : > { %3234 = vmatpush3.bf16.msra.mxu1 %v3511_v20  ;;  %3215 = vmatprep.subr.bf16.mxu0 %v3512_v23  ;;  %v3555_v20 = vld [vmem:[%s4209_s3 + $0xb8] sm:$0xff]  }
  0x6d   : > { %3235 = vmatprep.subr.bf16.mxu1 %v3513_v24 }
  0x6f   : > { %3216 = vmatpush3.bf16.msra.mxu0 %v3512_v23  ;;  %v3556_v23 = vld [vmem:[%s4209_s3 + $0xc0] sm:$0xff]  }
  0x70   : > { %3236 = vmatpush3.bf16.msra.mxu1 %v3513_v24  ;;  %3217 = vmatprep.subr.bf16.mxu0 %v3514_v25  ;;  %v3557_v24 = vld [vmem:[%s4209_s3 + $0x100] sm:$0xff]  }
  0x71   : > { %3237 = vmatprep.subr.bf16.mxu1 %v3515_v26 }
  0x73   : > { %3218 = vmatpush3.bf16.msra.mxu0 %v3514_v25  ;;  %v1452_v25 = vpack.c.bf16 %v1450_v21, %v1450_v21 }
  0x74   : > { %3238 = vmatpush3.bf16.msra.mxu1 %v3515_v26  ;;  %3219 = vmatprep.subr.bf16.mxu0 %v3516_v27  ;;  %v1690_v26 = vld [vmem:[%s3895_s26 + $0x6] sm:$0xff] }
  0x75   : > { %3239 = vmatprep.subr.bf16.mxu1 %v3517_v28 }
  0x77   : > { %3220 = vmatpush3.bf16.msra.mxu0 %v3516_v27  ;;  %v4025_v27 = vld [vmem:[%s3895_s26 + $0xe] sm:$0xff] }
  0x78   : > { %3240 = vmatpush3.bf16.msra.mxu1 %v3517_v28  ;;  %3221 = vmatprep.subr.bf16.mxu0 %v3518_v29  ;;  %v1573_v28 = vpack.c.bf16 %v1571_v22, %v1571_v22  ;;  %v2174_v22 = vld [vmem:[%s3895_s26 + $0xd] sm:$0xff] }
  0x79   : > { %3241 = vmatprep.subr.bf16.mxu1 %v3519_v30 }
  0x7b   : > { %3222 = vmatpush3.bf16.msra.mxu0 %v3518_v29  ;;  %v1811_v29 = vld [vmem:[%s3895_s26 + $0x7] sm:$0xff] }
  0x7c   : > { %3242 = vmatpush3.bf16.msra.mxu1 %v3519_v30  ;;  %3223 = vmatprep.subr.bf16.mxu0 %v3520_v31  ;;  %v1812_v30 = vld [vmem:[%s3895_s26 + $0xf] sm:$0xff] }
  0x7d   : > { %3243 = vmatprep.subr.bf16.mxu1 %v3521_v32 }
  0x7f   : > { %3224 = vmatpush3.bf16.msra.mxu0 %v3520_v31  ;;  %v3558_v31 = vld [vmem:[%s4209_s3 + $0xc8] sm:$0xff]  }
  0x80   : > { %3244 = vmatpush3.bf16.msra.mxu1 %v3521_v32  ;;  %3225 = vmatprep.subr.bf16.mxu0 %v3522_v33  ;;  %v3559_v32 = vld [vmem:[%s4209_s3 + $0x108] sm:$0xff]  }
  0x81   : > { %3245 = vmatprep.subr.bf16.mxu1 %v3523_v34 }
  0x83   : > { %3226 = vmatpush3.bf16.msra.mxu0 %v3522_v33  ;;  %v1693_v33 = vpack.c.bf16 %v4025_v27, %v1690_v26  ;;  %v3591_v26 = vld [vmem:[%s4209_s3 + $0x208] sm:$0xff]  }
  0x84   : > { %3246 = vmatpush3.bf16.msra.mxu1 %v3523_v34  ;;  %3251 = vmatprep.subr.bf16.mxu0 %v3524_v40  ;;  %v1814_v34 = vpack.c.bf16 %v1812_v30, %v1811_v29  ;;  %v3592_v30 = vld [vmem:[%s4209_s3 + $0x1d0] sm:$0xff]  }
  0x85   : > { %3271 = vmatprep.subr.bf16.mxu1 %v3525_v41 }
  0x86   : > { %3228 = vmatmul.mubr.bf16.vlgmr.msra.gmra.mrb[12].mxu0 %v969_v43  ;;  %v3565_v43 = vld [vmem:[%s4209_s3 + $0x120] sm:$0xff]  }
  0x87   : > { %3248 = vmatmul.mubr.bf16.vlgmr.msra.gmra.mrb[12].mxu1 %v1090_v45  ;;  %3252 = vmatpush3.bf16.msra.mxu0 %v3524_v40  ;;  %v3562_v40 = vld [vmem:[%s4209_s3 + $0xd8] sm:$0xff]   ;;  %v3566_v45 = vld [vmem:[%s4209_s3 + $0xe8] sm:$0xff]  }
  0x88   : > { %3272 = vmatpush3.bf16.msra.mxu1 %v3525_v41  ;;  %3253 = vmatprep.subr.bf16.mxu0 %v3526_v47  ;;  %v3563_v41 = vld [vmem:[%s4209_s3 + $0x118] sm:$0xff]  }
  0x89   : > { %3273 = vmatprep.subr.bf16.mxu1 %v3527_v49  ;;  %3267 = vmatprep.mubr.bf16.mxu0 %v1210_v39  ;;  %v3534_v39 = vld [vmem:[%s4208_s2 + $0x228] sm:$0xff]  }
  0x8a   : > { %3287 = vmatprep.mubr.bf16.mxu1 %v1331_v50  ;;  %v3569_v50 = vld [vmem:[%s4209_s3 + $0x130] sm:$0xff]  }
  0x8b   : > { %3254 = vmatpush3.bf16.msra.mxu0 %v3526_v47  ;;  %v3567_v47 = vld [vmem:[%s4209_s3 + $0x128] sm:$0xff]  }
  0x8c   : > { %3274 = vmatpush3.bf16.msra.mxu1 %v3527_v49  ;;  %3255 = vmatprep.subr.bf16.mxu0 %v3528_v51  ;;  %v3568_v49 = vld [vmem:[%s4209_s3 + $0xf0] sm:$0xff]  }
  0x8d   : > { %3275 = vmatprep.subr.bf16.mxu1 %v3529_v52 }
  0x8f   : > { %3256 = vmatpush3.bf16.msra.mxu0 %v3528_v51  ;;  %v3570_v51 = vld [vmem:[%s4209_s3 + $0xf8] sm:$0xff]  }
  0x90   : > { %3276 = vmatpush3.bf16.msra.mxu1 %v3529_v52  ;;  %3257 = vmatprep.subr.bf16.mxu0 %v3530_v53  ;;  %v3571_v52 = vld [vmem:[%s4209_s3 + $0x138] sm:$0xff]  }
  0x91   : > { %3277 = vmatprep.subr.bf16.mxu1 %v3531_v54 }
  0x93   : > { %3258 = vmatpush3.bf16.msra.mxu0 %v3530_v53  ;;  %v4073_v53 = vld [vmem:[%s3895_s26 + $0x16] sm:$0xff] }
  0x94   : > { %3278 = vmatpush3.bf16.msra.mxu1 %v3531_v54  ;;  %3259 = vmatprep.subr.bf16.mxu0 %v3532_v35  ;;  %v1813_v54 = vld [vmem:[%s3895_s26 + $0x17] sm:$0xff]  ;;  %v2298_v29 = vpack.c.bf16 %v4073_v53, %v4025_v27 }
  0x95   : > { %3279 = vmatprep.subr.bf16.mxu1 %v3533_v37  ;;  %v3594_v27 = vld [vmem:[%s4209_s3 + $0x1d8] sm:$0xff]  }
  0x97   : > { %3260 = vmatpush3.bf16.msra.mxu0 %v3532_v35  ;;  %v3572_v35 = vld [vmem:[%s4209_s3 + $0x140] sm:$0xff]  }
  0x98   : > { %3280 = vmatpush3.bf16.msra.mxu1 %v3533_v37  ;;  %3261 = vmatprep.subr.bf16.mxu0 %v3534_v39  ;;  %v3573_v37 = vld [vmem:[%s4209_s3 + $0x180] sm:$0xff]  }
  0x99   : > { %3281 = vmatprep.subr.bf16.mxu1 %v3535_v55 }
  0x9b   : > { %3262 = vmatpush3.bf16.msra.mxu0 %v3534_v39  ;;  %v1694_v39 = vpack.c.bf16 %v4073_v53, %v4073_v53 }
  0x9c   : > { %3282 = vmatpush3.bf16.msra.mxu1 %v3535_v55  ;;  %3263 = vmatprep.subr.bf16.mxu0 %v3536_v56  ;;  %v1815_v55 = vpack.c.bf16 %v1813_v54, %v1813_v54 }
  0x9d   : > { %3283 = vmatprep.subr.bf16.mxu1 %v3537_v57 }
  0x9f   : > { %3264 = vmatpush3.bf16.msra.mxu0 %v3536_v56  ;;  %v2053_v56 = vld [vmem:[%s3895_s26 + $0xc] sm:$0xff] }
  0xa0   : > { %3284 = vmatpush3.bf16.msra.mxu1 %v3537_v57  ;;  %3265 = vmatprep.subr.bf16.mxu0 %v3538_v58  ;;  %v2054_v57 = vld [vmem:[%s3895_s26 + $0x14] sm:$0xff] }
  0xa1   : > { %3285 = vmatprep.subr.bf16.mxu1 %v3539_v59  ;;  %v2056_v60 = vpack.c.bf16 %v2054_v57, %v2053_v56  ;;  %v3603_v56 = vld [vmem:[%s4209_s3 + $0x238] sm:$0xff]  }
  0xa3   : > { %3266 = vmatpush3.bf16.msra.mxu0 %v3538_v58  ;;  %v3574_v58 = vld [vmem:[%s4209_s3 + $0x148] sm:$0xff]  }
  0xa4   : > { %3286 = vmatpush3.bf16.msra.mxu1 %v3539_v59  ;;  %3291 = vmatprep.subr.bf16.mxu0 %v3540_v61  ;;  %v3575_v59 = vld [vmem:[%s4209_s3 + $0x188] sm:$0xff]  }
  0xa5   : > { %3311 = vmatprep.subr.bf16.mxu1 %v3541_v62 }
  0xa6   : > { %3268 = vmatmul.mubr.bf16.vlgmr.msra.gmra.mrb[16].mxu0 %v1211_v63  ;;  %v3578_v63 = vld [vmem:[%s4209_s3 + $0x158] sm:$0xff]  }
  0xa7   : > { %3288 = vmatmul.mubr.bf16.vlgmr.msra.gmra.mrb[16].mxu1 %v1332_v2  ;;  %3292 = vmatpush3.bf16.msra.mxu0 %v3540_v61  ;;  %v3576_v61 = vld [vmem:[%s4209_s3 + $0x150] sm:$0xff]  }
  0xa8   : > { %3312 = vmatpush3.bf16.msra.mxu1 %v3541_v62  ;;  %3293 = vmatprep.subr.bf16.mxu0 %v3542_v5  ;;  %v3577_v62 = vld [vmem:[%s4209_s3 + $0x190] sm:$0xff]  }
  0xa9   : > { %3313 = vmatprep.subr.bf16.mxu1 %v3543_v6  ;;  %3307 = vmatprep.mubr.bf16.mxu0 %v1451_v7  ;;  %v3584_v2 = vld [vmem:[%s4209_s3 + $0x170] sm:$0xff]  }
  0xaa   : > { %3327 = vmatprep.mubr.bf16.mxu1 %v1572_v8 }
  0xab   : > { %3294 = vmatpush3.bf16.msra.mxu0 %v3542_v5 }
  0xac   : > { %3314 = vmatpush3.bf16.msra.mxu1 %v3543_v6  ;;  %3295 = vmatprep.subr.bf16.mxu0 %v3544_v9 }
  0xad   : > { %3315 = vmatprep.subr.bf16.mxu1 %v3545_v10 }
  0xaf   : > { %3296 = vmatpush3.bf16.msra.mxu0 %v3544_v9 }
  0xb0   : > { %3316 = vmatpush3.bf16.msra.mxu1 %v3545_v10  ;;  %3297 = vmatprep.subr.bf16.mxu0 %v3546_v11 }
  0xb1   : > { %3317 = vmatprep.subr.bf16.mxu1 %v3547_v12 }
  0xb3   : > { %3298 = vmatpush3.bf16.msra.mxu0 %v3546_v11 }
  0xb4   : > { %3318 = vmatpush3.bf16.msra.mxu1 %v3547_v12  ;;  %3299 = vmatprep.subr.bf16.mxu0 %v3548_v13 }
  0xb5   : > { %3319 = vmatprep.subr.bf16.mxu1 %v3549_v14 }
  0xb7   : > { %3300 = vmatpush3.bf16.msra.mxu0 %v3548_v13  ;;  %v3586_v13 = vld [vmem:[%s4209_s3 + $0x178] sm:$0xff]  }
  0xb8   : > { %3320 = vmatpush3.bf16.msra.mxu1 %v3549_v14  ;;  %3301 = vmatprep.subr.bf16.mxu0 %v3550_v15 }
  0xb9   : > { %3321 = vmatprep.subr.bf16.mxu1 %v3551_v16 }
  0xbb   : > { %3302 = vmatpush3.bf16.msra.mxu0 %v3550_v15  ;;  %v3587_v15 = vld [vmem:[%s4209_s3 + $0x1b8] sm:$0xff]  }
  0xbc   : > { %3322 = vmatpush3.bf16.msra.mxu1 %v3551_v16  ;;  %3303 = vmatprep.subr.bf16.mxu0 %v3552_v17 }
  0xbd   : > { %3323 = vmatprep.subr.bf16.mxu1 %v3553_v18 }
  0xbf   : > { %3304 = vmatpush3.bf16.msra.mxu0 %v3552_v17  ;;  %v1934_v17 = vld [vmem:[%s3895_s26 + $0x18] sm:$0xff] }
  0xc0   : > { %3324 = vmatpush3.bf16.msra.mxu1 %v3553_v18  ;;  %3305 = vmatprep.subr.bf16.mxu0 %v3554_v19  ;;  %v2055_v18 = vld [vmem:[%s3895_s26 + $0x1c] sm:$0xff]  ;;  %v1936_v21 = vpack.c.bf16 %v1934_v17, %v1934_v17 }
  0xc1   : > { %3325 = vmatprep.subr.bf16.mxu1 %v3555_v20 }
  0xc3   : > { %3306 = vmatpush3.bf16.msra.mxu0 %v3554_v19  ;;  %v3588_v19 = vld [vmem:[%s4209_s3 + $0x1c0] sm:$0xff]  }
  0xc4   : > { %3326 = vmatpush3.bf16.msra.mxu1 %v3555_v20  ;;  %3331 = vmatprep.subr.bf16.mxu0 %v3556_v23  ;;  %v3589_v20 = vld [vmem:[%s4209_s3 + $0x200] sm:$0xff]  }
  0xc5   : > { %3351 = vmatprep.subr.bf16.mxu1 %v3557_v24 }
  0xc6   : > { %3308 = vmatmul.mubr.bf16.vlgmr.msra.gmra.mrb[20].mxu0 %v1452_v25  ;;  %v3590_v25 = vld [vmem:[%s4209_s3 + $0x1c8] sm:$0xff]  }
  0xc7   : > { %3328 = vmatmul.mubr.bf16.vlgmr.msra.gmra.mrb[20].mxu1 %v1573_v28  ;;  %3332 = vmatpush3.bf16.msra.mxu0 %v3556_v23  ;;  %v2175_v23 = vld [vmem:[%s3895_s26 + $0x15] sm:$0xff] }
  0xc8   : > { %3352 = vmatpush3.bf16.msra.mxu1 %v3557_v24  ;;  %3333 = vmatprep.subr.bf16.mxu0 %v3558_v31  ;;  %v2057_v24 = vpack.c.bf16 %v2055_v18, %v2055_v18  ;;  %v2177_v28 = vpack.c.bf16 %v2175_v23, %v2174_v22 }
  0xc9   : > { %3353 = vmatprep.subr.bf16.mxu1 %v3559_v32  ;;  %3347 = vmatprep.mubr.bf16.mxu0 %v1693_v33  ;;  %v3596_v33 = vld [vmem:[%s4209_s3 + $0x1e0] sm:$0xff]  }
  0xca   : > { %3367 = vmatprep.mubr.bf16.mxu1 %v1814_v34  ;;  %v3597_v34 = vld [vmem:[%s4209_s3 + $0x220] sm:$0xff]  }
  0xcb   : > { %3334 = vmatpush3.bf16.msra.mxu0 %v3558_v31  ;;  %v3593_v31 = vld [vmem:[%s4209_s3 + $0x210] sm:$0xff]  }
  0xcc   : > { %3354 = vmatpush3.bf16.msra.mxu1 %v3559_v32  ;;  %3335 = vmatprep.subr.bf16.mxu0 %v3560_v36  ;;  %v3595_v32 = vld [vmem:[%s4209_s3 + $0x218] sm:$0xff]  }
  0xcd   : > { %3355 = vmatprep.subr.bf16.mxu1 %v3561_v38 }
  0xcf   : > { %3336 = vmatpush3.bf16.msra.mxu0 %v3560_v36  ;;  %v3598_v36 = vld [vmem:[%s4209_s3 + $0x1e8] sm:$0xff]  }
  0xd0   : > { %3356 = vmatpush3.bf16.msra.mxu1 %v3561_v38  ;;  %3337 = vmatprep.subr.bf16.mxu0 %v3562_v40  ;;  %v3599_v38 = vld [vmem:[%s4209_s3 + $0x228] sm:$0xff]  }
  0xd1   : > { %3357 = vmatprep.subr.bf16.mxu1 %v3563_v41 }
  0xd3   : > { %3338 = vmatpush3.bf16.msra.mxu0 %v3562_v40  ;;  %v3600_v40 = vld [vmem:[%s4209_s3 + $0x1f0] sm:$0xff]  }
  0xd4   : > { %3358 = vmatpush3.bf16.msra.mxu1 %v3563_v41  ;;  %3339 = vmatprep.subr.bf16.mxu0 %v3564_v42 }
  0xd5   : > { %3359 = vmatprep.subr.bf16.mxu1 %v3565_v43 }
  0xd7   : > { %3340 = vmatpush3.bf16.msra.mxu0 %v3564_v42  ;;  %v3601_v42 = vld [vmem:[%s4209_s3 + $0x230] sm:$0xff]  }
  0xd8   : > { %3360 = vmatpush3.bf16.msra.mxu1 %v3565_v43  ;;  %3341 = vmatprep.subr.bf16.mxu0 %v3566_v45 }
  0xd9   : > { %3361 = vmatprep.subr.bf16.mxu1 %v3567_v47 }
  0xdb   : > { %3342 = vmatpush3.bf16.msra.mxu0 %v3566_v45 }
  0xdc   : > { %3362 = vmatpush3.bf16.msra.mxu1 %v3567_v47  ;;  %3343 = vmatprep.subr.bf16.mxu0 %v3568_v49 }
  0xdd   : > { %3363 = vmatprep.subr.bf16.mxu1 %v3569_v50 }
  0xdf   : > { %3344 = vmatpush3.bf16.msra.mxu0 %v3568_v49 }
  0xe0   : > { %3364 = vmatpush3.bf16.msra.mxu1 %v3569_v50  ;;  %3345 = vmatprep.subr.bf16.mxu0 %v3570_v51 }
  0xe1   : > { %3365 = vmatprep.subr.bf16.mxu1 %v3571_v52 }
  0xe3   : > { %3346 = vmatpush3.bf16.msra.mxu0 %v3570_v51 }
  0xe4   : > { %3366 = vmatpush3.bf16.msra.mxu1 %v3571_v52  ;;  %3371 = vmatprep.subr.bf16.mxu0 %v3572_v35 }
  0xe5   : > { %3391 = vmatprep.subr.bf16.mxu1 %v3573_v37 }
  0xe6   : > { %3348 = vmatmul.mubr.bf16.vlgmr.msra.gmra.mrb[24].mxu0 %v1694_v39 }
  0xe7   : > { %3368 = vmatmul.mubr.bf16.vlgmr.msra.gmra.mrb[24].mxu1 %v1815_v55  ;;  %3372 = vmatpush3.bf16.msra.mxu0 %v3572_v35  ;;  %v3602_v35 = vld [vmem:[%s4209_s3 + $0x1f8] sm:$0xff]  }
  0xe8   : > { %3392 = vmatpush3.bf16.msra.mxu1 %v3573_v37  ;;  %3373 = vmatprep.subr.bf16.mxu0 %v3574_v58 }
  0xe9   : > { %3393 = vmatprep.subr.bf16.mxu1 %v3575_v59  ;;  %3387 = vmatprep.mubr.bf16.mxu0 %v1935_v48  ;;  %v3582_v48 = vld [vmem:[%s4209_s3 + $0x168] sm:$0xff]  }
  0xea   : > { %3407 = vmatprep.mubr.bf16.mxu1 %v2056_v60 }
  0xeb   : > { %3374 = vmatpush3.bf16.msra.mxu0 %v3574_v58  ;;  %v2176_v58 = vld [vmem:[%s3895_s26 + $0x1d] sm:$0xff] }
  0xec   : > { %3394 = vmatpush3.bf16.msra.mxu1 %v3575_v59  ;;  %3375 = vmatprep.subr.bf16.mxu0 %v3576_v61  ;;  %v2297_v59 = vld [vmem:[%s3895_s26 + $0x1e] sm:$0xff]  ;;  %v2178_v60 = vpack.c.bf16 %v2176_v58, %v2176_v58  ;;  %s2910_s26 = sshll.u32 %s4213_s19, 4 }
  0xed   : > { %3395 = vmatprep.subr.bf16.mxu1 %v3577_v62  ;;  %s244_s13 = scalar_lea.vmem %s4211_s5, %s2910_s26 }
  0xef   : > { %3376 = vmatpush3.bf16.msra.mxu0 %v3576_v61  ;;  %v2299_v61 = vpack.c.bf16 %v2297_v59, %v2297_v59 }
  0xf0   : > { %3396 = vmatpush3.bf16.msra.mxu1 %v3577_v62  ;;  %3377 = vmatprep.subr.bf16.mxu0 %v3578_v63 }
  0xf1   : > { %3397 = vmatprep.subr.bf16.mxu1 %v3579_v0 }
  0xf3   : > { %3378 = vmatpush3.bf16.msra.mxu0 %v3578_v63 }
  0xf4   : > { %3398 = vmatpush3.bf16.msra.mxu1 %v3579_v0  ;;  %3379 = vmatprep.subr.bf16.mxu0 %v3580_v44 }
  0xf5   : > { %3399 = vmatprep.subr.bf16.mxu1 %v3581_v46 }
  0xf7   : > { %3380 = vmatpush3.bf16.msra.mxu0 %v3580_v44 }
  0xf8   : > { %3400 = vmatpush3.bf16.msra.mxu1 %v3581_v46  ;;  %3381 = vmatprep.subr.bf16.mxu0 %v3582_v48 }
  0xf9   : > { %v3109_v3 = vpop.f32.mrb[0].mxu0  ;;  %3401 = vmatprep.subr.bf16.mxu1 %v3583_v1 }
  0xfa   : > { %v3129_v5 = vpop.f32.mrb[0].mxu1  ;;  %v371_v6 = vpop.f32.mrb[1].mxu0 }
  0xfb   : > { %v4125_v7 = vadd.f32 %v3129_v5, %v3109_v3  ;;  %v467_v8 = vpop.f32.mrb[1].mxu1  ;;  %v3110_v9 = vpop.f32.mrb[2].mxu0  ;;  %3382 = vmatpush3.bf16.msra.mxu0 %v3582_v48 }
  0xfc   : > { %v4127_v10 = vadd.f32 %v467_v8, %v371_v6  ;;  %v3130_v11 = vpop.f32.mrb[2].mxu1  ;;  %3402 = vmatpush3.bf16.msra.mxu1 %v3583_v1  ;;  %v374_v12 = vpop.f32.mrb[3].mxu0  ;;  %3383 = vmatprep.subr.bf16.mxu0 %v3584_v2 }
  0xfd   : > { %v470_v14 = vpop.f32.mrb[3].mxu1  ;;  %3403 = vmatprep.subr.bf16.mxu1 %v3585_v4 }
  0xfe   : > { %v4135_v16 = vadd.f32 %v470_v14, %v374_v12 }
  0xff   : > { %3384 = vmatpush3.bf16.msra.mxu0 %v3584_v2 }
 0x100   : > { %3404 = vmatpush3.bf16.msra.mxu1 %v3585_v4  ;;  %3385 = vmatprep.subr.bf16.mxu0 %v3586_v13 }
 0x101   : > { %3405 = vmatprep.subr.bf16.mxu1 %v3587_v15 }
 0x103   : > { %3386 = vmatpush3.bf16.msra.mxu0 %v3586_v13 }
 0x104   : > { %3406 = vmatpush3.bf16.msra.mxu1 %v3587_v15  ;;  %3411 = vmatprep.subr.bf16.mxu0 %v3588_v19 }
 0x105   : > { %3431 = vmatprep.subr.bf16.mxu1 %v3589_v20 }
 0x106   : > { %3388 = vmatmul.mubr.bf16.vlgmr.msra.gmra.mrb[28].mxu0 %v1936_v21 }
 0x107   : > { %3408 = vmatmul.mubr.bf16.vlgmr.msra.gmra.mrb[28].mxu1 %v2057_v24  ;;  %3412 = vmatpush3.bf16.msra.mxu0 %v3588_v19 }
 0x108   : > { %3432 = vmatpush3.bf16.msra.mxu1 %v3589_v20  ;;  %3413 = vmatprep.subr.bf16.mxu0 %v3590_v25 }
 0x109   : > { %3433 = vmatprep.subr.bf16.mxu1 %v3591_v26  ;;  %3427 = vmatprep.mubr.bf16.mxu0 %v2177_v28 }
 0x10a   : > { %3447 = vmatprep.mubr.bf16.mxu1 %v2298_v29 }
 0x10b   : > { %3414 = vmatpush3.bf16.msra.mxu0 %v3590_v25 }
 0x10c   : > { %3434 = vmatpush3.bf16.msra.mxu1 %v3591_v26  ;;  %3415 = vmatprep.subr.bf16.mxu0 %v3592_v30 }
 0x10d   : > { %3435 = vmatprep.subr.bf16.mxu1 %v3593_v31 }
 0x10f   : > { %3416 = vmatpush3.bf16.msra.mxu0 %v3592_v30 }
 0x110   : > { %3436 = vmatpush3.bf16.msra.mxu1 %v3593_v31  ;;  %3417 = vmatprep.subr.bf16.mxu0 %v3594_v27 }
 0x111   : > { %3437 = vmatprep.subr.bf16.mxu1 %v3595_v32 }
 0x113   : > { %3418 = vmatpush3.bf16.msra.mxu0 %v3594_v27 }
 0x114   : > { %3438 = vmatpush3.bf16.msra.mxu1 %v3595_v32  ;;  %3419 = vmatprep.subr.bf16.mxu0 %v3596_v33 }
 0x115   : > { %3439 = vmatprep.subr.bf16.mxu1 %v3597_v34 }
 0x117   : > { %3420 = vmatpush3.bf16.msra.mxu0 %v3596_v33 }
 0x118   : > { %3440 = vmatpush3.bf16.msra.mxu1 %v3597_v34  ;;  %3421 = vmatprep.subr.bf16.mxu0 %v3598_v36 }
 0x119   : > { %v3149_v41 = vpop.f32.mrb[4].mxu0  ;;  %3441 = vmatprep.subr.bf16.mxu1 %v3599_v38 }
 0x11a   : > { %v601_v43 = vadd.f32 %v3149_v41, %v4125_v7  ;;  %v3169_v45 = vpop.f32.mrb[4].mxu1  ;;  %v585_v47 = vpop.f32.mrb[5].mxu0 }
 0x11b   : > { %v599_v49 = vadd.f32 %v585_v47, %v4127_v10  ;;  %v706_v50 = vpop.f32.mrb[5].mxu1  ;;  %v3150_v51 = vpop.f32.mrb[6].mxu0  ;;  %3422 = vmatpush3.bf16.msra.mxu0 %v3598_v36 }
 0x11c   : > { %v722_v52 = vadd.f32 %v3169_v45, %v601_v43  ;;  %v3170_v53 = vpop.f32.mrb[6].mxu1  ;;  %3442 = vmatpush3.bf16.msra.mxu1 %v3599_v38  ;;  %v588_v54 = vpop.f32.mrb[7].mxu0  ;;  %3423 = vmatprep.subr.bf16.mxu0 %v3600_v40 }
 0x11d   : > { %v720_v37 = vadd.f32 %v706_v50, %v599_v49  ;;  %v600_v39 = vadd.f32 %v588_v54, %v4135_v16  ;;  %v709_v55 = vpop.f32.mrb[7].mxu1  ;;  %3443 = vmatprep.subr.bf16.mxu1 %v3601_v42 }
 0x11f   : > { %v721_v57 = vadd.f32 %v709_v55, %v600_v39  ;;  %3424 = vmatpush3.bf16.msra.mxu0 %v3600_v40 }
 0x120   : > { %3444 = vmatpush3.bf16.msra.mxu1 %v3601_v42  ;;  %3425 = vmatprep.subr.bf16.mxu0 %v3602_v35 }
 0x121   : > { %3445 = vmatprep.subr.bf16.mxu1 %v3603_v56 }
 0x123   : > { %3426 = vmatpush3.bf16.msra.mxu0 %v3602_v35 }
 0x124   : > { %3446 = vmatpush3.bf16.msra.mxu1 %v3603_v56 }
 0x126   : > { %3428 = vmatmul.mubr.bf16.vlgmr.msra.gmra.mrb[32].mxu0 %v2178_v60 }
 0x127   : > { %3448 = vmatmul.mubr.bf16.vlgmr.msra.gmra.mrb[32].mxu1 %v2299_v61 }
 0x139   : > { %v3189_v62 = vpop.f32.mrb[8].mxu0 }
 0x13a   : > { %v843_v63 = vadd.f32 %v3189_v62, %v722_v52  ;;  %v3209_v0 = vpop.f32.mrb[8].mxu1  ;;  %v827_v44 = vpop.f32.mrb[9].mxu0 }
 0x13b   : > { %v841_v46 = vadd.f32 %v827_v44, %v720_v37  ;;  %v948_v48 = vpop.f32.mrb[9].mxu1  ;;  %v3190_v1 = vpop.f32.mrb[10].mxu0 }
 0x13c   : > { %v964_v2 = vadd.f32 %v3209_v0, %v843_v63  ;;  %v3210_v3 = vpop.f32.mrb[10].mxu1  ;;  %v830_v4 = vpop.f32.mrb[11].mxu0 }
 0x13d   : > { %v962_v5 = vadd.f32 %v948_v48, %v841_v46  ;;  %v842_v6 = vadd.f32 %v830_v4, %v721_v57  ;;  %v951_v7 = vpop.f32.mrb[11].mxu1 }
 0x13f   : > { %v963_v8 = vadd.f32 %v951_v7, %v842_v6 }
 0x159   : > { %v3229_v9 = vpop.f32.mrb[12].mxu0 }
 0x15a   : > { %v1085_v10 = vadd.f32 %v3229_v9, %v964_v2  ;;  %v3249_v11 = vpop.f32.mrb[12].mxu1  ;;  %v1069_v12 = vpop.f32.mrb[13].mxu0 }
 0x15b   : > { %v1083_v13 = vadd.f32 %v1069_v12, %v962_v5  ;;  %v1190_v14 = vpop.f32.mrb[13].mxu1  ;;  %v3230_v15 = vpop.f32.mrb[14].mxu0 }
 0x15c   : > { %v1206_v16 = vadd.f32 %v3249_v11, %v1085_v10  ;;  %v3250_v17 = vpop.f32.mrb[14].mxu1  ;;  %v1072_v18 = vpop.f32.mrb[15].mxu0 }
 0x15d   : > { %v1204_v19 = vadd.f32 %v1190_v14, %v1083_v13  ;;  %v1084_v20 = vadd.f32 %v1072_v18, %v963_v8  ;;  %v1193_v21 = vpop.f32.mrb[15].mxu1 }
 0x15f   : > { %v1205_v22 = vadd.f32 %v1193_v21, %v1084_v20 }
 0x179   : > { %v3269_v23 = vpop.f32.mrb[16].mxu0 }
 0x17a   : > { %v1327_v24 = vadd.f32 %v3269_v23, %v1206_v16  ;;  %v3289_v25 = vpop.f32.mrb[16].mxu1  ;;  %v1311_v26 = vpop.f32.mrb[17].mxu0 }
 0x17b   : > { %v1325_v28 = vadd.f32 %v1311_v26, %v1204_v19  ;;  %v1431_v29 = vpop.f32.mrb[17].mxu1  ;;  %v3270_v30 = vpop.f32.mrb[18].mxu0  ;;  %v2907_v19 = vld [vmem:[%s4210_s4] ss:$0 sm:$0xff] }
 0x17c   : > { %v1447_v31 = vadd.f32 %v3289_v25, %v1327_v24  ;;  %v3290_v27 = vpop.f32.mrb[18].mxu1  ;;  %v1314_v32 = vpop.f32.mrb[19].mxu0 }
 0x17d   : > { %v1445_v33 = vadd.f32 %v1431_v29, %v1325_v28  ;;  %v1326_v34 = vadd.f32 %v1314_v32, %v1205_v22  ;;  %v1434_v36 = vpop.f32.mrb[19].mxu1 }
 0x17f   : > { %v1446_v38 = vadd.f32 %v1434_v36, %v1326_v34 }
 0x199   : > { %v3309_v40 = vpop.f32.mrb[20].mxu0 }
 0x19a   : > { %v1568_v41 = vadd.f32 %v3309_v40, %v1447_v31  ;;  %v3329_v42 = vpop.f32.mrb[20].mxu1  ;;  %v1552_v43 = vpop.f32.mrb[21].mxu0 }
 0x19b   : > { %v1566_v45 = vadd.f32 %v1552_v43, %v1445_v33  ;;  %v1673_v47 = vpop.f32.mrb[21].mxu1  ;;  %v3310_v49 = vpop.f32.mrb[22].mxu0 }
 0x19c   : > { %v1689_v50 = vadd.f32 %v3329_v42, %v1568_v41  ;;  %v3330_v51 = vpop.f32.mrb[22].mxu1  ;;  %v1555_v52 = vpop.f32.mrb[23].mxu0 }
 0x19d   : > { %v1687_v53 = vadd.f32 %v1673_v47, %v1566_v45  ;;  %v1567_v54 = vadd.f32 %v1555_v52, %v1446_v38  ;;  %v1676_v35 = vpop.f32.mrb[23].mxu1 }
 0x19f   : > { %v1688_v37 = vadd.f32 %v1676_v35, %v1567_v54 }
 0x1b9   : > { %v3349_v39 = vpop.f32.mrb[24].mxu0 }
 0x1ba   : > { %v1810_v55 = vadd.f32 %v3349_v39, %v1689_v50  ;;  %v3369_v56 = vpop.f32.mrb[24].mxu1  ;;  %v1794_v57 = vpop.f32.mrb[25].mxu0 }
 0x1bb   : > { %v1808_v58 = vadd.f32 %v1794_v57, %v1687_v53  ;;  %v1915_v59 = vpop.f32.mrb[25].mxu1  ;;  %v3350_v60 = vpop.f32.mrb[26].mxu0 }
 0x1bc   : > { %v1931_v61 = vadd.f32 %v3369_v56, %v1810_v55  ;;  %v3370_v62 = vpop.f32.mrb[26].mxu1  ;;  %v1797_v63 = vpop.f32.mrb[27].mxu0 }
 0x1bd   : > { %v1929_v0 = vadd.f32 %v1915_v59, %v1808_v58  ;;  %v1809_v44 = vadd.f32 %v1797_v63, %v1688_v37  ;;  %v1918_v46 = vpop.f32.mrb[27].mxu1 }
 0x1bf   : > { %v1930_v48 = vadd.f32 %v1918_v46, %v1809_v44 }
 0x1d9   : > { %v3389_v1 = vpop.f32.mrb[28].mxu0 }
 0x1da   : > { %v2052_v2 = vadd.f32 %v3389_v1, %v1931_v61  ;;  %v3409_v3 = vpop.f32.mrb[28].mxu1  ;;  %v2036_v4 = vpop.f32.mrb[29].mxu0 }
 0x1db   : > { %v2050_v5 = vadd.f32 %v2036_v4, %v1929_v0  ;;  %v2157_v6 = vpop.f32.mrb[29].mxu1  ;;  %v3390_v7 = vpop.f32.mrb[30].mxu0 }
 0x1dc   : > { %v2173_v8 = vadd.f32 %v3409_v3, %v2052_v2  ;;  %v3410_v9 = vpop.f32.mrb[30].mxu1  ;;  %v2039_v10 = vpop.f32.mrb[31].mxu0 }
 0x1dd   : > { %v2171_v11 = vadd.f32 %v2157_v6, %v2050_v5  ;;  %v2051_v12 = vadd.f32 %v2039_v10, %v1930_v48  ;;  %v2160_v13 = vpop.f32.mrb[31].mxu1 }
 0x1df   : > { %v2172_v14 = vadd.f32 %v2160_v13, %v2051_v12 }
 0x1f9   : > { %v3429_v15 = vpop.f32.mrb[32].mxu0 }
 0x1fa   : > { %v2294_v16 = vadd.f32 %v3429_v15, %v2173_v8  ;;  %v3449_v17 = vpop.f32.mrb[32].mxu1  ;;  %v2278_v18 = vpop.f32.mrb[33].mxu0 }
 0x1fb   : > { %v2292_v20 = vadd.f32 %v2278_v18, %v2171_v11  ;;  %v2399_v21 = vpop.f32.mrb[33].mxu1  ;;  %v3430_v22 = vpop.f32.mrb[34].mxu0 }
 0x1fc   : > { %v2415_v23 = vadd.f32 %v3449_v17, %v2294_v16  ;;  %v3450_v24 = vpop.f32.mrb[34].mxu1  ;;  %v2281_v25 = vpop.f32.mrb[35].mxu0 }
 0x1fd   : > { %v2413_v26 = vadd.f32 %v2399_v21, %v2292_v20  ;;  %v2293_v28 = vadd.f32 %v2281_v25, %v2172_v14  ;;  %v2402_v29 = vpop.f32.mrb[35].mxu1 }
 0x1fe   : > { %v2425_v30 = vadd.f32 %v2907_v19, %v2415_v23 }
 0x1ff   : > { %v2423_v31 = vadd.f32 %v2907_v19, %v2413_v26  ;;  %v2414_v27 = vadd.f32 %v2402_v29, %v2293_v28 }
 0x200   : > { %2430 = vst [vmem:[%s244_s13 + $0xa] sm:$0x3c] %v2425_v30 }
 0x201   : > { %2426 = vst [vmem:[%s244_s13] sm:$0xf] %v2423_v31  ;;  %2427 = vst [vmem:[%s244_s13 - $0x2] sm:$0xc0] %v2423_v31  ;;  %v2424_v32 = vadd.f32 %v2907_v19, %v2414_v27 }
 0x203   : > { %2428 = vst [vmem:[%s244_s13 + $0x6] sm:$0x3] %v2424_v32  ;;  %2429 = vst [vmem:[%s244_s13 + $0x4] sm:$0xf0] %v2424_v32 }
 0x204 PF: > { %s15_s18 = sadd.s32 1, %s3610_s18  }
 0x205   : > { %p12_p4 = scmp.ge.s32.totalorder %s15_s18, 4  }
 0x207   :  { %14 = sbr.rel (!%p12_p4) target bundleno = 1 (0x1), region = 89 }

</bundles_post_ra>
